<compile_context>
chip_gen: v7x
topology: tpu7x:2x2x1
jax: 0.10.0
libtpu: 0.0.40
codegen_flags: <defaults>
</compile_context>

<pallas_src>
import jax
import jax.numpy as jnp
from jax import lax
from jax.experimental import pallas as pl
from jax.experimental.pallas import tpu as pltpu

NEG_SLOPE = 0.01            # PyTorch default negative_slope for leaky_relu / LeakyReLU
BN_EPS = 1e-5
MXU_DTYPE = jnp.bfloat16    # matmul-operand / activation-scratch dtype; set jnp.float32 for a
                            # near-exact f32 validation path (not a perf recommendation).

L_IN = 30                   # conv path input length  (x[:, 30] -> (B, 30))
L_OUT = 26                  # length after the conv1 Sequential; residual blocks preserve it
K_EFF = 5                   # composed conv1 Sequential kernel size (3 + 3 - 1)
K_PAD = 8                   # taps padded to 8 lanes for alignment
C_RES = 64                  # residual-path channel count
ROUND = 16                  # batch-tile rounding (bf16 sublane tile = 16 rows)


def _lrelu(v):
    return jnp.where(v >= 0, v, NEG_SLOPE * v)


def _round_up(n, m):
    return ((n + m - 1) // m) * m


def _const_map(ndim):
    def imap(i):
        return (0,) * ndim
    return imap


# --------------------------------------------------------------------------------------
# Kernel
# --------------------------------------------------------------------------------------
def model_kernel(x_ref, cw, cb,
                 r1w1, r1b1, r1w2, r1b2, r1w3, r1b3,
                 r2w1, r2b1, r2w2, r2b2, r2w3, r2b3,
                 w1, b1, w2, b2, w3, b3,
                 out_ref, pad_ref):
    tb = out_ref.shape[-1]                 # samples in this batch tile
    acdt = pad_ref.dtype                   # MXU / activation-scratch dtype

    # Zero the padding=1 edge rows of the persistent scratch.  Done every grid step (cheap,
    # 2*tb rows) so it is safe under megacore grid splitting (program_id 0 may not run on a core).
    zeros_edge = jnp.zeros((tb, C_RES), acdt)
    pad_ref[pl.ds(0, tb), :] = zeros_edge
    pad_ref[pl.ds((L_OUT + 1) * tb, tb), :] = zeros_edge

    def store_act(v):
        # Place a (26*tb, 64) activation into the padded interior (single bf16 store pass).
        pad_ref[pl.ds(tb, L_OUT * tb), :] = v.astype(acdt)

    def padded_conv3(w_ref, b_ref):
        # Conv1d(k=3, padding=1) on the scratch contents: three accumulating dots on
        # 8/16-aligned sublane slices (no im2col concat, no per-conv zero-pad copy).
        hp = pad_ref[...]                  # (28*tb, 64)
        acc = jnp.dot(hp[0:L_OUT * tb], w_ref[0], preferred_element_type=jnp.float32)
        acc = acc + jnp.dot(hp[tb:(L_OUT + 1) * tb], w_ref[1],
                            preferred_element_type=jnp.float32)
        acc = acc + jnp.dot(hp[2 * tb:(L_OUT + 2) * tb], w_ref[2],
                            preferred_element_type=jnp.float32)
        return acc + b_ref[...]

    def residual(w1_ref, b1_ref, w2_ref, b2_ref, w3_ref, b3_ref):
        # Faithful port of the (buggy) PyTorch Residual.forward: x is overwritten, so the
        # final op is leaky_relu(y + y) — BN folded into conv1/conv2, the 2x folded into conv3.
        t = _lrelu(padded_conv3(w1_ref, b1_ref))
        store_act(t)
        t = padded_conv3(w2_ref, b2_ref)
        t = jnp.dot(t.astype(acdt), w3_ref[...], preferred_element_type=jnp.float32) + b3_ref[...]
        return _lrelu(t)

    # conv1 Sequential (Conv1d(1,16,3) ∘ BN ∘ Conv1d(16,64,3)) composed into one K=5 conv,
    # already im2col'd host-side -> a single (26*tb, 8) x (8, 64) matmul, then leaky_relu.
    h = jnp.dot(x_ref[...], cw[...], preferred_element_type=jnp.float32) + cb[...]
    store_act(_lrelu(h))

    h = residual(r1w1, r1b1, r1w2, r1b2, r1w3, r1b3)
    store_act(h)
    h = residual(r2w1, r2b1, r2w2, r2b2, r2w3, r2b3)
    hq = h.astype(acdt)                    # (26*tb, 64) banded: row = position*tb + sample

    # fc1: 26 accumulating (tb,64)x(64,128) dots over banded positions; the PyTorch
    # channel-major flatten is folded into the pre-permuted (26, 64, 128) weight.
    acc = b1[...]
    for p in range(L_OUT):
        acc = acc + jnp.dot(hq[p * tb:(p + 1) * tb, :], w1[p],
                            preferred_element_type=jnp.float32)
    h1 = _lrelu(acc)                       # (tb, 128)
    # TODO(synk): Dropout(0.5) layers are identity (eval mode); training-mode dropout not implemented.
    h2 = _lrelu(jnp.dot(h1.astype(acdt), w2[...], preferred_element_type=jnp.float32) + b2[...])
    # fc3 emitted lane-dense: (1,32) x (tb,32)^T -> (1, tb).
    h3 = lax.dot_general(w3[...], h2.astype(acdt), (((1,), (1,)), ((), ())),
                         preferred_element_type=jnp.float32) + b3[...]
    out_ref[...] = h3.reshape(out_ref.shape).astype(out_ref.dtype)


# --------------------------------------------------------------------------------------
# Host wrapper
# --------------------------------------------------------------------------------------
def my_model_onehot_forward(x, params, batch_tile=None):
    """x: (B, F, 30) float32 with F >= 31 (PyTorch NCW layout).  Returns (B, 1) float32."""
    x1 = x[:, 30, :].astype(jnp.float32)           # torch: x[:, 30]  -> (B, 30)
    # torch: x2 = x[:, 30:] is dead code in forward(); intentionally not materialized.
    B = x1.shape[0]

    if batch_tile is None:
        # >=2 grid steps for medium B so v7x megacore shards both TensorCores; cap at 256.
        tb = max(ROUND, min(256, _round_up(pl.cdiv(B, 2), ROUND)))
    else:
        tb = max(ROUND, _round_up(batch_tile, ROUND))
    b_pad = _round_up(B, tb)
    n_tiles = b_pad // tb

    # Banded im2col for the composed K=5 conv1 Sequential:
    # row = ((tile*26 + position) * tb + sample), lanes 0..4 = x[sample, position + k].
    x1p = jnp.zeros((b_pad, L_IN), jnp.float32).at[:B].set(x1)
    taps = jnp.stack([x1p[:, k:k + L_OUT] for k in range(K_EFF)], axis=-1)   # (b_pad, 26, 5)
    taps = jnp.pad(taps, ((0, 0), (0, 0), (0, K_PAD - K_EFF)))
    xb = (taps.reshape(n_tiles, tb, L_OUT, K_PAD)
              .transpose(0, 2, 1, 3)
              .reshape(n_tiles * L_OUT * tb, K_PAD)
              .astype(MXU_DTYPE))

    in_specs = [pl.BlockSpec((L_OUT * tb, K_PAD), lambda i: (i, 0))]
    # Grid-invariant weights: constant block index (not re-fetched per step).
    # TODO(synk): could single-buffer them via pipeline_mode=pl.Buffered(1) to shave ~0.6 MiB VMEM.
    in_specs += [pl.BlockSpec(p.shape, _const_map(p.ndim)) for p in params]

    out = pl.pallas_call(
        model_kernel,
        out_shape=jax.ShapeDtypeStruct((n_tiles, 1, tb), jnp.float32),
        grid=(n_tiles,),
        in_specs=in_specs,
        out_specs=pl.BlockSpec((1, 1, tb), lambda i: (i, 0, 0)),
        scratch_shapes=[pltpu.VMEM(((L_OUT + 2) * tb, C_RES), MXU_DTYPE)],
        compiler_params=pltpu.CompilerParams(
            dimension_semantics=("parallel",),          # megacore sharding on v7x
            vmem_limit_bytes=48 * 1024 * 1024),         # headroom for tb up to 256 (fits v7x 64 MiB)
    )(xb, *params)
    return out.reshape(b_pad, 1)[:B]


# --------------------------------------------------------------------------------------
# Parameters: PyTorch-layout init + host-side folding / packing
# --------------------------------------------------------------------------------------
def init_torch_params(key, scale=0.1):
    keys = iter(jax.random.split(key, 48))

    def nrm(shape, s=scale):
        return s * jax.random.normal(next(keys), shape, jnp.float32)

    def bn(c):
        return dict(gamma=1.0 + nrm((c,)), beta=nrm((c,)),
                    mean=nrm((c,)), var=1.0 + jnp.abs(nrm((c,))))

    p = dict(
        c1a_w=nrm((16, 1, 3)), c1a_b=nrm((16,)), bn0=bn(16),
        c1b_w=nrm((64, 16, 3)), c1b_b=nrm((64,)),
        fc1_w=nrm((128, 64 * L_OUT), 0.02), fc1_b=nrm((128,)),
        fc2_w=nrm((32, 128)), fc2_b=nrm((32,)),
        fc3_w=nrm((1, 32)), fc3_b=nrm((1,)),
    )
    for r in ("res1", "res2"):
        p[r] = dict(c1_w=nrm((64, 64, 3)), c1_b=nrm((64,)), b1=bn(64),
                    c2_w=nrm((64, 64, 3)), c2_b=nrm((64,)), b2=bn(64),
                    c3_w=nrm((64, 64, 1)), c3_b=nrm((64,)))
    # NOTE: the `one_hot` Sequential (Linear 3085->1024->512->64) is never used by forward(),
    # so its weights are intentionally not materialized.
    return p


def _bn_fold(bn):
    s = bn["gamma"] / jnp.sqrt(bn["var"] + BN_EPS)
    return s, bn["beta"] - bn["mean"] * s


def _fold_bn_into_conv(w, b, bn):
    """BN(conv(x)) (eval mode) == conv'(x) with per-out-channel scaled weight / bias."""
    s, t = _bn_fold(bn)
    return w * s[:, None, None], b * s + t


def _pack_conv3(w, b):
    """(Cout,Cin,3) PyTorch conv -> (3, Cin, Cout) MXU layout + (1, Cout) f32 bias."""
    return jnp.transpose(w, (2, 1, 0)).astype(MXU_DTYPE), b.reshape(1, -1).astype(jnp.float32)


def prepare_params(tp):
    params = []

    # conv1 Sequential: Conv1d(1,16,3) -> BN(16) -> Conv1d(16,64,3) is linear in eval mode;
    # compose into one K=5 / Cin=1 / Cout=64 conv.
    s0, t0 = _bn_fold(tp["bn0"])
    w1a = tp["c1a_w"][:, 0, :] * s0[:, None]                 # (16, 3), BN scale folded
    b1a = tp["c1a_b"] * s0 + t0                              # (16,)
    w1b = tp["c1b_w"]                                        # (64, 16, 3)
    w_eff = jnp.zeros((64, K_EFF), jnp.float32)
    for k1 in range(3):
        for k2 in range(3):
            w_eff = w_eff.at[:, k1 + k2].add(w1b[:, :, k2] @ w1a[:, k1])
    b_eff = jnp.einsum("ock,c->o", w1b, b1a) + tp["c1b_b"]
    cw = jnp.zeros((K_PAD, 64), jnp.float32).at[:K_EFF].set(w_eff.T)   # taps on rows, padded to 8
    params += [cw.astype(MXU_DTYPE), b_eff.reshape(1, 64).astype(jnp.float32)]

    # Residual blocks: fold BN1/BN2 into conv1/conv2; fold the 2x from leaky_relu(x+x) into conv3.
    for r in ("res1", "res2"):
        rp = tp[r]
        w, b = _fold_bn_into_conv(rp["c1_w"], rp["c1_b"], rp["b1"])
        params += list(_pack_conv3(w, b))
        w, b = _fold_bn_into_conv(rp["c2_w"], rp["c2_b"], rp["b2"])
        params += list(_pack_conv3(w, b))
        w3 = 2.0 * jnp.transpose(rp["c3_w"][:, :, 0])        # (Cin, Cout), 1x1 conv, x2 folded
        b3 = 2.0 * rp["c3_b"]
        params += [w3.astype(MXU_DTYPE), b3.reshape(1, 64).astype(jnp.float32)]

    # fc head.  PyTorch flattens (B, 64, 26) channel-major (feature = c*26 + p); permute fc1's
    # weight rows to (position, channel, out) so the kernel can contract the banded layout.
    w1 = jnp.transpose(tp["fc1_w"].reshape(128, 64, L_OUT), (2, 1, 0))   # (26, 64, 128)
    params += [w1.astype(MXU_DTYPE), tp["fc1_b"].reshape(1, 128).astype(jnp.float32)]
    params += [jnp.transpose(tp["fc2_w"]).astype(MXU_DTYPE),
               tp["fc2_b"].reshape(1, 32).astype(jnp.float32)]
    params += [tp["fc3_w"].astype(MXU_DTYPE),
               tp["fc3_b"].reshape(1, 1).astype(jnp.float32)]
    return params


if __name__ == "__main__":
    key = jax.random.PRNGKey(0)
    kx, kp = jax.random.split(key)
    B, F, L = 2, 31, 30        # x[:, 30] must exist -> F >= 31; L = 30 so fc sees 64*26 features
    x = jax.random.normal(kx, (B, F, L), jnp.float32)
    params = prepare_params(init_torch_params(kp))
    out = jax.block_until_ready(my_model_onehot_forward(x, params))
    assert out.shape == (B, 1) and out.dtype == jnp.float32
    assert bool(jnp.all(jnp.isfinite(out)))
    print("KERNEL_OK")
</pallas_src>

<mosaic_0001>
module attributes {stable_mosaic.version = 11 : i64} {
  func.func @model_kernel(%arg0: i32, %arg1: memref<416x8xbf16, #tpu.memory_space<vmem>>, %arg2: memref<8x64xbf16, #tpu.memory_space<vmem>>, %arg3: memref<1x64xf32, #tpu.memory_space<vmem>>, %arg4: memref<3x64x64xbf16, #tpu.memory_space<vmem>>, %arg5: memref<1x64xf32, #tpu.memory_space<vmem>>, %arg6: memref<3x64x64xbf16, #tpu.memory_space<vmem>>, %arg7: memref<1x64xf32, #tpu.memory_space<vmem>>, %arg8: memref<64x64xbf16, #tpu.memory_space<vmem>>, %arg9: memref<1x64xf32, #tpu.memory_space<vmem>>, %arg10: memref<3x64x64xbf16, #tpu.memory_space<vmem>>, %arg11: memref<1x64xf32, #tpu.memory_space<vmem>>, %arg12: memref<3x64x64xbf16, #tpu.memory_space<vmem>>, %arg13: memref<1x64xf32, #tpu.memory_space<vmem>>, %arg14: memref<64x64xbf16, #tpu.memory_space<vmem>>, %arg15: memref<1x64xf32, #tpu.memory_space<vmem>>, %arg16: memref<26x64x128xbf16, #tpu.memory_space<vmem>>, %arg17: memref<1x128xf32, #tpu.memory_space<vmem>>, %arg18: memref<128x32xbf16, #tpu.memory_space<vmem>>, %arg19: memref<1x32xf32, #tpu.memory_space<vmem>>, %arg20: memref<1x32xbf16, #tpu.memory_space<vmem>>, %arg21: memref<1x1xf32, #tpu.memory_space<vmem>>, %arg22: memref<1x1x16xf32, #tpu.memory_space<vmem>>, %arg23: memref<448x64xbf16, #tpu.memory_space<vmem>>) attributes {dimension_semantics = [#tpu.dimension_semantics<parallel>], iteration_bounds = array<i64: 1>, scalar_prefetch = 0 : i64, scratch_operands = 1 : i64, tpu.core_type = #tpu.core_type<tc>, window_params = [{transform_indices = @transform_0, window_bounds = array<i64: 416, 8>}, {pipeline_mode = #tpu.pipeline_mode<synchronous>, transform_indices = @transform_1, window_bounds = array<i64: 8, 64>}, {pipeline_mode = #tpu.pipeline_mode<synchronous>, transform_indices = @transform_2, window_bounds = array<i64: 1, 64>}, {pipeline_mode = #tpu.pipeline_mode<synchronous>, transform_indices = @transform_3, window_bounds = array<i64: 3, 64, 64>}, {pipeline_mode = #tpu.pipeline_mode<synchronous>, transform_indices = @transform_4, window_bounds = array<i64: 1, 64>}, {pipeline_mode = #tpu.pipeline_mode<synchronous>, transform_indices = @transform_5, window_bounds = array<i64: 3, 64, 64>}, {pipeline_mode = #tpu.pipeline_mode<synchronous>, transform_indices = @transform_6, window_bounds = array<i64: 1, 64>}, {pipeline_mode = #tpu.pipeline_mode<synchronous>, transform_indices = @transform_7, window_bounds = array<i64: 64, 64>}, {pipeline_mode = #tpu.pipeline_mode<synchronous>, transform_indices = @transform_8, window_bounds = array<i64: 1, 64>}, {pipeline_mode = #tpu.pipeline_mode<synchronous>, transform_indices = @transform_9, window_bounds = array<i64: 3, 64, 64>}, {pipeline_mode = #tpu.pipeline_mode<synchronous>, transform_indices = @transform_10, window_bounds = array<i64: 1, 64>}, {pipeline_mode = #tpu.pipeline_mode<synchronous>, transform_indices = @transform_11, window_bounds = array<i64: 3, 64, 64>}, {pipeline_mode = #tpu.pipeline_mode<synchronous>, transform_indices = @transform_12, window_bounds = array<i64: 1, 64>}, {pipeline_mode = #tpu.pipeline_mode<synchronous>, transform_indices = @transform_13, window_bounds = array<i64: 64, 64>}, {pipeline_mode = #tpu.pipeline_mode<synchronous>, transform_indices = @transform_14, window_bounds = array<i64: 1, 64>}, {pipeline_mode = #tpu.pipeline_mode<synchronous>, transform_indices = @transform_15, window_bounds = array<i64: 26, 64, 128>}, {pipeline_mode = #tpu.pipeline_mode<synchronous>, transform_indices = @transform_16, window_bounds = array<i64: 1, 128>}, {pipeline_mode = #tpu.pipeline_mode<synchronous>, transform_indices = @transform_17, window_bounds = array<i64: 128, 32>}, {pipeline_mode = #tpu.pipeline_mode<synchronous>, transform_indices = @transform_18, window_bounds = array<i64: 1, 32>}, {pipeline_mode = #tpu.pipeline_mode<synchronous>, transform_indices = @transform_19, window_bounds = array<i64: 1, 32>}, {pipeline_mode = #tpu.pipeline_mode<synchronous>, transform_indices = @transform_20, window_bounds = array<i64: 1, 1>}, {transform_indices = @transform_21, window_bounds = array<i64: 1, 1, 16>}]} {
    %cst = arith.constant 0.000000e+00 : bf16
    %0 = vector.broadcast %cst : bf16 to vector<16x64xbf16>
    %c0 = arith.constant 0 : index
    %c0_0 = arith.constant 0 : index
    %1 = vector.load %arg23[%c0, %c0_0] : memref<448x64xbf16, #tpu.memory_space<vmem>>, vector<16x64xbf16>
    tpu.vector_store %arg23[%c0, %c0_0], %0 {strides = array<i32>} : memref<448x64xbf16, #tpu.memory_space<vmem>>, vector<16x64xbf16>,
    %c432 = arith.constant 432 : index
    %c0_1 = arith.constant 0 : index
    %2 = vector.load %arg23[%c432, %c0_1] : memref<448x64xbf16, #tpu.memory_space<vmem>>, vector<16x64xbf16>
    tpu.vector_store %arg23[%c432, %c0_1], %0 {strides = array<i32>} : memref<448x64xbf16, #tpu.memory_space<vmem>>, vector<16x64xbf16>,
    %c0_2 = arith.constant 0 : index
    %c0_3 = arith.constant 0 : index
    %3 = vector.load %arg1[%c0_2, %c0_3] : memref<416x8xbf16, #tpu.memory_space<vmem>>, vector<416x8xbf16>
    %c0_4 = arith.constant 0 : index
    %c0_5 = arith.constant 0 : index
    %4 = vector.load %arg2[%c0_4, %c0_5] : memref<8x64xbf16, #tpu.memory_space<vmem>>, vector<8x64xbf16>
    %cst_6 = arith.constant dense<0.000000e+00> : vector<416x64xf32>
    %5 = tpu.matmul %3, %4, %cst_6 {dimension_numbers = #tpu.dot_dimension_numbers<[1], [0], [0], [1], [0, 0, 1, 1], [], []>} : vector<416x8xbf16>, vector<8x64xbf16>, vector<416x64xf32> -> vector<416x64xf32>
    %c0_7 = arith.constant 0 : index
    %c0_8 = arith.constant 0 : index
    %6 = vector.load %arg3[%c0_7, %c0_8] : memref<1x64xf32, #tpu.memory_space<vmem>>, vector<1x64xf32>
    %7 = vector.broadcast %6 : vector<1x64xf32> to vector<416x64xf32>
    %8 = arith.addf %5, %7 : vector<416x64xf32>
    %cst_9 = arith.constant 0.000000e+00 : f32
    %9 = vector.broadcast %cst_9 : f32 to vector<416x64xf32>
    %10 = arith.cmpf oge, %8, %9 : vector<416x64xf32>
    %cst_10 = arith.constant 0.00999999977 : f32
    %11 = vector.broadcast %cst_10 : f32 to vector<416x64xf32>
    %12 = arith.mulf %11, %8 : vector<416x64xf32>
    %13 = arith.select %10, %8, %12 : vector<416x64xi1>, vector<416x64xf32>
    %14 = arith.truncf %13 : vector<416x64xf32> to vector<416x64xbf16>
    %c16 = arith.constant 16 : index
    %c0_11 = arith.constant 0 : index
    %15 = vector.load %arg23[%c16, %c0_11] : memref<448x64xbf16, #tpu.memory_space<vmem>>, vector<416x64xbf16>
    tpu.vector_store %arg23[%c16, %c0_11], %14 {strides = array<i32>} : memref<448x64xbf16, #tpu.memory_space<vmem>>, vector<416x64xbf16>,
    %c0_12 = arith.constant 0 : index
    %c0_13 = arith.constant 0 : index
    %16 = vector.load %arg23[%c0_12, %c0_13] : memref<448x64xbf16, #tpu.memory_space<vmem>>, vector<448x64xbf16>
    %17 = vector.extract_strided_slice %16 {offsets = [0, 0], sizes = [416, 64], strides = [1, 1]} : vector<448x64xbf16> to vector<416x64xbf16>
    %c0_14 = arith.constant 0 : index
    %c0_15 = arith.constant 0 : index
    %c0_16 = arith.constant 0 : index
    %18 = vector.load %arg4[%c0_14, %c0_15, %c0_16] : memref<3x64x64xbf16, #tpu.memory_space<vmem>>, vector<1x64x64xbf16>
    %19 = vector.shape_cast %18 : vector<1x64x64xbf16> to vector<64x64xbf16>
    %cst_17 = arith.constant dense<0.000000e+00> : vector<416x64xf32>
    %20 = tpu.matmul %17, %19, %cst_17 {dimension_numbers = #tpu.dot_dimension_numbers<[1], [0], [0], [1], [0, 0, 1, 1], [], []>} : vector<416x64xbf16>, vector<64x64xbf16>, vector<416x64xf32> -> vector<416x64xf32>
    %21 = vector.extract_strided_slice %16 {offsets = [16, 0], sizes = [416, 64], strides = [1, 1]} : vector<448x64xbf16> to vector<416x64xbf16>
    %c1 = arith.constant 1 : index
    %c0_18 = arith.constant 0 : index
    %c0_19 = arith.constant 0 : index
    %22 = vector.load %arg4[%c1, %c0_18, %c0_19] : memref<3x64x64xbf16, #tpu.memory_space<vmem>>, vector<1x64x64xbf16>
    %23 = vector.shape_cast %22 : vector<1x64x64xbf16> to vector<64x64xbf16>
    %cst_20 = arith.constant dense<0.000000e+00> : vector<416x64xf32>
    %24 = tpu.matmul %21, %23, %cst_20 {dimension_numbers = #tpu.dot_dimension_numbers<[1], [0], [0], [1], [0, 0, 1, 1], [], []>} : vector<416x64xbf16>, vector<64x64xbf16>, vector<416x64xf32> -> vector<416x64xf32>
    %25 = arith.addf %20, %24 : vector<416x64xf32>
    %26 = vector.extract_strided_slice %16 {offsets = [32, 0], sizes = [416, 64], strides = [1, 1]} : vector<448x64xbf16> to vector<416x64xbf16>
    %c2 = arith.constant 2 : index
    %c0_21 = arith.constant 0 : index
    %c0_22 = arith.constant 0 : index
    %27 = vector.load %arg4[%c2, %c0_21, %c0_22] : memref<3x64x64xbf16, #tpu.memory_space<vmem>>, vector<1x64x64xbf16>
    %28 = vector.shape_cast %27 : vector<1x64x64xbf16> to vector<64x64xbf16>
    %cst_23 = arith.constant dense<0.000000e+00> : vector<416x64xf32>
    %29 = tpu.matmul %26, %28, %cst_23 {dimension_numbers = #tpu.dot_dimension_numbers<[1], [0], [0], [1], [0, 0, 1, 1], [], []>} : vector<416x64xbf16>, vector<64x64xbf16>, vector<416x64xf32> -> vector<416x64xf32>
    %30 = arith.addf %25, %29 : vector<416x64xf32>
    %c0_24 = arith.constant 0 : index
    %c0_25 = arith.constant 0 : index
    %31 = vector.load %arg5[%c0_24, %c0_25] : memref<1x64xf32, #tpu.memory_space<vmem>>, vector<1x64xf32>
    %32 = vector.broadcast %31 : vector<1x64xf32> to vector<416x64xf32>
    %33 = arith.addf %30, %32 : vector<416x64xf32>
    %cst_26 = arith.constant 0.000000e+00 : f32
    %34 = vector.broadcast %cst_26 : f32 to vector<416x64xf32>
    %35 = arith.cmpf oge, %33, %34 : vector<416x64xf32>
    %cst_27 = arith.constant 0.00999999977 : f32
    %36 = vector.broadcast %cst_27 : f32 to vector<416x64xf32>
    %37 = arith.mulf %36, %33 : vector<416x64xf32>
    %38 = arith.select %35, %33, %37 : vector<416x64xi1>, vector<416x64xf32>
    %39 = arith.truncf %38 : vector<416x64xf32> to vector<416x64xbf16>
    %c16_28 = arith.constant 16 : index
    %c0_29 = arith.constant 0 : index
    %40 = vector.load %arg23[%c16_28, %c0_29] : memref<448x64xbf16, #tpu.memory_space<vmem>>, vector<416x64xbf16>
    tpu.vector_store %arg23[%c16_28, %c0_29], %39 {strides = array<i32>} : memref<448x64xbf16, #tpu.memory_space<vmem>>, vector<416x64xbf16>,
    %c0_30 = arith.constant 0 : index
    %c0_31 = arith.constant 0 : index
    %41 = vector.load %arg23[%c0_30, %c0_31] : memref<448x64xbf16, #tpu.memory_space<vmem>>, vector<448x64xbf16>
    %42 = vector.extract_strided_slice %41 {offsets = [0, 0], sizes = [416, 64], strides = [1, 1]} : vector<448x64xbf16> to vector<416x64xbf16>
    %c0_32 = arith.constant 0 : index
    %c0_33 = arith.constant 0 : index
    %c0_34 = arith.constant 0 : index
    %43 = vector.load %arg6[%c0_32, %c0_33, %c0_34] : memref<3x64x64xbf16, #tpu.memory_space<vmem>>, vector<1x64x64xbf16>
    %44 = vector.shape_cast %43 : vector<1x64x64xbf16> to vector<64x64xbf16>
    %cst_35 = arith.constant dense<0.000000e+00> : vector<416x64xf32>
    %45 = tpu.matmul %42, %44, %cst_35 {dimension_numbers = #tpu.dot_dimension_numbers<[1], [0], [0], [1], [0, 0, 1, 1], [], []>} : vector<416x64xbf16>, vector<64x64xbf16>, vector<416x64xf32> -> vector<416x64xf32>
    %46 = vector.extract_strided_slice %41 {offsets = [16, 0], sizes = [416, 64], strides = [1, 1]} : vector<448x64xbf16> to vector<416x64xbf16>
    %c1_36 = arith.constant 1 : index
    %c0_37 = arith.constant 0 : index
    %c0_38 = arith.constant 0 : index
    %47 = vector.load %arg6[%c1_36, %c0_37, %c0_38] : memref<3x64x64xbf16, #tpu.memory_space<vmem>>, vector<1x64x64xbf16>
    %48 = vector.shape_cast %47 : vector<1x64x64xbf16> to vector<64x64xbf16>
    %cst_39 = arith.constant dense<0.000000e+00> : vector<416x64xf32>
    %49 = tpu.matmul %46, %48, %cst_39 {dimension_numbers = #tpu.dot_dimension_numbers<[1], [0], [0], [1], [0, 0, 1, 1], [], []>} : vector<416x64xbf16>, vector<64x64xbf16>, vector<416x64xf32> -> vector<416x64xf32>
    %50 = arith.addf %45, %49 : vector<416x64xf32>
    %51 = vector.extract_strided_slice %41 {offsets = [32, 0], sizes = [416, 64], strides = [1, 1]} : vector<448x64xbf16> to vector<416x64xbf16>
    %c2_40 = arith.constant 2 : index
    %c0_41 = arith.constant 0 : index
    %c0_42 = arith.constant 0 : index
    %52 = vector.load %arg6[%c2_40, %c0_41, %c0_42] : memref<3x64x64xbf16, #tpu.memory_space<vmem>>, vector<1x64x64xbf16>
    %53 = vector.shape_cast %52 : vector<1x64x64xbf16> to vector<64x64xbf16>
    %cst_43 = arith.constant dense<0.000000e+00> : vector<416x64xf32>
    %54 = tpu.matmul %51, %53, %cst_43 {dimension_numbers = #tpu.dot_dimension_numbers<[1], [0], [0], [1], [0, 0, 1, 1], [], []>} : vector<416x64xbf16>, vector<64x64xbf16>, vector<416x64xf32> -> vector<416x64xf32>
    %55 = arith.addf %50, %54 : vector<416x64xf32>
    %c0_44 = arith.constant 0 : index
    %c0_45 = arith.constant 0 : index
    %56 = vector.load %arg7[%c0_44, %c0_45] : memref<1x64xf32, #tpu.memory_space<vmem>>, vector<1x64xf32>
    %57 = vector.broadcast %56 : vector<1x64xf32> to vector<416x64xf32>
    %58 = arith.addf %55, %57 : vector<416x64xf32>
    %59 = arith.truncf %58 : vector<416x64xf32> to vector<416x64xbf16>
    %c0_46 = arith.constant 0 : index
    %c0_47 = arith.constant 0 : index
    %60 = vector.load %arg8[%c0_46, %c0_47] : memref<64x64xbf16, #tpu.memory_space<vmem>>, vector<64x64xbf16>
    %cst_48 = arith.constant dense<0.000000e+00> : vector<416x64xf32>
    %61 = tpu.matmul %59, %60, %cst_48 {dimension_numbers = #tpu.dot_dimension_numbers<[1], [0], [0], [1], [0, 0, 1, 1], [], []>} : vector<416x64xbf16>, vector<64x64xbf16>, vector<416x64xf32> -> vector<416x64xf32>
    %c0_49 = arith.constant 0 : index
    %c0_50 = arith.constant 0 : index
    %62 = vector.load %arg9[%c0_49, %c0_50] : memref<1x64xf32, #tpu.memory_space<vmem>>, vector<1x64xf32>
    %63 = vector.broadcast %62 : vector<1x64xf32> to vector<416x64xf32>
    %64 = arith.addf %61, %63 : vector<416x64xf32>
    %cst_51 = arith.constant 0.000000e+00 : f32
    %65 = vector.broadcast %cst_51 : f32 to vector<416x64xf32>
    %66 = arith.cmpf oge, %64, %65 : vector<416x64xf32>
    %cst_52 = arith.constant 0.00999999977 : f32
    %67 = vector.broadcast %cst_52 : f32 to vector<416x64xf32>
    %68 = arith.mulf %67, %64 : vector<416x64xf32>
    %69 = arith.select %66, %64, %68 : vector<416x64xi1>, vector<416x64xf32>
    %70 = arith.truncf %69 : vector<416x64xf32> to vector<416x64xbf16>
    %c16_53 = arith.constant 16 : index
    %c0_54 = arith.constant 0 : index
    %71 = vector.load %arg23[%c16_53, %c0_54] : memref<448x64xbf16, #tpu.memory_space<vmem>>, vector<416x64xbf16>
    tpu.vector_store %arg23[%c16_53, %c0_54], %70 {strides = array<i32>} : memref<448x64xbf16, #tpu.memory_space<vmem>>, vector<416x64xbf16>,
    %c0_55 = arith.constant 0 : index
    %c0_56 = arith.constant 0 : index
    %72 = vector.load %arg23[%c0_55, %c0_56] : memref<448x64xbf16, #tpu.memory_space<vmem>>, vector<448x64xbf16>
    %73 = vector.extract_strided_slice %72 {offsets = [0, 0], sizes = [416, 64], strides = [1, 1]} : vector<448x64xbf16> to vector<416x64xbf16>
    %c0_57 = arith.constant 0 : index
    %c0_58 = arith.constant 0 : index
    %c0_59 = arith.constant 0 : index
    %74 = vector.load %arg10[%c0_57, %c0_58, %c0_59] : memref<3x64x64xbf16, #tpu.memory_space<vmem>>, vector<1x64x64xbf16>
    %75 = vector.shape_cast %74 : vector<1x64x64xbf16> to vector<64x64xbf16>
    %cst_60 = arith.constant dense<0.000000e+00> : vector<416x64xf32>
    %76 = tpu.matmul %73, %75, %cst_60 {dimension_numbers = #tpu.dot_dimension_numbers<[1], [0], [0], [1], [0, 0, 1, 1], [], []>} : vector<416x64xbf16>, vector<64x64xbf16>, vector<416x64xf32> -> vector<416x64xf32>
    %77 = vector.extract_strided_slice %72 {offsets = [16, 0], sizes = [416, 64], strides = [1, 1]} : vector<448x64xbf16> to vector<416x64xbf16>
    %c1_61 = arith.constant 1 : index
    %c0_62 = arith.constant 0 : index
    %c0_63 = arith.constant 0 : index
    %78 = vector.load %arg10[%c1_61, %c0_62, %c0_63] : memref<3x64x64xbf16, #tpu.memory_space<vmem>>, vector<1x64x64xbf16>
    %79 = vector.shape_cast %78 : vector<1x64x64xbf16> to vector<64x64xbf16>
    %cst_64 = arith.constant dense<0.000000e+00> : vector<416x64xf32>
    %80 = tpu.matmul %77, %79, %cst_64 {dimension_numbers = #tpu.dot_dimension_numbers<[1], [0], [0], [1], [0, 0, 1, 1], [], []>} : vector<416x64xbf16>, vector<64x64xbf16>, vector<416x64xf32> -> vector<416x64xf32>
    %81 = arith.addf %76, %80 : vector<416x64xf32>
    %82 = vector.extract_strided_slice %72 {offsets = [32, 0], sizes = [416, 64], strides = [1, 1]} : vector<448x64xbf16> to vector<416x64xbf16>
    %c2_65 = arith.constant 2 : index
    %c0_66 = arith.constant 0 : index
    %c0_67 = arith.constant 0 : index
    %83 = vector.load %arg10[%c2_65, %c0_66, %c0_67] : memref<3x64x64xbf16, #tpu.memory_space<vmem>>, vector<1x64x64xbf16>
    %84 = vector.shape_cast %83 : vector<1x64x64xbf16> to vector<64x64xbf16>
    %cst_68 = arith.constant dense<0.000000e+00> : vector<416x64xf32>
    %85 = tpu.matmul %82, %84, %cst_68 {dimension_numbers = #tpu.dot_dimension_numbers<[1], [0], [0], [1], [0, 0, 1, 1], [], []>} : vector<416x64xbf16>, vector<64x64xbf16>, vector<416x64xf32> -> vector<416x64xf32>
    %86 = arith.addf %81, %85 : vector<416x64xf32>
    %c0_69 = arith.constant 0 : index
    %c0_70 = arith.constant 0 : index
    %87 = vector.load %arg11[%c0_69, %c0_70] : memref<1x64xf32, #tpu.memory_space<vmem>>, vector<1x64xf32>
    %88 = vector.broadcast %87 : vector<1x64xf32> to vector<416x64xf32>
    %89 = arith.addf %86, %88 : vector<416x64xf32>
    %cst_71 = arith.constant 0.000000e+00 : f32
    %90 = vector.broadcast %cst_71 : f32 to vector<416x64xf32>
    %91 = arith.cmpf oge, %89, %90 : vector<416x64xf32>
    %cst_72 = arith.constant 0.00999999977 : f32
    %92 = vector.broadcast %cst_72 : f32 to vector<416x64xf32>
    %93 = arith.mulf %92, %89 : vector<416x64xf32>
    %94 = arith.select %91, %89, %93 : vector<416x64xi1>, vector<416x64xf32>
    %95 = arith.truncf %94 : vector<416x64xf32> to vector<416x64xbf16>
    %c16_73 = arith.constant 16 : index
    %c0_74 = arith.constant 0 : index
    %96 = vector.load %arg23[%c16_73, %c0_74] : memref<448x64xbf16, #tpu.memory_space<vmem>>, vector<416x64xbf16>
    tpu.vector_store %arg23[%c16_73, %c0_74], %95 {strides = array<i32>} : memref<448x64xbf16, #tpu.memory_space<vmem>>, vector<416x64xbf16>,
    %c0_75 = arith.constant 0 : index
    %c0_76 = arith.constant 0 : index
    %97 = vector.load %arg23[%c0_75, %c0_76] : memref<448x64xbf16, #tpu.memory_space<vmem>>, vector<448x64xbf16>
    %98 = vector.extract_strided_slice %97 {offsets = [0, 0], sizes = [416, 64], strides = [1, 1]} : vector<448x64xbf16> to vector<416x64xbf16>
    %c0_77 = arith.constant 0 : index
    %c0_78 = arith.constant 0 : index
    %c0_79 = arith.constant 0 : index
    %99 = vector.load %arg12[%c0_77, %c0_78, %c0_79] : memref<3x64x64xbf16, #tpu.memory_space<vmem>>, vector<1x64x64xbf16>
    %100 = vector.shape_cast %99 : vector<1x64x64xbf16> to vector<64x64xbf16>
    %cst_80 = arith.constant dense<0.000000e+00> : vector<416x64xf32>
    %101 = tpu.matmul %98, %100, %cst_80 {dimension_numbers = #tpu.dot_dimension_numbers<[1], [0], [0], [1], [0, 0, 1, 1], [], []>} : vector<416x64xbf16>, vector<64x64xbf16>, vector<416x64xf32> -> vector<416x64xf32>
    %102 = vector.extract_strided_slice %97 {offsets = [16, 0], sizes = [416, 64], strides = [1, 1]} : vector<448x64xbf16> to vector<416x64xbf16>
    %c1_81 = arith.constant 1 : index
    %c0_82 = arith.constant 0 : index
    %c0_83 = arith.constant 0 : index
    %103 = vector.load %arg12[%c1_81, %c0_82, %c0_83] : memref<3x64x64xbf16, #tpu.memory_space<vmem>>, vector<1x64x64xbf16>
    %104 = vector.shape_cast %103 : vector<1x64x64xbf16> to vector<64x64xbf16>
    %cst_84 = arith.constant dense<0.000000e+00> : vector<416x64xf32>
    %105 = tpu.matmul %102, %104, %cst_84 {dimension_numbers = #tpu.dot_dimension_numbers<[1], [0], [0], [1], [0, 0, 1, 1], [], []>} : vector<416x64xbf16>, vector<64x64xbf16>, vector<416x64xf32> -> vector<416x64xf32>
    %106 = arith.addf %101, %105 : vector<416x64xf32>
    %107 = vector.extract_strided_slice %97 {offsets = [32, 0], sizes = [416, 64], strides = [1, 1]} : vector<448x64xbf16> to vector<416x64xbf16>
    %c2_85 = arith.constant 2 : index
    %c0_86 = arith.constant 0 : index
    %c0_87 = arith.constant 0 : index
    %108 = vector.load %arg12[%c2_85, %c0_86, %c0_87] : memref<3x64x64xbf16, #tpu.memory_space<vmem>>, vector<1x64x64xbf16>
    %109 = vector.shape_cast %108 : vector<1x64x64xbf16> to vector<64x64xbf16>
    %cst_88 = arith.constant dense<0.000000e+00> : vector<416x64xf32>
    %110 = tpu.matmul %107, %109, %cst_88 {dimension_numbers = #tpu.dot_dimension_numbers<[1], [0], [0], [1], [0, 0, 1, 1], [], []>} : vector<416x64xbf16>, vector<64x64xbf16>, vector<416x64xf32> -> vector<416x64xf32>
    %111 = arith.addf %106, %110 : vector<416x64xf32>
    %c0_89 = arith.constant 0 : index
    %c0_90 = arith.constant 0 : index
    %112 = vector.load %arg13[%c0_89, %c0_90] : memref<1x64xf32, #tpu.memory_space<vmem>>, vector<1x64xf32>
    %113 = vector.broadcast %112 : vector<1x64xf32> to vector<416x64xf32>
    %114 = arith.addf %111, %113 : vector<416x64xf32>
    %115 = arith.truncf %114 : vector<416x64xf32> to vector<416x64xbf16>
    %c0_91 = arith.constant 0 : index
    %c0_92 = arith.constant 0 : index
    %116 = vector.load %arg14[%c0_91, %c0_92] : memref<64x64xbf16, #tpu.memory_space<vmem>>, vector<64x64xbf16>
    %cst_93 = arith.constant dense<0.000000e+00> : vector<416x64xf32>
    %117 = tpu.matmul %115, %116, %cst_93 {dimension_numbers = #tpu.dot_dimension_numbers<[1], [0], [0], [1], [0, 0, 1, 1], [], []>} : vector<416x64xbf16>, vector<64x64xbf16>, vector<416x64xf32> -> vector<416x64xf32>
    %c0_94 = arith.constant 0 : index
    %c0_95 = arith.constant 0 : index
    %118 = vector.load %arg15[%c0_94, %c0_95] : memref<1x64xf32, #tpu.memory_space<vmem>>, vector<1x64xf32>
    %119 = vector.broadcast %118 : vector<1x64xf32> to vector<416x64xf32>
    %120 = arith.addf %117, %119 : vector<416x64xf32>
    %cst_96 = arith.constant 0.000000e+00 : f32
    %121 = vector.broadcast %cst_96 : f32 to vector<416x64xf32>
    %122 = arith.cmpf oge, %120, %121 : vector<416x64xf32>
    %cst_97 = arith.constant 0.00999999977 : f32
    %123 = vector.broadcast %cst_97 : f32 to vector<416x64xf32>
    %124 = arith.mulf %123, %120 : vector<416x64xf32>
    %125 = arith.select %122, %120, %124 : vector<416x64xi1>, vector<416x64xf32>
    %126 = arith.truncf %125 : vector<416x64xf32> to vector<416x64xbf16>
    %c0_98 = arith.constant 0 : index
    %c0_99 = arith.constant 0 : index
    %127 = vector.load %arg17[%c0_98, %c0_99] : memref<1x128xf32, #tpu.memory_space<vmem>>, vector<1x128xf32>
    %128 = vector.extract_strided_slice %126 {offsets = [0, 0], sizes = [16, 64], strides = [1, 1]} : vector<416x64xbf16> to vector<16x64xbf16>
    %c0_100 = arith.constant 0 : index
    %c0_101 = arith.constant 0 : index
    %c0_102 = arith.constant 0 : index
    %129 = vector.load %arg16[%c0_100, %c0_101, %c0_102] : memref<26x64x128xbf16, #tpu.memory_space<vmem>>, vector<1x64x128xbf16>
    %130 = vector.shape_cast %129 : vector<1x64x128xbf16> to vector<64x128xbf16>
    %cst_103 = arith.constant dense<0.000000e+00> : vector<16x128xf32>
    %131 = tpu.matmul %128, %130, %cst_103 {dimension_numbers = #tpu.dot_dimension_numbers<[1], [0], [0], [1], [0, 0, 1, 1], [], []>} : vector<16x64xbf16>, vector<64x128xbf16>, vector<16x128xf32> -> vector<16x128xf32>
    %132 = vector.broadcast %127 : vector<1x128xf32> to vector<16x128xf32>
    %133 = arith.addf %132, %131 : vector<16x128xf32>
    %134 = vector.extract_strided_slice %126 {offsets = [16, 0], sizes = [16, 64], strides = [1, 1]} : vector<416x64xbf16> to vector<16x64xbf16>
    %c1_104 = arith.constant 1 : index
    %c0_105 = arith.constant 0 : index
    %c0_106 = arith.constant 0 : index
    %135 = vector.load %arg16[%c1_104, %c0_105, %c0_106] : memref<26x64x128xbf16, #tpu.memory_space<vmem>>, vector<1x64x128xbf16>
    %136 = vector.shape_cast %135 : vector<1x64x128xbf16> to vector<64x128xbf16>
    %cst_107 = arith.constant dense<0.000000e+00> : vector<16x128xf32>
    %137 = tpu.matmul %134, %136, %cst_107 {dimension_numbers = #tpu.dot_dimension_numbers<[1], [0], [0], [1], [0, 0, 1, 1], [], []>} : vector<16x64xbf16>, vector<64x128xbf16>, vector<16x128xf32> -> vector<16x128xf32>
    %138 = arith.addf %133, %137 : vector<16x128xf32>
    %139 = vector.extract_strided_slice %126 {offsets = [32, 0], sizes = [16, 64], strides = [1, 1]} : vector<416x64xbf16> to vector<16x64xbf16>
    %c2_108 = arith.constant 2 : index
    %c0_109 = arith.constant 0 : index
    %c0_110 = arith.constant 0 : index
    %140 = vector.load %arg16[%c2_108, %c0_109, %c0_110] : memref<26x64x128xbf16, #tpu.memory_space<vmem>>, vector<1x64x128xbf16>
    %141 = vector.shape_cast %140 : vector<1x64x128xbf16> to vector<64x128xbf16>
    %cst_111 = arith.constant dense<0.000000e+00> : vector<16x128xf32>
    %142 = tpu.matmul %139, %141, %cst_111 {dimension_numbers = #tpu.dot_dimension_numbers<[1], [0], [0], [1], [0, 0, 1, 1], [], []>} : vector<16x64xbf16>, vector<64x128xbf16>, vector<16x128xf32> -> vector<16x128xf32>
    %143 = arith.addf %138, %142 : vector<16x128xf32>
    %144 = vector.extract_strided_slice %126 {offsets = [48, 0], sizes = [16, 64], strides = [1, 1]} : vector<416x64xbf16> to vector<16x64xbf16>
    %c3 = arith.constant 3 : index
    %c0_112 = arith.constant 0 : index
    %c0_113 = arith.constant 0 : index
    %145 = vector.load %arg16[%c3, %c0_112, %c0_113] : memref<26x64x128xbf16, #tpu.memory_space<vmem>>, vector<1x64x128xbf16>
    %146 = vector.shape_cast %145 : vector<1x64x128xbf16> to vector<64x128xbf16>
    %cst_114 = arith.constant dense<0.000000e+00> : vector<16x128xf32>
    %147 = tpu.matmul %144, %146, %cst_114 {dimension_numbers = #tpu.dot_dimension_numbers<[1], [0], [0], [1], [0, 0, 1, 1], [], []>} : vector<16x64xbf16>, vector<64x128xbf16>, vector<16x128xf32> -> vector<16x128xf32>
    %148 = arith.addf %143, %147 : vector<16x128xf32>
    %149 = vector.extract_strided_slice %126 {offsets = [64, 0], sizes = [16, 64], strides = [1, 1]} : vector<416x64xbf16> to vector<16x64xbf16>
    %c4 = arith.constant 4 : index
    %c0_115 = arith.constant 0 : index
    %c0_116 = arith.constant 0 : index
    %150 = vector.load %arg16[%c4, %c0_115, %c0_116] : memref<26x64x128xbf16, #tpu.memory_space<vmem>>, vector<1x64x128xbf16>
    %151 = vector.shape_cast %150 : vector<1x64x128xbf16> to vector<64x128xbf16>
    %cst_117 = arith.constant dense<0.000000e+00> : vector<16x128xf32>
    %152 = tpu.matmul %149, %151, %cst_117 {dimension_numbers = #tpu.dot_dimension_numbers<[1], [0], [0], [1], [0, 0, 1, 1], [], []>} : vector<16x64xbf16>, vector<64x128xbf16>, vector<16x128xf32> -> vector<16x128xf32>
    %153 = arith.addf %148, %152 : vector<16x128xf32>
    %154 = vector.extract_strided_slice %126 {offsets = [80, 0], sizes = [16, 64], strides = [1, 1]} : vector<416x64xbf16> to vector<16x64xbf16>
    %c5 = arith.constant 5 : index
    %c0_118 = arith.constant 0 : index
    %c0_119 = arith.constant 0 : index
    %155 = vector.load %arg16[%c5, %c0_118, %c0_119] : memref<26x64x128xbf16, #tpu.memory_space<vmem>>, vector<1x64x128xbf16>
    %156 = vector.shape_cast %155 : vector<1x64x128xbf16> to vector<64x128xbf16>
    %cst_120 = arith.constant dense<0.000000e+00> : vector<16x128xf32>
    %157 = tpu.matmul %154, %156, %cst_120 {dimension_numbers = #tpu.dot_dimension_numbers<[1], [0], [0], [1], [0, 0, 1, 1], [], []>} : vector<16x64xbf16>, vector<64x128xbf16>, vector<16x128xf32> -> vector<16x128xf32>
    %158 = arith.addf %153, %157 : vector<16x128xf32>
    %159 = vector.extract_strided_slice %126 {offsets = [96, 0], sizes = [16, 64], strides = [1, 1]} : vector<416x64xbf16> to vector<16x64xbf16>
    %c6 = arith.constant 6 : index
    %c0_121 = arith.constant 0 : index
    %c0_122 = arith.constant 0 : index
    %160 = vector.load %arg16[%c6, %c0_121, %c0_122] : memref<26x64x128xbf16, #tpu.memory_space<vmem>>, vector<1x64x128xbf16>
    %161 = vector.shape_cast %160 : vector<1x64x128xbf16> to vector<64x128xbf16>
    %cst_123 = arith.constant dense<0.000000e+00> : vector<16x128xf32>
    %162 = tpu.matmul %159, %161, %cst_123 {dimension_numbers = #tpu.dot_dimension_numbers<[1], [0], [0], [1], [0, 0, 1, 1], [], []>} : vector<16x64xbf16>, vector<64x128xbf16>, vector<16x128xf32> -> vector<16x128xf32>
    %163 = arith.addf %158, %162 : vector<16x128xf32>
    %164 = vector.extract_strided_slice %126 {offsets = [112, 0], sizes = [16, 64], strides = [1, 1]} : vector<416x64xbf16> to vector<16x64xbf16>
    %c7 = arith.constant 7 : index
    %c0_124 = arith.constant 0 : index
    %c0_125 = arith.constant 0 : index
    %165 = vector.load %arg16[%c7, %c0_124, %c0_125] : memref<26x64x128xbf16, #tpu.memory_space<vmem>>, vector<1x64x128xbf16>
    %166 = vector.shape_cast %165 : vector<1x64x128xbf16> to vector<64x128xbf16>
    %cst_126 = arith.constant dense<0.000000e+00> : vector<16x128xf32>
    %167 = tpu.matmul %164, %166, %cst_126 {dimension_numbers = #tpu.dot_dimension_numbers<[1], [0], [0], [1], [0, 0, 1, 1], [], []>} : vector<16x64xbf16>, vector<64x128xbf16>, vector<16x128xf32> -> vector<16x128xf32>
    %168 = arith.addf %163, %167 : vector<16x128xf32>
    %169 = vector.extract_strided_slice %126 {offsets = [128, 0], sizes = [16, 64], strides = [1, 1]} : vector<416x64xbf16> to vector<16x64xbf16>
    %c8 = arith.constant 8 : index
    %c0_127 = arith.constant 0 : index
    %c0_128 = arith.constant 0 : index
    %170 = vector.load %arg16[%c8, %c0_127, %c0_128] : memref<26x64x128xbf16, #tpu.memory_space<vmem>>, vector<1x64x128xbf16>
    %171 = vector.shape_cast %170 : vector<1x64x128xbf16> to vector<64x128xbf16>
    %cst_129 = arith.constant dense<0.000000e+00> : vector<16x128xf32>
    %172 = tpu.matmul %169, %171, %cst_129 {dimension_numbers = #tpu.dot_dimension_numbers<[1], [0], [0], [1], [0, 0, 1, 1], [], []>} : vector<16x64xbf16>, vector<64x128xbf16>, vector<16x128xf32> -> vector<16x128xf32>
    %173 = arith.addf %168, %172 : vector<16x128xf32>
    %174 = vector.extract_strided_slice %126 {offsets = [144, 0], sizes = [16, 64], strides = [1, 1]} : vector<416x64xbf16> to vector<16x64xbf16>
    %c9 = arith.constant 9 : index
    %c0_130 = arith.constant 0 : index
    %c0_131 = arith.constant 0 : index
    %175 = vector.load %arg16[%c9, %c0_130, %c0_131] : memref<26x64x128xbf16, #tpu.memory_space<vmem>>, vector<1x64x128xbf16>
    %176 = vector.shape_cast %175 : vector<1x64x128xbf16> to vector<64x128xbf16>
    %cst_132 = arith.constant dense<0.000000e+00> : vector<16x128xf32>
    %177 = tpu.matmul %174, %176, %cst_132 {dimension_numbers = #tpu.dot_dimension_numbers<[1], [0], [0], [1], [0, 0, 1, 1], [], []>} : vector<16x64xbf16>, vector<64x128xbf16>, vector<16x128xf32> -> vector<16x128xf32>
    %178 = arith.addf %173, %177 : vector<16x128xf32>
    %179 = vector.extract_strided_slice %126 {offsets = [160, 0], sizes = [16, 64], strides = [1, 1]} : vector<416x64xbf16> to vector<16x64xbf16>
    %c10 = arith.constant 10 : index
    %c0_133 = arith.constant 0 : index
    %c0_134 = arith.constant 0 : index
    %180 = vector.load %arg16[%c10, %c0_133, %c0_134] : memref<26x64x128xbf16, #tpu.memory_space<vmem>>, vector<1x64x128xbf16>
    %181 = vector.shape_cast %180 : vector<1x64x128xbf16> to vector<64x128xbf16>
    %cst_135 = arith.constant dense<0.000000e+00> : vector<16x128xf32>
    %182 = tpu.matmul %179, %181, %cst_135 {dimension_numbers = #tpu.dot_dimension_numbers<[1], [0], [0], [1], [0, 0, 1, 1], [], []>} : vector<16x64xbf16>, vector<64x128xbf16>, vector<16x128xf32> -> vector<16x128xf32>
    %183 = arith.addf %178, %182 : vector<16x128xf32>
    %184 = vector.extract_strided_slice %126 {offsets = [176, 0], sizes = [16, 64], strides = [1, 1]} : vector<416x64xbf16> to vector<16x64xbf16>
    %c11 = arith.constant 11 : index
    %c0_136 = arith.constant 0 : index
    %c0_137 = arith.constant 0 : index
    %185 = vector.load %arg16[%c11, %c0_136, %c0_137] : memref<26x64x128xbf16, #tpu.memory_space<vmem>>, vector<1x64x128xbf16>
    %186 = vector.shape_cast %185 : vector<1x64x128xbf16> to vector<64x128xbf16>
    %cst_138 = arith.constant dense<0.000000e+00> : vector<16x128xf32>
    %187 = tpu.matmul %184, %186, %cst_138 {dimension_numbers = #tpu.dot_dimension_numbers<[1], [0], [0], [1], [0, 0, 1, 1], [], []>} : vector<16x64xbf16>, vector<64x128xbf16>, vector<16x128xf32> -> vector<16x128xf32>
    %188 = arith.addf %183, %187 : vector<16x128xf32>
    %189 = vector.extract_strided_slice %126 {offsets = [192, 0], sizes = [16, 64], strides = [1, 1]} : vector<416x64xbf16> to vector<16x64xbf16>
    %c12 = arith.constant 12 : index
    %c0_139 = arith.constant 0 : index
    %c0_140 = arith.constant 0 : index
    %190 = vector.load %arg16[%c12, %c0_139, %c0_140] : memref<26x64x128xbf16, #tpu.memory_space<vmem>>, vector<1x64x128xbf16>
    %191 = vector.shape_cast %190 : vector<1x64x128xbf16> to vector<64x128xbf16>
    %cst_141 = arith.constant dense<0.000000e+00> : vector<16x128xf32>
    %192 = tpu.matmul %189, %191, %cst_141 {dimension_numbers = #tpu.dot_dimension_numbers<[1], [0], [0], [1], [0, 0, 1, 1], [], []>} : vector<16x64xbf16>, vector<64x128xbf16>, vector<16x128xf32> -> vector<16x128xf32>
    %193 = arith.addf %188, %192 : vector<16x128xf32>
    %194 = vector.extract_strided_slice %126 {offsets = [208, 0], sizes = [16, 64], strides = [1, 1]} : vector<416x64xbf16> to vector<16x64xbf16>
    %c13 = arith.constant 13 : index
    %c0_142 = arith.constant 0 : index
    %c0_143 = arith.constant 0 : index
    %195 = vector.load %arg16[%c13, %c0_142, %c0_143] : memref<26x64x128xbf16, #tpu.memory_space<vmem>>, vector<1x64x128xbf16>
    %196 = vector.shape_cast %195 : vector<1x64x128xbf16> to vector<64x128xbf16>
    %cst_144 = arith.constant dense<0.000000e+00> : vector<16x128xf32>
    %197 = tpu.matmul %194, %196, %cst_144 {dimension_numbers = #tpu.dot_dimension_numbers<[1], [0], [0], [1], [0, 0, 1, 1], [], []>} : vector<16x64xbf16>, vector<64x128xbf16>, vector<16x128xf32> -> vector<16x128xf32>
    %198 = arith.addf %193, %197 : vector<16x128xf32>
    %199 = vector.extract_strided_slice %126 {offsets = [224, 0], sizes = [16, 64], strides = [1, 1]} : vector<416x64xbf16> to vector<16x64xbf16>
    %c14 = arith.constant 14 : index
    %c0_145 = arith.constant 0 : index
    %c0_146 = arith.constant 0 : index
    %200 = vector.load %arg16[%c14, %c0_145, %c0_146] : memref<26x64x128xbf16, #tpu.memory_space<vmem>>, vector<1x64x128xbf16>
    %201 = vector.shape_cast %200 : vector<1x64x128xbf16> to vector<64x128xbf16>
    %cst_147 = arith.constant dense<0.000000e+00> : vector<16x128xf32>
    %202 = tpu.matmul %199, %201, %cst_147 {dimension_numbers = #tpu.dot_dimension_numbers<[1], [0], [0], [1], [0, 0, 1, 1], [], []>} : vector<16x64xbf16>, vector<64x128xbf16>, vector<16x128xf32> -> vector<16x128xf32>
    %203 = arith.addf %198, %202 : vector<16x128xf32>
    %204 = vector.extract_strided_slice %126 {offsets = [240, 0], sizes = [16, 64], strides = [1, 1]} : vector<416x64xbf16> to vector<16x64xbf16>
    %c15 = arith.constant 15 : index
    %c0_148 = arith.constant 0 : index
    %c0_149 = arith.constant 0 : index
    %205 = vector.load %arg16[%c15, %c0_148, %c0_149] : memref<26x64x128xbf16, #tpu.memory_space<vmem>>, vector<1x64x128xbf16>
    %206 = vector.shape_cast %205 : vector<1x64x128xbf16> to vector<64x128xbf16>
    %cst_150 = arith.constant dense<0.000000e+00> : vector<16x128xf32>
    %207 = tpu.matmul %204, %206, %cst_150 {dimension_numbers = #tpu.dot_dimension_numbers<[1], [0], [0], [1], [0, 0, 1, 1], [], []>} : vector<16x64xbf16>, vector<64x128xbf16>, vector<16x128xf32> -> vector<16x128xf32>
    %208 = arith.addf %203, %207 : vector<16x128xf32>
    %209 = vector.extract_strided_slice %126 {offsets = [256, 0], sizes = [16, 64], strides = [1, 1]} : vector<416x64xbf16> to vector<16x64xbf16>
    %c16_151 = arith.constant 16 : index
    %c0_152 = arith.constant 0 : index
    %c0_153 = arith.constant 0 : index
    %210 = vector.load %arg16[%c16_151, %c0_152, %c0_153] : memref<26x64x128xbf16, #tpu.memory_space<vmem>>, vector<1x64x128xbf16>
    %211 = vector.shape_cast %210 : vector<1x64x128xbf16> to vector<64x128xbf16>
    %cst_154 = arith.constant dense<0.000000e+00> : vector<16x128xf32>
    %212 = tpu.matmul %209, %211, %cst_154 {dimension_numbers = #tpu.dot_dimension_numbers<[1], [0], [0], [1], [0, 0, 1, 1], [], []>} : vector<16x64xbf16>, vector<64x128xbf16>, vector<16x128xf32> -> vector<16x128xf32>
    %213 = arith.addf %208, %212 : vector<16x128xf32>
    %214 = vector.extract_strided_slice %126 {offsets = [272, 0], sizes = [16, 64], strides = [1, 1]} : vector<416x64xbf16> to vector<16x64xbf16>
    %c17 = arith.constant 17 : index
    %c0_155 = arith.constant 0 : index
    %c0_156 = arith.constant 0 : index
    %215 = vector.load %arg16[%c17, %c0_155, %c0_156] : memref<26x64x128xbf16, #tpu.memory_space<vmem>>, vector<1x64x128xbf16>
    %216 = vector.shape_cast %215 : vector<1x64x128xbf16> to vector<64x128xbf16>
    %cst_157 = arith.constant dense<0.000000e+00> : vector<16x128xf32>
    %217 = tpu.matmul %214, %216, %cst_157 {dimension_numbers = #tpu.dot_dimension_numbers<[1], [0], [0], [1], [0, 0, 1, 1], [], []>} : vector<16x64xbf16>, vector<64x128xbf16>, vector<16x128xf32> -> vector<16x128xf32>
    %218 = arith.addf %213, %217 : vector<16x128xf32>
    %219 = vector.extract_strided_slice %126 {offsets = [288, 0], sizes = [16, 64], strides = [1, 1]} : vector<416x64xbf16> to vector<16x64xbf16>
    %c18 = arith.constant 18 : index
    %c0_158 = arith.constant 0 : index
    %c0_159 = arith.constant 0 : index
    %220 = vector.load %arg16[%c18, %c0_158, %c0_159] : memref<26x64x128xbf16, #tpu.memory_space<vmem>>, vector<1x64x128xbf16>
    %221 = vector.shape_cast %220 : vector<1x64x128xbf16> to vector<64x128xbf16>
    %cst_160 = arith.constant dense<0.000000e+00> : vector<16x128xf32>
    %222 = tpu.matmul %219, %221, %cst_160 {dimension_numbers = #tpu.dot_dimension_numbers<[1], [0], [0], [1], [0, 0, 1, 1], [], []>} : vector<16x64xbf16>, vector<64x128xbf16>, vector<16x128xf32> -> vector<16x128xf32>
    %223 = arith.addf %218, %222 : vector<16x128xf32>
    %224 = vector.extract_strided_slice %126 {offsets = [304, 0], sizes = [16, 64], strides = [1, 1]} : vector<416x64xbf16> to vector<16x64xbf16>
    %c19 = arith.constant 19 : index
    %c0_161 = arith.constant 0 : index
    %c0_162 = arith.constant 0 : index
    %225 = vector.load %arg16[%c19, %c0_161, %c0_162] : memref<26x64x128xbf16, #tpu.memory_space<vmem>>, vector<1x64x128xbf16>
    %226 = vector.shape_cast %225 : vector<1x64x128xbf16> to vector<64x128xbf16>
    %cst_163 = arith.constant dense<0.000000e+00> : vector<16x128xf32>
    %227 = tpu.matmul %224, %226, %cst_163 {dimension_numbers = #tpu.dot_dimension_numbers<[1], [0], [0], [1], [0, 0, 1, 1], [], []>} : vector<16x64xbf16>, vector<64x128xbf16>, vector<16x128xf32> -> vector<16x128xf32>
    %228 = arith.addf %223, %227 : vector<16x128xf32>
    %229 = vector.extract_strided_slice %126 {offsets = [320, 0], sizes = [16, 64], strides = [1, 1]} : vector<416x64xbf16> to vector<16x64xbf16>
    %c20 = arith.constant 20 : index
    %c0_164 = arith.constant 0 : index
    %c0_165 = arith.constant 0 : index
    %230 = vector.load %arg16[%c20, %c0_164, %c0_165] : memref<26x64x128xbf16, #tpu.memory_space<vmem>>, vector<1x64x128xbf16>
    %231 = vector.shape_cast %230 : vector<1x64x128xbf16> to vector<64x128xbf16>
    %cst_166 = arith.constant dense<0.000000e+00> : vector<16x128xf32>
    %232 = tpu.matmul %229, %231, %cst_166 {dimension_numbers = #tpu.dot_dimension_numbers<[1], [0], [0], [1], [0, 0, 1, 1], [], []>} : vector<16x64xbf16>, vector<64x128xbf16>, vector<16x128xf32> -> vector<16x128xf32>
    %233 = arith.addf %228, %232 : vector<16x128xf32>
    %234 = vector.extract_strided_slice %126 {offsets = [336, 0], sizes = [16, 64], strides = [1, 1]} : vector<416x64xbf16> to vector<16x64xbf16>
    %c21 = arith.constant 21 : index
    %c0_167 = arith.constant 0 : index
    %c0_168 = arith.constant 0 : index
    %235 = vector.load %arg16[%c21, %c0_167, %c0_168] : memref<26x64x128xbf16, #tpu.memory_space<vmem>>, vector<1x64x128xbf16>
    %236 = vector.shape_cast %235 : vector<1x64x128xbf16> to vector<64x128xbf16>
    %cst_169 = arith.constant dense<0.000000e+00> : vector<16x128xf32>
    %237 = tpu.matmul %234, %236, %cst_169 {dimension_numbers = #tpu.dot_dimension_numbers<[1], [0], [0], [1], [0, 0, 1, 1], [], []>} : vector<16x64xbf16>, vector<64x128xbf16>, vector<16x128xf32> -> vector<16x128xf32>
    %238 = arith.addf %233, %237 : vector<16x128xf32>
    %239 = vector.extract_strided_slice %126 {offsets = [352, 0], sizes = [16, 64], strides = [1, 1]} : vector<416x64xbf16> to vector<16x64xbf16>
    %c22 = arith.constant 22 : index
    %c0_170 = arith.constant 0 : index
    %c0_171 = arith.constant 0 : index
    %240 = vector.load %arg16[%c22, %c0_170, %c0_171] : memref<26x64x128xbf16, #tpu.memory_space<vmem>>, vector<1x64x128xbf16>
    %241 = vector.shape_cast %240 : vector<1x64x128xbf16> to vector<64x128xbf16>
    %cst_172 = arith.constant dense<0.000000e+00> : vector<16x128xf32>
    %242 = tpu.matmul %239, %241, %cst_172 {dimension_numbers = #tpu.dot_dimension_numbers<[1], [0], [0], [1], [0, 0, 1, 1], [], []>} : vector<16x64xbf16>, vector<64x128xbf16>, vector<16x128xf32> -> vector<16x128xf32>
    %243 = arith.addf %238, %242 : vector<16x128xf32>
    %244 = vector.extract_strided_slice %126 {offsets = [368, 0], sizes = [16, 64], strides = [1, 1]} : vector<416x64xbf16> to vector<16x64xbf16>
    %c23 = arith.constant 23 : index
    %c0_173 = arith.constant 0 : index
    %c0_174 = arith.constant 0 : index
    %245 = vector.load %arg16[%c23, %c0_173, %c0_174] : memref<26x64x128xbf16, #tpu.memory_space<vmem>>, vector<1x64x128xbf16>
    %246 = vector.shape_cast %245 : vector<1x64x128xbf16> to vector<64x128xbf16>
    %cst_175 = arith.constant dense<0.000000e+00> : vector<16x128xf32>
    %247 = tpu.matmul %244, %246, %cst_175 {dimension_numbers = #tpu.dot_dimension_numbers<[1], [0], [0], [1], [0, 0, 1, 1], [], []>} : vector<16x64xbf16>, vector<64x128xbf16>, vector<16x128xf32> -> vector<16x128xf32>
    %248 = arith.addf %243, %247 : vector<16x128xf32>
    %249 = vector.extract_strided_slice %126 {offsets = [384, 0], sizes = [16, 64], strides = [1, 1]} : vector<416x64xbf16> to vector<16x64xbf16>
    %c24 = arith.constant 24 : index
    %c0_176 = arith.constant 0 : index
    %c0_177 = arith.constant 0 : index
    %250 = vector.load %arg16[%c24, %c0_176, %c0_177] : memref<26x64x128xbf16, #tpu.memory_space<vmem>>, vector<1x64x128xbf16>
    %251 = vector.shape_cast %250 : vector<1x64x128xbf16> to vector<64x128xbf16>
    %cst_178 = arith.constant dense<0.000000e+00> : vector<16x128xf32>
    %252 = tpu.matmul %249, %251, %cst_178 {dimension_numbers = #tpu.dot_dimension_numbers<[1], [0], [0], [1], [0, 0, 1, 1], [], []>} : vector<16x64xbf16>, vector<64x128xbf16>, vector<16x128xf32> -> vector<16x128xf32>
    %253 = arith.addf %248, %252 : vector<16x128xf32>
    %254 = vector.extract_strided_slice %126 {offsets = [400, 0], sizes = [16, 64], strides = [1, 1]} : vector<416x64xbf16> to vector<16x64xbf16>
    %c25 = arith.constant 25 : index
    %c0_179 = arith.constant 0 : index
    %c0_180 = arith.constant 0 : index
    %255 = vector.load %arg16[%c25, %c0_179, %c0_180] : memref<26x64x128xbf16, #tpu.memory_space<vmem>>, vector<1x64x128xbf16>
    %256 = vector.shape_cast %255 : vector<1x64x128xbf16> to vector<64x128xbf16>
    %cst_181 = arith.constant dense<0.000000e+00> : vector<16x128xf32>
    %257 = tpu.matmul %254, %256, %cst_181 {dimension_numbers = #tpu.dot_dimension_numbers<[1], [0], [0], [1], [0, 0, 1, 1], [], []>} : vector<16x64xbf16>, vector<64x128xbf16>, vector<16x128xf32> -> vector<16x128xf32>
    %258 = arith.addf %253, %257 : vector<16x128xf32>
    %cst_182 = arith.constant 0.000000e+00 : f32
    %259 = vector.broadcast %cst_182 : f32 to vector<16x128xf32>
    %260 = arith.cmpf oge, %258, %259 : vector<16x128xf32>
    %cst_183 = arith.constant 0.00999999977 : f32
    %261 = vector.broadcast %cst_183 : f32 to vector<16x128xf32>
    %262 = arith.mulf %261, %258 : vector<16x128xf32>
    %263 = arith.select %260, %258, %262 : vector<16x128xi1>, vector<16x128xf32>
    %264 = arith.truncf %263 : vector<16x128xf32> to vector<16x128xbf16>
    %c0_184 = arith.constant 0 : index
    %c0_185 = arith.constant 0 : index
    %265 = vector.load %arg18[%c0_184, %c0_185] : memref<128x32xbf16, #tpu.memory_space<vmem>>, vector<128x32xbf16>
    %cst_186 = arith.constant dense<0.000000e+00> : vector<16x32xf32>
    %266 = tpu.matmul %264, %265, %cst_186 {dimension_numbers = #tpu.dot_dimension_numbers<[1], [0], [0], [1], [0, 0, 1, 1], [], []>} : vector<16x128xbf16>, vector<128x32xbf16>, vector<16x32xf32> -> vector<16x32xf32>
    %c0_187 = arith.constant 0 : index
    %c0_188 = arith.constant 0 : index
    %267 = vector.load %arg19[%c0_187, %c0_188] : memref<1x32xf32, #tpu.memory_space<vmem>>, vector<1x32xf32>
    %268 = vector.broadcast %267 : vector<1x32xf32> to vector<16x32xf32>
    %269 = arith.addf %266, %268 : vector<16x32xf32>
    %cst_189 = arith.constant 0.000000e+00 : f32
    %270 = vector.broadcast %cst_189 : f32 to vector<16x32xf32>
    %271 = arith.cmpf oge, %269, %270 : vector<16x32xf32>
    %cst_190 = arith.constant 0.00999999977 : f32
    %272 = vector.broadcast %cst_190 : f32 to vector<16x32xf32>
    %273 = arith.mulf %272, %269 : vector<16x32xf32>
    %274 = arith.select %271, %269, %273 : vector<16x32xi1>, vector<16x32xf32>
    %c0_191 = arith.constant 0 : index
    %c0_192 = arith.constant 0 : index
    %275 = vector.load %arg20[%c0_191, %c0_192] : memref<1x32xbf16, #tpu.memory_space<vmem>>, vector<1x32xbf16>
    %276 = arith.truncf %274 : vector<16x32xf32> to vector<16x32xbf16>
    %cst_193 = arith.constant dense<0.000000e+00> : vector<1x16xf32>
    %277 = tpu.matmul %275, %276, %cst_193 {dimension_numbers = #tpu.dot_dimension_numbers<[1], [1], [0], [0], [0, 0, 1, 0], [], []>} : vector<1x32xbf16>, vector<16x32xbf16>, vector<1x16xf32> -> vector<1x16xf32>
    %c0_194 = arith.constant 0 : index
    %c0_195 = arith.constant 0 : index
    %278 = vector.load %arg21[%c0_194, %c0_195] : memref<1x1xf32, #tpu.memory_space<vmem>>, vector<1x1xf32>
    %279 = vector.broadcast %278 : vector<1x1xf32> to vector<1x16xf32>
    %280 = arith.addf %277, %279 : vector<1x16xf32>
    %281 = vector.shape_cast %280 : vector<1x16xf32> to vector<1x1x16xf32>
    %c0_196 = arith.constant 0 : index
    %c0_197 = arith.constant 0 : index
    %c0_198 = arith.constant 0 : index
    %282 = vector.load %arg22[%c0_196, %c0_197, %c0_198] : memref<1x1x16xf32, #tpu.memory_space<vmem>>, vector<1x1x16xf32>
    tpu.vector_store %arg22[%c0_196, %c0_197, %c0_198], %281 {strides = array<i32>} : memref<1x1x16xf32, #tpu.memory_space<vmem>>, vector<1x1x16xf32>,
    return
  }
  func.func @transform_0(%arg0: i32) -> (i32, i32) {
    %c0_i32 = arith.constant 0 : i32
    %c0_i32_0 = arith.constant 0 : i32
    return %arg0, %c0_i32 : i32, i32
  }
  func.func @transform_1(%arg0: i32) -> (i32, i32) {
    %c0_i32 = arith.constant 0 : i32
    %c0_i32_0 = arith.constant 0 : i32
    %c0_i32_1 = arith.constant 0 : i32
    return %c0_i32, %c0_i32_0 : i32, i32
  }
  func.func @transform_2(%arg0: i32) -> (i32, i32) {
    %c0_i32 = arith.constant 0 : i32
    %c0_i32_0 = arith.constant 0 : i32
    %c0_i32_1 = arith.constant 0 : i32
    return %c0_i32, %c0_i32_0 : i32, i32
  }
  func.func @transform_3(%arg0: i32) -> (i32, i32, i32) {
    %c0_i32 = arith.constant 0 : i32
    %c0_i32_0 = arith.constant 0 : i32
    %c0_i32_1 = arith.constant 0 : i32
    %c0_i32_2 = arith.constant 0 : i32
    return %c0_i32, %c0_i32_0, %c0_i32_1 : i32, i32, i32
  }
  func.func @transform_4(%arg0: i32) -> (i32, i32) {
    %c0_i32 = arith.constant 0 : i32
    %c0_i32_0 = arith.constant 0 : i32
    %c0_i32_1 = arith.constant 0 : i32
    return %c0_i32, %c0_i32_0 : i32, i32
  }
  func.func @transform_5(%arg0: i32) -> (i32, i32, i32) {
    %c0_i32 = arith.constant 0 : i32
    %c0_i32_0 = arith.constant 0 : i32
    %c0_i32_1 = arith.constant 0 : i32
    %c0_i32_2 = arith.constant 0 : i32
    return %c0_i32, %c0_i32_0, %c0_i32_1 : i32, i32, i32
  }
  func.func @transform_6(%arg0: i32) -> (i32, i32) {
    %c0_i32 = arith.constant 0 : i32
    %c0_i32_0 = arith.constant 0 : i32
    %c0_i32_1 = arith.constant 0 : i32
    return %c0_i32, %c0_i32_0 : i32, i32
  }
  func.func @transform_7(%arg0: i32) -> (i32, i32) {
    %c0_i32 = arith.constant 0 : i32
    %c0_i32_0 = arith.constant 0 : i32
    %c0_i32_1 = arith.constant 0 : i32
    return %c0_i32, %c0_i32_0 : i32, i32
  }
  func.func @transform_8(%arg0: i32) -> (i32, i32) {
    %c0_i32 = arith.constant 0 : i32
    %c0_i32_0 = arith.constant 0 : i32
    %c0_i32_1 = arith.constant 0 : i32
    return %c0_i32, %c0_i32_0 : i32, i32
  }
  func.func @transform_9(%arg0: i32) -> (i32, i32, i32) {
    %c0_i32 = arith.constant 0 : i32
    %c0_i32_0 = arith.constant 0 : i32
    %c0_i32_1 = arith.constant 0 : i32
    %c0_i32_2 = arith.constant 0 : i32
    return %c0_i32, %c0_i32_0, %c0_i32_1 : i32, i32, i32
  }
  func.func @transform_10(%arg0: i32) -> (i32, i32) {
    %c0_i32 = arith.constant 0 : i32
    %c0_i32_0 = arith.constant 0 : i32
    %c0_i32_1 = arith.constant 0 : i32
    return %c0_i32, %c0_i32_0 : i32, i32
  }
  func.func @transform_11(%arg0: i32) -> (i32, i32, i32) {
    %c0_i32 = arith.constant 0 : i32
    %c0_i32_0 = arith.constant 0 : i32
    %c0_i32_1 = arith.constant 0 : i32
    %c0_i32_2 = arith.constant 0 : i32
    return %c0_i32, %c0_i32_0, %c0_i32_1 : i32, i32, i32
  }
  func.func @transform_12(%arg0: i32) -> (i32, i32) {
    %c0_i32 = arith.constant 0 : i32
    %c0_i32_0 = arith.constant 0 : i32
    %c0_i32_1 = arith.constant 0 : i32
    return %c0_i32, %c0_i32_0 : i32, i32
  }
  func.func @transform_13(%arg0: i32) -> (i32, i32) {
    %c0_i32 = arith.constant 0 : i32
    %c0_i32_0 = arith.constant 0 : i32
    %c0_i32_1 = arith.constant 0 : i32
    return %c0_i32, %c0_i32_0 : i32, i32
  }
  func.func @transform_14(%arg0: i32) -> (i32, i32) {
    %c0_i32 = arith.constant 0 : i32
    %c0_i32_0 = arith.constant 0 : i32
    %c0_i32_1 = arith.constant 0 : i32
    return %c0_i32, %c0_i32_0 : i32, i32
  }
  func.func @transform_15(%arg0: i32) -> (i32, i32, i32) {
    %c0_i32 = arith.constant 0 : i32
    %c0_i32_0 = arith.constant 0 : i32
    %c0_i32_1 = arith.constant 0 : i32
    %c0_i32_2 = arith.constant 0 : i32
    return %c0_i32, %c0_i32_0, %c0_i32_1 : i32, i32, i32
  }
  func.func @transform_16(%arg0: i32) -> (i32, i32) {
    %c0_i32 = arith.constant 0 : i32
    %c0_i32_0 = arith.constant 0 : i32
    %c0_i32_1 = arith.constant 0 : i32
    return %c0_i32, %c0_i32_0 : i32, i32
  }
  func.func @transform_17(%arg0: i32) -> (i32, i32) {
    %c0_i32 = arith.constant 0 : i32
    %c0_i32_0 = arith.constant 0 : i32
    %c0_i32_1 = arith.constant 0 : i32
    return %c0_i32, %c0_i32_0 : i32, i32
  }
  func.func @transform_18(%arg0: i32) -> (i32, i32) {
    %c0_i32 = arith.constant 0 : i32
    %c0_i32_0 = arith.constant 0 : i32
    %c0_i32_1 = arith.constant 0 : i32
    return %c0_i32, %c0_i32_0 : i32, i32
  }
  func.func @transform_19(%arg0: i32) -> (i32, i32) {
    %c0_i32 = arith.constant 0 : i32
    %c0_i32_0 = arith.constant 0 : i32
    %c0_i32_1 = arith.constant 0 : i32
    return %c0_i32, %c0_i32_0 : i32, i32
  }
  func.func @transform_20(%arg0: i32) -> (i32, i32) {
    %c0_i32 = arith.constant 0 : i32
    %c0_i32_0 = arith.constant 0 : i32
    %c0_i32_1 = arith.constant 0 : i32
    return %c0_i32, %c0_i32_0 : i32, i32
  }
  func.func @transform_21(%arg0: i32) -> (i32, i32, i32) {
    %c0_i32 = arith.constant 0 : i32
    %c0_i32_0 = arith.constant 0 : i32
    %c0_i32_1 = arith.constant 0 : i32
    return %arg0, %c0_i32, %c0_i32_0 : i32, i32, i32
  }
}

</mosaic_0001>

<bundles_post_ra>
// kernel: tpu_custom_call.1
= control target key start
LH: loop header
LB: loop body
LE: loop exit
PB: predicated region body
PF: predicated region fallthrough
CT: control target
= control target key end

     0   :  { %s14914_s0 = inlined_call_operand.vmem [shape: bf16[416,8], index: 0, kind: input, shape index: {}]   ;;  %s14915_s1 = inlined_call_operand.hbm [shape: bf16[8,64], index: 1, kind: input, shape index: {}]   ;;  %s14916_s2 = inlined_call_operand.hbm [shape: f32[1,64], index: 2, kind: input, shape index: {}]   ;;  %s14917_s3 = inlined_call_operand.vmem [shape: bf16[3,64,64], index: 3, kind: input, shape index: {}]   ;;  %s14918_s4 = inlined_call_operand.hbm [shape: f32[1,64], index: 4, kind: input, shape index: {}]   ;;  %s14919_s5 = inlined_call_operand.vmem [shape: bf16[3,64,64], index: 5, kind: input, shape index: {}]   ;;  %s14920_s6 = inlined_call_operand.hbm [shape: f32[1,64], index: 6, kind: input, shape index: {}]   ;;  %s14921_s7 = inlined_call_operand.vmem [shape: bf16[64,64], index: 7, kind: input, shape index: {}]   ;;  %s14922_s8 = inlined_call_operand.hbm [shape: f32[1,64], index: 8, kind: input, shape index: {}]   ;;  %s14923_s9 = inlined_call_operand.vmem [shape: bf16[3,64,64], index: 9, kind: input, shape index: {}]   ;;  %s14924_s10 = inlined_call_operand.hbm [shape: f32[1,64], index: 10, kind: input, shape index: {}]   ;;  %s14925_s11 = inlined_call_operand.hbm [shape: bf16[3,64,64], index: 11, kind: input, shape index: {}]   ;;  %s14926_s12 = inlined_call_operand.hbm [shape: f32[1,64], index: 12, kind: input, shape index: {}]   ;;  %s14927_s13 = inlined_call_operand.vmem [shape: bf16[64,64], index: 13, kind: input, shape index: {}]   ;;  %s14928_s14 = inlined_call_operand.hbm [shape: f32[1,64], index: 14, kind: input, shape index: {}]   ;;  %s14929_s15 = inlined_call_operand.hbm [shape: bf16[26,64,128], index: 15, kind: input, shape index: {}]   ;;  %s14930_s16 = inlined_call_operand.hbm [shape: f32[1,128], index: 16, kind: input, shape index: {}]   ;;  %s14931_s17 = inlined_call_operand.vmem [shape: bf16[128,32], index: 17, kind: input, shape index: {}]   ;;  %s14932_s18 = inlined_call_operand.vmem [shape: f32[1,32], index: 18, kind: input, shape index: {}]   ;;  %s14933_s19 = inlined_call_operand.vmem [shape: bf16[1,32], index: 19, kind: input, shape index: {}]   ;;  %s14934_s20 = inlined_call_operand.<no memory space> [shape: f32[1,1], index: 20, kind: input, shape index: {}]   ;;  %s14935_s21 = inlined_call_operand.hbm [shape: f32[1,1,16], index: 21, kind: output, shape index: {}]  }
   0x1   :  { %14944 = sst [smem:[#allocation31_spill]] %s14914_s0  ;;  %v26_v0 = vstv %s14934_s20 }
   0x2   :  { %14945 = sst [smem:[#allocation32_spill]] %s14915_s1  ;;  %27 = vst [vmem:[#allocation3] sm:$0x1] %v26_v0 }
   0x3   :  { %14946 = sst [smem:[#allocation33_spill]] %s14916_s2 }
   0x4   :  { %14947 = sst [smem:[#allocation34_spill]] %s14917_s3 }
   0x5   :  { %14948 = sst [smem:[#allocation35_spill]] %s14918_s4 }
   0x6   :  { %14949 = sst [smem:[#allocation36_spill]] %s14919_s5 }
   0x7   :  { %28 = vsyncpa [#allocation5], 0 }
   0x8   :  { %29 = vsyncpa [#allocation8], 0 }
   0x9   :  { %30 = vsyncpa [#allocation11], 0 }
   0xa   :  { %31 = vsyncpa [#allocation14], 0 }
   0xb   :  { %32 = vsyncpa [#allocation17], 0 }
   0xc   :  { %33 = vsyncpa [#allocation20], 0 }
   0xd   :  { %34 = vsyncpa [#allocation6], 0  ;;  %s12449_s26 = smov [#allocation7]   ;;  %s12450_s3 = smov [#allocation10]  }
   0xe   :  { %s53_s27 = sshll.u32 %s12449_s26, 4  ;;  %s77_s28 = sshll.u32 %s12450_s3, 4  ;;  %s54_s27 = int_to_ptr.vmem [resolvable:$true] %s53_s27  ;;  %s78_s28 = int_to_ptr.vmem [resolvable:$true] %s77_s28 }
   0xf   :  { %s14950_s4 = sld [smem:[#allocation33_spill]] }
  0x15   :  { %s12171_s30 = scalar_lea.hbm %s14950_s4, 16 }
  0x16   :  { %p12172_p0 = scmp.ne.s32.totalorder %s14950_s4, %s12171_s30  ;;  %p12175_p1 = scmp.lt.u32.totalorder %s12171_s30, %s14950_s4 }
  0x18   :  { %p12177_p2 = pnand %p12175_p1, %p12172_p0 }
  0x1a   :  { %12180 = shalt.err (!%p12177_p2)
}
  0x1b   :  { %s12181_s1 = scalar_lea.vmem %s54_s27, 16  ;;  %s12185_s24 = scalar_lea.vmem %s54_s27, 32 }
  0x1c   :  { %p12182_p3 = scmp.ne.s32.totalorder %s54_s27, %s12181_s1  ;;  %p12186_p4 = scmp.lt.s32.totalorder %s54_s27, %s54_s27 }
  0x1d   :  { %p12187_p5 = scmp.lt.s32.totalorder %s12185_s24, %s12181_s1 }
  0x1f   :  { %p12188_p6 = por %p12187_p5, %p12186_p4 }
  0x21   :  { %p12189_p7 = pnand %p12188_p6, %p12182_p3 }
  0x23   :  { %12192 = shalt.err (!%p12189_p7)
}
  0x24   :  { %56 = dma.hbm_to_vmem [thread:$0]  %s14950_s4, 16, %s54_s27, [#allocation8]  }
  0x25   :  { %s12193_s29 = scalar_lea.hbm %s14920_s6, 16 }
  0x26   :  { %p12194_p8 = scmp.ne.s32.totalorder %s14920_s6, %s12193_s29  ;;  %p12197_p9 = scmp.lt.u32.totalorder %s12193_s29, %s14920_s6 }
  0x28   :  { %p12199_p10 = pnand %p12197_p9, %p12194_p8 }
  0x2a   :  { %12202 = shalt.err (!%p12199_p10)
}
  0x2b   :  { %s12203_s22 = scalar_lea.vmem %s78_s28, 16  ;;  %s12207_s23 = scalar_lea.vmem %s78_s28, 32 }
  0x2c   :  { %p12204_p11 = scmp.ne.s32.totalorder %s78_s28, %s12203_s22  ;;  %p12208_p12 = scmp.lt.s32.totalorder %s78_s28, %s78_s28 }
  0x2d   :  { %p12209_p13 = scmp.lt.s32.totalorder %s12207_s23, %s12203_s22 }
  0x2f   :  { %p12210_p0 = por %p12209_p13, %p12208_p12 }
  0x31   :  { %p12211_p1 = pnand %p12210_p0, %p12204_p11 }
  0x33   :  { %12214 = shalt.err (!%p12211_p1)
}
  0x34   :  { %80 = dma.hbm_to_vmem [thread:$0]  %s14920_s6, 16, %s78_s28, [#allocation11]  }
  0x35   :  { %s12451_s1 = smov [#allocation13]   ;;  %s12452_s2 = smov [#allocation16]  }
  0x36   :  { %s101_s24 = sshll.u32 %s12451_s1, 4  ;;  %s123_s25 = sshll.u32 %s12452_s2, 4  ;;  %s102_s24 = int_to_ptr.vmem [resolvable:$true] %s101_s24  ;;  %s124_s25 = int_to_ptr.vmem [resolvable:$true] %s123_s25 }
  0x37   :  { %s12215_s29 = scalar_lea.hbm %s14924_s10, 16 }
  0x38   :  { %p12216_p2 = scmp.ne.s32.totalorder %s14924_s10, %s12215_s29  ;;  %p12219_p3 = scmp.lt.u32.totalorder %s12215_s29, %s14924_s10 }
  0x3a   :  { %p12221_p4 = pnand %p12219_p3, %p12216_p2 }
  0x3c   :  { %12224 = shalt.err (!%p12221_p4)
}
  0x3d   :  { %s12225_s6 = scalar_lea.vmem %s102_s24, 16  ;;  %s12229_s28 = scalar_lea.vmem %s102_s24, 32 }
  0x3e   :  { %p12226_p5 = scmp.ne.s32.totalorder %s102_s24, %s12225_s6  ;;  %p12230_p6 = scmp.lt.s32.totalorder %s102_s24, %s102_s24 }
  0x3f   :  { %p12231_p7 = scmp.lt.s32.totalorder %s12229_s28, %s12225_s6 }
  0x41   :  { %p12232_p8 = por %p12231_p7, %p12230_p6 }
  0x43   :  { %p12233_p9 = pnand %p12232_p8, %p12226_p5 }
  0x45   :  { %12236 = shalt.err (!%p12233_p9)
}
  0x46   :  { %104 = dma.hbm_to_vmem [thread:$0]  %s14924_s10, 16, %s102_s24, [#allocation14]  }
  0x47   :  { %s12237_s1 = scalar_lea.hbm %s14926_s12, 16 }
  0x48   :  { %p12238_p10 = scmp.ne.s32.totalorder %s14926_s12, %s12237_s1  ;;  %p12241_p11 = scmp.lt.u32.totalorder %s12237_s1, %s14926_s12 }
  0x4a   :  { %p12243_p12 = pnand %p12241_p11, %p12238_p10 }
  0x4c   :  { %12246 = shalt.err (!%p12243_p12)
}
  0x4d   :  { %s12247_s0 = scalar_lea.vmem %s124_s25, 16  ;;  %s12251_s30 = scalar_lea.vmem %s124_s25, 32 }
  0x4e   :  { %p12248_p13 = scmp.ne.s32.totalorder %s124_s25, %s12247_s0  ;;  %p12252_p0 = scmp.lt.s32.totalorder %s124_s25, %s124_s25 }
  0x4f   :  { %p12253_p1 = scmp.lt.s32.totalorder %s12251_s30, %s12247_s0 }
  0x51   :  { %p12254_p2 = por %p12253_p1, %p12252_p0 }
  0x53   :  { %p12255_p3 = pnand %p12254_p2, %p12248_p13 }
  0x55   :  { %12258 = shalt.err (!%p12255_p3)
}
  0x56   :  { %126 = dma.hbm_to_vmem [thread:$0]  %s14926_s12, 16, %s124_s25, [#allocation17]  }
  0x57   :  { %s12453_s5 = smov [#allocation19]   ;;  %s12454_s6 = smov [#allocation4]  }
  0x58   :  { %s144_s20 = sshll.u32 %s12453_s5, 4  ;;  %s43_s28 = sshll.u32 %s12454_s6, 4  ;;  %s145_s20 = int_to_ptr.vmem [resolvable:$true] %s144_s20  ;;  %s44_s28 = int_to_ptr.vmem [resolvable:$true] %s43_s28 }
  0x59   :  { %s12259_s27 = scalar_lea.hbm %s14929_s15, 13312 }
  0x5a   :  { %p12260_p4 = scmp.ne.s32.totalorder %s14929_s15, %s12259_s27  ;;  %p12263_p5 = scmp.lt.u32.totalorder %s12259_s27, %s14929_s15 }
  0x5c   :  { %p12265_p6 = pnand %p12263_p5, %p12260_p4 }
  0x5e   :  { %12268 = shalt.err (!%p12265_p6)
}
  0x5f   :  { %s12269_s12 = scalar_lea.vmem %s145_s20, 13312  ;;  %p12274_p8 = scmp.lt.s32.totalorder %s145_s20, %s145_s20 }
  0x60   :  { %p12270_p7 = scmp.ne.s32.totalorder %s145_s20, %s12269_s12  ;;  %p12275_p9 = scmp.lt.s32.totalorder %s12269_s12, %s12269_s12 }
  0x62   :  { %p12276_p10 = por %p12275_p9, %p12274_p8 }
  0x64   :  { %p12277_p11 = pnand %p12276_p10, %p12270_p7 }
  0x66   :  { %12280 = shalt.err (!%p12277_p11)
}
  0x67   :  { %s12455_s25 = smov 64   ;;  %s12456_s3 = smov 4  }
  0x68   :  { %150 = dma.hbm_to_vmem [thread:$0]  %s14929_s15, 13312, %s145_s20, [#allocation20], %s12455_s25, %s12455_s25, %s12456_s3  }
  0x69   :  { %s14951_s24 = sld [smem:[#allocation32_spill]] }
  0x6f   :  { %s12281_s5 = scalar_lea.hbm %s14951_s24, 64 }
  0x70   :  { %p12282_p12 = scmp.ne.s32.totalorder %s14951_s24, %s12281_s5  ;;  %p12285_p13 = scmp.lt.u32.totalorder %s12281_s5, %s14951_s24 }
  0x72   :  { %p12287_p0 = pnand %p12285_p13, %p12282_p12 }
  0x74   :  { %12290 = shalt.err (!%p12287_p0)
}
  0x75   :  { %s12291_s4 = scalar_lea.vmem %s44_s28, 64  ;;  %p12296_p2 = scmp.lt.s32.totalorder %s44_s28, %s44_s28 }
  0x76   :  { %p12292_p1 = scmp.ne.s32.totalorder %s44_s28, %s12291_s4  ;;  %p12297_p3 = scmp.lt.s32.totalorder %s12291_s4, %s12291_s4 }
  0x78   :  { %p12298_p4 = por %p12297_p3, %p12296_p2 }
  0x7a   :  { %p12299_p5 = pnand %p12298_p4, %p12292_p1 }
  0x7c   :  { %12302 = shalt.err (!%p12299_p5)
}
  0x7d   :  { %46 = dma.hbm_to_vmem [thread:$0]  %s14951_s24, 64, %s44_s28, [#allocation5]  }
  0x7e   :  { %s12457_s1 = smov [#allocation9]   ;;  %s12458_s26 = smov [#allocation12]  }
  0x7f   :  { %s65_s2 = sshll.u32 %s12457_s1, 4  ;;  %s89_s12 = sshll.u32 %s12458_s26, 4  ;;  %s66_s2 = int_to_ptr.vmem [resolvable:$true] %s65_s2  ;;  %s90_s12 = int_to_ptr.vmem [resolvable:$true] %s89_s12 }
  0x80   :  { %s14952_s30 = sld [smem:[#allocation35_spill]] }
  0x86   :  { %s12303_s10 = scalar_lea.hbm %s14952_s30, 16 }
  0x87   :  { %p12304_p6 = scmp.ne.s32.totalorder %s14952_s30, %s12303_s10  ;;  %p12307_p7 = scmp.lt.u32.totalorder %s12303_s10, %s14952_s30 }
  0x89   :  { %p12309_p8 = pnand %p12307_p7, %p12304_p6 }
  0x8b   :  { %12312 = shalt.err (!%p12309_p8)
}
  0x8c   :  { %s12313_s28 = scalar_lea.vmem %s66_s2, 16  ;;  %s12317_s24 = scalar_lea.vmem %s66_s2, 32 }
  0x8d   :  { %p12314_p9 = scmp.ne.s32.totalorder %s66_s2, %s12313_s28  ;;  %p12318_p10 = scmp.lt.s32.totalorder %s66_s2, %s66_s2 }
  0x8e   :  { %p12319_p11 = scmp.lt.s32.totalorder %s12317_s24, %s12313_s28 }
  0x90   :  { %p12320_p12 = por %p12319_p11, %p12318_p10 }
  0x92   :  { %p12321_p13 = pnand %p12320_p12, %p12314_p9 }
  0x94   :  { %12324 = shalt.err (!%p12321_p13)
}
  0x95   :  { %68 = dma.hbm_to_vmem [thread:$0]  %s14952_s30, 16, %s66_s2, [#allocation8]  }
  0x96   :  { %s12325_s1 = scalar_lea.hbm %s14922_s8, 16 }
  0x97   :  { %p12326_p0 = scmp.ne.s32.totalorder %s14922_s8, %s12325_s1  ;;  %p12329_p1 = scmp.lt.u32.totalorder %s12325_s1, %s14922_s8 }
  0x99   :  { %p12331_p2 = pnand %p12329_p1, %p12326_p0 }
  0x9b   :  { %12334 = shalt.err (!%p12331_p2)
}
  0x9c   :  { %s12335_s5 = scalar_lea.vmem %s90_s12, 16  ;;  %s12339_s6 = scalar_lea.vmem %s90_s12, 32 }
  0x9d   :  { %p12336_p3 = scmp.ne.s32.totalorder %s90_s12, %s12335_s5  ;;  %p12340_p4 = scmp.lt.s32.totalorder %s90_s12, %s90_s12 }
  0x9e   :  { %p12341_p5 = scmp.lt.s32.totalorder %s12339_s6, %s12335_s5 }
  0xa0   :  { %p12342_p6 = por %p12341_p5, %p12340_p4 }
  0xa2   :  { %p12343_p7 = pnand %p12342_p6, %p12336_p3 }
  0xa4   :  { %12346 = shalt.err (!%p12343_p7)
}
  0xa5   :  { %92 = dma.hbm_to_vmem [thread:$0]  %s14922_s8, 16, %s90_s12, [#allocation11]  }
  0xa6   :  { %s12459_s22 = smov [#allocation15]   ;;  %s12460_s28 = smov [#allocation18]  }
  0xa7   :  { %s110_s23 = sshll.u32 %s12459_s22, 4  ;;  %s135_s24 = sshll.u32 %s12460_s28, 4  ;;  %s111_s23 = int_to_ptr.vmem [resolvable:$true] %s110_s23  ;;  %s136_s24 = int_to_ptr.vmem [resolvable:$true] %s135_s24 }
  0xa8   :  { %s12347_s15 = scalar_lea.hbm %s14925_s11, 1536 }
  0xa9   :  { %p12348_p8 = scmp.ne.s32.totalorder %s14925_s11, %s12347_s15  ;;  %p12351_p9 = scmp.lt.u32.totalorder %s12347_s15, %s14925_s11 }
  0xab   :  { %p12353_p10 = pnand %p12351_p9, %p12348_p8 }
  0xad   :  { %12356 = shalt.err (!%p12353_p10)
}
  0xae   :  { %s12357_s8 = scalar_lea.vmem %s111_s23, 1536  ;;  %p12362_p12 = scmp.lt.s32.totalorder %s111_s23, %s111_s23 }
  0xaf   :  { %p12358_p11 = scmp.ne.s32.totalorder %s111_s23, %s12357_s8  ;;  %p12363_p13 = scmp.lt.s32.totalorder %s12357_s8, %s12357_s8 }
  0xb1   :  { %p12364_p0 = por %p12363_p13, %p12362_p12 }
  0xb3   :  { %p12365_p1 = pnand %p12364_p0, %p12358_p11 }
  0xb5   :  { %12368 = shalt.err (!%p12365_p1)
}
  0xb6   :  { %116 = dma.hbm_to_vmem [thread:$0]  %s14925_s11, 1536, %s111_s23, [#allocation14], %s12455_s25, %s12455_s25, %s12456_s3  }
  0xb7   :  { %s12369_s6 = scalar_lea.hbm %s14928_s14, 16 }
  0xb8   :  { %p12370_p2 = scmp.ne.s32.totalorder %s14928_s14, %s12369_s6  ;;  %p12373_p3 = scmp.lt.u32.totalorder %s12369_s6, %s14928_s14 }
  0xba   :  { %p12375_p4 = pnand %p12373_p3, %p12370_p2 }
  0xbc   :  { %12378 = shalt.err (!%p12375_p4)
}
  0xbd   :  { %s12379_s27 = scalar_lea.vmem %s136_s24, 16  ;;  %s12383_s4 = scalar_lea.vmem %s136_s24, 32 }
  0xbe   :  { %p12380_p5 = scmp.ne.s32.totalorder %s136_s24, %s12379_s27  ;;  %p12384_p6 = scmp.lt.s32.totalorder %s136_s24, %s136_s24 }
  0xbf   :  { %p12385_p7 = scmp.lt.s32.totalorder %s12383_s4, %s12379_s27 }
  0xc1   :  { %p12386_p8 = por %p12385_p7, %p12384_p6 }
  0xc3   :  { %p12387_p9 = pnand %p12386_p8, %p12380_p5 }
  0xc5   :  { %12390 = shalt.err (!%p12387_p9)
}
  0xc6   :  { %138 = dma.hbm_to_vmem [thread:$0]  %s14928_s14, 16, %s136_s24, [#allocation17]  }
  0xc7   :  { %s12461_s3 = smov [#allocation21]   ;;  %s12391_s1 = scalar_lea.hbm %s14930_s16, 16 }
  0xc8   :  { %s157_s23 = sshll.u32 %s12461_s3, 4  ;;  %p12392_p10 = scmp.ne.s32.totalorder %s14930_s16, %s12391_s1  ;;  %s158_s23 = int_to_ptr.vmem [resolvable:$true] %s157_s23 }
  0xc9   :  { %p12395_p11 = scmp.lt.u32.totalorder %s12391_s1, %s14930_s16 }
  0xcb   :  { %p12397_p12 = pnand %p12395_p11, %p12392_p10 }
  0xcd   :  { %12400 = shalt.err (!%p12397_p12)
}
  0xce   :  { %s12401_s0 = scalar_lea.vmem %s158_s23, 16  ;;  %s12405_s14 = scalar_lea.vmem %s158_s23, 32 }
  0xcf   :  { %p12402_p13 = scmp.ne.s32.totalorder %s158_s23, %s12401_s0  ;;  %p12406_p0 = scmp.lt.s32.totalorder %s158_s23, %s158_s23 }
  0xd0   :  { %p12407_p1 = scmp.lt.s32.totalorder %s12405_s14, %s12401_s0 }
  0xd2   :  { %p12408_p2 = por %p12407_p1, %p12406_p0 }
  0xd4   :  { %p12409_p3 = pnand %p12408_p2, %p12402_p13 }
  0xd6   :  { %12412 = shalt.err (!%p12409_p3)
}
  0xd7   :  { %160 = dma.hbm_to_vmem [thread:$0]  %s14930_s16, 16, %s158_s23, [#allocation20]  }
  0xd8   :  { %12435 = dma.done.wait [#allocation5], 64  }
  0xd9   :  { %12436 = vsyncadd [#allocation5], 4294967232 }
  0xda   :  { %12437 = dma.done.wait [#allocation8], 32  }
  0xdb   :  { %12438 = vsyncadd [#allocation8], 4294967264 }
  0xdc   :  { %12439 = dma.done.wait [#allocation11], 32  }
  0xdd   :  { %12440 = vsyncadd [#allocation11], 4294967264 }
  0xde   :  { %12441 = dma.done.wait [#allocation14], 1552  }
  0xdf   :  { %12442 = vsyncadd [#allocation14], 4294965744 }
  0xe0   :  { %12443 = dma.done.wait [#allocation17], 32  }
  0xe1   :  { %12444 = vsyncadd [#allocation17], 4294967264 }
  0xe2   :  { %12445 = dma.done.wait [#allocation20], 13328  }
  0xe3   :  { %12446 = vsyncadd [#allocation20], 4294953968  ;;  %vm475_vm0 = vcmask 1043456   ;;  %vm396_vm1 = vcmask 64512   ;;  %v258_v1 = vld [vmem:[#allocation4] sm:$0xf] }
  0xe4   :  { %11958 = vmatprep.subr.msk.bf16.mxu0 %vm475_vm0, %v258_v1  ;;  %v477_v2 = vsel %vm475_vm0, %v258_v1, 0  ;;  %s14953_s16 = sld [smem:[#allocation31_spill]]  ;;  %s14954_s14 = sld [smem:[#allocation34_spill]]  ;;  %vm203_vm2 = vcmask 523264   ;;  %v12462_v38 = vmov 0  }
  0xe5   :  { %10201 = vmatpush3.bf16.msra.mxu0 %v477_v2  ;;  %204 = vst.msk [vmem:[#allocation2] sm:$0xff] %vm203_vm2, %v12462_v38  ;;  %205 = vst.msk [vmem:[#allocation2 + $0xd8] sm:$0xff] %vm203_vm2, %v12462_v38  ;;  %11976 = vset.pattern.permute.xlu0 %v12462_v38  ;;  %v12870_v39 = vld [vmem:[#allocation7] ss:$0 sm:$0xff]  ;;  %s14955_s3 = sld [smem:[#allocation36_spill]] }
  0xea   :  { %v11977_v3 = vld [vmem:[%s14953_s16] sm:$0xff]   ;;  %v11978_v4 = vld [vmem:[%s14953_s16 + $0x8] sm:$0xff]   ;;  %v11979_v5 = vld [vmem:[%s14953_s16 + $0x10] sm:$0xff]  }
  0xeb   :  { %10202 = vmatprep.mubr.msk.bf16.mxu0 %vm396_vm1, %v11977_v3  ;;  %v11980_v6 = vld [vmem:[%s14953_s16 + $0x18] sm:$0xff]   ;;  %v11981_v7 = vld [vmem:[%s14953_s16 + $0x20] sm:$0xff]   ;;  %v11982_v8 = vld [vmem:[%s14953_s16 + $0x28] sm:$0xff]  }
  0xec   :  { %10203 = vmatmul.mubr.msk.bf16.vlgmr.msra.gmra.mrb[0].mxu0 %vm396_vm1, %v11978_v4  ;;  %v11983_v9 = vld [vmem:[%s14953_s16 + $0x30] sm:$0xff]   ;;  %v11984_v10 = vld [vmem:[%s14953_s16 + $0x38] sm:$0xff]   ;;  %v11985_v11 = vld [vmem:[%s14953_s16 + $0x40] sm:$0xff]  }
  0xed   :  { %10206 = vmatprep.mubr.msk.bf16.mxu0 %vm396_vm1, %v11979_v5  ;;  %v12003_v12 = vld [vmem:[%s14954_s14 + $0x20] sm:$0xff]   ;;  %v12004_v13 = vld [vmem:[%s14954_s14 + $0x28] sm:$0xff]   ;;  %v12005_v14 = vld [vmem:[%s14954_s14 + $0x30] sm:$0xff]  }
  0xee   :  { %10254 = vmatprep.subr.bf16.mxu0 %v12003_v12  ;;  %v11986_v15 = vld [vmem:[%s14953_s16 + $0x48] sm:$0xff]   ;;  %v11987_v16 = vld [vmem:[%s14953_s16 + $0x50] sm:$0xff]   ;;  %v12006_v17 = vld [vmem:[%s14954_s14 + $0x38] sm:$0xff]  }
  0xef   :  { %10255 = vmatpush3.bf16.msra.mxu0 %v12003_v12  ;;  %v11988_v18 = vld [vmem:[%s14953_s16 + $0x58] sm:$0xff]   ;;  %v11989_v19 = vld [vmem:[%s14953_s16 + $0x60] sm:$0xff]   ;;  %v11990_v20 = vld [vmem:[%s14953_s16 + $0x68] sm:$0xff]  }
  0xf0   :  { %10256 = vmatprep.subr.bf16.mxu0 %v12004_v13  ;;  %v11991_v21 = vld [vmem:[%s14953_s16 + $0x70] sm:$0xff]   ;;  %v11992_v22 = vld [vmem:[%s14953_s16 + $0x78] sm:$0xff]   ;;  %v11993_v23 = vld [vmem:[%s14953_s16 + $0x80] sm:$0xff]  }
  0xf1   :  { %v11994_v24 = vld [vmem:[%s14953_s16 + $0x88] sm:$0xff]   ;;  %v11995_v25 = vld [vmem:[%s14953_s16 + $0x90] sm:$0xff]   ;;  %v11996_v26 = vld [vmem:[%s14953_s16 + $0x98] sm:$0xff]  }
  0xf2   :  { %v11997_v27 = vld [vmem:[%s14953_s16 + $0xa0] sm:$0xff]   ;;  %v11998_v28 = vld [vmem:[%s14953_s16 + $0xa8] sm:$0xff]   ;;  %v11999_v29 = vld [vmem:[%s14953_s16 + $0xb0] sm:$0xff]  }
  0xf3   :  { %10257 = vmatpush3.bf16.msra.mxu0 %v12004_v13  ;;  %v12000_v30 = vld [vmem:[%s14953_s16 + $0xb8] sm:$0xff]   ;;  %v12001_v31 = vld [vmem:[%s14953_s16 + $0xc0] sm:$0xff]   ;;  %v12002_v32 = vld [vmem:[%s14953_s16 + $0xc8] sm:$0xff]  }
  0xf4   :  { %10207 = vmatmul.mubr.msk.bf16.gmra.mrb[4].mxu0 %vm396_vm1, %v11980_v6  ;;  %10258 = vmatprep.subr.bf16.mxu0 %v12005_v14  ;;  %v12836_v33 = vld [vmem:[%s14954_s14] sm:$0xff]   ;;  %v12844_v34 = vld [vmem:[%s14954_s14 + $0x8] sm:$0xff]   ;;  %v12851_v35 = vld [vmem:[%s14954_s14 + $0x10] sm:$0xff]  }
  0xf5   :  { %10210 = vmatprep.mubr.msk.bf16.mxu0 %vm396_vm1, %v11981_v7  ;;  %11432 = vmatprep.subr.bf16.mxu1 %v12836_v33  ;;  %v12858_v36 = vld [vmem:[%s14954_s14 + $0x18] sm:$0xff]   ;;  %v12865_v37 = vld [vmem:[%s14954_s14 + $0x40] sm:$0xff]  }
  0xf6   :  { %11436 = vmatpush3.bf16.msra.mxu1 %v12836_v33 }
  0xf7   :  { %10259 = vmatpush3.bf16.msra.mxu0 %v12005_v14  ;;  %11433 = vmatprep.subr.bf16.mxu1 %v12844_v34 }
  0xf8   :  { %10260 = vmatprep.subr.bf16.mxu0 %v12006_v17 }
  0xfa   :  { %11437 = vmatpush3.bf16.msra.mxu1 %v12844_v34 }
  0xfb   :  { %10261 = vmatpush3.bf16.msra.mxu0 %v12006_v17  ;;  %11434 = vmatprep.subr.bf16.mxu1 %v12851_v35 }
  0xfc   :  { %10211 = vmatmul.mubr.msk.bf16.gmra.mrb[8].mxu0 %vm396_vm1, %v11982_v8  ;;  %10314 = vmatprep.subr.bf16.mxu0 %v12836_v33 }
  0xfd   :  { %10214 = vmatprep.mubr.msk.bf16.mxu0 %vm396_vm1, %v11983_v9 }
  0xfe   :  { %11438 = vmatpush3.bf16.msra.mxu1 %v12851_v35 }
  0xff   :  { %11435 = vmatprep.subr.bf16.mxu1 %v12858_v36 }
 0x102   :  { %11439 = vmatpush3.bf16.msra.mxu1 %v12858_v36 }
 0x103   :  { %10374 = vmatprep.subr.bf16.mxu1 %v12865_v37 }
 0x104   :  { %10215 = vmatmul.mubr.msk.bf16.gmra.mrb[12].mxu0 %vm396_vm1, %v11984_v10 }
 0x105   :  { %10218 = vmatprep.mubr.msk.bf16.mxu0 %vm396_vm1, %v11985_v11 }
 0x10c   :  { %10219 = vmatmul.mubr.msk.bf16.gmra.mrb[16].mxu0 %vm396_vm1, %v11986_v15 }
 0x10d   :  { %10222 = vmatprep.mubr.msk.bf16.mxu0 %vm396_vm1, %v11987_v16 }
 0x114   :  { %10223 = vmatmul.mubr.msk.bf16.gmra.mrb[20].mxu0 %vm396_vm1, %v11988_v18 }
 0x115   :  { %10226 = vmatprep.mubr.msk.bf16.mxu0 %vm396_vm1, %v11989_v19 }
 0x11c   :  { %10227 = vmatmul.mubr.msk.bf16.gmra.mrb[24].mxu0 %vm396_vm1, %v11990_v20 }
 0x11d   :  { %10230 = vmatprep.mubr.msk.bf16.mxu0 %vm396_vm1, %v11991_v21 }
 0x124   :  { %10231 = vmatmul.mubr.msk.bf16.gmra.mrb[28].mxu0 %vm396_vm1, %v11992_v22 }
 0x125   :  { %10234 = vmatprep.mubr.msk.bf16.mxu0 %vm396_vm1, %v11993_v23 }
 0x12c   :  { %10235 = vmatmul.mubr.msk.bf16.gmra.mrb[32].mxu0 %vm396_vm1, %v11994_v24 }
 0x12d   :  { %10238 = vmatprep.mubr.msk.bf16.mxu0 %vm396_vm1, %v11995_v25 }
 0x134   :  { %10239 = vmatmul.mubr.msk.bf16.gmra.mrb[36].mxu0 %vm396_vm1, %v11996_v26 }
 0x135   :  { %10242 = vmatprep.mubr.msk.bf16.mxu0 %vm396_vm1, %v11997_v27 }
 0x13c   :  { %10243 = vmatmul.mubr.msk.bf16.gmra.mrb[40].mxu0 %vm396_vm1, %v11998_v28 }
 0x13d   :  { %10246 = vmatprep.mubr.msk.bf16.mxu0 %vm396_vm1, %v11999_v29 }
 0x144   :  { %10247 = vmatmul.mubr.msk.bf16.gmra.mrb[44].mxu0 %vm396_vm1, %v12000_v30 }
 0x145   :  { %10250 = vmatprep.mubr.msk.bf16.mxu0 %vm396_vm1, %v12001_v31 }
 0x14c   :  { %10251 = vmatmul.mubr.msk.bf16.gmra.mrb[48].mxu0 %vm396_vm1, %v12002_v32 }
 0x1bf   :  { %v10204_v40 = vpop.f32.mrb[0].mxu0 }
 0x1c0   :  { %v522_v41 = vadd.f32 %v10204_v40, %v12870_v39  ;;  %v513_v42 = vpop.f32.mrb[1].mxu0 }
 0x1c1   :  { %v514_v43 = vadd.f32 %v12870_v39, %v513_v42  ;;  %v10205_v44 = vpop.f32.mrb[2].mxu0 }
 0x1c2   :  { %v774_v45 = vmul.f32 0.01, %v522_v41  ;;  %v525_v46 = vadd.f32 %v10205_v44, %v12870_v39  ;;  %v516_v47 = vpop.f32.mrb[3].mxu0  ;;  %vm722_vm3 = vcmp.ge.f32.partialorder %v522_v41, 0.0 }
 0x1c3   :  { %v772_v48 = vmul.f32 0.01, %v514_v43  ;;  %v517_v49 = vadd.f32 %v12870_v39, %v516_v47  ;;  %vm720_vm4 = vcmp.ge.f32.partialorder %v514_v43, 0.0 }
 0x1c4   :  { %vm723_vm5 = vcmp.ge.f32.partialorder %v525_v46, 0.0  ;;  %v775_v50 = vmul.f32 0.01, %v525_v46  ;;  %v826_v52 = vsel %vm722_vm3, %v522_v41, %v774_v45 }
 0x1c5   :  { %vm721_vm6 = vcmp.ge.f32.partialorder %v517_v49, 0.0  ;;  %v773_v51 = vmul.f32 0.01, %v517_v49  ;;  %v824_v54 = vsel %vm720_vm4, %v514_v43, %v772_v48 }
 0x1c6   :  { %v827_v53 = vsel %vm723_vm5, %v525_v46, %v775_v50 }
 0x1c7   :  { %v877_v55 = vpack.c.bf16 %v827_v53, %v826_v52  ;;  %v825_v56 = vsel %vm721_vm6, %v517_v49, %v773_v51  ;;  %v10208_v57 = vpop.f32.mrb[4].mxu0 }
 0x1c8   :  { %v876_v58 = vpack.c.bf16 %v825_v56, %v824_v54  ;;  %v538_v59 = vadd.f32 %v10208_v57, %v12870_v39  ;;  %v529_v60 = vpop.f32.mrb[5].mxu0 }
 0x1c9   :  { %903 = vst.msk [vmem:[#allocation2 + $0x10] sm:$0xff] %vm203_vm2, %v877_v55  ;;  %v530_v61 = vadd.f32 %v12870_v39, %v529_v60  ;;  %v10209_v62 = vpop.f32.mrb[6].mxu0 }
 0x1ca   :  { %902 = vst.msk [vmem:[#allocation2 + $0x8] sm:$0xff] %vm203_vm2, %v876_v58  ;;  %v778_v63 = vmul.f32 0.01, %v538_v59  ;;  %v541_v0 = vadd.f32 %v10209_v62, %v12870_v39  ;;  %v532_v1 = vpop.f32.mrb[7].mxu0  ;;  %vm726_vm7 = vcmp.ge.f32.partialorder %v538_v59, 0.0 }
 0x1cb   :  { %v776_v2 = vmul.f32 0.01, %v530_v61  ;;  %v533_v3 = vadd.f32 %v12870_v39, %v532_v1  ;;  %vm724_vm8 = vcmp.ge.f32.partialorder %v530_v61, 0.0 }
 0x1cc   :  { %vm727_vm9 = vcmp.ge.f32.partialorder %v541_v0, 0.0  ;;  %v779_v4 = vmul.f32 0.01, %v541_v0  ;;  %v830_v6 = vsel %vm726_vm7, %v538_v59, %v778_v63 }
 0x1cd   :  { %vm725_vm10 = vcmp.ge.f32.partialorder %v533_v3, 0.0  ;;  %v777_v5 = vmul.f32 0.01, %v533_v3  ;;  %v828_v8 = vsel %vm724_vm8, %v530_v61, %v776_v2 }
 0x1ce   :  { %v831_v7 = vsel %vm727_vm9, %v541_v0, %v779_v4 }
 0x1cf   :  { %v879_v9 = vpack.c.bf16 %v831_v7, %v830_v6  ;;  %v829_v10 = vsel %vm725_vm10, %v533_v3, %v777_v5  ;;  %v10212_v11 = vpop.f32.mrb[8].mxu0 }
 0x1d0   :  { %v878_v12 = vpack.c.bf16 %v829_v10, %v828_v8  ;;  %v554_v13 = vadd.f32 %v10212_v11, %v12870_v39  ;;  %v545_v14 = vpop.f32.mrb[9].mxu0  ;;  %v12891_v21 = vld [vmem:[#allocation2 + $0x10] sm:$0xff] }
 0x1d1   :  { %905 = vst.msk [vmem:[#allocation2 + $0x20] sm:$0xff] %vm203_vm2, %v879_v9  ;;  %v546_v15 = vadd.f32 %v12870_v39, %v545_v14  ;;  %v10213_v16 = vpop.f32.mrb[10].mxu0  ;;  %v12885_v17 = vld [vmem:[#allocation2 + $0x8] sm:$0xff] }
 0x1d2   :  { %904 = vst.msk [vmem:[#allocation2 + $0x18] sm:$0xff] %vm203_vm2, %v878_v12  ;;  %v782_v18 = vmul.f32 0.01, %v554_v13  ;;  %v557_v19 = vadd.f32 %v10213_v16, %v12870_v39  ;;  %v548_v20 = vpop.f32.mrb[11].mxu0  ;;  %10262 = vmatprep.mubr.msk.bf16.mxu0 %vm203_vm2, %v12885_v17  ;;  %vm730_vm11 = vcmp.ge.f32.partialorder %v554_v13, 0.0 }
 0x1d3   :  { %v780_v22 = vmul.f32 0.01, %v546_v15  ;;  %v549_v23 = vadd.f32 %v12870_v39, %v548_v20  ;;  %10263 = vmatmul.mubr.msk.bf16.vlgmr.msra.gmra.mrb[52].mxu0 %vm203_vm2, %v12891_v21  ;;  %vm728_vm12 = vcmp.ge.f32.partialorder %v546_v15, 0.0 }
 0x1d4   :  { %vm731_vm13 = vcmp.ge.f32.partialorder %v557_v19, 0.0  ;;  %v783_v24 = vmul.f32 0.01, %v557_v19  ;;  %10315 = vmatpush3.bf16.msra.mxu0 %v12836_v33  ;;  %v834_v26 = vsel %vm730_vm11, %v554_v13, %v782_v18 }
 0x1d5   :  { %vm729_vm14 = vcmp.ge.f32.partialorder %v549_v23, 0.0  ;;  %v781_v25 = vmul.f32 0.01, %v549_v23  ;;  %10316 = vmatprep.subr.bf16.mxu0 %v12844_v34  ;;  %v832_v28 = vsel %vm728_vm12, %v546_v15, %v780_v22 }
 0x1d6   :  { %v835_v27 = vsel %vm731_vm13, %v557_v19, %v783_v24 }
 0x1d7   :  { %v881_v29 = vpack.c.bf16 %v835_v27, %v834_v26  ;;  %v833_v30 = vsel %vm729_vm14, %v549_v23, %v781_v25  ;;  %v10216_v31 = vpop.f32.mrb[12].mxu0 }
 0x1d8   :  { %v880_v32 = vpack.c.bf16 %v833_v30, %v832_v28  ;;  %v570_v38 = vadd.f32 %v10216_v31, %v12870_v39  ;;  %v561_v40 = vpop.f32.mrb[13].mxu0  ;;  %10317 = vmatpush3.bf16.msra.mxu0 %v12844_v34  ;;  %v12909_v46 = vld [vmem:[#allocation2 + $0x20] sm:$0xff] }
 0x1d9   :  { %907 = vst.msk [vmem:[#allocation2 + $0x30] sm:$0xff] %vm203_vm2, %v881_v29  ;;  %v562_v33 = vadd.f32 %v12870_v39, %v561_v40  ;;  %v10217_v41 = vpop.f32.mrb[14].mxu0  ;;  %v12902_v42 = vld [vmem:[#allocation2 + $0x18] sm:$0xff]  ;;  %10318 = vmatprep.subr.bf16.mxu0 %v12851_v35 }
 0x1da   :  { %906 = vst.msk [vmem:[#allocation2 + $0x28] sm:$0xff] %vm203_vm2, %v880_v32  ;;  %v786_v43 = vmul.f32 0.01, %v570_v38  ;;  %v573_v44 = vadd.f32 %v10217_v41, %v12870_v39  ;;  %v564_v45 = vpop.f32.mrb[15].mxu0  ;;  %10266 = vmatprep.mubr.msk.bf16.mxu0 %vm203_vm2, %v12902_v42  ;;  %vm734_vm15 = vcmp.ge.f32.partialorder %v570_v38, 0.0 }
 0x1db   :  { %v784_v34 = vmul.f32 0.01, %v562_v33  ;;  %v565_v47 = vadd.f32 %v12870_v39, %v564_v45  ;;  %10267 = vmatmul.mubr.msk.bf16.gmra.mrb[56].mxu0 %vm203_vm2, %v12909_v46  ;;  %vm732_vm0 = vcmp.ge.f32.partialorder %v562_v33, 0.0 }
 0x1dc   :  { %vm735_vm1 = vcmp.ge.f32.partialorder %v573_v44, 0.0  ;;  %v787_v48 = vmul.f32 0.01, %v573_v44  ;;  %10319 = vmatpush3.bf16.msra.mxu0 %v12851_v35  ;;  %v838_v50 = vsel %vm734_vm15, %v570_v38, %v786_v43 }
 0x1dd   :  { %vm733_vm3 = vcmp.ge.f32.partialorder %v565_v47, 0.0  ;;  %v785_v49 = vmul.f32 0.01, %v565_v47  ;;  %10320 = vmatprep.subr.bf16.mxu0 %v12858_v36  ;;  %v836_v52 = vsel %vm732_vm0, %v562_v33, %v784_v34 }
 0x1de   :  { %v839_v51 = vsel %vm735_vm1, %v573_v44, %v787_v48 }
 0x1df   :  { %v883_v53 = vpack.c.bf16 %v839_v51, %v838_v50  ;;  %v837_v54 = vsel %vm733_vm3, %v565_v47, %v785_v49  ;;  %v10220_v55 = vpop.f32.mrb[16].mxu0 }
 0x1e0   :  { %v882_v56 = vpack.c.bf16 %v837_v54, %v836_v52  ;;  %v586_v57 = vadd.f32 %v10220_v55, %v12870_v39  ;;  %v577_v58 = vpop.f32.mrb[17].mxu0  ;;  %10321 = vmatpush3.bf16.msra.mxu0 %v12858_v36  ;;  %v12926_v0 = vld [vmem:[#allocation2 + $0x30] sm:$0xff] }
 0x1e1   :  { %909 = vst.msk [vmem:[#allocation2 + $0x40] sm:$0xff] %vm203_vm2, %v883_v53  ;;  %v578_v35 = vadd.f32 %v12870_v39, %v577_v58  ;;  %v10221_v59 = vpop.f32.mrb[18].mxu0  ;;  %v12920_v60 = vld [vmem:[#allocation2 + $0x28] sm:$0xff] }
 0x1e2   :  { %908 = vst.msk [vmem:[#allocation2 + $0x38] sm:$0xff] %vm203_vm2, %v882_v56  ;;  %v790_v61 = vmul.f32 0.01, %v586_v57  ;;  %v589_v62 = vadd.f32 %v10221_v59, %v12870_v39  ;;  %v580_v63 = vpop.f32.mrb[19].mxu0  ;;  %10270 = vmatprep.mubr.msk.bf16.mxu0 %vm203_vm2, %v12920_v60  ;;  %vm738_vm4 = vcmp.ge.f32.partialorder %v586_v57, 0.0 }
 0x1e3   :  { %v788_v36 = vmul.f32 0.01, %v578_v35  ;;  %v581_v1 = vadd.f32 %v12870_v39, %v580_v63  ;;  %10271 = vmatmul.mubr.msk.bf16.gmra.mrb[60].mxu0 %vm203_vm2, %v12926_v0  ;;  %vm736_vm5 = vcmp.ge.f32.partialorder %v578_v35, 0.0 }
 0x1e4   :  { %vm739_vm6 = vcmp.ge.f32.partialorder %v589_v62, 0.0  ;;  %v791_v2 = vmul.f32 0.01, %v589_v62  ;;  %v842_v4 = vsel %vm738_vm4, %v586_v57, %v790_v61 }
 0x1e5   :  { %vm737_vm7 = vcmp.ge.f32.partialorder %v581_v1, 0.0  ;;  %v789_v3 = vmul.f32 0.01, %v581_v1  ;;  %v840_v6 = vsel %vm736_vm5, %v578_v35, %v788_v36  ;;  %v12012_v36 = vld [vmem:[%s14954_s14 + $0x48] sm:$0xff]  }
 0x1e6   :  { %v843_v5 = vsel %vm739_vm6, %v589_v62, %v791_v2 }
 0x1e7   :  { %v885_v7 = vpack.c.bf16 %v843_v5, %v842_v4  ;;  %v841_v8 = vsel %vm737_vm7, %v581_v1, %v789_v3  ;;  %v10224_v9 = vpop.f32.mrb[20].mxu0 }
 0x1e8   :  { %v884_v10 = vpack.c.bf16 %v841_v8, %v840_v6  ;;  %v602_v11 = vadd.f32 %v10224_v9, %v12870_v39  ;;  %v593_v12 = vpop.f32.mrb[21].mxu0  ;;  %v12940_v20 = vld [vmem:[#allocation2 + $0x40] sm:$0xff]  ;;  %v12013_v9 = vld [vmem:[%s14954_s14 + $0x50] sm:$0xff]  }
 0x1e9   :  { %911 = vst.msk [vmem:[#allocation2 + $0x50] sm:$0xff] %vm203_vm2, %v885_v7  ;;  %v594_v13 = vadd.f32 %v12870_v39, %v593_v12  ;;  %v10225_v14 = vpop.f32.mrb[22].mxu0  ;;  %v12934_v15 = vld [vmem:[#allocation2 + $0x38] sm:$0xff] }
 0x1ea   :  { %910 = vst.msk [vmem:[#allocation2 + $0x48] sm:$0xff] %vm203_vm2, %v884_v10  ;;  %v794_v16 = vmul.f32 0.01, %v602_v11  ;;  %v605_v18 = vadd.f32 %v10225_v14, %v12870_v39  ;;  %v596_v19 = vpop.f32.mrb[23].mxu0  ;;  %10274 = vmatprep.mubr.msk.bf16.mxu0 %vm203_vm2, %v12934_v15  ;;  %vm742_vm8 = vcmp.ge.f32.partialorder %v602_v11, 0.0 }
 0x1eb   :  { %v792_v22 = vmul.f32 0.01, %v594_v13  ;;  %v597_v23 = vadd.f32 %v12870_v39, %v596_v19  ;;  %10275 = vmatmul.mubr.msk.bf16.gmra.mrb[64].mxu0 %vm203_vm2, %v12940_v20  ;;  %vm740_vm9 = vcmp.ge.f32.partialorder %v594_v13, 0.0 }
 0x1ec   :  { %vm743_vm10 = vcmp.ge.f32.partialorder %v605_v18, 0.0  ;;  %v795_v24 = vmul.f32 0.01, %v605_v18  ;;  %v846_v26 = vsel %vm742_vm8, %v602_v11, %v794_v16 }
 0x1ed   :  { %vm741_vm11 = vcmp.ge.f32.partialorder %v597_v23, 0.0  ;;  %v793_v25 = vmul.f32 0.01, %v597_v23  ;;  %v844_v28 = vsel %vm740_vm9, %v594_v13, %v792_v22 }
 0x1ee   :  { %v847_v27 = vsel %vm743_vm10, %v605_v18, %v795_v24 }
 0x1ef   :  { %v887_v29 = vpack.c.bf16 %v847_v27, %v846_v26  ;;  %v845_v30 = vsel %vm741_vm11, %v597_v23, %v793_v25  ;;  %v10228_v31 = vpop.f32.mrb[24].mxu0  ;;  %v12014_v25 = vld [vmem:[%s14954_s14 + $0x58] sm:$0xff]  }
 0x1f0   :  { %v886_v32 = vpack.c.bf16 %v845_v30, %v844_v28  ;;  %v618_v38 = vadd.f32 %v10228_v31, %v12870_v39  ;;  %v609_v40 = vpop.f32.mrb[25].mxu0  ;;  %v12946_v33 = vld [vmem:[#allocation2 + $0x50] sm:$0xff] }
 0x1f1   :  { %913 = vst.msk [vmem:[#allocation2 + $0x60] sm:$0xff] %vm203_vm2, %v887_v29  ;;  %v610_v41 = vadd.f32 %v12870_v39, %v609_v40  ;;  %v10229_v43 = vpop.f32.mrb[26].mxu0  ;;  %10342 = vmatprep.mubr.msk.bf16.mxu1 %vm203_vm2, %v12946_v33  ;;  %v12952_v44 = vld [vmem:[#allocation2 + $0x48] sm:$0xff] }
 0x1f2   :  { %912 = vst.msk [vmem:[#allocation2 + $0x58] sm:$0xff] %vm203_vm2, %v886_v32  ;;  %v798_v45 = vmul.f32 0.01, %v618_v38  ;;  %v621_v34 = vadd.f32 %v10229_v43, %v12870_v39  ;;  %v612_v47 = vpop.f32.mrb[27].mxu0  ;;  %10278 = vmatprep.mubr.msk.bf16.mxu0 %vm203_vm2, %v12952_v44  ;;  %vm746_vm12 = vcmp.ge.f32.partialorder %v618_v38, 0.0 }
 0x1f3   :  { %v796_v48 = vmul.f32 0.01, %v610_v41  ;;  %v613_v49 = vadd.f32 %v12870_v39, %v612_v47  ;;  %10279 = vmatmul.mubr.msk.bf16.gmra.mrb[68].mxu0 %vm203_vm2, %v12946_v33  ;;  %vm744_vm13 = vcmp.ge.f32.partialorder %v610_v41, 0.0 }
 0x1f4   :  { %vm747_vm14 = vcmp.ge.f32.partialorder %v621_v34, 0.0  ;;  %v799_v50 = vmul.f32 0.01, %v621_v34  ;;  %v850_v52 = vsel %vm746_vm12, %v618_v38, %v798_v45 }
 0x1f5   :  { %vm745_vm15 = vcmp.ge.f32.partialorder %v613_v49, 0.0  ;;  %v797_v51 = vmul.f32 0.01, %v613_v49  ;;  %v848_v54 = vsel %vm744_vm13, %v610_v41, %v796_v48 }
 0x1f6   :  { %v851_v53 = vsel %vm747_vm14, %v621_v34, %v799_v50 }
 0x1f7   :  { %v889_v55 = vpack.c.bf16 %v851_v53, %v850_v52  ;;  %v849_v56 = vsel %vm745_vm15, %v613_v49, %v797_v51  ;;  %v10232_v57 = vpop.f32.mrb[28].mxu0 }
 0x1f8   :  { %v888_v58 = vpack.c.bf16 %v849_v56, %v848_v54  ;;  %v634_v35 = vadd.f32 %v10232_v57, %v12870_v39  ;;  %v625_v59 = vpop.f32.mrb[29].mxu0  ;;  %v12975_v4 = vld [vmem:[#allocation2 + $0x60] sm:$0xff] }
 0x1f9   :  { %915 = vst.msk [vmem:[#allocation2 + $0x70] sm:$0xff] %vm203_vm2, %v889_v55  ;;  %v626_v61 = vadd.f32 %v12870_v39, %v625_v59  ;;  %v10233_v62 = vpop.f32.mrb[30].mxu0  ;;  %v12964_v63 = vld [vmem:[#allocation2 + $0x58] sm:$0xff] }
 0x1fa   :  { %914 = vst.msk [vmem:[#allocation2 + $0x68] sm:$0xff] %vm203_vm2, %v888_v58  ;;  %v802_v1 = vmul.f32 0.01, %v634_v35  ;;  %v637_v2 = vadd.f32 %v10233_v62, %v12870_v39  ;;  %v628_v3 = vpop.f32.mrb[31].mxu0  ;;  %10282 = vmatprep.mubr.msk.bf16.mxu0 %vm203_vm2, %v12964_v63  ;;  %10343 = vmatmul.mubr.msk.bf16.vlgmr.msra.gmra.mrb[0].mxu1 %vm203_vm2, %v12964_v63  ;;  %vm750_vm0 = vcmp.ge.f32.partialorder %v634_v35, 0.0 }
 0x1fb   :  { %v800_v5 = vmul.f32 0.01, %v626_v61  ;;  %v629_v6 = vadd.f32 %v12870_v39, %v628_v3  ;;  %10283 = vmatmul.mubr.msk.bf16.gmra.mrb[72].mxu0 %vm203_vm2, %v12975_v4  ;;  %10346 = vmatprep.mubr.msk.bf16.mxu1 %vm203_vm2, %v12975_v4  ;;  %vm748_vm1 = vcmp.ge.f32.partialorder %v626_v61, 0.0 }
 0x1fc   :  { %vm751_vm3 = vcmp.ge.f32.partialorder %v637_v2, 0.0  ;;  %v803_v7 = vmul.f32 0.01, %v637_v2  ;;  %10375 = vmatpush3.bf16.msra.mxu1 %v12865_v37  ;;  %v854_v10 = vsel %vm750_vm0, %v634_v35, %v802_v1 }
 0x1fd   :  { %vm749_vm4 = vcmp.ge.f32.partialorder %v629_v6, 0.0  ;;  %v801_v8 = vmul.f32 0.01, %v629_v6  ;;  %10376 = vmatprep.subr.bf16.mxu1 %v12012_v36  ;;  %v852_v12 = vsel %vm748_vm1, %v626_v61, %v800_v5 }
 0x1fe   :  { %v855_v11 = vsel %vm751_vm3, %v637_v2, %v803_v7 }
 0x1ff   :  { %v891_v13 = vpack.c.bf16 %v855_v11, %v854_v10  ;;  %v853_v14 = vsel %vm749_vm4, %v629_v6, %v801_v8  ;;  %v10236_v16 = vpop.f32.mrb[32].mxu0 }
 0x200   :  { %v890_v18 = vpack.c.bf16 %v853_v14, %v852_v12  ;;  %v650_v19 = vadd.f32 %v10236_v16, %v12870_v39  ;;  %v641_v22 = vpop.f32.mrb[33].mxu0  ;;  %10377 = vmatpush3.bf16.msra.mxu1 %v12012_v36  ;;  %v13000_v29 = vld [vmem:[#allocation2 + $0x70] sm:$0xff] }
 0x201   :  { %917 = vst.msk [vmem:[#allocation2 + $0x80] sm:$0xff] %vm203_vm2, %v891_v13  ;;  %v642_v37 = vadd.f32 %v12870_v39, %v641_v22  ;;  %v10237_v23 = vpop.f32.mrb[34].mxu0  ;;  %v12989_v24 = vld [vmem:[#allocation2 + $0x68] sm:$0xff]  ;;  %10378 = vmatprep.subr.bf16.mxu1 %v12013_v9 }
 0x202   :  { %916 = vst.msk [vmem:[#allocation2 + $0x78] sm:$0xff] %vm203_vm2, %v890_v18  ;;  %v806_v26 = vmul.f32 0.01, %v650_v19  ;;  %v653_v27 = vadd.f32 %v10237_v23, %v12870_v39  ;;  %v644_v28 = vpop.f32.mrb[35].mxu0  ;;  %10286 = vmatprep.mubr.msk.bf16.mxu0 %vm203_vm2, %v12989_v24  ;;  %10347 = vmatmul.mubr.msk.bf16.gmra.mrb[4].mxu1 %vm203_vm2, %v12989_v24  ;;  %vm754_vm5 = vcmp.ge.f32.partialorder %v650_v19, 0.0 }
 0x203   :  { %v804_v30 = vmul.f32 0.01, %v642_v37  ;;  %v645_v31 = vadd.f32 %v12870_v39, %v644_v28  ;;  %10287 = vmatmul.mubr.msk.bf16.gmra.mrb[76].mxu0 %vm203_vm2, %v13000_v29  ;;  %10350 = vmatprep.mubr.msk.bf16.mxu1 %vm203_vm2, %v13000_v29  ;;  %vm752_vm6 = vcmp.ge.f32.partialorder %v642_v37, 0.0 }
 0x204   :  { %vm755_vm7 = vcmp.ge.f32.partialorder %v653_v27, 0.0  ;;  %v807_v32 = vmul.f32 0.01, %v653_v27  ;;  %10379 = vmatpush3.bf16.msra.mxu1 %v12013_v9  ;;  %v858_v40 = vsel %vm754_vm5, %v650_v19, %v806_v26 }
 0x205   :  { %vm753_vm8 = vcmp.ge.f32.partialorder %v645_v31, 0.0  ;;  %v805_v38 = vmul.f32 0.01, %v645_v31  ;;  %10380 = vmatprep.subr.bf16.mxu1 %v12014_v25  ;;  %v856_v43 = vsel %vm752_vm6, %v642_v37, %v804_v30 }
 0x206   :  { %v859_v41 = vsel %vm755_vm7, %v653_v27, %v807_v32 }
 0x207   :  { %v893_v45 = vpack.c.bf16 %v859_v41, %v858_v40  ;;  %v857_v34 = vsel %vm753_vm8, %v645_v31, %v805_v38  ;;  %v10240_v47 = vpop.f32.mrb[36].mxu0 }
 0x208   :  { %v892_v48 = vpack.c.bf16 %v857_v34, %v856_v43  ;;  %v666_v49 = vadd.f32 %v10240_v47, %v12870_v39  ;;  %v657_v50 = vpop.f32.mrb[37].mxu0  ;;  %10381 = vmatpush3.bf16.msra.mxu1 %v12014_v25  ;;  %v13018_v57 = vld [vmem:[#allocation2 + $0x80] sm:$0xff] }
 0x209   :  { %919 = vst.msk [vmem:[#allocation2 + $0x90] sm:$0xff] %vm203_vm2, %v893_v45  ;;  %v658_v51 = vadd.f32 %v12870_v39, %v657_v50  ;;  %v10241_v52 = vpop.f32.mrb[38].mxu0  ;;  %v13010_v53 = vld [vmem:[#allocation2 + $0x78] sm:$0xff] }
 0x20a   :  { %918 = vst.msk [vmem:[#allocation2 + $0x88] sm:$0xff] %vm203_vm2, %v892_v48  ;;  %v810_v54 = vmul.f32 0.01, %v666_v49  ;;  %v669_v55 = vadd.f32 %v10241_v52, %v12870_v39  ;;  %v660_v56 = vpop.f32.mrb[39].mxu0  ;;  %10290 = vmatprep.mubr.msk.bf16.mxu0 %vm203_vm2, %v13010_v53  ;;  %10351 = vmatmul.mubr.msk.bf16.gmra.mrb[8].mxu1 %vm203_vm2, %v13010_v53  ;;  %vm758_vm9 = vcmp.ge.f32.partialorder %v666_v49, 0.0 }
 0x20b   :  { %v808_v58 = vmul.f32 0.01, %v658_v51  ;;  %v661_v35 = vadd.f32 %v12870_v39, %v660_v56  ;;  %10291 = vmatmul.mubr.msk.bf16.gmra.mrb[80].mxu0 %vm203_vm2, %v13018_v57  ;;  %10354 = vmatprep.mubr.msk.bf16.mxu1 %vm203_vm2, %v13018_v57  ;;  %vm756_vm10 = vcmp.ge.f32.partialorder %v658_v51, 0.0 }
 0x20c   :  { %vm759_vm11 = vcmp.ge.f32.partialorder %v669_v55, 0.0  ;;  %v811_v59 = vmul.f32 0.01, %v669_v55  ;;  %v862_v62 = vsel %vm758_vm9, %v666_v49, %v810_v54 }
 0x20d   :  { %vm757_vm12 = vcmp.ge.f32.partialorder %v661_v35, 0.0  ;;  %v809_v61 = vmul.f32 0.01, %v661_v35  ;;  %v860_v1 = vsel %vm756_vm10, %v658_v51, %v808_v58 }
 0x20e   :  { %v863_v36 = vsel %vm759_vm11, %v669_v55, %v811_v59 }
 0x20f   :  { %v895_v2 = vpack.c.bf16 %v863_v36, %v862_v62  ;;  %v861_v3 = vsel %vm757_vm12, %v661_v35, %v809_v61  ;;  %v10244_v5 = vpop.f32.mrb[40].mxu0 }
 0x210   :  { %v894_v6 = vpack.c.bf16 %v861_v3, %v860_v1  ;;  %v682_v7 = vadd.f32 %v10244_v5, %v12870_v39  ;;  %v673_v8 = vpop.f32.mrb[41].mxu0  ;;  %v13036_v16 = vld [vmem:[#allocation2 + $0x90] sm:$0xff] }
 0x211   :  { %921 = vst.msk [vmem:[#allocation2 + $0xa0] sm:$0xff] %vm203_vm2, %v895_v2  ;;  %v674_v9 = vadd.f32 %v12870_v39, %v673_v8  ;;  %v10245_v10 = vpop.f32.mrb[42].mxu0  ;;  %v13028_v11 = vld [vmem:[#allocation2 + $0x88] sm:$0xff] }
 0x212   :  { %920 = vst.msk [vmem:[#allocation2 + $0x98] sm:$0xff] %vm203_vm2, %v894_v6  ;;  %v814_v12 = vmul.f32 0.01, %v682_v7  ;;  %v685_v13 = vadd.f32 %v10245_v10, %v12870_v39  ;;  %v676_v14 = vpop.f32.mrb[43].mxu0  ;;  %10294 = vmatprep.mubr.msk.bf16.mxu0 %vm203_vm2, %v13028_v11  ;;  %10355 = vmatmul.mubr.msk.bf16.gmra.mrb[12].mxu1 %vm203_vm2, %v13028_v11  ;;  %vm762_vm13 = vcmp.ge.f32.partialorder %v682_v7, 0.0 }
 0x213   :  { %v812_v18 = vmul.f32 0.01, %v674_v9  ;;  %v677_v19 = vadd.f32 %v12870_v39, %v676_v14  ;;  %10295 = vmatmul.mubr.msk.bf16.gmra.mrb[84].mxu0 %vm203_vm2, %v13036_v16  ;;  %10358 = vmatprep.mubr.msk.bf16.mxu1 %vm203_vm2, %v13036_v16  ;;  %vm760_vm14 = vcmp.ge.f32.partialorder %v674_v9, 0.0 }
 0x214   :  { %vm763_vm15 = vcmp.ge.f32.partialorder %v685_v13, 0.0  ;;  %v815_v22 = vmul.f32 0.01, %v685_v13  ;;  %v866_v23 = vsel %vm762_vm13, %v682_v7, %v814_v12 }
 0x215   :  { %vm761_vm0 = vcmp.ge.f32.partialorder %v677_v19, 0.0  ;;  %v813_v37 = vmul.f32 0.01, %v677_v19  ;;  %v864_v26 = vsel %vm760_vm14, %v674_v9, %v812_v18 }
 0x216   :  { %v867_v25 = vsel %vm763_vm15, %v685_v13, %v815_v22 }
 0x217   :  { %v897_v27 = vpack.c.bf16 %v867_v25, %v866_v23  ;;  %v865_v28 = vsel %vm761_vm0, %v677_v19, %v813_v37  ;;  %v10248_v30 = vpop.f32.mrb[44].mxu0 }
 0x218   :  { %v896_v31 = vpack.c.bf16 %v865_v28, %v864_v26  ;;  %v698_v32 = vadd.f32 %v10248_v30, %v12870_v39  ;;  %v689_v38 = vpop.f32.mrb[45].mxu0  ;;  %v13054_v48 = vld [vmem:[#allocation2 + $0xa0] sm:$0xff] }
 0x219   :  { %923 = vst.msk [vmem:[#allocation2 + $0xb0] sm:$0xff] %vm203_vm2, %v897_v27  ;;  %v690_v40 = vadd.f32 %v12870_v39, %v689_v38  ;;  %v10249_v41 = vpop.f32.mrb[46].mxu0  ;;  %v13046_v43 = vld [vmem:[#allocation2 + $0x98] sm:$0xff]  ;;  %v928_v27 = vld [vmem:[#allocation2] sm:$0xff] }
 0x21a   :  { %922 = vst.msk [vmem:[#allocation2 + $0xa8] sm:$0xff] %vm203_vm2, %v896_v31  ;;  %v818_v45 = vmul.f32 0.01, %v698_v32  ;;  %v701_v34 = vadd.f32 %v10249_v41, %v12870_v39  ;;  %v692_v47 = vpop.f32.mrb[47].mxu0  ;;  %10298 = vmatprep.mubr.msk.bf16.mxu0 %vm203_vm2, %v13046_v43  ;;  %10359 = vmatmul.mubr.msk.bf16.gmra.mrb[16].mxu1 %vm203_vm2, %v13046_v43  ;;  %vm766_vm1 = vcmp.ge.f32.partialorder %v698_v32, 0.0 }
 0x21b   :  { %v816_v49 = vmul.f32 0.01, %v690_v40  ;;  %v693_v50 = vadd.f32 %v12870_v39, %v692_v47  ;;  %10299 = vmatmul.mubr.msk.bf16.gmra.mrb[88].mxu0 %vm203_vm2, %v13054_v48  ;;  %10362 = vmatprep.mubr.msk.bf16.mxu1 %vm203_vm2, %v13054_v48  ;;  %vm764_vm3 = vcmp.ge.f32.partialorder %v690_v40, 0.0 }
 0x21c   :  { %vm767_vm4 = vcmp.ge.f32.partialorder %v701_v34, 0.0  ;;  %v819_v51 = vmul.f32 0.01, %v701_v34  ;;  %v870_v54 = vsel %vm766_vm1, %v698_v32, %v818_v45 }
 0x21d   :  { %vm765_vm5 = vcmp.ge.f32.partialorder %v693_v50, 0.0  ;;  %v817_v52 = vmul.f32 0.01, %v693_v50  ;;  %v868_v56 = vsel %vm764_vm3, %v690_v40, %v816_v49 }
 0x21e   :  { %v871_v55 = vsel %vm767_vm4, %v701_v34, %v819_v51 }
 0x21f   :  { %v899_v58 = vpack.c.bf16 %v871_v55, %v870_v54  ;;  %v869_v35 = vsel %vm765_vm5, %v693_v50, %v817_v52  ;;  %v10252_v59 = vpop.f32.mrb[48].mxu0 }
 0x220   :  { %v898_v61 = vpack.c.bf16 %v869_v35, %v868_v56  ;;  %v714_v62 = vadd.f32 %v10252_v59, %v12870_v39  ;;  %v705_v36 = vpop.f32.mrb[49].mxu0  ;;  %v13072_v8 = vld [vmem:[#allocation2 + $0xb0] sm:$0xff] }
 0x221   :  { %925 = vst.msk [vmem:[#allocation2 + $0xc0] sm:$0xff] %vm203_vm2, %v899_v58  ;;  %v706_v1 = vadd.f32 %v12870_v39, %v705_v36  ;;  %v10253_v2 = vpop.f32.mrb[50].mxu0  ;;  %v13064_v3 = vld [vmem:[#allocation2 + $0xa8] sm:$0xff] }
 0x222   :  { %924 = vst.msk [vmem:[#allocation2 + $0xb8] sm:$0xff] %vm203_vm2, %v898_v61  ;;  %v822_v5 = vmul.f32 0.01, %v714_v62  ;;  %v717_v6 = vadd.f32 %v10253_v2, %v12870_v39  ;;  %v708_v7 = vpop.f32.mrb[51].mxu0  ;;  %10302 = vmatprep.mubr.msk.bf16.mxu0 %vm203_vm2, %v13064_v3  ;;  %10363 = vmatmul.mubr.msk.bf16.gmra.mrb[20].mxu1 %vm203_vm2, %v13064_v3  ;;  %vm770_vm6 = vcmp.ge.f32.partialorder %v714_v62, 0.0 }
 0x223   :  { %v820_v9 = vmul.f32 0.01, %v706_v1  ;;  %v709_v10 = vadd.f32 %v12870_v39, %v708_v7  ;;  %10303 = vmatmul.mubr.msk.bf16.gmra.mrb[92].mxu0 %vm203_vm2, %v13072_v8  ;;  %10366 = vmatprep.mubr.msk.bf16.mxu1 %vm203_vm2, %v13072_v8  ;;  %vm768_vm7 = vcmp.ge.f32.partialorder %v706_v1, 0.0 }
 0x224   :  { %vm771_vm8 = vcmp.ge.f32.partialorder %v717_v6, 0.0  ;;  %v823_v12 = vmul.f32 0.01, %v717_v6  ;;  %v874_v14 = vsel %vm770_vm6, %v714_v62, %v822_v5  ;;  %v13236_v62 = vld [vmem:[#allocation9] ss:$0 sm:$0xff] }
 0x225   :  { %vm769_vm9 = vcmp.ge.f32.partialorder %v709_v10, 0.0  ;;  %v821_v13 = vmul.f32 0.01, %v709_v10  ;;  %v872_v19 = vsel %vm768_vm7, %v706_v1, %v820_v9 }
 0x226   :  { %v875_v18 = vsel %vm771_vm8, %v717_v6, %v823_v12 }
 0x227   :  { %v901_v22 = vpack.c.bf16 %v875_v18, %v874_v14  ;;  %v873_v37 = vsel %vm769_vm9, %v709_v10, %v821_v13 }
 0x228   :  { %v900_v23 = vpack.c.bf16 %v873_v37, %v872_v19  ;;  %v952_v25 = vld [vmem:[#allocation2 + $0xc0] sm:$0xff] }
 0x229   :  { %927 = vst.msk [vmem:[#allocation2 + $0xd0] sm:$0xff] %vm203_vm2, %v901_v22  ;;  %v951_v39 = vld [vmem:[#allocation2 + $0xb8] sm:$0xff] }
 0x22a   :  { %926 = vst.msk [vmem:[#allocation2 + $0xc8] sm:$0xff] %vm203_vm2, %v900_v23  ;;  %10306 = vmatprep.mubr.msk.bf16.mxu0 %vm203_vm2, %v951_v39  ;;  %10367 = vmatmul.mubr.msk.bf16.gmra.mrb[24].mxu1 %vm203_vm2, %v951_v39 }
 0x22b   :  { %10307 = vmatmul.mubr.msk.bf16.gmra.mrb[96].mxu0 %vm203_vm2, %v952_v25  ;;  %10370 = vmatprep.mubr.msk.bf16.mxu1 %vm203_vm2, %v952_v25 }
 0x230   :  { %v954_v28 = vld [vmem:[#allocation2 + $0xd0] sm:$0xff] }
 0x231   :  { %v953_v26 = vld [vmem:[#allocation2 + $0xc8] sm:$0xff] }
 0x232   :  { %10310 = vmatprep.mubr.msk.bf16.mxu0 %vm203_vm2, %v953_v26  ;;  %10371 = vmatmul.mubr.msk.bf16.gmra.mrb[28].mxu1 %vm203_vm2, %v953_v26 }
 0x233   :  { %10311 = vmatmul.mubr.msk.bf16.gmra.mrb[100].mxu0 %vm203_vm2, %v954_v28  ;;  %10382 = vmatprep.mubr.msk.bf16.mxu1 %vm203_vm2, %v12891_v21 }
 0x234   :  { %10322 = vmatprep.mubr.msk.bf16.mxu0 %vm203_vm2, %v928_v27 }
 0x23a   :  { %10383 = vmatmul.mubr.msk.bf16.vlgmr.msra.gmra.mrb[32].mxu1 %vm203_vm2, %v12902_v42 }
 0x23b   :  { %10323 = vmatmul.mubr.msk.bf16.vlgmr.msra.gmra.mrb[52].mxu0 %vm203_vm2, %v12885_v17  ;;  %10386 = vmatprep.mubr.msk.bf16.mxu1 %vm203_vm2, %v12909_v46  ;;  %v12015_v17 = vld [vmem:[%s14955_s3 + $0x20] sm:$0xff]  }
 0x23c   :  { %10326 = vmatprep.mubr.msk.bf16.mxu0 %vm203_vm2, %v12891_v21  ;;  %10434 = vmatprep.subr.bf16.mxu0 %v12015_v17  ;;  %v12016_v21 = vld [vmem:[%s14955_s3 + $0x28] sm:$0xff]  }
 0x23d   :  { %10435 = vmatpush3.bf16.msra.mxu0 %v12015_v17 }
 0x23e   :  { %10436 = vmatprep.subr.bf16.mxu0 %v12016_v21 }
 0x241   :  { %10437 = vmatpush3.bf16.msra.mxu0 %v12016_v21 }
 0x242   :  { %10387 = vmatmul.mubr.msk.bf16.gmra.mrb[36].mxu1 %vm203_vm2, %v12920_v60 }
 0x243   :  { %10327 = vmatmul.mubr.msk.bf16.gmra.mrb[56].mxu0 %vm203_vm2, %v12902_v42  ;;  %10390 = vmatprep.mubr.msk.bf16.mxu1 %vm203_vm2, %v12926_v0  ;;  %v955_v42 = vld [vmem:[#allocation2 + $0xd8] sm:$0xff] }
 0x244   :  { %10330 = vmatprep.mubr.msk.bf16.mxu0 %vm203_vm2, %v12909_v46  ;;  %v12017_v46 = vld [vmem:[%s14955_s3 + $0x30] sm:$0xff]  }
 0x245   :  { %10438 = vmatprep.subr.bf16.mxu0 %v12017_v46 }
 0x246   :  { %10439 = vmatpush3.bf16.msra.mxu0 %v12017_v46 }
 0x24a   :  { %10391 = vmatmul.mubr.msk.bf16.gmra.mrb[40].mxu1 %vm203_vm2, %v12934_v15 }
 0x24b   :  { %10331 = vmatmul.mubr.msk.bf16.gmra.mrb[60].mxu0 %vm203_vm2, %v12920_v60  ;;  %10394 = vmatprep.mubr.msk.bf16.mxu1 %vm203_vm2, %v12940_v20  ;;  %v12018_v60 = vld [vmem:[%s14955_s3 + $0x38] sm:$0xff]  }
 0x24c   :  { %10334 = vmatprep.mubr.msk.bf16.mxu0 %vm203_vm2, %v12926_v0  ;;  %10440 = vmatprep.subr.bf16.mxu0 %v12018_v60  ;;  %v13169_v0 = vld [vmem:[%s14955_s3] sm:$0xff]  }
 0x24d   :  { %10441 = vmatpush3.bf16.msra.mxu0 %v12018_v60 }
 0x24e   :  { %10494 = vmatprep.subr.bf16.mxu0 %v13169_v0 }
 0x252   :  { %10395 = vmatmul.mubr.msk.bf16.gmra.mrb[44].mxu1 %vm203_vm2, %v12952_v44 }
 0x253   :  { %10335 = vmatmul.mubr.msk.bf16.gmra.mrb[64].mxu0 %vm203_vm2, %v12934_v15  ;;  %10398 = vmatprep.mubr.msk.bf16.mxu1 %vm203_vm2, %v12946_v33 }
 0x254   :  { %10338 = vmatprep.mubr.msk.bf16.mxu0 %vm203_vm2, %v12940_v20 }
 0x25a   :  { %10399 = vmatmul.mubr.msk.bf16.gmra.mrb[48].mxu1 %vm203_vm2, %v12964_v63 }
 0x25b   :  { %10339 = vmatmul.mubr.msk.bf16.gmra.mrb[68].mxu0 %vm203_vm2, %v12952_v44  ;;  %10402 = vmatprep.mubr.msk.bf16.mxu1 %vm203_vm2, %v12975_v4 }
 0x262   :  { %10403 = vmatmul.mubr.msk.bf16.gmra.mrb[0].mxu1 %vm203_vm2, %v12989_v24 }
 0x263   :  { %10406 = vmatprep.mubr.msk.bf16.mxu1 %vm203_vm2, %v13000_v29 }
 0x26a   :  { %10407 = vmatmul.mubr.msk.bf16.gmra.mrb[4].mxu1 %vm203_vm2, %v13010_v53 }
 0x26b   :  { %10410 = vmatprep.mubr.msk.bf16.mxu1 %vm203_vm2, %v13018_v57 }
 0x272   :  { %10411 = vmatmul.mubr.msk.bf16.gmra.mrb[8].mxu1 %vm203_vm2, %v13028_v11 }
 0x273   :  { %10414 = vmatprep.mubr.msk.bf16.mxu1 %vm203_vm2, %v13036_v16 }
 0x27a   :  { %10415 = vmatmul.mubr.msk.bf16.gmra.mrb[12].mxu1 %vm203_vm2, %v13046_v43 }
 0x27b   :  { %10418 = vmatprep.mubr.msk.bf16.mxu1 %vm203_vm2, %v13054_v48 }
 0x282   :  { %10419 = vmatmul.mubr.msk.bf16.gmra.mrb[16].mxu1 %vm203_vm2, %v13064_v3 }
 0x283   :  { %10422 = vmatprep.mubr.msk.bf16.mxu1 %vm203_vm2, %v13072_v8 }
 0x28a   :  { %10423 = vmatmul.mubr.msk.bf16.gmra.mrb[20].mxu1 %vm203_vm2, %v951_v39 }
 0x28b   :  { %10426 = vmatprep.mubr.msk.bf16.mxu1 %vm203_vm2, %v952_v25 }
 0x292   :  { %10427 = vmatmul.mubr.msk.bf16.gmra.mrb[24].mxu1 %vm203_vm2, %v953_v26 }
 0x293   :  { %10430 = vmatprep.mubr.msk.bf16.mxu1 %vm203_vm2, %v954_v28 }
 0x29a   :  { %10431 = vmatmul.mubr.msk.bf16.gmra.mrb[28].mxu1 %vm203_vm2, %v955_v42 }
 0x2ce   :  { %v13172_v15 = vpop.f32.mrb[72].mxu0 }
 0x2cf   :  { %v13174_v20 = vpop.f32.mrb[73].mxu0 }
 0x2d0   :  { %v13176_v33 = vpop.f32.mrb[74].mxu0 }
 0x2d1   :  { %v13178_v44 = vpop.f32.mrb[75].mxu0 }
 0x2d6   :  { %v13180_v63 = vpop.f32.mrb[76].mxu0 }
 0x2d7   :  { %v13182_v4 = vpop.f32.mrb[77].mxu0 }
 0x2d8   :  { %v13184_v24 = vpop.f32.mrb[78].mxu0 }
 0x2d9   :  { %v13186_v29 = vpop.f32.mrb[79].mxu0 }
 0x2de   :  { %v13188_v53 = vpop.f32.mrb[80].mxu0 }
 0x2df   :  { %v13190_v57 = vpop.f32.mrb[81].mxu0 }
 0x2e0   :  { %v13192_v11 = vpop.f32.mrb[82].mxu0 }
 0x2e1   :  { %v13194_v16 = vpop.f32.mrb[83].mxu0 }
 0x2e6   :  { %v13196_v30 = vpop.f32.mrb[84].mxu0 }
 0x2e7   :  { %v13198_v31 = vpop.f32.mrb[85].mxu0 }
 0x2e8   :  { %v13200_v32 = vpop.f32.mrb[86].mxu0 }
 0x2e9   :  { %v13202_v38 = vpop.f32.mrb[87].mxu0 }
 0x2ee   :  { %v13204_v40 = vpop.f32.mrb[88].mxu0 }
 0x2ef   :  { %v13206_v41 = vpop.f32.mrb[89].mxu0 }
 0x2f0   :  { %v13208_v43 = vpop.f32.mrb[90].mxu0 }
 0x2f1   :  { %v13210_v45 = vpop.f32.mrb[91].mxu0 }
 0x2f6   :  { %v13212_v34 = vpop.f32.mrb[92].mxu0 }
 0x2f7   :  { %v13214_v47 = vpop.f32.mrb[93].mxu0 }
 0x2f8   :  { %v13216_v48 = vpop.f32.mrb[94].mxu0 }
 0x2f9   :  { %v13218_v49 = vpop.f32.mrb[95].mxu0 }
 0x2fe   :  { %v13220_v50 = vpop.f32.mrb[96].mxu0 }
 0x2ff   :  { %v13222_v51 = vpop.f32.mrb[97].mxu0 }
 0x300   :  { %v13224_v52 = vpop.f32.mrb[98].mxu0 }
 0x301   :  { %v13226_v54 = vpop.f32.mrb[99].mxu0 }
 0x306   :  { %v13228_v55 = vpop.f32.mrb[100].mxu0 }
 0x307   :  { %v13230_v56 = vpop.f32.mrb[101].mxu0 }
 0x308   :  { %v13232_v58 = vpop.f32.mrb[102].mxu0 }
 0x309   :  { %v13234_v35 = vpop.f32.mrb[103].mxu0 }
 0x30d   :  { %v10384_v59 = vpop.f32.mrb[32].mxu1 }
 0x30e   :  { %v10324_v61 = vpop.f32.mrb[52].mxu0  ;;  %v1654_v36 = vpop.f32.mrb[33].mxu1 }
 0x30f   :  { %v11440_v1 = vadd.f32 %v10384_v59, %v10324_v61  ;;  %v1377_v2 = vpop.f32.mrb[53].mxu0  ;;  %v10385_v3 = vpop.f32.mrb[34].mxu1 }
 0x310   :  { %v11441_v5 = vadd.f32 %v1654_v36, %v1377_v2  ;;  %v10325_v6 = vpop.f32.mrb[54].mxu0  ;;  %v1657_v7 = vpop.f32.mrb[35].mxu1 }
 0x311   :  { %v1922_v8 = vadd.f32 %v11440_v1, %v13236_v62  ;;  %v11442_v9 = vadd.f32 %v10385_v3, %v10325_v6  ;;  %v1380_v10 = vpop.f32.mrb[55].mxu0 }
 0x312   :  { %v1920_v12 = vadd.f32 %v11441_v5, %v13236_v62  ;;  %v11443_v13 = vadd.f32 %v1657_v7, %v1380_v10 }
 0x313   :  { %v2026_v14 = vmul.f32 0.01, %v1922_v8  ;;  %v1923_v18 = vadd.f32 %v11442_v9, %v13236_v62  ;;  %vm1974_vm10 = vcmp.ge.f32.partialorder %v1922_v8, 0.0 }
 0x314   :  { %v2024_v19 = vmul.f32 0.01, %v1920_v12  ;;  %v1921_v22 = vadd.f32 %v11443_v13, %v13236_v62  ;;  %vm1972_vm11 = vcmp.ge.f32.partialorder %v1920_v12, 0.0 }
 0x315   :  { %vm1975_vm12 = vcmp.ge.f32.partialorder %v1923_v18, 0.0  ;;  %v2027_v37 = vmul.f32 0.01, %v1923_v18  ;;  %v10388_v23 = vpop.f32.mrb[36].mxu1  ;;  %v2078_v27 = vsel %vm1974_vm10, %v1922_v8, %v2026_v14 }
 0x316   :  { %vm1973_vm13 = vcmp.ge.f32.partialorder %v1921_v22, 0.0  ;;  %v2025_v39 = vmul.f32 0.01, %v1921_v22  ;;  %v10328_v25 = vpop.f32.mrb[56].mxu0  ;;  %v1670_v26 = vpop.f32.mrb[37].mxu1  ;;  %v2076_v46 = vsel %vm1972_vm11, %v1920_v12, %v2024_v19 }
 0x317   :  { %v2079_v28 = vsel %vm1975_vm12, %v1923_v18, %v2027_v37  ;;  %v11444_v17 = vadd.f32 %v10388_v23, %v10328_v25  ;;  %v1393_v21 = vpop.f32.mrb[57].mxu0  ;;  %v10389_v42 = vpop.f32.mrb[38].mxu1 }
 0x318   :  { %v2129_v60 = vpack.c.bf16 %v2079_v28, %v2078_v27  ;;  %v2077_v59 = vsel %vm1973_vm13, %v1921_v22, %v2025_v39  ;;  %v11445_v61 = vadd.f32 %v1670_v26, %v1393_v21  ;;  %v10329_v36 = vpop.f32.mrb[58].mxu0  ;;  %v1673_v1 = vpop.f32.mrb[39].mxu1 }
 0x319   :  { %v2128_v2 = vpack.c.bf16 %v2077_v59, %v2076_v46  ;;  %v1926_v3 = vadd.f32 %v11444_v17, %v13236_v62  ;;  %v11446_v5 = vadd.f32 %v10389_v42, %v10329_v36  ;;  %v1396_v6 = vpop.f32.mrb[59].mxu0 }
 0x31a   :  { %2155 = vst.msk [vmem:[#allocation2 + $0x10] sm:$0xff] %vm203_vm2, %v2129_v60  ;;  %v1924_v7 = vadd.f32 %v11445_v61, %v13236_v62  ;;  %v11447_v8 = vadd.f32 %v1673_v1, %v1396_v6  ;;  %v12020_v6 = vld [vmem:[%s14955_s3 + $0x8] sm:$0xff]  }
 0x31b   :  { %2154 = vst.msk [vmem:[#allocation2 + $0x8] sm:$0xff] %vm203_vm2, %v2128_v2  ;;  %v2030_v9 = vmul.f32 0.01, %v1926_v3  ;;  %v1927_v10 = vadd.f32 %v11446_v5, %v13236_v62  ;;  %vm1978_vm14 = vcmp.ge.f32.partialorder %v1926_v3, 0.0 }
 0x31c   :  { %v2028_v12 = vmul.f32 0.01, %v1924_v7  ;;  %v1925_v13 = vadd.f32 %v11447_v8, %v13236_v62  ;;  %vm1976_vm15 = vcmp.ge.f32.partialorder %v1924_v7, 0.0 }
 0x31d   :  { %vm1979_vm0 = vcmp.ge.f32.partialorder %v1927_v10, 0.0  ;;  %v2031_v14 = vmul.f32 0.01, %v1927_v10  ;;  %v10392_v18 = vpop.f32.mrb[40].mxu1  ;;  %v2082_v23 = vsel %vm1978_vm14, %v1926_v3, %v2030_v9 }
 0x31e   :  { %vm1977_vm1 = vcmp.ge.f32.partialorder %v1925_v13, 0.0  ;;  %v2029_v19 = vmul.f32 0.01, %v1925_v13  ;;  %v10332_v22 = vpop.f32.mrb[60].mxu0  ;;  %v1686_v37 = vpop.f32.mrb[41].mxu1  ;;  %v2080_v28 = vsel %vm1976_vm15, %v1924_v7, %v2028_v12 }
 0x31f   :  { %v2083_v39 = vsel %vm1979_vm0, %v1927_v10, %v2031_v14  ;;  %v11448_v25 = vadd.f32 %v10392_v18, %v10332_v22  ;;  %v1409_v26 = vpop.f32.mrb[61].mxu0  ;;  %v10393_v27 = vpop.f32.mrb[42].mxu1 }
 0x320   :  { %v2131_v17 = vpack.c.bf16 %v2083_v39, %v2082_v23  ;;  %v2081_v21 = vsel %vm1977_vm1, %v1925_v13, %v2029_v19  ;;  %v11449_v42 = vadd.f32 %v1686_v37, %v1409_v26  ;;  %v10333_v46 = vpop.f32.mrb[62].mxu0  ;;  %v1689_v60 = vpop.f32.mrb[43].mxu1  ;;  %v12021_v37 = vld [vmem:[%s14955_s3 + $0x10] sm:$0xff]  }
 0x321   :  { %v2130_v59 = vpack.c.bf16 %v2081_v21, %v2080_v28  ;;  %v1930_v61 = vadd.f32 %v11448_v25, %v13236_v62  ;;  %v11450_v36 = vadd.f32 %v10393_v27, %v10333_v46  ;;  %v1412_v1 = vpop.f32.mrb[63].mxu0  ;;  %v13260_v9 = vld [vmem:[#allocation2 + $0x10] sm:$0xff] }
 0x322   :  { %2157 = vst.msk [vmem:[#allocation2 + $0x20] sm:$0xff] %vm203_vm2, %v2131_v17  ;;  %v1928_v2 = vadd.f32 %v11449_v42, %v13236_v62  ;;  %v11451_v3 = vadd.f32 %v1689_v60, %v1412_v1  ;;  %v13251_v5 = vld [vmem:[#allocation2 + $0x8] sm:$0xff] }
 0x323   :  { %2156 = vst.msk [vmem:[#allocation2 + $0x18] sm:$0xff] %vm203_vm2, %v2130_v59  ;;  %v2034_v7 = vmul.f32 0.01, %v1930_v61  ;;  %v1931_v8 = vadd.f32 %v11450_v36, %v13236_v62  ;;  %10442 = vmatprep.mubr.msk.bf16.mxu0 %vm203_vm2, %v13251_v5  ;;  %vm1982_vm3 = vcmp.ge.f32.partialorder %v1930_v61, 0.0 }
 0x324   :  { %v2032_v10 = vmul.f32 0.01, %v1928_v2  ;;  %v1929_v12 = vadd.f32 %v11451_v3, %v13236_v62  ;;  %10443 = vmatmul.mubr.msk.bf16.vlgmr.msra.gmra.mrb[104].mxu0 %vm203_vm2, %v13260_v9  ;;  %vm1980_vm4 = vcmp.ge.f32.partialorder %v1928_v2, 0.0 }
 0x325   :  { %vm1983_vm5 = vcmp.ge.f32.partialorder %v1931_v8, 0.0  ;;  %v2035_v13 = vmul.f32 0.01, %v1931_v8  ;;  %v10396_v14 = vpop.f32.mrb[44].mxu1  ;;  %10495 = vmatpush3.bf16.msra.mxu0 %v13169_v0  ;;  %v2086_v23 = vsel %vm1982_vm3, %v1930_v61, %v2034_v7 }
 0x326   :  { %vm1981_vm6 = vcmp.ge.f32.partialorder %v1929_v12, 0.0  ;;  %v2033_v18 = vmul.f32 0.01, %v1929_v12  ;;  %v10336_v19 = vpop.f32.mrb[64].mxu0  ;;  %v1702_v22 = vpop.f32.mrb[45].mxu1  ;;  %10496 = vmatprep.subr.bf16.mxu0 %v12020_v6  ;;  %v2084_v28 = vsel %vm1980_vm4, %v1928_v2, %v2032_v10  ;;  %v12022_v2 = vld [vmem:[%s14955_s3 + $0x18] sm:$0xff]  }
 0x327   :  { %v2087_v39 = vsel %vm1983_vm5, %v1931_v8, %v2035_v13  ;;  %v11452_v25 = vadd.f32 %v10396_v14, %v10336_v19  ;;  %v1425_v26 = vpop.f32.mrb[65].mxu0  ;;  %v10397_v27 = vpop.f32.mrb[46].mxu1 }
 0x328   :  { %v2133_v17 = vpack.c.bf16 %v2087_v39, %v2086_v23  ;;  %v2085_v21 = vsel %vm1981_vm6, %v1929_v12, %v2033_v18  ;;  %v11453_v42 = vadd.f32 %v1702_v22, %v1425_v26  ;;  %v10337_v0 = vpop.f32.mrb[66].mxu0  ;;  %v1705_v46 = vpop.f32.mrb[47].mxu1  ;;  %v13290_v39 = vld [vmem:[%s14955_s3 + $0x40] sm:$0xff]  }
 0x329   :  { %v2132_v60 = vpack.c.bf16 %v2085_v21, %v2084_v28  ;;  %v1934_v59 = vadd.f32 %v11452_v25, %v13236_v62  ;;  %v11454_v36 = vadd.f32 %v10397_v27, %v10337_v0  ;;  %v1428_v1 = vpop.f32.mrb[67].mxu0  ;;  %10497 = vmatpush3.bf16.msra.mxu0 %v12020_v6  ;;  %v13282_v6 = vld [vmem:[#allocation2 + $0x20] sm:$0xff] }
 0x32a   :  { %2159 = vst.msk [vmem:[#allocation2 + $0x30] sm:$0xff] %vm203_vm2, %v2133_v17  ;;  %v1932_v61 = vadd.f32 %v11453_v42, %v13236_v62  ;;  %v11455_v3 = vadd.f32 %v1705_v46, %v1428_v1  ;;  %v13273_v7 = vld [vmem:[#allocation2 + $0x18] sm:$0xff]  ;;  %10498 = vmatprep.subr.bf16.mxu0 %v12021_v37  ;;  %14956 = vst [vmem:[#allocation30_spill] sm:$0xff] %v13282_v6 }
 0x32b   :  { %2158 = vst.msk [vmem:[#allocation2 + $0x28] sm:$0xff] %vm203_vm2, %v2132_v60  ;;  %v2038_v8 = vmul.f32 0.01, %v1934_v59  ;;  %v1935_v10 = vadd.f32 %v11454_v36, %v13236_v62  ;;  %10446 = vmatprep.mubr.msk.bf16.mxu0 %vm203_vm2, %v13273_v7  ;;  %vm1986_vm7 = vcmp.ge.f32.partialorder %v1934_v59, 0.0 }
 0x32c   :  { %v2036_v12 = vmul.f32 0.01, %v1932_v61  ;;  %v1933_v13 = vadd.f32 %v11455_v3, %v13236_v62  ;;  %10447 = vmatmul.mubr.msk.bf16.gmra.mrb[108].mxu0 %vm203_vm2, %v13282_v6  ;;  %vm1984_vm8 = vcmp.ge.f32.partialorder %v1932_v61, 0.0 }
 0x32d   :  { %vm1987_vm9 = vcmp.ge.f32.partialorder %v1935_v10, 0.0  ;;  %v2039_v14 = vmul.f32 0.01, %v1935_v10  ;;  %v10400_v18 = vpop.f32.mrb[48].mxu1  ;;  %10499 = vmatpush3.bf16.msra.mxu0 %v12021_v37  ;;  %v2090_v25 = vsel %vm1986_vm7, %v1934_v59, %v2038_v8 }
 0x32e   :  { %vm1985_vm10 = vcmp.ge.f32.partialorder %v1933_v13, 0.0  ;;  %v2037_v19 = vmul.f32 0.01, %v1933_v13  ;;  %v10340_v22 = vpop.f32.mrb[68].mxu0  ;;  %v1718_v23 = vpop.f32.mrb[49].mxu1  ;;  %10500 = vmatprep.subr.bf16.mxu0 %v12022_v2  ;;  %v2088_v21 = vsel %vm1984_vm8, %v1932_v61, %v2036_v12 }
 0x32f   :  { %v2091_v26 = vsel %vm1987_vm9, %v1935_v10, %v2039_v14  ;;  %v11456_v27 = vadd.f32 %v10400_v18, %v10340_v22  ;;  %v1441_v28 = vpop.f32.mrb[69].mxu0  ;;  %v10401_v17 = vpop.f32.mrb[50].mxu1 }
 0x330   :  { %v2135_v42 = vpack.c.bf16 %v2091_v26, %v2090_v25  ;;  %v2089_v0 = vsel %vm1985_vm10, %v1933_v13, %v2037_v19  ;;  %v11457_v37 = vadd.f32 %v1718_v23, %v1441_v28  ;;  %v10341_v46 = vpop.f32.mrb[70].mxu0  ;;  %v1721_v60 = vpop.f32.mrb[51].mxu1 }
 0x331   :  { %v2134_v36 = vpack.c.bf16 %v2089_v0, %v2088_v21  ;;  %v1938_v1 = vadd.f32 %v11456_v27, %v13236_v62  ;;  %v11458_v3 = vadd.f32 %v10401_v17, %v10341_v46  ;;  %v1444_v6 = vpop.f32.mrb[71].mxu0  ;;  %10501 = vmatpush3.bf16.msra.mxu0 %v12022_v2  ;;  %v13303_v13 = vld [vmem:[#allocation2 + $0x30] sm:$0xff] }
 0x332   :  { %2161 = vst.msk [vmem:[#allocation2 + $0x40] sm:$0xff] %vm203_vm2, %v2135_v42  ;;  %v1936_v59 = vadd.f32 %v11457_v37, %v13236_v62  ;;  %v11459_v8 = vadd.f32 %v1721_v60, %v1444_v6  ;;  %v13296_v10 = vld [vmem:[#allocation2 + $0x28] sm:$0xff]  ;;  %10554 = vmatprep.subr.bf16.mxu0 %v13290_v39 }
 0x333   :  { %2160 = vst.msk [vmem:[#allocation2 + $0x38] sm:$0xff] %vm203_vm2, %v2134_v36  ;;  %v2042_v61 = vmul.f32 0.01, %v1938_v1  ;;  %v1939_v12 = vadd.f32 %v11458_v3, %v13236_v62  ;;  %10450 = vmatprep.mubr.msk.bf16.mxu0 %vm203_vm2, %v13296_v10  ;;  %vm1990_vm11 = vcmp.ge.f32.partialorder %v1938_v1, 0.0 }
 0x334   :  { %vm1988_vm12 = vcmp.ge.f32.partialorder %v1936_v59, 0.0  ;;  %v2040_v2 = vmul.f32 0.01, %v1936_v59  ;;  %v1937_v14 = vadd.f32 %v11459_v8, %v13236_v62  ;;  %10451 = vmatmul.mubr.msk.bf16.gmra.mrb[112].mxu0 %vm203_vm2, %v13303_v13 }
 0x335   :  { %vm1991_vm13 = vcmp.ge.f32.partialorder %v1939_v12, 0.0  ;;  %v2043_v6 = vmul.f32 0.01, %v1939_v12  ;;  %v10404_v18 = vpop.f32.mrb[0].mxu1  ;;  %v2094_v25 = vsel %vm1990_vm11, %v1938_v1, %v2042_v61 }
 0x336   :  { %vm1989_vm14 = vcmp.ge.f32.partialorder %v1937_v14, 0.0  ;;  %v2041_v19 = vmul.f32 0.01, %v1937_v14  ;;  %v11460_v22 = vadd.f32 %v10404_v18, %v13172_v15  ;;  %v1734_v23 = vpop.f32.mrb[1].mxu1  ;;  %v2092_v26 = vsel %vm1988_vm12, %v1936_v59, %v2040_v2 }
 0x337   :  { %v2095_v27 = vsel %vm1991_vm13, %v1939_v12, %v2043_v6  ;;  %v11461_v28 = vadd.f32 %v1734_v23, %v13174_v20  ;;  %v10405_v17 = vpop.f32.mrb[2].mxu1 }
 0x338   :  { %v2137_v21 = vpack.c.bf16 %v2095_v27, %v2094_v25  ;;  %v2093_v42 = vsel %vm1989_vm14, %v1937_v14, %v2041_v19  ;;  %v1942_v0 = vadd.f32 %v11460_v22, %v13236_v62  ;;  %v11462_v37 = vadd.f32 %v10405_v17, %v13176_v33  ;;  %v1737_v46 = vpop.f32.mrb[3].mxu1 }
 0x339   :  { %v2136_v60 = vpack.c.bf16 %v2093_v42, %v2092_v26  ;;  %v1940_v36 = vadd.f32 %v11461_v28, %v13236_v62  ;;  %v11463_v3 = vadd.f32 %v1737_v46, %v13178_v44  ;;  %v13322_v33 = vld [vmem:[#allocation2 + $0x40] sm:$0xff] }
 0x33a   :  { %2163 = vst.msk [vmem:[#allocation2 + $0x50] sm:$0xff] %vm203_vm2, %v2137_v21  ;;  %v2046_v15 = vmul.f32 0.01, %v1942_v0  ;;  %v1943_v1 = vadd.f32 %v11462_v37, %v13236_v62  ;;  %v13316_v59 = vld [vmem:[#allocation2 + $0x38] sm:$0xff]  ;;  %vm1994_vm15 = vcmp.ge.f32.partialorder %v1942_v0, 0.0 }
 0x33b   :  { %2162 = vst.msk [vmem:[#allocation2 + $0x48] sm:$0xff] %vm203_vm2, %v2136_v60  ;;  %v2044_v20 = vmul.f32 0.01, %v1940_v36  ;;  %v1941_v8 = vadd.f32 %v11463_v3, %v13236_v62  ;;  %10454 = vmatprep.mubr.msk.bf16.mxu0 %vm203_vm2, %v13316_v59  ;;  %vm1992_vm0 = vcmp.ge.f32.partialorder %v1940_v36, 0.0 }
 0x33c   :  { %vm1995_vm1 = vcmp.ge.f32.partialorder %v1943_v1, 0.0  ;;  %v2047_v44 = vmul.f32 0.01, %v1943_v1  ;;  %10455 = vmatmul.mubr.msk.bf16.gmra.mrb[116].mxu0 %vm203_vm2, %v13322_v33  ;;  %v2098_v2 = vsel %vm1994_vm15, %v1942_v0, %v2046_v15 }
 0x33d   :  { %vm1993_vm3 = vcmp.ge.f32.partialorder %v1941_v8, 0.0  ;;  %v2045_v61 = vmul.f32 0.01, %v1941_v8  ;;  %v10408_v12 = vpop.f32.mrb[4].mxu1  ;;  %v2096_v19 = vsel %vm1992_vm0, %v1940_v36, %v2044_v20 }
 0x33e   :  { %v2099_v14 = vsel %vm1995_vm1, %v1943_v1, %v2047_v44  ;;  %v11464_v6 = vadd.f32 %v10408_v12, %v13180_v63  ;;  %v1750_v18 = vpop.f32.mrb[5].mxu1 }
 0x33f   :  { %v2139_v22 = vpack.c.bf16 %v2099_v14, %v2098_v2  ;;  %v2097_v23 = vsel %vm1993_vm3, %v1941_v8, %v2045_v61  ;;  %v11465_v25 = vadd.f32 %v1750_v18, %v13182_v4  ;;  %v10409_v26 = vpop.f32.mrb[6].mxu1 }
 0x340   :  { %v2138_v27 = vpack.c.bf16 %v2097_v23, %v2096_v19  ;;  %v1946_v28 = vadd.f32 %v11464_v6, %v13236_v62  ;;  %v11466_v17 = vadd.f32 %v10409_v26, %v13184_v24  ;;  %v1753_v21 = vpop.f32.mrb[7].mxu1 }
 0x341   :  { %2165 = vst.msk [vmem:[#allocation2 + $0x60] sm:$0xff] %vm203_vm2, %v2139_v22  ;;  %v1944_v42 = vadd.f32 %v11465_v25, %v13236_v62  ;;  %v11467_v0 = vadd.f32 %v1753_v21, %v13186_v29  ;;  %v13340_v24 = vld [vmem:[#allocation2 + $0x50] sm:$0xff] }
 0x342   :  { %2164 = vst.msk [vmem:[#allocation2 + $0x58] sm:$0xff] %vm203_vm2, %v2138_v27  ;;  %v2050_v63 = vmul.f32 0.01, %v1946_v28  ;;  %v1947_v37 = vadd.f32 %v11466_v17, %v13236_v62  ;;  %v13335_v46 = vld [vmem:[#allocation2 + $0x48] sm:$0xff]  ;;  %vm1998_vm4 = vcmp.ge.f32.partialorder %v1946_v28, 0.0 }
 0x343   :  { %v2048_v4 = vmul.f32 0.01, %v1944_v42  ;;  %v1945_v60 = vadd.f32 %v11467_v0, %v13236_v62  ;;  %10458 = vmatprep.mubr.msk.bf16.mxu0 %vm203_vm2, %v13335_v46  ;;  %vm1996_vm5 = vcmp.ge.f32.partialorder %v1944_v42, 0.0 }
 0x344   :  { %vm1999_vm6 = vcmp.ge.f32.partialorder %v1947_v37, 0.0  ;;  %v2051_v36 = vmul.f32 0.01, %v1947_v37  ;;  %10459 = vmatmul.mubr.msk.bf16.gmra.mrb[120].mxu0 %vm203_vm2, %v13340_v24  ;;  %v2102_v15 = vsel %vm1998_vm4, %v1946_v28, %v2050_v63 }
 0x345   :  { %vm1997_vm7 = vcmp.ge.f32.partialorder %v1945_v60, 0.0  ;;  %v2049_v29 = vmul.f32 0.01, %v1945_v60  ;;  %v10412_v3 = vpop.f32.mrb[8].mxu1  ;;  %v2100_v44 = vsel %vm1996_vm5, %v1944_v42, %v2048_v4 }
 0x346   :  { %v2103_v1 = vsel %vm1999_vm6, %v1947_v37, %v2051_v36  ;;  %v11468_v20 = vadd.f32 %v10412_v3, %v13188_v53  ;;  %v1766_v8 = vpop.f32.mrb[9].mxu1 }
 0x347   :  { %v2141_v61 = vpack.c.bf16 %v2103_v1, %v2102_v15  ;;  %v2101_v12 = vsel %vm1997_vm7, %v1945_v60, %v2049_v29  ;;  %v11469_v2 = vadd.f32 %v1766_v8, %v13190_v57  ;;  %v10413_v14 = vpop.f32.mrb[10].mxu1 }
 0x348   :  { %v2140_v6 = vpack.c.bf16 %v2101_v12, %v2100_v44  ;;  %v1950_v18 = vadd.f32 %v11468_v20, %v13236_v62  ;;  %v11470_v19 = vadd.f32 %v10413_v14, %v13192_v11  ;;  %v1769_v22 = vpop.f32.mrb[11].mxu1  ;;  %v13358_v28 = vld [vmem:[#allocation2 + $0x60] sm:$0xff] }
 0x349   :  { %2167 = vst.msk [vmem:[#allocation2 + $0x70] sm:$0xff] %vm203_vm2, %v2141_v61  ;;  %v1948_v23 = vadd.f32 %v11469_v2, %v13236_v62  ;;  %v11471_v25 = vadd.f32 %v1769_v22, %v13194_v16  ;;  %v13351_v53 = vld [vmem:[#allocation2 + $0x58] sm:$0xff] }
 0x34a   :  { %2166 = vst.msk [vmem:[#allocation2 + $0x68] sm:$0xff] %vm203_vm2, %v2140_v6  ;;  %v2054_v26 = vmul.f32 0.01, %v1950_v18  ;;  %v1951_v57 = vadd.f32 %v11470_v19, %v13236_v62  ;;  %10462 = vmatprep.mubr.msk.bf16.mxu0 %vm203_vm2, %v13351_v53  ;;  %vm2002_vm8 = vcmp.ge.f32.partialorder %v1950_v18, 0.0 }
 0x34b   :  { %v2052_v27 = vmul.f32 0.01, %v1948_v23  ;;  %v1949_v11 = vadd.f32 %v11471_v25, %v13236_v62  ;;  %vm2000_vm9 = vcmp.ge.f32.partialorder %v1948_v23, 0.0 }
 0x34c   :  { %vm2003_vm10 = vcmp.ge.f32.partialorder %v1951_v57, 0.0  ;;  %v2055_v17 = vmul.f32 0.01, %v1951_v57  ;;  %10463 = vmatmul.mubr.msk.bf16.gmra.mrb[124].mxu0 %vm203_vm2, %v13358_v28  ;;  %v2106_v42 = vsel %vm2002_vm8, %v1950_v18, %v2054_v26 }
 0x34d   :  { %vm2001_vm11 = vcmp.ge.f32.partialorder %v1949_v11, 0.0  ;;  %v2053_v16 = vmul.f32 0.01, %v1949_v11  ;;  %v10416_v21 = vpop.f32.mrb[12].mxu1  ;;  %v2104_v4 = vsel %vm2000_vm9, %v1948_v23, %v2052_v27 }
 0x34e   :  { %v2107_v0 = vsel %vm2003_vm10, %v1951_v57, %v2055_v17  ;;  %v11472_v63 = vadd.f32 %v10416_v21, %v13196_v30  ;;  %v1782_v37 = vpop.f32.mrb[13].mxu1 }
 0x34f   :  { %v2143_v60 = vpack.c.bf16 %v2107_v0, %v2106_v42  ;;  %v2105_v36 = vsel %vm2001_vm11, %v1949_v11, %v2053_v16  ;;  %v11473_v29 = vadd.f32 %v1782_v37, %v13198_v31  ;;  %v10417_v3 = vpop.f32.mrb[14].mxu1 }
 0x350   :  { %v2142_v15 = vpack.c.bf16 %v2105_v36, %v2104_v4  ;;  %v1954_v1 = vadd.f32 %v11472_v63, %v13236_v62  ;;  %v11474_v20 = vadd.f32 %v10417_v3, %v13200_v32  ;;  %v1785_v8 = vpop.f32.mrb[15].mxu1  ;;  %v13376_v14 = vld [vmem:[#allocation2 + $0x70] sm:$0xff] }
 0x351   :  { %2169 = vst.msk [vmem:[#allocation2 + $0x80] sm:$0xff] %vm203_vm2, %v2143_v60  ;;  %v1952_v44 = vadd.f32 %v11473_v29, %v13236_v62  ;;  %v11475_v61 = vadd.f32 %v1785_v8, %v13202_v38  ;;  %v13369_v30 = vld [vmem:[#allocation2 + $0x68] sm:$0xff] }
 0x352   :  { %2168 = vst.msk [vmem:[#allocation2 + $0x78] sm:$0xff] %vm203_vm2, %v2142_v15  ;;  %v2058_v12 = vmul.f32 0.01, %v1954_v1  ;;  %v1955_v31 = vadd.f32 %v11474_v20, %v13236_v62  ;;  %10466 = vmatprep.mubr.msk.bf16.mxu0 %vm203_vm2, %v13369_v30  ;;  %vm2006_vm12 = vcmp.ge.f32.partialorder %v1954_v1, 0.0 }
 0x353   :  { %v2056_v2 = vmul.f32 0.01, %v1952_v44  ;;  %v1953_v32 = vadd.f32 %v11475_v61, %v13236_v62  ;;  %vm2004_vm13 = vcmp.ge.f32.partialorder %v1952_v44, 0.0 }
 0x354   :  { %vm2007_vm14 = vcmp.ge.f32.partialorder %v1955_v31, 0.0  ;;  %v2059_v6 = vmul.f32 0.01, %v1955_v31  ;;  %10467 = vmatmul.mubr.msk.bf16.gmra.mrb[128].mxu0 %vm203_vm2, %v13376_v14  ;;  %v2110_v19 = vsel %vm2006_vm12, %v1954_v1, %v2058_v12 }
 0x355   :  { %vm2005_vm15 = vcmp.ge.f32.partialorder %v1953_v32, 0.0  ;;  %v2057_v38 = vmul.f32 0.01, %v1953_v32  ;;  %v10420_v18 = vpop.f32.mrb[16].mxu1  ;;  %v2108_v26 = vsel %vm2004_vm13, %v1952_v44, %v2056_v2 }
 0x356   :  { %v2111_v22 = vsel %vm2007_vm14, %v1955_v31, %v2059_v6  ;;  %v11476_v23 = vadd.f32 %v10420_v18, %v13204_v40  ;;  %v1798_v25 = vpop.f32.mrb[17].mxu1 }
 0x357   :  { %v2145_v57 = vpack.c.bf16 %v2111_v22, %v2110_v19  ;;  %v2109_v27 = vsel %vm2005_vm15, %v1953_v32, %v2057_v38  ;;  %v11477_v11 = vadd.f32 %v1798_v25, %v13206_v41  ;;  %v10421_v17 = vpop.f32.mrb[18].mxu1 }
 0x358   :  { %v2144_v16 = vpack.c.bf16 %v2109_v27, %v2108_v26  ;;  %v1958_v21 = vadd.f32 %v11476_v23, %v13236_v62  ;;  %v11478_v42 = vadd.f32 %v10421_v17, %v13208_v43  ;;  %v1801_v0 = vpop.f32.mrb[19].mxu1  ;;  %v13394_v36 = vld [vmem:[#allocation2 + $0x80] sm:$0xff] }
 0x359   :  { %2171 = vst.msk [vmem:[#allocation2 + $0x90] sm:$0xff] %vm203_vm2, %v2145_v57  ;;  %v1956_v63 = vadd.f32 %v11477_v11, %v13236_v62  ;;  %v11479_v37 = vadd.f32 %v1801_v0, %v13210_v45  ;;  %v13387_v40 = vld [vmem:[#allocation2 + $0x78] sm:$0xff] }
 0x35a   :  { %2170 = vst.msk [vmem:[#allocation2 + $0x88] sm:$0xff] %vm203_vm2, %v2144_v16  ;;  %v2062_v4 = vmul.f32 0.01, %v1958_v21  ;;  %v1959_v41 = vadd.f32 %v11478_v42, %v13236_v62  ;;  %10470 = vmatprep.mubr.msk.bf16.mxu0 %vm203_vm2, %v13387_v40  ;;  %vm2010_vm0 = vcmp.ge.f32.partialorder %v1958_v21, 0.0 }
 0x35b   :  { %v2060_v60 = vmul.f32 0.01, %v1956_v63  ;;  %v1957_v43 = vadd.f32 %v11479_v37, %v13236_v62  ;;  %vm2008_vm1 = vcmp.ge.f32.partialorder %v1956_v63, 0.0 }
 0x35c   :  { %vm2011_vm3 = vcmp.ge.f32.partialorder %v1959_v41, 0.0  ;;  %v2063_v29 = vmul.f32 0.01, %v1959_v41  ;;  %10471 = vmatmul.mubr.msk.bf16.gmra.mrb[132].mxu0 %vm203_vm2, %v13394_v36  ;;  %v2114_v15 = vsel %vm2010_vm0, %v1958_v21, %v2062_v4 }
 0x35d   :  { %vm2009_vm4 = vcmp.ge.f32.partialorder %v1957_v43, 0.0  ;;  %v2061_v45 = vmul.f32 0.01, %v1957_v43  ;;  %v10424_v3 = vpop.f32.mrb[20].mxu1  ;;  %v2112_v44 = vsel %vm2008_vm1, %v1956_v63, %v2060_v60 }
 0x35e   :  { %v2115_v1 = vsel %vm2011_vm3, %v1959_v41, %v2063_v29  ;;  %v11480_v20 = vadd.f32 %v10424_v3, %v13212_v34  ;;  %v1814_v8 = vpop.f32.mrb[21].mxu1 }
 0x35f   :  { %v2147_v61 = vpack.c.bf16 %v2115_v1, %v2114_v15  ;;  %v2113_v12 = vsel %vm2009_vm4, %v1957_v43, %v2061_v45  ;;  %v11481_v31 = vadd.f32 %v1814_v8, %v13214_v47  ;;  %v10425_v2 = vpop.f32.mrb[22].mxu1 }
 0x360   :  { %v2146_v32 = vpack.c.bf16 %v2113_v12, %v2112_v44  ;;  %v1962_v6 = vadd.f32 %v11480_v20, %v13236_v62  ;;  %v11482_v38 = vadd.f32 %v10425_v2, %v13216_v48  ;;  %v1817_v18 = vpop.f32.mrb[23].mxu1  ;;  %v13412_v26 = vld [vmem:[#allocation2 + $0x90] sm:$0xff] }
 0x361   :  { %2173 = vst.msk [vmem:[#allocation2 + $0xa0] sm:$0xff] %vm203_vm2, %v2147_v61  ;;  %v1960_v19 = vadd.f32 %v11481_v31, %v13236_v62  ;;  %v11483_v22 = vadd.f32 %v1817_v18, %v13218_v49  ;;  %v13405_v34 = vld [vmem:[#allocation2 + $0x88] sm:$0xff] }
 0x362   :  { %2172 = vst.msk [vmem:[#allocation2 + $0x98] sm:$0xff] %vm203_vm2, %v2146_v32  ;;  %v2066_v23 = vmul.f32 0.01, %v1962_v6  ;;  %v1963_v47 = vadd.f32 %v11482_v38, %v13236_v62  ;;  %10474 = vmatprep.mubr.msk.bf16.mxu0 %vm203_vm2, %v13405_v34  ;;  %vm2014_vm5 = vcmp.ge.f32.partialorder %v1962_v6, 0.0 }
 0x363   :  { %v2064_v25 = vmul.f32 0.01, %v1960_v19  ;;  %v1961_v48 = vadd.f32 %v11483_v22, %v13236_v62  ;;  %vm2012_vm6 = vcmp.ge.f32.partialorder %v1960_v19, 0.0 }
 0x364   :  { %vm2015_vm7 = vcmp.ge.f32.partialorder %v1963_v47, 0.0  ;;  %v2067_v57 = vmul.f32 0.01, %v1963_v47  ;;  %10475 = vmatmul.mubr.msk.bf16.gmra.mrb[136].mxu0 %vm203_vm2, %v13412_v26  ;;  %v2118_v11 = vsel %vm2014_vm5, %v1962_v6, %v2066_v23 }
 0x365   :  { %vm2013_vm8 = vcmp.ge.f32.partialorder %v1961_v48, 0.0  ;;  %v2065_v49 = vmul.f32 0.01, %v1961_v48  ;;  %v10428_v27 = vpop.f32.mrb[24].mxu1  ;;  %v2116_v42 = vsel %vm2012_vm6, %v1960_v19, %v2064_v25 }
 0x366   :  { %v2119_v17 = vsel %vm2015_vm7, %v1963_v47, %v2067_v57  ;;  %v11484_v16 = vadd.f32 %v10428_v27, %v13220_v50  ;;  %v1830_v21 = vpop.f32.mrb[25].mxu1 }
 0x367   :  { %v2149_v0 = vpack.c.bf16 %v2119_v17, %v2118_v11  ;;  %v2117_v63 = vsel %vm2013_vm8, %v1961_v48, %v2065_v49  ;;  %v11485_v37 = vadd.f32 %v1830_v21, %v13222_v51  ;;  %v10429_v4 = vpop.f32.mrb[26].mxu1 }
 0x368   :  { %v2148_v41 = vpack.c.bf16 %v2117_v63, %v2116_v42  ;;  %v1966_v60 = vadd.f32 %v11484_v16, %v13236_v62  ;;  %v11486_v43 = vadd.f32 %v10429_v4, %v13224_v52  ;;  %v1833_v29 = vpop.f32.mrb[27].mxu1  ;;  %v13430_v20 = vld [vmem:[#allocation2 + $0xa0] sm:$0xff] }
 0x369   :  { %2175 = vst.msk [vmem:[#allocation2 + $0xb0] sm:$0xff] %vm203_vm2, %v2149_v0  ;;  %v1964_v45 = vadd.f32 %v11485_v37, %v13236_v62  ;;  %v11487_v3 = vadd.f32 %v1833_v29, %v13226_v54  ;;  %v13423_v50 = vld [vmem:[#allocation2 + $0x98] sm:$0xff]  ;;  %v12024_v29 = vld [vmem:[%s14955_s3 + $0x48] sm:$0xff]  }
 0x36a   :  { %2174 = vst.msk [vmem:[#allocation2 + $0xa8] sm:$0xff] %vm203_vm2, %v2148_v41  ;;  %v2070_v15 = vmul.f32 0.01, %v1966_v60  ;;  %v1967_v51 = vadd.f32 %v11486_v43, %v13236_v62  ;;  %10478 = vmatprep.mubr.msk.bf16.mxu0 %vm203_vm2, %v13423_v50  ;;  %vm2018_vm9 = vcmp.ge.f32.partialorder %v1966_v60, 0.0 }
 0x36b   :  { %v2068_v1 = vmul.f32 0.01, %v1964_v45  ;;  %v1965_v52 = vadd.f32 %v11487_v3, %v13236_v62  ;;  %vm2016_vm10 = vcmp.ge.f32.partialorder %v1964_v45, 0.0  ;;  %v12026_v3 = vld [vmem:[%s14955_s3 + $0x58] sm:$0xff]  }
 0x36c   :  { %vm2019_vm11 = vcmp.ge.f32.partialorder %v1967_v51, 0.0  ;;  %v2071_v8 = vmul.f32 0.01, %v1967_v51  ;;  %10479 = vmatmul.mubr.msk.bf16.gmra.mrb[140].mxu0 %vm203_vm2, %v13430_v20  ;;  %v2122_v61 = vsel %vm2018_vm9, %v1966_v60, %v2070_v15  ;;  %v2180_v60 = vld [vmem:[#allocation2] sm:$0xff]  ;;  %v12028_v15 = vld [vmem:[%s14921_s7 + $0x8] sm:$0xff]  }
 0x36d   :  { %vm2017_vm12 = vcmp.ge.f32.partialorder %v1965_v52, 0.0  ;;  %v2069_v54 = vmul.f32 0.01, %v1965_v52  ;;  %v10432_v44 = vpop.f32.mrb[28].mxu1  ;;  %v2120_v32 = vsel %vm2016_vm10, %v1964_v45, %v2068_v1  ;;  %v12025_v45 = vld [vmem:[%s14955_s3 + $0x50] sm:$0xff]   ;;  %v12030_v1 = vld [vmem:[%s14921_s7 + $0x18] sm:$0xff]  }
 0x36e   :  { %v2123_v12 = vsel %vm2019_vm11, %v1967_v51, %v2071_v8  ;;  %v11488_v31 = vadd.f32 %v10432_v44, %v13228_v55  ;;  %v1846_v2 = vpop.f32.mrb[29].mxu1  ;;  %v12029_v51 = vld [vmem:[%s14921_s7 + $0x10] sm:$0xff]  }
 0x36f   :  { %v2151_v6 = vpack.c.bf16 %v2123_v12, %v2122_v61  ;;  %v2121_v38 = vsel %vm2017_vm12, %v1965_v52, %v2069_v54  ;;  %v11489_v18 = vadd.f32 %v1846_v2, %v13230_v56  ;;  %v10433_v19 = vpop.f32.mrb[30].mxu1 }
 0x370   :  { %v2150_v22 = vpack.c.bf16 %v2121_v38, %v2120_v32  ;;  %v1970_v23 = vadd.f32 %v11488_v31, %v13236_v62  ;;  %v11490_v47 = vadd.f32 %v10433_v19, %v13232_v58  ;;  %v1849_v25 = vpop.f32.mrb[31].mxu1  ;;  %v13448_v11 = vld [vmem:[#allocation2 + $0xb0] sm:$0xff] }
 0x371   :  { %2177 = vst.msk [vmem:[#allocation2 + $0xc0] sm:$0xff] %vm203_vm2, %v2151_v6  ;;  %v1968_v48 = vadd.f32 %v11489_v18, %v13236_v62  ;;  %v11491_v57 = vadd.f32 %v1849_v25, %v13234_v35  ;;  %v13441_v55 = vld [vmem:[#allocation2 + $0xa8] sm:$0xff] }
 0x372   :  { %2176 = vst.msk [vmem:[#allocation2 + $0xb8] sm:$0xff] %vm203_vm2, %v2150_v22  ;;  %v2074_v49 = vmul.f32 0.01, %v1970_v23  ;;  %v1971_v56 = vadd.f32 %v11490_v47, %v13236_v62  ;;  %10482 = vmatprep.mubr.msk.bf16.mxu0 %vm203_vm2, %v13441_v55  ;;  %vm2022_vm13 = vcmp.ge.f32.partialorder %v1970_v23, 0.0 }
 0x373   :  { %v2072_v27 = vmul.f32 0.01, %v1968_v48  ;;  %v1969_v58 = vadd.f32 %v11491_v57, %v13236_v62  ;;  %vm2020_vm14 = vcmp.ge.f32.partialorder %v1968_v48, 0.0 }
 0x374   :  { %vm2023_vm15 = vcmp.ge.f32.partialorder %v1971_v56, 0.0  ;;  %v2075_v17 = vmul.f32 0.01, %v1971_v56  ;;  %10483 = vmatmul.mubr.msk.bf16.gmra.mrb[144].mxu0 %vm203_vm2, %v13448_v11  ;;  %v2126_v16 = vsel %vm2022_vm13, %v1970_v23, %v2074_v49 }
 0x375   :  { %vm2021_vm0 = vcmp.ge.f32.partialorder %v1969_v58, 0.0  ;;  %v2073_v35 = vmul.f32 0.01, %v1969_v58  ;;  %v2124_v42 = vsel %vm2020_vm14, %v1968_v48, %v2072_v27 }
 0x376   :  { %v2127_v21 = vsel %vm2023_vm15, %v1971_v56, %v2075_v17 }
 0x377   :  { %v2153_v0 = vpack.c.bf16 %v2127_v21, %v2126_v16  ;;  %v2125_v63 = vsel %vm2021_vm0, %v1969_v58, %v2073_v35 }
 0x378   :  { %v2152_v37 = vpack.c.bf16 %v2125_v63, %v2124_v42  ;;  %v13458_v62 = vld [vmem:[#allocation2 + $0xc0] sm:$0xff] }
 0x379   :  { %2179 = vst.msk [vmem:[#allocation2 + $0xd0] sm:$0xff] %vm203_vm2, %v2153_v0  ;;  %v13453_v4 = vld [vmem:[#allocation2 + $0xb8] sm:$0xff] }
 0x37a   :  { %2178 = vst.msk [vmem:[#allocation2 + $0xc8] sm:$0xff] %vm203_vm2, %v2152_v37  ;;  %10486 = vmatprep.mubr.msk.bf16.mxu0 %vm203_vm2, %v13453_v4 }
 0x37c   :  { %10487 = vmatmul.mubr.msk.bf16.gmra.mrb[148].mxu0 %vm203_vm2, %v13458_v62 }
 0x380   :  { %v13466_v43 = vld [vmem:[#allocation2 + $0xd0] sm:$0xff] }
 0x381   :  { %v13462_v41 = vld [vmem:[#allocation2 + $0xc8] sm:$0xff] }
 0x382   :  { %10490 = vmatprep.mubr.msk.bf16.mxu0 %vm203_vm2, %v13462_v41 }
 0x384   :  { %10491 = vmatmul.mubr.msk.bf16.gmra.mrb[152].mxu0 %vm203_vm2, %v13466_v43 }
 0x385   :  { %10502 = vmatprep.mubr.msk.bf16.mxu0 %vm203_vm2, %v2180_v60 }
 0x38c   :  { %10503 = vmatmul.mubr.msk.bf16.vlgmr.msra.gmra.mrb[104].mxu0 %vm203_vm2, %v13251_v5  ;;  %v14957_v5 = vld [vmem:[#allocation30_spill] sm:$0xff] }
 0x38d   :  { %10506 = vmatprep.mubr.msk.bf16.mxu0 %vm203_vm2, %v13260_v9  ;;  %10555 = vmatpush3.bf16.msra.mxu0 %v13290_v39  ;;  %v12027_v39 = vld [vmem:[%s14921_s7] sm:$0xff]  }
 0x38e   :  { %10556 = vmatprep.subr.bf16.mxu0 %v12024_v29  ;;  %10614 = vmatprep.subr.bf16.mxu1 %v12027_v39 }
 0x38f   :  { %10615 = vmatpush3.bf16.msra.mxu1 %v12027_v39 }
 0x390   :  { %10616 = vmatprep.subr.bf16.mxu1 %v12028_v15 }
 0x391   :  { %10557 = vmatpush3.bf16.msra.mxu0 %v12024_v29 }
 0x392   :  { %10558 = vmatprep.subr.bf16.mxu0 %v12025_v45 }
 0x393   :  { %10617 = vmatpush3.bf16.msra.mxu1 %v12028_v15 }
 0x394   :  { %10507 = vmatmul.mubr.msk.bf16.gmra.mrb[108].mxu0 %vm203_vm2, %v13273_v7  ;;  %10618 = vmatprep.subr.bf16.mxu1 %v12029_v51 }
 0x395   :  { %10510 = vmatprep.mubr.msk.bf16.mxu0 %vm203_vm2, %v14957_v5  ;;  %10559 = vmatpush3.bf16.msra.mxu0 %v12025_v45 }
 0x396   :  { %10560 = vmatprep.subr.bf16.mxu0 %v12026_v3 }
 0x397   :  { %10619 = vmatpush3.bf16.msra.mxu1 %v12029_v51 }
 0x398   :  { %10620 = vmatprep.subr.bf16.mxu1 %v12030_v1 }
 0x399   :  { %10561 = vmatpush3.bf16.msra.mxu0 %v12026_v3 }
 0x39b   :  { %10621 = vmatpush3.bf16.msra.mxu1 %v12030_v1 }
 0x39c   :  { %10511 = vmatmul.mubr.msk.bf16.gmra.mrb[112].mxu0 %vm203_vm2, %v13296_v10 }
 0x39d   :  { %10514 = vmatprep.mubr.msk.bf16.mxu0 %vm203_vm2, %v13303_v13 }
 0x3a4   :  { %10515 = vmatmul.mubr.msk.bf16.gmra.mrb[116].mxu0 %vm203_vm2, %v13316_v59 }
 0x3a5   :  { %10518 = vmatprep.mubr.msk.bf16.mxu0 %vm203_vm2, %v13322_v33 }
 0x3ac   :  { %10519 = vmatmul.mubr.msk.bf16.gmra.mrb[120].mxu0 %vm203_vm2, %v13335_v46 }
 0x3ad   :  { %10522 = vmatprep.mubr.msk.bf16.mxu0 %vm203_vm2, %v13340_v24 }
 0x3b4   :  { %10523 = vmatmul.mubr.msk.bf16.gmra.mrb[124].mxu0 %vm203_vm2, %v13351_v53 }
 0x3b5   :  { %10526 = vmatprep.mubr.msk.bf16.mxu0 %vm203_vm2, %v13358_v28 }
 0x3bc   :  { %10527 = vmatmul.mubr.msk.bf16.gmra.mrb[128].mxu0 %vm203_vm2, %v13369_v30 }
 0x3bd   :  { %10530 = vmatprep.mubr.msk.bf16.mxu0 %vm203_vm2, %v13376_v14 }
 0x3c4   :  { %10531 = vmatmul.mubr.msk.bf16.gmra.mrb[132].mxu0 %vm203_vm2, %v13387_v40 }
 0x3c5   :  { %10534 = vmatprep.mubr.msk.bf16.mxu0 %vm203_vm2, %v13394_v36 }
 0x3cc   :  { %10535 = vmatmul.mubr.msk.bf16.gmra.mrb[136].mxu0 %vm203_vm2, %v13405_v34 }
 0x3cd   :  { %10538 = vmatprep.mubr.msk.bf16.mxu0 %vm203_vm2, %v13412_v26 }
 0x3d4   :  { %10539 = vmatmul.mubr.msk.bf16.gmra.mrb[140].mxu0 %vm203_vm2, %v13423_v50 }
 0x3d5   :  { %10542 = vmatprep.mubr.msk.bf16.mxu0 %vm203_vm2, %v13430_v20 }
 0x3dc   :  { %10543 = vmatmul.mubr.msk.bf16.gmra.mrb[144].mxu0 %vm203_vm2, %v13441_v55 }
 0x3dd   :  { %10546 = vmatprep.mubr.msk.bf16.mxu0 %vm203_vm2, %v13448_v11 }
 0x3e4   :  { %10547 = vmatmul.mubr.msk.bf16.gmra.mrb[148].mxu0 %vm203_vm2, %v13453_v4 }
 0x3e5   :  { %10550 = vmatprep.mubr.msk.bf16.mxu0 %vm203_vm2, %v13458_v62 }
 0x3ec   :  { %10551 = vmatmul.mubr.msk.bf16.gmra.mrb[152].mxu0 %vm203_vm2, %v13462_v41 }
 0x3ed   :  { %10562 = vmatprep.mubr.msk.bf16.mxu0 %vm203_vm2, %v13260_v9  ;;  %v2207_v9 = vld [vmem:[#allocation2 + $0xd8] sm:$0xff] }
 0x3f4   :  { %10563 = vmatmul.mubr.msk.bf16.vlgmr.msra.gmra.mrb[104].mxu0 %vm203_vm2, %v13273_v7  ;;  %v12031_v7 = vld [vmem:[%s14923_s9 + $0x20] sm:$0xff]  }
 0x3f5   :  { %10566 = vmatprep.mubr.msk.bf16.mxu0 %vm203_vm2, %v14957_v5  ;;  %10674 = vmatprep.subr.bf16.mxu0 %v12031_v7 }
 0x3f6   :  { %10675 = vmatpush3.bf16.msra.mxu0 %v12031_v7 }
 0x3fc   :  { %10567 = vmatmul.mubr.msk.bf16.gmra.mrb[108].mxu0 %vm203_vm2, %v13296_v10  ;;  %v12032_v10 = vld [vmem:[%s14923_s9 + $0x28] sm:$0xff]  }
 0x3fd   :  { %10570 = vmatprep.mubr.msk.bf16.mxu0 %vm203_vm2, %v13303_v13  ;;  %10676 = vmatprep.subr.bf16.mxu0 %v12032_v10  ;;  %v12033_v13 = vld [vmem:[%s14923_s9 + $0x30] sm:$0xff]  }
 0x3fe   :  { %10677 = vmatpush3.bf16.msra.mxu0 %v12032_v10 }
 0x3ff   :  { %10678 = vmatprep.subr.bf16.mxu0 %v12033_v13 }
 0x402   :  { %10679 = vmatpush3.bf16.msra.mxu0 %v12033_v13 }
 0x404   :  { %10571 = vmatmul.mubr.msk.bf16.gmra.mrb[112].mxu0 %vm203_vm2, %v13316_v59  ;;  %v12034_v59 = vld [vmem:[%s14923_s9 + $0x38] sm:$0xff]  }
 0x405   :  { %10574 = vmatprep.mubr.msk.bf16.mxu0 %vm203_vm2, %v13322_v33  ;;  %10680 = vmatprep.subr.bf16.mxu0 %v12034_v59 }
 0x406   :  { %10681 = vmatpush3.bf16.msra.mxu0 %v12034_v59 }
 0x40c   :  { %10575 = vmatmul.mubr.msk.bf16.gmra.mrb[116].mxu0 %vm203_vm2, %v13335_v46  ;;  %v13606_v46 = vld [vmem:[#allocation10] ss:$0 sm:$0xff] }
 0x40d   :  { %10578 = vmatprep.mubr.msk.bf16.mxu0 %vm203_vm2, %v13340_v24 }
 0x414   :  { %10579 = vmatmul.mubr.msk.bf16.gmra.mrb[120].mxu0 %vm203_vm2, %v13351_v53 }
 0x415   :  { %10582 = vmatprep.mubr.msk.bf16.mxu0 %vm203_vm2, %v13358_v28 }
 0x41c   :  { %10583 = vmatmul.mubr.msk.bf16.gmra.mrb[124].mxu0 %vm203_vm2, %v13369_v30 }
 0x41d   :  { %10586 = vmatprep.mubr.msk.bf16.mxu0 %vm203_vm2, %v13376_v14 }
 0x424   :  { %10587 = vmatmul.mubr.msk.bf16.gmra.mrb[128].mxu0 %vm203_vm2, %v13387_v40 }
 0x425   :  { %10590 = vmatprep.mubr.msk.bf16.mxu0 %vm203_vm2, %v13394_v36 }
 0x42c   :  { %10591 = vmatmul.mubr.msk.bf16.gmra.mrb[132].mxu0 %vm203_vm2, %v13405_v34 }
 0x42d   :  { %10594 = vmatprep.mubr.msk.bf16.mxu0 %vm203_vm2, %v13412_v26 }
 0x434   :  { %10595 = vmatmul.mubr.msk.bf16.gmra.mrb[136].mxu0 %vm203_vm2, %v13423_v50 }
 0x435   :  { %10598 = vmatprep.mubr.msk.bf16.mxu0 %vm203_vm2, %v13430_v20 }
 0x43c   :  { %10599 = vmatmul.mubr.msk.bf16.gmra.mrb[140].mxu0 %vm203_vm2, %v13441_v55 }
 0x43d   :  { %10602 = vmatprep.mubr.msk.bf16.mxu0 %vm203_vm2, %v13448_v11 }
 0x444   :  { %10603 = vmatmul.mubr.msk.bf16.gmra.mrb[144].mxu0 %vm203_vm2, %v13453_v4 }
 0x445   :  { %10606 = vmatprep.mubr.msk.bf16.mxu0 %vm203_vm2, %v13458_v62 }
 0x44c   :  { %10607 = vmatmul.mubr.msk.bf16.gmra.mrb[148].mxu0 %vm203_vm2, %v13462_v41 }
 0x44d   :  { %10610 = vmatprep.mubr.msk.bf16.mxu0 %vm203_vm2, %v13466_v43 }
 0x454   :  { %10611 = vmatmul.mubr.msk.bf16.gmra.mrb[152].mxu0 %vm203_vm2, %v2207_v9 }
 0x4c7   :  { %v10564_v33 = vpop.f32.mrb[104].mxu0 }
 0x4c8   :  { %v2906_v24 = vpop.f32.mrb[105].mxu0  ;;  %v3174_v28 = vadd.f32 %v10564_v33, %v13606_v46 }
 0x4c9   :  { %v10565_v53 = vpop.f32.mrb[106].mxu0  ;;  %v3172_v40 = vadd.f32 %v13606_v46, %v2906_v24 }
 0x4ca   :  { %v3175_v30 = vadd.f32 %v10565_v53, %v13606_v46  ;;  %v2909_v14 = vpop.f32.mrb[107].mxu0 }
 0x4cb   :  { %v3173_v36 = vadd.f32 %v13606_v46, %v2909_v14 }
 0x4cc   :  { %v3225_v34 = vpack.c.bf16 %v3175_v30, %v3174_v28 }
 0x4cd   :  { %v3224_v26 = vpack.c.bf16 %v3173_v36, %v3172_v40 }
 0x4cf   :  { %v10568_v50 = vpop.f32.mrb[108].mxu0  ;;  %10622 = vmatprep.mubr.msk.bf16.mxu1 %vm203_vm2, %v3224_v26 }
 0x4d0   :  { %v2922_v52 = vpop.f32.mrb[109].mxu0  ;;  %10623 = vmatmul.mubr.msk.bf16.vlgmr.msra.gmra.mrb[52].mxu1 %vm203_vm2, %v3225_v34  ;;  %v3178_v8 = vadd.f32 %v10568_v50, %v13606_v46 }
 0x4d1   :  { %v10569_v20 = vpop.f32.mrb[110].mxu0  ;;  %v3176_v61 = vadd.f32 %v13606_v46, %v2922_v52 }
 0x4d2   :  { %v3179_v54 = vadd.f32 %v10569_v20, %v13606_v46  ;;  %v2925_v44 = vpop.f32.mrb[111].mxu0 }
 0x4d3   :  { %v3177_v12 = vadd.f32 %v13606_v46, %v2925_v44 }
 0x4d4   :  { %v3227_v31 = vpack.c.bf16 %v3179_v54, %v3178_v8 }
 0x4d5   :  { %v3226_v2 = vpack.c.bf16 %v3177_v12, %v3176_v61 }
 0x4d7   :  { %v10572_v32 = vpop.f32.mrb[112].mxu0  ;;  %10626 = vmatprep.mubr.msk.bf16.mxu1 %vm203_vm2, %v3226_v2 }
 0x4d8   :  { %v2938_v6 = vpop.f32.mrb[113].mxu0  ;;  %10627 = vmatmul.mubr.msk.bf16.gmra.mrb[56].mxu1 %vm203_vm2, %v3227_v31  ;;  %v3182_v18 = vadd.f32 %v10572_v32, %v13606_v46 }
 0x4d9   :  { %v10573_v38 = vpop.f32.mrb[114].mxu0  ;;  %v3180_v23 = vadd.f32 %v13606_v46, %v2938_v6 }
 0x4da   :  { %v3183_v19 = vadd.f32 %v10573_v38, %v13606_v46  ;;  %v2941_v22 = vpop.f32.mrb[115].mxu0 }
 0x4db   :  { %v3181_v47 = vadd.f32 %v13606_v46, %v2941_v22 }
 0x4dc   :  { %v3229_v25 = vpack.c.bf16 %v3183_v19, %v3182_v18 }
 0x4dd   :  { %v3228_v48 = vpack.c.bf16 %v3181_v47, %v3180_v23 }
 0x4df   :  { %v10576_v57 = vpop.f32.mrb[116].mxu0  ;;  %10630 = vmatprep.mubr.msk.bf16.mxu1 %vm203_vm2, %v3228_v48 }
 0x4e0   :  { %v2954_v55 = vpop.f32.mrb[117].mxu0  ;;  %10631 = vmatmul.mubr.msk.bf16.gmra.mrb[60].mxu1 %vm203_vm2, %v3229_v25  ;;  %v3186_v56 = vadd.f32 %v10576_v57, %v13606_v46 }
 0x4e1   :  { %v10577_v49 = vpop.f32.mrb[118].mxu0  ;;  %v3184_v11 = vadd.f32 %v13606_v46, %v2954_v55 }
 0x4e2   :  { %v3187_v27 = vadd.f32 %v10577_v49, %v13606_v46  ;;  %v2957_v58 = vpop.f32.mrb[119].mxu0 }
 0x4e3   :  { %v3185_v17 = vadd.f32 %v13606_v46, %v2957_v58 }
 0x4e4   :  { %v3231_v35 = vpack.c.bf16 %v3187_v27, %v3186_v56 }
 0x4e5   :  { %v3230_v16 = vpack.c.bf16 %v3185_v17, %v3184_v11 }
 0x4e7   :  { %v10580_v21 = vpop.f32.mrb[120].mxu0  ;;  %10634 = vmatprep.mubr.msk.bf16.mxu1 %vm203_vm2, %v3230_v16 }
 0x4e8   :  { %v2970_v42 = vpop.f32.mrb[121].mxu0  ;;  %10635 = vmatmul.mubr.msk.bf16.gmra.mrb[64].mxu1 %vm203_vm2, %v3231_v35  ;;  %v3190_v63 = vadd.f32 %v10580_v21, %v13606_v46 }
 0x4e9   :  { %v10581_v0 = vpop.f32.mrb[122].mxu0  ;;  %v3188_v62 = vadd.f32 %v13606_v46, %v2970_v42 }
 0x4ea   :  { %v3191_v37 = vadd.f32 %v10581_v0, %v13606_v46  ;;  %v2973_v4 = vpop.f32.mrb[123].mxu0 }
 0x4eb   :  { %v3189_v41 = vadd.f32 %v13606_v46, %v2973_v4 }
 0x4ec   :  { %v3233_v60 = vpack.c.bf16 %v3191_v37, %v3190_v63 }
 0x4ed   :  { %v3232_v43 = vpack.c.bf16 %v3189_v41, %v3188_v62 }
 0x4ef   :  { %v10584_v29 = vpop.f32.mrb[124].mxu0  ;;  %10638 = vmatprep.mubr.msk.bf16.mxu1 %vm203_vm2, %v3232_v43 }
 0x4f0   :  { %v2986_v45 = vpop.f32.mrb[125].mxu0  ;;  %10639 = vmatmul.mubr.msk.bf16.gmra.mrb[68].mxu1 %vm203_vm2, %v3233_v60  ;;  %v3194_v5 = vadd.f32 %v10584_v29, %v13606_v46 }
 0x4f1   :  { %v10585_v3 = vpop.f32.mrb[126].mxu0  ;;  %v3192_v51 = vadd.f32 %v13606_v46, %v2986_v45 }
 0x4f2   :  { %v3195_v39 = vadd.f32 %v10585_v3, %v13606_v46  ;;  %v2989_v15 = vpop.f32.mrb[127].mxu0 }
 0x4f3   :  { %v3193_v1 = vadd.f32 %v13606_v46, %v2989_v15 }
 0x4f4   :  { %v3235_v9 = vpack.c.bf16 %v3195_v39, %v3194_v5 }
 0x4f5   :  { %v3234_v7 = vpack.c.bf16 %v3193_v1, %v3192_v51 }
 0x4f7   :  { %v10588_v10 = vpop.f32.mrb[128].mxu0  ;;  %10642 = vmatprep.mubr.msk.bf16.mxu1 %vm203_vm2, %v3234_v7 }
 0x4f8   :  { %v3002_v13 = vpop.f32.mrb[129].mxu0  ;;  %10643 = vmatmul.mubr.msk.bf16.gmra.mrb[72].mxu1 %vm203_vm2, %v3235_v9  ;;  %v3198_v33 = vadd.f32 %v10588_v10, %v13606_v46 }
 0x4f9   :  { %v10589_v59 = vpop.f32.mrb[130].mxu0  ;;  %v3196_v28 = vadd.f32 %v13606_v46, %v3002_v13 }
 0x4fa   :  { %v3199_v24 = vadd.f32 %v10589_v59, %v13606_v46  ;;  %v3005_v53 = vpop.f32.mrb[131].mxu0 }
 0x4fb   :  { %v3197_v30 = vadd.f32 %v13606_v46, %v3005_v53 }
 0x4fc   :  { %v3237_v14 = vpack.c.bf16 %v3199_v24, %v3198_v33 }
 0x4fd   :  { %v3236_v40 = vpack.c.bf16 %v3197_v30, %v3196_v28  ;;  %v13689_v30 = vld [vmem:[%s14923_s9] sm:$0xff]  }
 0x4fe   :  { %10734 = vmatprep.subr.bf16.mxu0 %v13689_v30 }
 0x4ff   :  { %v10592_v36 = vpop.f32.mrb[132].mxu0  ;;  %10646 = vmatprep.mubr.msk.bf16.mxu1 %vm203_vm2, %v3236_v40 }
 0x500   :  { %v3018_v34 = vpop.f32.mrb[133].mxu0  ;;  %10647 = vmatmul.mubr.msk.bf16.gmra.mrb[76].mxu1 %vm203_vm2, %v3237_v14  ;;  %v3202_v50 = vadd.f32 %v10592_v36, %v13606_v46  ;;  %v13692_v14 = vld [vmem:[#allocation12] ss:$0 sm:$0xff] }
 0x501   :  { %v10593_v26 = vpop.f32.mrb[134].mxu0  ;;  %v3200_v8 = vadd.f32 %v13606_v46, %v3018_v34 }
 0x502   :  { %v3203_v52 = vadd.f32 %v10593_v26, %v13606_v46  ;;  %v3021_v20 = vpop.f32.mrb[135].mxu0 }
 0x503   :  { %v3201_v54 = vadd.f32 %v13606_v46, %v3021_v20 }
 0x504   :  { %v3239_v44 = vpack.c.bf16 %v3203_v52, %v3202_v50 }
 0x505   :  { %v3238_v61 = vpack.c.bf16 %v3201_v54, %v3200_v8 }
 0x507   :  { %v10596_v12 = vpop.f32.mrb[136].mxu0  ;;  %10650 = vmatprep.mubr.msk.bf16.mxu1 %vm203_vm2, %v3238_v61 }
 0x508   :  { %v3034_v31 = vpop.f32.mrb[137].mxu0  ;;  %10651 = vmatmul.mubr.msk.bf16.gmra.mrb[80].mxu1 %vm203_vm2, %v3239_v44  ;;  %v3206_v32 = vadd.f32 %v10596_v12, %v13606_v46 }
 0x509   :  { %v10597_v2 = vpop.f32.mrb[138].mxu0  ;;  %v3204_v18 = vadd.f32 %v13606_v46, %v3034_v31 }
 0x50a   :  { %v3207_v6 = vadd.f32 %v10597_v2, %v13606_v46  ;;  %v3037_v38 = vpop.f32.mrb[139].mxu0 }
 0x50b   :  { %v3205_v19 = vadd.f32 %v13606_v46, %v3037_v38 }
 0x50c   :  { %v3241_v22 = vpack.c.bf16 %v3207_v6, %v3206_v32 }
 0x50d   :  { %v3240_v23 = vpack.c.bf16 %v3205_v19, %v3204_v18 }
 0x50f   :  { %v10600_v47 = vpop.f32.mrb[140].mxu0  ;;  %10654 = vmatprep.mubr.msk.bf16.mxu1 %vm203_vm2, %v3240_v23 }
 0x510   :  { %v3050_v25 = vpop.f32.mrb[141].mxu0  ;;  %10655 = vmatmul.mubr.msk.bf16.gmra.mrb[84].mxu1 %vm203_vm2, %v3241_v22  ;;  %v3210_v57 = vadd.f32 %v10600_v47, %v13606_v46 }
 0x511   :  { %v10601_v48 = vpop.f32.mrb[142].mxu0  ;;  %v3208_v56 = vadd.f32 %v13606_v46, %v3050_v25 }
 0x512   :  { %v3211_v55 = vadd.f32 %v10601_v48, %v13606_v46  ;;  %v3053_v49 = vpop.f32.mrb[143].mxu0 }
 0x513   :  { %v3209_v27 = vadd.f32 %v13606_v46, %v3053_v49 }
 0x514   :  { %v3243_v58 = vpack.c.bf16 %v3211_v55, %v3210_v57 }
 0x515   :  { %v3242_v11 = vpack.c.bf16 %v3209_v27, %v3208_v56 }
 0x517   :  { %v10604_v17 = vpop.f32.mrb[144].mxu0  ;;  %10658 = vmatprep.mubr.msk.bf16.mxu1 %vm203_vm2, %v3242_v11 }
 0x518   :  { %v3066_v35 = vpop.f32.mrb[145].mxu0  ;;  %10659 = vmatmul.mubr.msk.bf16.gmra.mrb[88].mxu1 %vm203_vm2, %v3243_v58  ;;  %v3214_v21 = vadd.f32 %v10604_v17, %v13606_v46 }
 0x519   :  { %v10605_v16 = vpop.f32.mrb[146].mxu0  ;;  %v3212_v63 = vadd.f32 %v13606_v46, %v3066_v35 }
 0x51a   :  { %v3215_v42 = vadd.f32 %v10605_v16, %v13606_v46  ;;  %v3069_v0 = vpop.f32.mrb[147].mxu0 }
 0x51b   :  { %v3213_v37 = vadd.f32 %v13606_v46, %v3069_v0 }
 0x51c   :  { %v3245_v4 = vpack.c.bf16 %v3215_v42, %v3214_v21 }
 0x51d   :  { %v3244_v62 = vpack.c.bf16 %v3213_v37, %v3212_v63 }
 0x51f   :  { %v10608_v41 = vpop.f32.mrb[148].mxu0  ;;  %10662 = vmatprep.mubr.msk.bf16.mxu1 %vm203_vm2, %v3244_v62 }
 0x520   :  { %v3082_v60 = vpop.f32.mrb[149].mxu0  ;;  %10663 = vmatmul.mubr.msk.bf16.gmra.mrb[92].mxu1 %vm203_vm2, %v3245_v4  ;;  %v3218_v29 = vadd.f32 %v10608_v41, %v13606_v46  ;;  %v12036_v41 = vld [vmem:[%s14923_s9 + $0x8] sm:$0xff]  }
 0x521   :  { %v10609_v43 = vpop.f32.mrb[150].mxu0  ;;  %v3216_v5 = vadd.f32 %v13606_v46, %v3082_v60 }
 0x522   :  { %v3219_v45 = vadd.f32 %v10609_v43, %v13606_v46  ;;  %v3085_v3 = vpop.f32.mrb[151].mxu0 }
 0x523   :  { %v3217_v39 = vadd.f32 %v13606_v46, %v3085_v3 }
 0x524   :  { %v3247_v15 = vpack.c.bf16 %v3219_v45, %v3218_v29 }
 0x525   :  { %v3246_v51 = vpack.c.bf16 %v3217_v39, %v3216_v5 }
 0x527   :  { %v10612_v1 = vpop.f32.mrb[152].mxu0  ;;  %10666 = vmatprep.mubr.msk.bf16.mxu1 %vm203_vm2, %v3246_v51  ;;  %v12037_v51 = vld [vmem:[%s14923_s9 + $0x10] sm:$0xff]  }
 0x528   :  { %v3098_v9 = vpop.f32.mrb[153].mxu0  ;;  %10667 = vmatmul.mubr.msk.bf16.gmra.mrb[96].mxu1 %vm203_vm2, %v3247_v15  ;;  %v3222_v10 = vadd.f32 %v10612_v1, %v13606_v46 }
 0x529   :  { %v10613_v7 = vpop.f32.mrb[154].mxu0  ;;  %v3220_v33 = vadd.f32 %v13606_v46, %v3098_v9 }
 0x52a   :  { %v3223_v13 = vadd.f32 %v10613_v7, %v13606_v46  ;;  %v3101_v59 = vpop.f32.mrb[155].mxu0 }
 0x52b   :  { %v3221_v24 = vadd.f32 %v13606_v46, %v3101_v59 }
 0x52c   :  { %v3249_v53 = vpack.c.bf16 %v3223_v13, %v3222_v10 }
 0x52d   :  { %v3248_v28 = vpack.c.bf16 %v3221_v24, %v3220_v33 }
 0x52f   :  { %10670 = vmatprep.mubr.msk.bf16.mxu1 %vm203_vm2, %v3248_v28 }
 0x530   :  { %10671 = vmatmul.mubr.msk.bf16.gmra.mrb[100].mxu1 %vm203_vm2, %v3249_v53 }
 0x5a3   :  { %v10624_v40 = vpop.f32.mrb[52].mxu1 }
 0x5a4   :  { %v3410_v36 = vadd.f32 %v10624_v40, %v13692_v14  ;;  %v3401_v34 = vpop.f32.mrb[53].mxu1 }
 0x5a5   :  { %v3402_v46 = vadd.f32 %v13692_v14, %v3401_v34  ;;  %v10625_v26 = vpop.f32.mrb[54].mxu1 }
 0x5a6   :  { %v3662_v50 = vmul.f32 0.01, %v3410_v36  ;;  %v3413_v52 = vadd.f32 %v10625_v26, %v13692_v14  ;;  %v3404_v20 = vpop.f32.mrb[55].mxu1  ;;  %vm3610_vm1 = vcmp.ge.f32.partialorder %v3410_v36, 0.0 }
 0x5a7   :  { %v3660_v8 = vmul.f32 0.01, %v3402_v46  ;;  %v3405_v54 = vadd.f32 %v13692_v14, %v3404_v20  ;;  %vm3608_vm3 = vcmp.ge.f32.partialorder %v3402_v46, 0.0 }
 0x5a8   :  { %vm3611_vm4 = vcmp.ge.f32.partialorder %v3413_v52, 0.0  ;;  %v3663_v44 = vmul.f32 0.01, %v3413_v52  ;;  %v3714_v12 = vsel %vm3610_vm1, %v3410_v36, %v3662_v50  ;;  %v12038_v36 = vld [vmem:[%s14923_s9 + $0x18] sm:$0xff]  }
 0x5a9   :  { %vm3609_vm5 = vcmp.ge.f32.partialorder %v3405_v54, 0.0  ;;  %v3661_v61 = vmul.f32 0.01, %v3405_v54  ;;  %v3712_v2 = vsel %vm3608_vm3, %v3402_v46, %v3660_v8 }
 0x5aa   :  { %v3715_v31 = vsel %vm3611_vm4, %v3413_v52, %v3663_v44  ;;  %v13745_v44 = vld [vmem:[%s14923_s9 + $0x40] sm:$0xff]  }
 0x5ab   :  { %v3765_v32 = vpack.c.bf16 %v3715_v31, %v3714_v12  ;;  %v3713_v6 = vsel %vm3609_vm5, %v3405_v54, %v3661_v61  ;;  %v10628_v38 = vpop.f32.mrb[56].mxu1 }
 0x5ac   :  { %v3764_v18 = vpack.c.bf16 %v3713_v6, %v3712_v2  ;;  %v3426_v19 = vadd.f32 %v10628_v38, %v13692_v14  ;;  %v3417_v22 = vpop.f32.mrb[57].mxu1 }
 0x5ad   :  { %3791 = vst.msk [vmem:[#allocation2 + $0x10] sm:$0xff] %vm203_vm2, %v3765_v32  ;;  %v3418_v23 = vadd.f32 %v13692_v14, %v3417_v22  ;;  %v10629_v47 = vpop.f32.mrb[58].mxu1 }
 0x5ae   :  { %3790 = vst.msk [vmem:[#allocation2 + $0x8] sm:$0xff] %vm203_vm2, %v3764_v18  ;;  %v3666_v25 = vmul.f32 0.01, %v3426_v19  ;;  %v3429_v48 = vadd.f32 %v10629_v47, %v13692_v14  ;;  %v3420_v57 = vpop.f32.mrb[59].mxu1  ;;  %vm3614_vm6 = vcmp.ge.f32.partialorder %v3426_v19, 0.0 }
 0x5af   :  { %v3664_v55 = vmul.f32 0.01, %v3418_v23  ;;  %v3421_v49 = vadd.f32 %v13692_v14, %v3420_v57  ;;  %vm3612_vm7 = vcmp.ge.f32.partialorder %v3418_v23, 0.0 }
 0x5b0   :  { %vm3615_vm8 = vcmp.ge.f32.partialorder %v3429_v48, 0.0  ;;  %v3667_v56 = vmul.f32 0.01, %v3429_v48  ;;  %v3718_v58 = vsel %vm3614_vm6, %v3426_v19, %v3666_v25 }
 0x5b1   :  { %vm3613_vm9 = vcmp.ge.f32.partialorder %v3421_v49, 0.0  ;;  %v3665_v27 = vmul.f32 0.01, %v3421_v49  ;;  %v3716_v17 = vsel %vm3612_vm7, %v3418_v23, %v3664_v55 }
 0x5b2   :  { %v3719_v11 = vsel %vm3615_vm8, %v3429_v48, %v3667_v56 }
 0x5b3   :  { %v3767_v35 = vpack.c.bf16 %v3719_v11, %v3718_v58  ;;  %v3717_v16 = vsel %vm3613_vm9, %v3421_v49, %v3665_v27  ;;  %v10632_v21 = vpop.f32.mrb[60].mxu1 }
 0x5b4   :  { %v3766_v42 = vpack.c.bf16 %v3717_v16, %v3716_v17  ;;  %v3442_v0 = vadd.f32 %v10632_v21, %v13692_v14  ;;  %v3433_v63 = vpop.f32.mrb[61].mxu1  ;;  %v13716_v45 = vld [vmem:[#allocation2 + $0x10] sm:$0xff] }
 0x5b5   :  { %3793 = vst.msk [vmem:[#allocation2 + $0x20] sm:$0xff] %vm203_vm2, %v3767_v35  ;;  %v3434_v37 = vadd.f32 %v13692_v14, %v3433_v63  ;;  %v10633_v4 = vpop.f32.mrb[62].mxu1  ;;  %v13707_v62 = vld [vmem:[#allocation2 + $0x8] sm:$0xff] }
 0x5b6   :  { %3792 = vst.msk [vmem:[#allocation2 + $0x18] sm:$0xff] %vm203_vm2, %v3766_v42  ;;  %v3670_v60 = vmul.f32 0.01, %v3442_v0  ;;  %v3445_v43 = vadd.f32 %v10633_v4, %v13692_v14  ;;  %v3436_v29 = vpop.f32.mrb[63].mxu1  ;;  %10682 = vmatprep.mubr.msk.bf16.mxu0 %vm203_vm2, %v13707_v62  ;;  %vm3618_vm10 = vcmp.ge.f32.partialorder %v3442_v0, 0.0 }
 0x5b7   :  { %v3668_v3 = vmul.f32 0.01, %v3434_v37  ;;  %v3437_v5 = vadd.f32 %v13692_v14, %v3436_v29  ;;  %10683 = vmatmul.mubr.msk.bf16.vlgmr.msra.gmra.mrb[156].mxu0 %vm203_vm2, %v13716_v45  ;;  %vm3616_vm11 = vcmp.ge.f32.partialorder %v3434_v37, 0.0 }
 0x5b8   :  { %vm3619_vm12 = vcmp.ge.f32.partialorder %v3445_v43, 0.0  ;;  %v3671_v39 = vmul.f32 0.01, %v3445_v43  ;;  %10735 = vmatpush3.bf16.msra.mxu0 %v13689_v30  ;;  %v3722_v1 = vsel %vm3618_vm10, %v3442_v0, %v3670_v60 }
 0x5b9   :  { %vm3617_vm13 = vcmp.ge.f32.partialorder %v3437_v5, 0.0  ;;  %v3669_v15 = vmul.f32 0.01, %v3437_v5  ;;  %10736 = vmatprep.subr.bf16.mxu0 %v12036_v41  ;;  %v3720_v7 = vsel %vm3616_vm11, %v3434_v37, %v3668_v3 }
 0x5ba   :  { %v3723_v9 = vsel %vm3619_vm12, %v3445_v43, %v3671_v39 }
 0x5bb   :  { %v3769_v10 = vpack.c.bf16 %v3723_v9, %v3722_v1  ;;  %v3721_v13 = vsel %vm3617_vm13, %v3437_v5, %v3669_v15  ;;  %v10636_v59 = vpop.f32.mrb[64].mxu1 }
 0x5bc   :  { %v3768_v33 = vpack.c.bf16 %v3721_v13, %v3720_v7  ;;  %v3458_v24 = vadd.f32 %v10636_v59, %v13692_v14  ;;  %v3449_v53 = vpop.f32.mrb[65].mxu1  ;;  %10737 = vmatpush3.bf16.msra.mxu0 %v12036_v41  ;;  %v13737_v50 = vld [vmem:[#allocation2 + $0x20] sm:$0xff] }
 0x5bd   :  { %3795 = vst.msk [vmem:[#allocation2 + $0x30] sm:$0xff] %vm203_vm2, %v3769_v10  ;;  %v3450_v28 = vadd.f32 %v13692_v14, %v3449_v53  ;;  %v10637_v30 = vpop.f32.mrb[66].mxu1  ;;  %v13728_v40 = vld [vmem:[#allocation2 + $0x18] sm:$0xff]  ;;  %10738 = vmatprep.subr.bf16.mxu0 %v12037_v51 }
 0x5be   :  { %3794 = vst.msk [vmem:[#allocation2 + $0x28] sm:$0xff] %vm203_vm2, %v3768_v33  ;;  %v3674_v34 = vmul.f32 0.01, %v3458_v24  ;;  %v3461_v46 = vadd.f32 %v10637_v30, %v13692_v14  ;;  %v3452_v26 = vpop.f32.mrb[67].mxu1  ;;  %10686 = vmatprep.mubr.msk.bf16.mxu0 %vm203_vm2, %v13728_v40  ;;  %vm3622_vm14 = vcmp.ge.f32.partialorder %v3458_v24, 0.0 }
 0x5bf   :  { %v3672_v52 = vmul.f32 0.01, %v3450_v28  ;;  %v3453_v20 = vadd.f32 %v13692_v14, %v3452_v26  ;;  %10687 = vmatmul.mubr.msk.bf16.gmra.mrb[160].mxu0 %vm203_vm2, %v13737_v50  ;;  %vm3620_vm15 = vcmp.ge.f32.partialorder %v3450_v28, 0.0 }
 0x5c0   :  { %vm3623_vm0 = vcmp.ge.f32.partialorder %v3461_v46, 0.0  ;;  %v3675_v8 = vmul.f32 0.01, %v3461_v46  ;;  %10739 = vmatpush3.bf16.msra.mxu0 %v12037_v51  ;;  %v3726_v61 = vsel %vm3622_vm14, %v3458_v24, %v3674_v34 }
 0x5c1   :  { %vm3621_vm1 = vcmp.ge.f32.partialorder %v3453_v20, 0.0  ;;  %v3673_v54 = vmul.f32 0.01, %v3453_v20  ;;  %10740 = vmatprep.subr.bf16.mxu0 %v12038_v36  ;;  %v3724_v31 = vsel %vm3620_vm15, %v3450_v28, %v3672_v52 }
 0x5c2   :  { %v3727_v12 = vsel %vm3623_vm0, %v3461_v46, %v3675_v8 }
 0x5c3   :  { %v3771_v2 = vpack.c.bf16 %v3727_v12, %v3726_v61  ;;  %v3725_v32 = vsel %vm3621_vm1, %v3453_v20, %v3673_v54  ;;  %v10640_v6 = vpop.f32.mrb[68].mxu1 }
 0x5c4   :  { %v3770_v38 = vpack.c.bf16 %v3725_v32, %v3724_v31  ;;  %v3474_v18 = vadd.f32 %v10640_v6, %v13692_v14  ;;  %v3465_v19 = vpop.f32.mrb[69].mxu1  ;;  %10741 = vmatpush3.bf16.msra.mxu0 %v12038_v36  ;;  %v13757_v55 = vld [vmem:[#allocation2 + $0x30] sm:$0xff] }
 0x5c5   :  { %3797 = vst.msk [vmem:[#allocation2 + $0x40] sm:$0xff] %vm203_vm2, %v3771_v2  ;;  %v3466_v22 = vadd.f32 %v13692_v14, %v3465_v19  ;;  %v10641_v23 = vpop.f32.mrb[70].mxu1  ;;  %v13750_v47 = vld [vmem:[#allocation2 + $0x28] sm:$0xff]  ;;  %10794 = vmatprep.subr.bf16.mxu0 %v13745_v44 }
 0x5c6   :  { %3796 = vst.msk [vmem:[#allocation2 + $0x38] sm:$0xff] %vm203_vm2, %v3770_v38  ;;  %v3678_v25 = vmul.f32 0.01, %v3474_v18  ;;  %v3477_v48 = vadd.f32 %v10641_v23, %v13692_v14  ;;  %v3468_v57 = vpop.f32.mrb[71].mxu1  ;;  %10690 = vmatprep.mubr.msk.bf16.mxu0 %vm203_vm2, %v13750_v47  ;;  %vm3626_vm3 = vcmp.ge.f32.partialorder %v3474_v18, 0.0 }
 0x5c7   :  { %v3676_v49 = vmul.f32 0.01, %v3466_v22  ;;  %v3469_v56 = vadd.f32 %v13692_v14, %v3468_v57  ;;  %10691 = vmatmul.mubr.msk.bf16.gmra.mrb[164].mxu0 %vm203_vm2, %v13757_v55  ;;  %vm3624_vm4 = vcmp.ge.f32.partialorder %v3466_v22, 0.0 }
 0x5c8   :  { %vm3627_vm5 = vcmp.ge.f32.partialorder %v3477_v48, 0.0  ;;  %v3679_v27 = vmul.f32 0.01, %v3477_v48  ;;  %v3730_v11 = vsel %vm3626_vm3, %v3474_v18, %v3678_v25 }
 0x5c9   :  { %vm3625_vm6 = vcmp.ge.f32.partialorder %v3469_v56, 0.0  ;;  %v3677_v58 = vmul.f32 0.01, %v3469_v56  ;;  %v3728_v35 = vsel %vm3624_vm4, %v3466_v22, %v3676_v49 }
 0x5ca   :  { %v3731_v17 = vsel %vm3627_vm5, %v3477_v48, %v3679_v27 }
 0x5cb   :  { %v3773_v16 = vpack.c.bf16 %v3731_v17, %v3730_v11  ;;  %v3729_v21 = vsel %vm3625_vm6, %v3469_v56, %v3677_v58  ;;  %v10644_v42 = vpop.f32.mrb[72].mxu1 }
 0x5cc   :  { %v3772_v0 = vpack.c.bf16 %v3729_v21, %v3728_v35  ;;  %v3490_v63 = vadd.f32 %v10644_v42, %v13692_v14  ;;  %v3481_v37 = vpop.f32.mrb[73].mxu1  ;;  %v13771_v5 = vld [vmem:[#allocation2 + $0x40] sm:$0xff] }
 0x5cd   :  { %3799 = vst.msk [vmem:[#allocation2 + $0x50] sm:$0xff] %vm203_vm2, %v3773_v16  ;;  %v3482_v4 = vadd.f32 %v13692_v14, %v3481_v37  ;;  %v10645_v41 = vpop.f32.mrb[74].mxu1  ;;  %v13765_v60 = vld [vmem:[#allocation2 + $0x38] sm:$0xff] }
 0x5ce   :  { %3798 = vst.msk [vmem:[#allocation2 + $0x48] sm:$0xff] %vm203_vm2, %v3772_v0  ;;  %v3682_v43 = vmul.f32 0.01, %v3490_v63  ;;  %v3493_v29 = vadd.f32 %v10645_v41, %v13692_v14  ;;  %v3484_v3 = vpop.f32.mrb[75].mxu1  ;;  %10694 = vmatprep.mubr.msk.bf16.mxu0 %vm203_vm2, %v13765_v60  ;;  %vm3630_vm7 = vcmp.ge.f32.partialorder %v3490_v63, 0.0 }
 0x5cf   :  { %v3680_v39 = vmul.f32 0.01, %v3482_v4  ;;  %v3485_v15 = vadd.f32 %v13692_v14, %v3484_v3  ;;  %10695 = vmatmul.mubr.msk.bf16.gmra.mrb[168].mxu0 %vm203_vm2, %v13771_v5  ;;  %vm3628_vm8 = vcmp.ge.f32.partialorder %v3482_v4, 0.0 }
 0x5d0   :  { %vm3631_vm9 = vcmp.ge.f32.partialorder %v3493_v29, 0.0  ;;  %v3683_v51 = vmul.f32 0.01, %v3493_v29  ;;  %v3734_v9 = vsel %vm3630_vm7, %v3490_v63, %v3682_v43 }
 0x5d1   :  { %vm3629_vm10 = vcmp.ge.f32.partialorder %v3485_v15, 0.0  ;;  %v3681_v1 = vmul.f32 0.01, %v3485_v15  ;;  %v3732_v10 = vsel %vm3628_vm8, %v3482_v4, %v3680_v39 }
 0x5d2   :  { %v3735_v7 = vsel %vm3631_vm9, %v3493_v29, %v3683_v51 }
 0x5d3   :  { %v3775_v13 = vpack.c.bf16 %v3735_v7, %v3734_v9  ;;  %v3733_v59 = vsel %vm3629_vm10, %v3485_v15, %v3681_v1  ;;  %v10648_v33 = vpop.f32.mrb[76].mxu1 }
 0x5d4   :  { %v3774_v24 = vpack.c.bf16 %v3733_v59, %v3732_v10  ;;  %v3506_v53 = vadd.f32 %v10648_v33, %v13692_v14  ;;  %v3497_v28 = vpop.f32.mrb[77].mxu1  ;;  %v13785_v20 = vld [vmem:[#allocation2 + $0x50] sm:$0xff] }
 0x5d5   :  { %3801 = vst.msk [vmem:[#allocation2 + $0x60] sm:$0xff] %vm203_vm2, %v3775_v13  ;;  %v3498_v30 = vadd.f32 %v13692_v14, %v3497_v28  ;;  %v10649_v36 = vpop.f32.mrb[78].mxu1  ;;  %v13779_v34 = vld [vmem:[#allocation2 + $0x48] sm:$0xff] }
 0x5d6   :  { %3800 = vst.msk [vmem:[#allocation2 + $0x58] sm:$0xff] %vm203_vm2, %v3774_v24  ;;  %v3686_v46 = vmul.f32 0.01, %v3506_v53  ;;  %v3509_v26 = vadd.f32 %v10649_v36, %v13692_v14  ;;  %v3500_v52 = vpop.f32.mrb[79].mxu1  ;;  %10698 = vmatprep.mubr.msk.bf16.mxu0 %vm203_vm2, %v13779_v34  ;;  %vm3634_vm11 = vcmp.ge.f32.partialorder %v3506_v53, 0.0 }
 0x5d7   :  { %v3684_v8 = vmul.f32 0.01, %v3498_v30  ;;  %v3501_v54 = vadd.f32 %v13692_v14, %v3500_v52  ;;  %10699 = vmatmul.mubr.msk.bf16.gmra.mrb[172].mxu0 %vm203_vm2, %v13785_v20  ;;  %vm3632_vm12 = vcmp.ge.f32.partialorder %v3498_v30, 0.0 }
 0x5d8   :  { %vm3635_vm13 = vcmp.ge.f32.partialorder %v3509_v26, 0.0  ;;  %v3687_v61 = vmul.f32 0.01, %v3509_v26  ;;  %v3738_v31 = vsel %vm3634_vm11, %v3506_v53, %v3686_v46 }
 0x5d9   :  { %vm3633_vm14 = vcmp.ge.f32.partialorder %v3501_v54, 0.0  ;;  %v3685_v12 = vmul.f32 0.01, %v3501_v54  ;;  %v3736_v32 = vsel %vm3632_vm12, %v3498_v30, %v3684_v8 }
 0x5da   :  { %v3739_v2 = vsel %vm3635_vm13, %v3509_v26, %v3687_v61 }
 0x5db   :  { %v3777_v6 = vpack.c.bf16 %v3739_v2, %v3738_v31  ;;  %v3737_v38 = vsel %vm3633_vm14, %v3501_v54, %v3685_v12  ;;  %v10652_v18 = vpop.f32.mrb[80].mxu1 }
 0x5dc   :  { %v3776_v19 = vpack.c.bf16 %v3737_v38, %v3736_v32  ;;  %v3522_v22 = vadd.f32 %v10652_v18, %v13692_v14  ;;  %v3513_v23 = vpop.f32.mrb[81].mxu1  ;;  %v13799_v58 = vld [vmem:[#allocation2 + $0x60] sm:$0xff] }
 0x5dd   :  { %3803 = vst.msk [vmem:[#allocation2 + $0x70] sm:$0xff] %vm203_vm2, %v3777_v6  ;;  %v3514_v25 = vadd.f32 %v13692_v14, %v3513_v23  ;;  %v10653_v48 = vpop.f32.mrb[82].mxu1  ;;  %v13793_v57 = vld [vmem:[#allocation2 + $0x58] sm:$0xff] }
 0x5de   :  { %3802 = vst.msk [vmem:[#allocation2 + $0x68] sm:$0xff] %vm203_vm2, %v3776_v19  ;;  %v3690_v49 = vmul.f32 0.01, %v3522_v22  ;;  %v3525_v56 = vadd.f32 %v10653_v48, %v13692_v14  ;;  %v3516_v27 = vpop.f32.mrb[83].mxu1  ;;  %10702 = vmatprep.mubr.msk.bf16.mxu0 %vm203_vm2, %v13793_v57  ;;  %vm3638_vm15 = vcmp.ge.f32.partialorder %v3522_v22, 0.0 }
 0x5df   :  { %v3688_v11 = vmul.f32 0.01, %v3514_v25  ;;  %v3517_v17 = vadd.f32 %v13692_v14, %v3516_v27  ;;  %10703 = vmatmul.mubr.msk.bf16.gmra.mrb[176].mxu0 %vm203_vm2, %v13799_v58  ;;  %vm3636_vm0 = vcmp.ge.f32.partialorder %v3514_v25, 0.0 }
 0x5e0   :  { %vm3639_vm1 = vcmp.ge.f32.partialorder %v3525_v56, 0.0  ;;  %v3691_v35 = vmul.f32 0.01, %v3525_v56  ;;  %v3742_v21 = vsel %vm3638_vm15, %v3522_v22, %v3690_v49 }
 0x5e1   :  { %vm3637_vm3 = vcmp.ge.f32.partialorder %v3517_v17, 0.0  ;;  %v3689_v16 = vmul.f32 0.01, %v3517_v17  ;;  %v3740_v0 = vsel %vm3636_vm0, %v3514_v25, %v3688_v11 }
 0x5e2   :  { %v3743_v42 = vsel %vm3639_vm1, %v3525_v56, %v3691_v35 }
 0x5e3   :  { %v3779_v63 = vpack.c.bf16 %v3743_v42, %v3742_v21  ;;  %v3741_v37 = vsel %vm3637_vm3, %v3517_v17, %v3689_v16  ;;  %v10656_v4 = vpop.f32.mrb[84].mxu1 }
 0x5e4   :  { %v3778_v41 = vpack.c.bf16 %v3741_v37, %v3740_v0  ;;  %v3538_v43 = vadd.f32 %v10656_v4, %v13692_v14  ;;  %v3529_v29 = vpop.f32.mrb[85].mxu1  ;;  %v13813_v7 = vld [vmem:[#allocation2 + $0x70] sm:$0xff] }
 0x5e5   :  { %3805 = vst.msk [vmem:[#allocation2 + $0x80] sm:$0xff] %vm203_vm2, %v3779_v63  ;;  %v3530_v3 = vadd.f32 %v13692_v14, %v3529_v29  ;;  %v10657_v39 = vpop.f32.mrb[86].mxu1  ;;  %v13807_v15 = vld [vmem:[#allocation2 + $0x68] sm:$0xff] }
 0x5e6   :  { %3804 = vst.msk [vmem:[#allocation2 + $0x78] sm:$0xff] %vm203_vm2, %v3778_v41  ;;  %v3694_v51 = vmul.f32 0.01, %v3538_v43  ;;  %v3541_v1 = vadd.f32 %v10657_v39, %v13692_v14  ;;  %v3532_v9 = vpop.f32.mrb[87].mxu1  ;;  %10706 = vmatprep.mubr.msk.bf16.mxu0 %vm203_vm2, %v13807_v15  ;;  %vm3642_vm4 = vcmp.ge.f32.partialorder %v3538_v43, 0.0 }
 0x5e7   :  { %v3692_v10 = vmul.f32 0.01, %v3530_v3  ;;  %v3533_v13 = vadd.f32 %v13692_v14, %v3532_v9  ;;  %10707 = vmatmul.mubr.msk.bf16.gmra.mrb[180].mxu0 %vm203_vm2, %v13813_v7  ;;  %vm3640_vm5 = vcmp.ge.f32.partialorder %v3530_v3, 0.0 }
 0x5e8   :  { %vm3643_vm6 = vcmp.ge.f32.partialorder %v3541_v1, 0.0  ;;  %v3695_v59 = vmul.f32 0.01, %v3541_v1  ;;  %v3746_v24 = vsel %vm3642_vm4, %v3538_v43, %v3694_v51 }
 0x5e9   :  { %vm3641_vm7 = vcmp.ge.f32.partialorder %v3533_v13, 0.0  ;;  %v3693_v33 = vmul.f32 0.01, %v3533_v13  ;;  %v3744_v28 = vsel %vm3640_vm5, %v3530_v3, %v3692_v10 }
 0x5ea   :  { %v3747_v53 = vsel %vm3643_vm6, %v3541_v1, %v3695_v59 }
 0x5eb   :  { %v3781_v30 = vpack.c.bf16 %v3747_v53, %v3746_v24  ;;  %v3745_v36 = vsel %vm3641_vm7, %v3533_v13, %v3693_v33  ;;  %v10660_v46 = vpop.f32.mrb[88].mxu1 }
 0x5ec   :  { %v3780_v26 = vpack.c.bf16 %v3745_v36, %v3744_v28  ;;  %v3554_v52 = vadd.f32 %v10660_v46, %v13692_v14  ;;  %v3545_v8 = vpop.f32.mrb[89].mxu1  ;;  %v13827_v6 = vld [vmem:[#allocation2 + $0x80] sm:$0xff] }
 0x5ed   :  { %3807 = vst.msk [vmem:[#allocation2 + $0x90] sm:$0xff] %vm203_vm2, %v3781_v30  ;;  %v3546_v54 = vadd.f32 %v13692_v14, %v3545_v8  ;;  %v10661_v61 = vpop.f32.mrb[90].mxu1  ;;  %v13821_v12 = vld [vmem:[#allocation2 + $0x78] sm:$0xff] }
 0x5ee   :  { %3806 = vst.msk [vmem:[#allocation2 + $0x88] sm:$0xff] %vm203_vm2, %v3780_v26  ;;  %v3698_v31 = vmul.f32 0.01, %v3554_v52  ;;  %v3557_v2 = vadd.f32 %v10661_v61, %v13692_v14  ;;  %v3548_v32 = vpop.f32.mrb[91].mxu1  ;;  %10710 = vmatprep.mubr.msk.bf16.mxu0 %vm203_vm2, %v13821_v12  ;;  %vm3646_vm8 = vcmp.ge.f32.partialorder %v3554_v52, 0.0 }
 0x5ef   :  { %v3696_v38 = vmul.f32 0.01, %v3546_v54  ;;  %v3549_v18 = vadd.f32 %v13692_v14, %v3548_v32  ;;  %10711 = vmatmul.mubr.msk.bf16.gmra.mrb[184].mxu0 %vm203_vm2, %v13827_v6  ;;  %vm3644_vm9 = vcmp.ge.f32.partialorder %v3546_v54, 0.0 }
 0x5f0   :  { %vm3647_vm10 = vcmp.ge.f32.partialorder %v3557_v2, 0.0  ;;  %v3699_v19 = vmul.f32 0.01, %v3557_v2  ;;  %v3750_v23 = vsel %vm3646_vm8, %v3554_v52, %v3698_v31 }
 0x5f1   :  { %vm3645_vm11 = vcmp.ge.f32.partialorder %v3549_v18, 0.0  ;;  %v3697_v22 = vmul.f32 0.01, %v3549_v18  ;;  %v3748_v48 = vsel %vm3644_vm9, %v3546_v54, %v3696_v38 }
 0x5f2   :  { %v3751_v25 = vsel %vm3647_vm10, %v3557_v2, %v3699_v19 }
 0x5f3   :  { %v3783_v49 = vpack.c.bf16 %v3751_v25, %v3750_v23  ;;  %v3749_v56 = vsel %vm3645_vm11, %v3549_v18, %v3697_v22  ;;  %v10664_v27 = vpop.f32.mrb[92].mxu1 }
 0x5f4   :  { %v3782_v11 = vpack.c.bf16 %v3749_v56, %v3748_v48  ;;  %v3570_v17 = vadd.f32 %v10664_v27, %v13692_v14  ;;  %v3561_v35 = vpop.f32.mrb[93].mxu1  ;;  %v13841_v4 = vld [vmem:[#allocation2 + $0x90] sm:$0xff] }
 0x5f5   :  { %3809 = vst.msk [vmem:[#allocation2 + $0xa0] sm:$0xff] %vm203_vm2, %v3783_v49  ;;  %v3562_v16 = vadd.f32 %v13692_v14, %v3561_v35  ;;  %v10665_v21 = vpop.f32.mrb[94].mxu1  ;;  %v13835_v42 = vld [vmem:[#allocation2 + $0x88] sm:$0xff] }
 0x5f6   :  { %3808 = vst.msk [vmem:[#allocation2 + $0x98] sm:$0xff] %vm203_vm2, %v3782_v11  ;;  %v3702_v0 = vmul.f32 0.01, %v3570_v17  ;;  %v3573_v63 = vadd.f32 %v10665_v21, %v13692_v14  ;;  %v3564_v37 = vpop.f32.mrb[95].mxu1  ;;  %10714 = vmatprep.mubr.msk.bf16.mxu0 %vm203_vm2, %v13835_v42  ;;  %vm3650_vm12 = vcmp.ge.f32.partialorder %v3570_v17, 0.0 }
 0x5f7   :  { %v3700_v41 = vmul.f32 0.01, %v3562_v16  ;;  %v3565_v43 = vadd.f32 %v13692_v14, %v3564_v37  ;;  %10715 = vmatmul.mubr.msk.bf16.gmra.mrb[188].mxu0 %vm203_vm2, %v13841_v4  ;;  %vm3648_vm13 = vcmp.ge.f32.partialorder %v3562_v16, 0.0 }
 0x5f8   :  { %vm3651_vm14 = vcmp.ge.f32.partialorder %v3573_v63, 0.0  ;;  %v3703_v29 = vmul.f32 0.01, %v3573_v63  ;;  %v3754_v39 = vsel %vm3650_vm12, %v3570_v17, %v3702_v0 }
 0x5f9   :  { %vm3649_vm15 = vcmp.ge.f32.partialorder %v3565_v43, 0.0  ;;  %v3701_v3 = vmul.f32 0.01, %v3565_v43  ;;  %v3752_v1 = vsel %vm3648_vm13, %v3562_v16, %v3700_v41 }
 0x5fa   :  { %v3755_v51 = vsel %vm3651_vm14, %v3573_v63, %v3703_v29 }
 0x5fb   :  { %v3785_v9 = vpack.c.bf16 %v3755_v51, %v3754_v39  ;;  %v3753_v10 = vsel %vm3649_vm15, %v3565_v43, %v3701_v3  ;;  %v10668_v13 = vpop.f32.mrb[96].mxu1 }
 0x5fc   :  { %v3784_v59 = vpack.c.bf16 %v3753_v10, %v3752_v1  ;;  %v3586_v33 = vadd.f32 %v10668_v13, %v13692_v14  ;;  %v3577_v24 = vpop.f32.mrb[97].mxu1  ;;  %v13855_v52 = vld [vmem:[#allocation2 + $0xa0] sm:$0xff] }
 0x5fd   :  { %3811 = vst.msk [vmem:[#allocation2 + $0xb0] sm:$0xff] %vm203_vm2, %v3785_v9  ;;  %v3578_v53 = vadd.f32 %v13692_v14, %v3577_v24  ;;  %v10669_v28 = vpop.f32.mrb[98].mxu1  ;;  %v13849_v30 = vld [vmem:[#allocation2 + $0x98] sm:$0xff]  ;;  %v13886_v10 = vld [vmem:[#allocation2] sm:$0xff] }
 0x5fe   :  { %3810 = vst.msk [vmem:[#allocation2 + $0xa8] sm:$0xff] %vm203_vm2, %v3784_v59  ;;  %v3706_v36 = vmul.f32 0.01, %v3586_v33  ;;  %v3589_v46 = vadd.f32 %v10669_v28, %v13692_v14  ;;  %v3580_v26 = vpop.f32.mrb[99].mxu1  ;;  %10718 = vmatprep.mubr.msk.bf16.mxu0 %vm203_vm2, %v13849_v30  ;;  %vm3654_vm0 = vcmp.ge.f32.partialorder %v3586_v33, 0.0  ;;  %v12040_v59 = vld [vmem:[%s14923_s9 + $0x48] sm:$0xff]  }
 0x5ff   :  { %v3704_v8 = vmul.f32 0.01, %v3578_v53  ;;  %v3581_v54 = vadd.f32 %v13692_v14, %v3580_v26  ;;  %10719 = vmatmul.mubr.msk.bf16.gmra.mrb[192].mxu0 %vm203_vm2, %v13855_v52  ;;  %vm3652_vm1 = vcmp.ge.f32.partialorder %v3578_v53, 0.0  ;;  %v12042_v24 = vld [vmem:[%s14923_s9 + $0x58] sm:$0xff]   ;;  %v12046_v28 = vld [vmem:[#allocation15 + $0x38] sm:$0xff]  }
 0x600   :  { %vm3655_vm3 = vcmp.ge.f32.partialorder %v3589_v46, 0.0  ;;  %v3707_v61 = vmul.f32 0.01, %v3589_v46  ;;  %v3758_v2 = vsel %vm3654_vm0, %v3586_v33, %v3706_v36  ;;  %v12041_v33 = vld [vmem:[%s14923_s9 + $0x50] sm:$0xff]  }
 0x601   :  { %vm3653_vm4 = vcmp.ge.f32.partialorder %v3581_v54, 0.0  ;;  %v3705_v31 = vmul.f32 0.01, %v3581_v54  ;;  %v3756_v38 = vsel %vm3652_vm1, %v3578_v53, %v3704_v8  ;;  %v12045_v53 = vld [vmem:[#allocation15 + $0x30] sm:$0xff]  }
 0x602   :  { %v3759_v32 = vsel %vm3655_vm3, %v3589_v46, %v3707_v61 }
 0x603   :  { %v3787_v18 = vpack.c.bf16 %v3759_v32, %v3758_v2  ;;  %v3757_v19 = vsel %vm3653_vm4, %v3581_v54, %v3705_v31  ;;  %v10672_v22 = vpop.f32.mrb[100].mxu1 }
 0x604   :  { %v3786_v23 = vpack.c.bf16 %v3757_v19, %v3756_v38  ;;  %v3602_v25 = vadd.f32 %v10672_v22, %v13692_v14  ;;  %v3593_v48 = vpop.f32.mrb[101].mxu1  ;;  %v13869_v16 = vld [vmem:[#allocation2 + $0xb0] sm:$0xff] }
 0x605   :  { %3813 = vst.msk [vmem:[#allocation2 + $0xc0] sm:$0xff] %vm203_vm2, %v3787_v18  ;;  %v3594_v49 = vadd.f32 %v13692_v14, %v3593_v48  ;;  %v10673_v56 = vpop.f32.mrb[102].mxu1  ;;  %v13863_v27 = vld [vmem:[#allocation2 + $0xa8] sm:$0xff] }
 0x606   :  { %3812 = vst.msk [vmem:[#allocation2 + $0xb8] sm:$0xff] %vm203_vm2, %v3786_v23  ;;  %v3710_v11 = vmul.f32 0.01, %v3602_v25  ;;  %v3605_v17 = vadd.f32 %v10673_v56, %v13692_v14  ;;  %v3596_v35 = vpop.f32.mrb[103].mxu1  ;;  %10722 = vmatprep.mubr.msk.bf16.mxu0 %vm203_vm2, %v13863_v27  ;;  %vm3658_vm5 = vcmp.ge.f32.partialorder %v3602_v25, 0.0 }
 0x607   :  { %v3708_v21 = vmul.f32 0.01, %v3594_v49  ;;  %v3597_v0 = vadd.f32 %v13692_v14, %v3596_v35  ;;  %10723 = vmatmul.mubr.msk.bf16.gmra.mrb[196].mxu0 %vm203_vm2, %v13869_v16  ;;  %vm3656_vm6 = vcmp.ge.f32.partialorder %v3594_v49, 0.0 }
 0x608   :  { %vm3659_vm7 = vcmp.ge.f32.partialorder %v3605_v17, 0.0  ;;  %v3711_v63 = vmul.f32 0.01, %v3605_v17  ;;  %v3762_v41 = vsel %vm3658_vm5, %v3602_v25, %v3710_v11 }
 0x609   :  { %vm3657_vm8 = vcmp.ge.f32.partialorder %v3597_v0, 0.0  ;;  %v3709_v37 = vmul.f32 0.01, %v3597_v0  ;;  %v3760_v29 = vsel %vm3656_vm6, %v3594_v49, %v3708_v21 }
 0x60a   :  { %v3763_v43 = vsel %vm3659_vm7, %v3605_v17, %v3711_v63 }
 0x60b   :  { %v3789_v3 = vpack.c.bf16 %v3763_v43, %v3762_v41  ;;  %v3761_v39 = vsel %vm3657_vm8, %v3597_v0, %v3709_v37  ;;  %v12048_v37 = vld [vmem:[#allocation15 + $0x8] sm:$0xff]  }
 0x60c   :  { %v3788_v51 = vpack.c.bf16 %v3761_v39, %v3760_v29  ;;  %v13880_v14 = vld [vmem:[#allocation2 + $0xc0] sm:$0xff] }
 0x60d   :  { %3815 = vst.msk [vmem:[#allocation2 + $0xd0] sm:$0xff] %vm203_vm2, %v3789_v3  ;;  %v13875_v1 = vld [vmem:[#allocation2 + $0xb8] sm:$0xff] }
 0x60e   :  { %3814 = vst.msk [vmem:[#allocation2 + $0xc8] sm:$0xff] %vm203_vm2, %v3788_v51  ;;  %10726 = vmatprep.mubr.msk.bf16.mxu0 %vm203_vm2, %v13875_v1 }
 0x60f   :  { %10727 = vmatmul.mubr.msk.bf16.gmra.mrb[200].mxu0 %vm203_vm2, %v13880_v14 }
 0x614   :  { %v13890_v13 = vld [vmem:[#allocation2 + $0xd0] sm:$0xff] }
 0x615   :  { %v13884_v9 = vld [vmem:[#allocation2 + $0xc8] sm:$0xff] }
 0x616   :  { %10730 = vmatprep.mubr.msk.bf16.mxu0 %vm203_vm2, %v13884_v9 }
 0x617   :  { %10731 = vmatmul.mubr.msk.bf16.gmra.mrb[204].mxu0 %vm203_vm2, %v13890_v13 }
 0x618   :  { %10742 = vmatprep.mubr.msk.bf16.mxu0 %vm203_vm2, %v13886_v10 }
 0x61f   :  { %10743 = vmatmul.mubr.msk.bf16.vlgmr.msra.gmra.mrb[156].mxu0 %vm203_vm2, %v13707_v62  ;;  %v12043_v62 = vld [vmem:[#allocation15 + $0x20] sm:$0xff]  }
 0x620   :  { %10746 = vmatprep.mubr.msk.bf16.mxu0 %vm203_vm2, %v13716_v45  ;;  %10795 = vmatpush3.bf16.msra.mxu0 %v13745_v44  ;;  %v12044_v44 = vld [vmem:[#allocation15 + $0x28] sm:$0xff]  }
 0x621   :  { %10796 = vmatprep.subr.bf16.mxu0 %v12040_v59  ;;  %10854 = vmatprep.subr.bf16.mxu1 %v12043_v62 }
 0x622   :  { %10855 = vmatpush3.bf16.msra.mxu1 %v12043_v62 }
 0x623   :  { %10856 = vmatprep.subr.bf16.mxu1 %v12044_v44 }
 0x624   :  { %10797 = vmatpush3.bf16.msra.mxu0 %v12040_v59 }
 0x625   :  { %10798 = vmatprep.subr.bf16.mxu0 %v12041_v33 }
 0x626   :  { %10857 = vmatpush3.bf16.msra.mxu1 %v12044_v44 }
 0x627   :  { %10747 = vmatmul.mubr.msk.bf16.gmra.mrb[160].mxu0 %vm203_vm2, %v13728_v40  ;;  %10858 = vmatprep.subr.bf16.mxu1 %v12045_v53 }
 0x628   :  { %10750 = vmatprep.mubr.msk.bf16.mxu0 %vm203_vm2, %v13737_v50  ;;  %10799 = vmatpush3.bf16.msra.mxu0 %v12041_v33 }
 0x629   :  { %10800 = vmatprep.subr.bf16.mxu0 %v12042_v24 }
 0x62a   :  { %10859 = vmatpush3.bf16.msra.mxu1 %v12045_v53 }
 0x62b   :  { %10860 = vmatprep.subr.bf16.mxu1 %v12046_v28 }
 0x62c   :  { %10801 = vmatpush3.bf16.msra.mxu0 %v12042_v24 }
 0x62e   :  { %10861 = vmatpush3.bf16.msra.mxu1 %v12046_v28 }
 0x62f   :  { %10751 = vmatmul.mubr.msk.bf16.gmra.mrb[164].mxu0 %vm203_vm2, %v13750_v47 }
 0x630   :  { %10754 = vmatprep.mubr.msk.bf16.mxu0 %vm203_vm2, %v13757_v55 }
 0x637   :  { %10755 = vmatmul.mubr.msk.bf16.gmra.mrb[168].mxu0 %vm203_vm2, %v13765_v60 }
 0x638   :  { %10758 = vmatprep.mubr.msk.bf16.mxu0 %vm203_vm2, %v13771_v5 }
 0x63f   :  { %10759 = vmatmul.mubr.msk.bf16.gmra.mrb[172].mxu0 %vm203_vm2, %v13779_v34 }
 0x640   :  { %10762 = vmatprep.mubr.msk.bf16.mxu0 %vm203_vm2, %v13785_v20 }
 0x647   :  { %10763 = vmatmul.mubr.msk.bf16.gmra.mrb[176].mxu0 %vm203_vm2, %v13793_v57 }
 0x648   :  { %10766 = vmatprep.mubr.msk.bf16.mxu0 %vm203_vm2, %v13799_v58 }
 0x64f   :  { %10767 = vmatmul.mubr.msk.bf16.gmra.mrb[180].mxu0 %vm203_vm2, %v13807_v15 }
 0x650   :  { %10770 = vmatprep.mubr.msk.bf16.mxu0 %vm203_vm2, %v13813_v7 }
 0x657   :  { %10771 = vmatmul.mubr.msk.bf16.gmra.mrb[184].mxu0 %vm203_vm2, %v13821_v12 }
 0x658   :  { %10774 = vmatprep.mubr.msk.bf16.mxu0 %vm203_vm2, %v13827_v6 }
 0x65f   :  { %10775 = vmatmul.mubr.msk.bf16.gmra.mrb[188].mxu0 %vm203_vm2, %v13835_v42 }
 0x660   :  { %10778 = vmatprep.mubr.msk.bf16.mxu0 %vm203_vm2, %v13841_v4 }
 0x667   :  { %10779 = vmatmul.mubr.msk.bf16.gmra.mrb[192].mxu0 %vm203_vm2, %v13849_v30 }
 0x668   :  { %10782 = vmatprep.mubr.msk.bf16.mxu0 %vm203_vm2, %v13855_v52 }
 0x66f   :  { %10783 = vmatmul.mubr.msk.bf16.gmra.mrb[196].mxu0 %vm203_vm2, %v13863_v27 }
 0x670   :  { %10786 = vmatprep.mubr.msk.bf16.mxu0 %vm203_vm2, %v13869_v16 }
 0x677   :  { %10787 = vmatmul.mubr.msk.bf16.gmra.mrb[200].mxu0 %vm203_vm2, %v13875_v1 }
 0x678   :  { %10790 = vmatprep.mubr.msk.bf16.mxu0 %vm203_vm2, %v13880_v14 }
 0x67f   :  { %10791 = vmatmul.mubr.msk.bf16.gmra.mrb[204].mxu0 %vm203_vm2, %v13884_v9 }
 0x680   :  { %10802 = vmatprep.mubr.msk.bf16.mxu0 %vm203_vm2, %v13716_v45  ;;  %v14006_v45 = vld [vmem:[#allocation2 + $0xd8] sm:$0xff] }
 0x687   :  { %10803 = vmatmul.mubr.msk.bf16.vlgmr.msra.gmra.mrb[156].mxu0 %vm203_vm2, %v13728_v40  ;;  %v14010_v40 = vld [vmem:[#allocation15] sm:$0xff]  }
 0x688   :  { %10806 = vmatprep.mubr.msk.bf16.mxu0 %vm203_vm2, %v13737_v50  ;;  %10914 = vmatprep.subr.bf16.mxu1 %v14010_v40  ;;  %v14013_v50 = vld [vmem:[#allocation13] ss:$0 sm:$0xff] }
 0x68f   :  { %10807 = vmatmul.mubr.msk.bf16.gmra.mrb[160].mxu0 %vm203_vm2, %v13750_v47 }
 0x690   :  { %10810 = vmatprep.mubr.msk.bf16.mxu0 %vm203_vm2, %v13757_v55 }
 0x697   :  { %10811 = vmatmul.mubr.msk.bf16.gmra.mrb[164].mxu0 %vm203_vm2, %v13765_v60 }
 0x698   :  { %10814 = vmatprep.mubr.msk.bf16.mxu0 %vm203_vm2, %v13771_v5 }
 0x69f   :  { %10815 = vmatmul.mubr.msk.bf16.gmra.mrb[168].mxu0 %vm203_vm2, %v13779_v34 }
 0x6a0   :  { %10818 = vmatprep.mubr.msk.bf16.mxu0 %vm203_vm2, %v13785_v20 }
 0x6a7   :  { %10819 = vmatmul.mubr.msk.bf16.gmra.mrb[172].mxu0 %vm203_vm2, %v13793_v57 }
 0x6a8   :  { %10822 = vmatprep.mubr.msk.bf16.mxu0 %vm203_vm2, %v13799_v58 }
 0x6af   :  { %10823 = vmatmul.mubr.msk.bf16.gmra.mrb[176].mxu0 %vm203_vm2, %v13807_v15 }
 0x6b0   :  { %10826 = vmatprep.mubr.msk.bf16.mxu0 %vm203_vm2, %v13813_v7 }
 0x6b7   :  { %10827 = vmatmul.mubr.msk.bf16.gmra.mrb[180].mxu0 %vm203_vm2, %v13821_v12 }
 0x6b8   :  { %10830 = vmatprep.mubr.msk.bf16.mxu0 %vm203_vm2, %v13827_v6 }
 0x6bf   :  { %10831 = vmatmul.mubr.msk.bf16.gmra.mrb[184].mxu0 %vm203_vm2, %v13835_v42 }
 0x6c0   :  { %10834 = vmatprep.mubr.msk.bf16.mxu0 %vm203_vm2, %v13841_v4 }
 0x6c7   :  { %10835 = vmatmul.mubr.msk.bf16.gmra.mrb[188].mxu0 %vm203_vm2, %v13849_v30 }
 0x6c8   :  { %10838 = vmatprep.mubr.msk.bf16.mxu0 %vm203_vm2, %v13855_v52 }
 0x6cf   :  { %10839 = vmatmul.mubr.msk.bf16.gmra.mrb[192].mxu0 %vm203_vm2, %v13863_v27 }
 0x6d0   :  { %10842 = vmatprep.mubr.msk.bf16.mxu0 %vm203_vm2, %v13869_v16 }
 0x6d7   :  { %10843 = vmatmul.mubr.msk.bf16.gmra.mrb[196].mxu0 %vm203_vm2, %v13875_v1 }
 0x6d8   :  { %10846 = vmatprep.mubr.msk.bf16.mxu0 %vm203_vm2, %v13880_v14 }
 0x6df   :  { %10847 = vmatmul.mubr.msk.bf16.gmra.mrb[200].mxu0 %vm203_vm2, %v13884_v9  ;;  %v12049_v9 = vld [vmem:[#allocation15 + $0x10] sm:$0xff]  }
 0x6e0   :  { %10850 = vmatprep.mubr.msk.bf16.mxu0 %vm203_vm2, %v13890_v13 }
 0x6e7   :  { %10851 = vmatmul.mubr.msk.bf16.gmra.mrb[204].mxu0 %vm203_vm2, %v14006_v45 }
 0x75a   :  { %v10804_v47 = vpop.f32.mrb[156].mxu0 }
 0x75b   :  { %v4810_v55 = vadd.f32 %v10804_v47, %v14013_v50  ;;  %v4542_v60 = vpop.f32.mrb[157].mxu0 }
 0x75c   :  { %v4808_v5 = vadd.f32 %v14013_v50, %v4542_v60  ;;  %v10805_v34 = vpop.f32.mrb[158].mxu0 }
 0x75d   :  { %v4914_v20 = vmul.f32 0.01, %v4810_v55  ;;  %v4811_v57 = vadd.f32 %v10805_v34, %v14013_v50  ;;  %v4545_v58 = vpop.f32.mrb[159].mxu0  ;;  %vm4862_vm9 = vcmp.ge.f32.partialorder %v4810_v55, 0.0 }
 0x75e   :  { %v4912_v15 = vmul.f32 0.01, %v4808_v5  ;;  %v4809_v7 = vadd.f32 %v14013_v50, %v4545_v58  ;;  %vm4860_vm10 = vcmp.ge.f32.partialorder %v4808_v5, 0.0 }
 0x75f   :  { %vm4863_vm11 = vcmp.ge.f32.partialorder %v4811_v57, 0.0  ;;  %v4915_v12 = vmul.f32 0.01, %v4811_v57  ;;  %v4966_v42 = vsel %vm4862_vm9, %v4810_v55, %v4914_v20 }
 0x760   :  { %vm4861_vm12 = vcmp.ge.f32.partialorder %v4809_v7, 0.0  ;;  %v4913_v6 = vmul.f32 0.01, %v4809_v7  ;;  %v4964_v30 = vsel %vm4860_vm10, %v4808_v5, %v4912_v15  ;;  %v12050_v5 = vld [vmem:[#allocation15 + $0x18] sm:$0xff]  }
 0x761   :  { %v4967_v4 = vsel %vm4863_vm11, %v4811_v57, %v4915_v12 }
 0x762   :  { %v5017_v36 = vpack.c.bf16 %v4967_v4, %v4966_v42  ;;  %v4965_v46 = vsel %vm4861_vm12, %v4809_v7, %v4913_v6  ;;  %v10808_v26 = vpop.f32.mrb[160].mxu0  ;;  %v14054_v42 = vld [vmem:[#allocation15 + $0x40] sm:$0xff]  }
 0x763   :  { %v5016_v52 = vpack.c.bf16 %v4965_v46, %v4964_v30  ;;  %v4814_v8 = vadd.f32 %v10808_v26, %v14013_v50  ;;  %v4558_v54 = vpop.f32.mrb[161].mxu0 }
 0x764   :  { %5043 = vst.msk [vmem:[#allocation2 + $0x10] sm:$0xff] %vm203_vm2, %v5017_v36  ;;  %v4812_v61 = vadd.f32 %v14013_v50, %v4558_v54  ;;  %v10809_v31 = vpop.f32.mrb[162].mxu0 }
 0x765   :  { %5042 = vst.msk [vmem:[#allocation2 + $0x8] sm:$0xff] %vm203_vm2, %v5016_v52  ;;  %v4918_v2 = vmul.f32 0.01, %v4814_v8  ;;  %v4815_v32 = vadd.f32 %v10809_v31, %v14013_v50  ;;  %v4561_v38 = vpop.f32.mrb[163].mxu0  ;;  %vm4866_vm13 = vcmp.ge.f32.partialorder %v4814_v8, 0.0 }
 0x766   :  { %v4916_v18 = vmul.f32 0.01, %v4812_v61  ;;  %v4813_v19 = vadd.f32 %v14013_v50, %v4561_v38  ;;  %vm4864_vm14 = vcmp.ge.f32.partialorder %v4812_v61, 0.0 }
 0x767   :  { %vm4867_vm15 = vcmp.ge.f32.partialorder %v4815_v32, 0.0  ;;  %v4919_v22 = vmul.f32 0.01, %v4815_v32  ;;  %v4970_v25 = vsel %vm4866_vm13, %v4814_v8, %v4918_v2 }
 0x768   :  { %vm4865_vm0 = vcmp.ge.f32.partialorder %v4813_v19, 0.0  ;;  %v4917_v23 = vmul.f32 0.01, %v4813_v19  ;;  %v4968_v49 = vsel %vm4864_vm14, %v4812_v61, %v4916_v18 }
 0x769   :  { %v4971_v48 = vsel %vm4867_vm15, %v4815_v32, %v4919_v22 }
 0x76a   :  { %v5019_v56 = vpack.c.bf16 %v4971_v48, %v4970_v25  ;;  %v4969_v27 = vsel %vm4865_vm0, %v4813_v19, %v4917_v23  ;;  %v10812_v11 = vpop.f32.mrb[164].mxu0 }
 0x76b   :  { %v5018_v17 = vpack.c.bf16 %v4969_v27, %v4968_v49  ;;  %v4818_v35 = vadd.f32 %v10812_v11, %v14013_v50  ;;  %v4574_v16 = vpop.f32.mrb[165].mxu0  ;;  %v14034_v3 = vld [vmem:[#allocation2 + $0x10] sm:$0xff] }
 0x76c   :  { %5045 = vst.msk [vmem:[#allocation2 + $0x20] sm:$0xff] %vm203_vm2, %v5019_v56  ;;  %v4816_v21 = vadd.f32 %v14013_v50, %v4574_v16  ;;  %v10813_v0 = vpop.f32.mrb[166].mxu0  ;;  %v14028_v63 = vld [vmem:[#allocation2 + $0x8] sm:$0xff] }
 0x76d   :  { %5044 = vst.msk [vmem:[#allocation2 + $0x18] sm:$0xff] %vm203_vm2, %v5018_v17  ;;  %v4922_v41 = vmul.f32 0.01, %v4818_v35  ;;  %v4819_v43 = vadd.f32 %v10813_v0, %v14013_v50  ;;  %v4577_v29 = vpop.f32.mrb[167].mxu0  ;;  %10862 = vmatprep.mubr.msk.bf16.mxu1 %vm203_vm2, %v14028_v63  ;;  %vm4870_vm1 = vcmp.ge.f32.partialorder %v4818_v35, 0.0 }
 0x76e   :  { %v4920_v39 = vmul.f32 0.01, %v4816_v21  ;;  %v4817_v51 = vadd.f32 %v14013_v50, %v4577_v29  ;;  %10863 = vmatmul.mubr.msk.bf16.vlgmr.msra.gmra.mrb[104].mxu1 %vm203_vm2, %v14034_v3  ;;  %vm4868_vm3 = vcmp.ge.f32.partialorder %v4816_v21, 0.0 }
 0x76f   :  { %vm4871_vm4 = vcmp.ge.f32.partialorder %v4819_v43, 0.0  ;;  %v4923_v1 = vmul.f32 0.01, %v4819_v43  ;;  %10915 = vmatpush3.bf16.msra.mxu1 %v14010_v40  ;;  %v4974_v13 = vsel %vm4870_vm1, %v4818_v35, %v4922_v41 }
 0x770   :  { %vm4869_vm5 = vcmp.ge.f32.partialorder %v4817_v51, 0.0  ;;  %v4921_v14 = vmul.f32 0.01, %v4817_v51  ;;  %10916 = vmatprep.subr.bf16.mxu1 %v12048_v37  ;;  %v4972_v33 = vsel %vm4868_vm3, %v4816_v21, %v4920_v39 }
 0x771   :  { %v4975_v59 = vsel %vm4871_vm4, %v4819_v43, %v4923_v1 }
 0x772   :  { %v5021_v24 = vpack.c.bf16 %v4975_v59, %v4974_v13  ;;  %v4973_v62 = vsel %vm4869_vm5, %v4817_v51, %v4921_v14  ;;  %v10816_v44 = vpop.f32.mrb[168].mxu0 }
 0x773   :  { %v5020_v53 = vpack.c.bf16 %v4973_v62, %v4972_v33  ;;  %v4822_v28 = vadd.f32 %v10816_v44, %v14013_v50  ;;  %v4590_v47 = vpop.f32.mrb[169].mxu0  ;;  %10917 = vmatpush3.bf16.msra.mxu1 %v12048_v37  ;;  %v14049_v58 = vld [vmem:[#allocation2 + $0x20] sm:$0xff] }
 0x774   :  { %5047 = vst.msk [vmem:[#allocation2 + $0x30] sm:$0xff] %vm203_vm2, %v5021_v24  ;;  %v4820_v55 = vadd.f32 %v14013_v50, %v4590_v47  ;;  %v10817_v40 = vpop.f32.mrb[170].mxu0  ;;  %v14043_v60 = vld [vmem:[#allocation2 + $0x18] sm:$0xff]  ;;  %10918 = vmatprep.subr.bf16.mxu1 %v12049_v9 }
 0x775   :  { %5046 = vst.msk [vmem:[#allocation2 + $0x28] sm:$0xff] %vm203_vm2, %v5020_v53  ;;  %v4926_v34 = vmul.f32 0.01, %v4822_v28  ;;  %v4823_v20 = vadd.f32 %v10817_v40, %v14013_v50  ;;  %v4593_v57 = vpop.f32.mrb[171].mxu0  ;;  %10866 = vmatprep.mubr.msk.bf16.mxu1 %vm203_vm2, %v14043_v60  ;;  %vm4874_vm6 = vcmp.ge.f32.partialorder %v4822_v28, 0.0 }
 0x776   :  { %v4924_v15 = vmul.f32 0.01, %v4820_v55  ;;  %v4821_v7 = vadd.f32 %v14013_v50, %v4593_v57  ;;  %10867 = vmatmul.mubr.msk.bf16.gmra.mrb[108].mxu1 %vm203_vm2, %v14049_v58  ;;  %vm4872_vm7 = vcmp.ge.f32.partialorder %v4820_v55, 0.0 }
 0x777   :  { %vm4875_vm8 = vcmp.ge.f32.partialorder %v4823_v20, 0.0  ;;  %v4927_v12 = vmul.f32 0.01, %v4823_v20  ;;  %10919 = vmatpush3.bf16.msra.mxu1 %v12049_v9  ;;  %v4978_v4 = vsel %vm4874_vm6, %v4822_v28, %v4926_v34 }
 0x778   :  { %vm4873_vm9 = vcmp.ge.f32.partialorder %v4821_v7, 0.0  ;;  %v4925_v6 = vmul.f32 0.01, %v4821_v7  ;;  %10920 = vmatprep.subr.bf16.mxu1 %v12050_v5  ;;  %v4976_v36 = vsel %vm4872_vm7, %v4820_v55, %v4924_v15 }
 0x779   :  { %v4979_v30 = vsel %vm4875_vm8, %v4823_v20, %v4927_v12 }
 0x77a   :  { %v5023_v46 = vpack.c.bf16 %v4979_v30, %v4978_v4  ;;  %v4977_v26 = vsel %vm4873_vm9, %v4821_v7, %v4925_v6  ;;  %v10820_v52 = vpop.f32.mrb[172].mxu0 }
 0x77b   :  { %v5022_v8 = vpack.c.bf16 %v4977_v26, %v4976_v36  ;;  %v4826_v54 = vadd.f32 %v10820_v52, %v14013_v50  ;;  %v4606_v61 = vpop.f32.mrb[173].mxu0  ;;  %10921 = vmatpush3.bf16.msra.mxu1 %v12050_v5  ;;  %v14066_v22 = vld [vmem:[#allocation2 + $0x30] sm:$0xff] }
 0x77c   :  { %5049 = vst.msk [vmem:[#allocation2 + $0x40] sm:$0xff] %vm203_vm2, %v5023_v46  ;;  %v4824_v31 = vadd.f32 %v14013_v50, %v4606_v61  ;;  %v10821_v2 = vpop.f32.mrb[174].mxu0  ;;  %v14059_v32 = vld [vmem:[#allocation2 + $0x28] sm:$0xff]  ;;  %10974 = vmatprep.subr.bf16.mxu1 %v14054_v42 }
 0x77d   :  { %5048 = vst.msk [vmem:[#allocation2 + $0x38] sm:$0xff] %vm203_vm2, %v5022_v8  ;;  %v4930_v38 = vmul.f32 0.01, %v4826_v54  ;;  %v4827_v18 = vadd.f32 %v10821_v2, %v14013_v50  ;;  %v4609_v19 = vpop.f32.mrb[175].mxu0  ;;  %10870 = vmatprep.mubr.msk.bf16.mxu1 %vm203_vm2, %v14059_v32  ;;  %vm4878_vm10 = vcmp.ge.f32.partialorder %v4826_v54, 0.0 }
 0x77e   :  { %v4928_v23 = vmul.f32 0.01, %v4824_v31  ;;  %v4825_v25 = vadd.f32 %v14013_v50, %v4609_v19  ;;  %10871 = vmatmul.mubr.msk.bf16.gmra.mrb[112].mxu1 %vm203_vm2, %v14066_v22  ;;  %vm4876_vm11 = vcmp.ge.f32.partialorder %v4824_v31, 0.0 }
 0x77f   :  { %vm4879_vm12 = vcmp.ge.f32.partialorder %v4827_v18, 0.0  ;;  %v4931_v48 = vmul.f32 0.01, %v4827_v18  ;;  %v4982_v56 = vsel %vm4878_vm10, %v4826_v54, %v4930_v38 }
 0x780   :  { %vm4877_vm13 = vcmp.ge.f32.partialorder %v4825_v25, 0.0  ;;  %v4929_v49 = vmul.f32 0.01, %v4825_v25  ;;  %v4980_v11 = vsel %vm4876_vm11, %v4824_v31, %v4928_v23 }
 0x781   :  { %v4983_v27 = vsel %vm4879_vm12, %v4827_v18, %v4931_v48 }
 0x782   :  { %v5025_v17 = vpack.c.bf16 %v4983_v27, %v4982_v56  ;;  %v4981_v35 = vsel %vm4877_vm13, %v4825_v25, %v4929_v49  ;;  %v10824_v16 = vpop.f32.mrb[176].mxu0 }
 0x783   :  { %v5024_v21 = vpack.c.bf16 %v4981_v35, %v4980_v11  ;;  %v4830_v0 = vadd.f32 %v10824_v16, %v14013_v50  ;;  %v4622_v37 = vpop.f32.mrb[177].mxu0  ;;  %v14080_v14 = vld [vmem:[#allocation2 + $0x40] sm:$0xff] }
 0x784   :  { %5051 = vst.msk [vmem:[#allocation2 + $0x50] sm:$0xff] %vm203_vm2, %v5025_v17  ;;  %v4828_v41 = vadd.f32 %v14013_v50, %v4622_v37  ;;  %v10825_v43 = vpop.f32.mrb[178].mxu0  ;;  %v14074_v29 = vld [vmem:[#allocation2 + $0x38] sm:$0xff] }
 0x785   :  { %5050 = vst.msk [vmem:[#allocation2 + $0x48] sm:$0xff] %vm203_vm2, %v5024_v21  ;;  %v4934_v39 = vmul.f32 0.01, %v4830_v0  ;;  %v4831_v51 = vadd.f32 %v10825_v43, %v14013_v50  ;;  %v4625_v1 = vpop.f32.mrb[179].mxu0  ;;  %10874 = vmatprep.mubr.msk.bf16.mxu1 %vm203_vm2, %v14074_v29  ;;  %vm4882_vm14 = vcmp.ge.f32.partialorder %v4830_v0, 0.0 }
 0x786   :  { %v4932_v9 = vmul.f32 0.01, %v4828_v41  ;;  %v4829_v13 = vadd.f32 %v14013_v50, %v4625_v1  ;;  %10875 = vmatmul.mubr.msk.bf16.gmra.mrb[116].mxu1 %vm203_vm2, %v14080_v14  ;;  %vm4880_vm15 = vcmp.ge.f32.partialorder %v4828_v41, 0.0 }
 0x787   :  { %vm4883_vm0 = vcmp.ge.f32.partialorder %v4831_v51, 0.0  ;;  %v4935_v59 = vmul.f32 0.01, %v4831_v51  ;;  %v4986_v24 = vsel %vm4882_vm14, %v4830_v0, %v4934_v39 }
 0x788   :  { %vm4881_vm1 = vcmp.ge.f32.partialorder %v4829_v13, 0.0  ;;  %v4933_v33 = vmul.f32 0.01, %v4829_v13  ;;  %v4984_v44 = vsel %vm4880_vm15, %v4828_v41, %v4932_v9 }
 0x789   :  { %v4987_v62 = vsel %vm4883_vm0, %v4831_v51, %v4935_v59 }
 0x78a   :  { %v5027_v53 = vpack.c.bf16 %v4987_v62, %v4986_v24  ;;  %v4985_v28 = vsel %vm4881_vm1, %v4829_v13, %v4933_v33  ;;  %v10828_v47 = vpop.f32.mrb[180].mxu0 }
 0x78b   :  { %v5026_v55 = vpack.c.bf16 %v4985_v28, %v4984_v44  ;;  %v4834_v40 = vadd.f32 %v10828_v47, %v14013_v50  ;;  %v4638_v5 = vpop.f32.mrb[181].mxu0  ;;  %v14094_v6 = vld [vmem:[#allocation2 + $0x50] sm:$0xff] }
 0x78c   :  { %5053 = vst.msk [vmem:[#allocation2 + $0x60] sm:$0xff] %vm203_vm2, %v5027_v53  ;;  %v4832_v34 = vadd.f32 %v14013_v50, %v4638_v5  ;;  %v10829_v20 = vpop.f32.mrb[182].mxu0  ;;  %v14088_v57 = vld [vmem:[#allocation2 + $0x48] sm:$0xff] }
 0x78d   :  { %5052 = vst.msk [vmem:[#allocation2 + $0x58] sm:$0xff] %vm203_vm2, %v5026_v55  ;;  %v4938_v15 = vmul.f32 0.01, %v4834_v40  ;;  %v4835_v7 = vadd.f32 %v10829_v20, %v14013_v50  ;;  %v4641_v12 = vpop.f32.mrb[183].mxu0  ;;  %10878 = vmatprep.mubr.msk.bf16.mxu1 %vm203_vm2, %v14088_v57  ;;  %vm4886_vm3 = vcmp.ge.f32.partialorder %v4834_v40, 0.0 }
 0x78e   :  { %v4936_v4 = vmul.f32 0.01, %v4832_v34  ;;  %v4833_v30 = vadd.f32 %v14013_v50, %v4641_v12  ;;  %10879 = vmatmul.mubr.msk.bf16.gmra.mrb[120].mxu1 %vm203_vm2, %v14094_v6  ;;  %vm4884_vm4 = vcmp.ge.f32.partialorder %v4832_v34, 0.0 }
 0x78f   :  { %vm4887_vm5 = vcmp.ge.f32.partialorder %v4835_v7, 0.0  ;;  %v4939_v36 = vmul.f32 0.01, %v4835_v7  ;;  %v4990_v26 = vsel %vm4886_vm3, %v4834_v40, %v4938_v15 }
 0x790   :  { %vm4885_vm6 = vcmp.ge.f32.partialorder %v4833_v30, 0.0  ;;  %v4937_v46 = vmul.f32 0.01, %v4833_v30  ;;  %v4988_v8 = vsel %vm4884_vm4, %v4832_v34, %v4936_v4 }
 0x791   :  { %v4991_v52 = vsel %vm4887_vm5, %v4835_v7, %v4939_v36 }
 0x792   :  { %v5029_v54 = vpack.c.bf16 %v4991_v52, %v4990_v26  ;;  %v4989_v61 = vsel %vm4885_vm6, %v4833_v30, %v4937_v46  ;;  %v10832_v31 = vpop.f32.mrb[184].mxu0 }
 0x793   :  { %v5028_v2 = vpack.c.bf16 %v4989_v61, %v4988_v8  ;;  %v4838_v38 = vadd.f32 %v10832_v31, %v14013_v50  ;;  %v4654_v18 = vpop.f32.mrb[185].mxu0  ;;  %v14108_v27 = vld [vmem:[#allocation2 + $0x60] sm:$0xff] }
 0x794   :  { %5055 = vst.msk [vmem:[#allocation2 + $0x70] sm:$0xff] %vm203_vm2, %v5029_v54  ;;  %v4836_v19 = vadd.f32 %v14013_v50, %v4654_v18  ;;  %v10833_v23 = vpop.f32.mrb[186].mxu0  ;;  %v14102_v25 = vld [vmem:[#allocation2 + $0x58] sm:$0xff] }
 0x795   :  { %5054 = vst.msk [vmem:[#allocation2 + $0x68] sm:$0xff] %vm203_vm2, %v5028_v2  ;;  %v4942_v48 = vmul.f32 0.01, %v4838_v38  ;;  %v4839_v49 = vadd.f32 %v10833_v23, %v14013_v50  ;;  %v4657_v56 = vpop.f32.mrb[187].mxu0  ;;  %10882 = vmatprep.mubr.msk.bf16.mxu1 %vm203_vm2, %v14102_v25  ;;  %vm4890_vm7 = vcmp.ge.f32.partialorder %v4838_v38, 0.0 }
 0x796   :  { %v4940_v11 = vmul.f32 0.01, %v4836_v19  ;;  %v4837_v17 = vadd.f32 %v14013_v50, %v4657_v56  ;;  %10883 = vmatmul.mubr.msk.bf16.gmra.mrb[124].mxu1 %vm203_vm2, %v14108_v27  ;;  %vm4888_vm8 = vcmp.ge.f32.partialorder %v4836_v19, 0.0 }
 0x797   :  { %vm4891_vm9 = vcmp.ge.f32.partialorder %v4839_v49, 0.0  ;;  %v4943_v35 = vmul.f32 0.01, %v4839_v49  ;;  %v4994_v21 = vsel %vm4890_vm7, %v4838_v38, %v4942_v48 }
 0x798   :  { %vm4889_vm10 = vcmp.ge.f32.partialorder %v4837_v17, 0.0  ;;  %v4941_v16 = vmul.f32 0.01, %v4837_v17  ;;  %v4992_v37 = vsel %vm4888_vm8, %v4836_v19, %v4940_v11 }
 0x799   :  { %v4995_v0 = vsel %vm4891_vm9, %v4839_v49, %v4943_v35 }
 0x79a   :  { %v5031_v41 = vpack.c.bf16 %v4995_v0, %v4994_v21  ;;  %v4993_v43 = vsel %vm4889_vm10, %v4837_v17, %v4941_v16  ;;  %v10836_v39 = vpop.f32.mrb[188].mxu0 }
 0x79b   :  { %v5030_v51 = vpack.c.bf16 %v4993_v43, %v4992_v37  ;;  %v4842_v1 = vadd.f32 %v10836_v39, %v14013_v50  ;;  %v4670_v9 = vpop.f32.mrb[189].mxu0  ;;  %v14122_v53 = vld [vmem:[#allocation2 + $0x70] sm:$0xff] }
 0x79c   :  { %5057 = vst.msk [vmem:[#allocation2 + $0x80] sm:$0xff] %vm203_vm2, %v5031_v41  ;;  %v4840_v13 = vadd.f32 %v14013_v50, %v4670_v9  ;;  %v10837_v59 = vpop.f32.mrb[190].mxu0  ;;  %v14116_v33 = vld [vmem:[#allocation2 + $0x68] sm:$0xff] }
 0x79d   :  { %5056 = vst.msk [vmem:[#allocation2 + $0x78] sm:$0xff] %vm203_vm2, %v5030_v51  ;;  %v4946_v24 = vmul.f32 0.01, %v4842_v1  ;;  %v4843_v62 = vadd.f32 %v10837_v59, %v14013_v50  ;;  %v4673_v44 = vpop.f32.mrb[191].mxu0  ;;  %10886 = vmatprep.mubr.msk.bf16.mxu1 %vm203_vm2, %v14116_v33  ;;  %vm4894_vm11 = vcmp.ge.f32.partialorder %v4842_v1, 0.0 }
 0x79e   :  { %v4944_v28 = vmul.f32 0.01, %v4840_v13  ;;  %v4841_v47 = vadd.f32 %v14013_v50, %v4673_v44  ;;  %10887 = vmatmul.mubr.msk.bf16.gmra.mrb[128].mxu1 %vm203_vm2, %v14122_v53  ;;  %vm4892_vm12 = vcmp.ge.f32.partialorder %v4840_v13, 0.0 }
 0x79f   :  { %vm4895_vm13 = vcmp.ge.f32.partialorder %v4843_v62, 0.0  ;;  %v4947_v55 = vmul.f32 0.01, %v4843_v62  ;;  %v4998_v5 = vsel %vm4894_vm11, %v4842_v1, %v4946_v24 }
 0x7a0   :  { %vm4893_vm14 = vcmp.ge.f32.partialorder %v4841_v47, 0.0  ;;  %v4945_v40 = vmul.f32 0.01, %v4841_v47  ;;  %v4996_v20 = vsel %vm4892_vm12, %v4840_v13, %v4944_v28 }
 0x7a1   :  { %v4999_v34 = vsel %vm4895_vm13, %v4843_v62, %v4947_v55 }
 0x7a2   :  { %v5033_v15 = vpack.c.bf16 %v4999_v34, %v4998_v5  ;;  %v4997_v7 = vsel %vm4893_vm14, %v4841_v47, %v4945_v40  ;;  %v10840_v12 = vpop.f32.mrb[192].mxu0 }
 0x7a3   :  { %v5032_v4 = vpack.c.bf16 %v4997_v7, %v4996_v20  ;;  %v4846_v30 = vadd.f32 %v10840_v12, %v14013_v50  ;;  %v4686_v36 = vpop.f32.mrb[193].mxu0  ;;  %v14136_v31 = vld [vmem:[#allocation2 + $0x80] sm:$0xff] }
 0x7a4   :  { %5059 = vst.msk [vmem:[#allocation2 + $0x90] sm:$0xff] %vm203_vm2, %v5033_v15  ;;  %v4844_v46 = vadd.f32 %v14013_v50, %v4686_v36  ;;  %v10841_v26 = vpop.f32.mrb[194].mxu0  ;;  %v14130_v52 = vld [vmem:[#allocation2 + $0x78] sm:$0xff] }
 0x7a5   :  { %5058 = vst.msk [vmem:[#allocation2 + $0x88] sm:$0xff] %vm203_vm2, %v5032_v4  ;;  %v4950_v8 = vmul.f32 0.01, %v4846_v30  ;;  %v4847_v54 = vadd.f32 %v10841_v26, %v14013_v50  ;;  %v4689_v61 = vpop.f32.mrb[195].mxu0  ;;  %10890 = vmatprep.mubr.msk.bf16.mxu1 %vm203_vm2, %v14130_v52  ;;  %vm4898_vm15 = vcmp.ge.f32.partialorder %v4846_v30, 0.0 }
 0x7a6   :  { %v4948_v2 = vmul.f32 0.01, %v4844_v46  ;;  %v4845_v38 = vadd.f32 %v14013_v50, %v4689_v61  ;;  %10891 = vmatmul.mubr.msk.bf16.gmra.mrb[132].mxu1 %vm203_vm2, %v14136_v31  ;;  %vm4896_vm0 = vcmp.ge.f32.partialorder %v4844_v46, 0.0 }
 0x7a7   :  { %vm4899_vm1 = vcmp.ge.f32.partialorder %v4847_v54, 0.0  ;;  %v4951_v18 = vmul.f32 0.01, %v4847_v54  ;;  %v5002_v23 = vsel %vm4898_vm15, %v4846_v30, %v4950_v8 }
 0x7a8   :  { %vm4897_vm3 = vcmp.ge.f32.partialorder %v4845_v38, 0.0  ;;  %v4949_v19 = vmul.f32 0.01, %v4845_v38  ;;  %v5000_v49 = vsel %vm4896_vm0, %v4844_v46, %v4948_v2  ;;  %vm12464_vm0 = vmmov 0  }
 0x7a9   :  { %v5003_v48 = vsel %vm4899_vm1, %v4847_v54, %v4951_v18 }
 0x7aa   :  { %v5035_v56 = vpack.c.bf16 %v5003_v48, %v5002_v23  ;;  %v5001_v11 = vsel %vm4897_vm3, %v4845_v38, %v4949_v19  ;;  %v10844_v17 = vpop.f32.mrb[196].mxu0 }
 0x7ab   :  { %v5034_v35 = vpack.c.bf16 %v5001_v11, %v5000_v49  ;;  %v4850_v16 = vadd.f32 %v10844_v17, %v14013_v50  ;;  %v4702_v21 = vpop.f32.mrb[197].mxu0  ;;  %v14150_v1 = vld [vmem:[#allocation2 + $0x90] sm:$0xff] }
 0x7ac   :  { %5061 = vst.msk [vmem:[#allocation2 + $0xa0] sm:$0xff] %vm203_vm2, %v5035_v56  ;;  %v4848_v0 = vadd.f32 %v14013_v50, %v4702_v21  ;;  %v10845_v37 = vpop.f32.mrb[198].mxu0  ;;  %v14144_v41 = vld [vmem:[#allocation2 + $0x88] sm:$0xff] }
 0x7ad   :  { %5060 = vst.msk [vmem:[#allocation2 + $0x98] sm:$0xff] %vm203_vm2, %v5034_v35  ;;  %v4954_v43 = vmul.f32 0.01, %v4850_v16  ;;  %v4851_v39 = vadd.f32 %v10845_v37, %v14013_v50  ;;  %v4705_v51 = vpop.f32.mrb[199].mxu0  ;;  %10894 = vmatprep.mubr.msk.bf16.mxu1 %vm203_vm2, %v14144_v41  ;;  %vm4902_vm4 = vcmp.ge.f32.partialorder %v4850_v16, 0.0 }
 0x7ae   :  { %v4952_v9 = vmul.f32 0.01, %v4848_v0  ;;  %v4849_v13 = vadd.f32 %v14013_v50, %v4705_v51  ;;  %10895 = vmatmul.mubr.msk.bf16.gmra.mrb[136].mxu1 %vm203_vm2, %v14150_v1  ;;  %vm4900_vm5 = vcmp.ge.f32.partialorder %v4848_v0, 0.0 }
 0x7af   :  { %vm4903_vm6 = vcmp.ge.f32.partialorder %v4851_v39, 0.0  ;;  %v4955_v59 = vmul.f32 0.01, %v4851_v39  ;;  %v5006_v62 = vsel %vm4902_vm4, %v4850_v16, %v4954_v43 }
 0x7b0   :  { %vm4901_vm7 = vcmp.ge.f32.partialorder %v4849_v13, 0.0  ;;  %v4953_v24 = vmul.f32 0.01, %v4849_v13  ;;  %v5004_v28 = vsel %vm4900_vm5, %v4848_v0, %v4952_v9 }
 0x7b1   :  { %v5007_v44 = vsel %vm4903_vm6, %v4851_v39, %v4955_v59 }
 0x7b2   :  { %v5037_v47 = vpack.c.bf16 %v5007_v44, %v5006_v62  ;;  %v5005_v55 = vsel %vm4901_vm7, %v4849_v13, %v4953_v24  ;;  %v10848_v40 = vpop.f32.mrb[200].mxu0 }
 0x7b3   :  { %v5036_v5 = vpack.c.bf16 %v5005_v55, %v5004_v28  ;;  %v4854_v34 = vadd.f32 %v10848_v40, %v14013_v50  ;;  %v4718_v20 = vpop.f32.mrb[201].mxu0  ;;  %v14164_v46 = vld [vmem:[#allocation2 + $0xa0] sm:$0xff] }
 0x7b4   :  { %5063 = vst.msk [vmem:[#allocation2 + $0xb0] sm:$0xff] %vm203_vm2, %v5037_v47  ;;  %v4852_v15 = vadd.f32 %v14013_v50, %v4718_v20  ;;  %v10849_v7 = vpop.f32.mrb[202].mxu0  ;;  %v14158_v12 = vld [vmem:[#allocation2 + $0x98] sm:$0xff] }
 0x7b5   :  { %5062 = vst.msk [vmem:[#allocation2 + $0xa8] sm:$0xff] %vm203_vm2, %v5036_v5  ;;  %v4958_v4 = vmul.f32 0.01, %v4854_v34  ;;  %v4855_v30 = vadd.f32 %v10849_v7, %v14013_v50  ;;  %v4721_v36 = vpop.f32.mrb[203].mxu0  ;;  %10898 = vmatprep.mubr.msk.bf16.mxu1 %vm203_vm2, %v14158_v12  ;;  %vm4906_vm8 = vcmp.ge.f32.partialorder %v4854_v34, 0.0  ;;  %v12053_v20 = vld [vmem:[#allocation15 + $0x50] sm:$0xff]  }
 0x7b6   :  { %v4956_v26 = vmul.f32 0.01, %v4852_v15  ;;  %v4853_v8 = vadd.f32 %v14013_v50, %v4721_v36  ;;  %10899 = vmatmul.mubr.msk.bf16.gmra.mrb[140].mxu1 %vm203_vm2, %v14164_v46  ;;  %vm4904_vm9 = vcmp.ge.f32.partialorder %v4852_v15, 0.0  ;;  %v12058_v7 = vld [vmem:[%s14927_s13 + $0x18] sm:$0xff]  }
 0x7b7   :  { %vm4907_vm10 = vcmp.ge.f32.partialorder %v4855_v30, 0.0  ;;  %v4959_v54 = vmul.f32 0.01, %v4855_v30  ;;  %v5010_v2 = vsel %vm4906_vm8, %v4854_v34, %v4958_v4  ;;  %v12052_v34 = vld [vmem:[#allocation15 + $0x48] sm:$0xff]  }
 0x7b8   :  { %vm4905_vm11 = vcmp.ge.f32.partialorder %v4853_v8, 0.0  ;;  %v4957_v61 = vmul.f32 0.01, %v4853_v8  ;;  %v5008_v18 = vsel %vm4904_vm9, %v4852_v15, %v4956_v26  ;;  %v12054_v15 = vld [vmem:[#allocation15 + $0x58] sm:$0xff]  }
 0x7b9   :  { %v5011_v38 = vsel %vm4907_vm10, %v4855_v30, %v4959_v54 }
 0x7ba   :  { %v5039_v19 = vpack.c.bf16 %v5011_v38, %v5010_v2  ;;  %v5009_v23 = vsel %vm4905_vm11, %v4853_v8, %v4957_v61  ;;  %v10852_v48 = vpop.f32.mrb[204].mxu0 }
 0x7bb   :  { %v5038_v49 = vpack.c.bf16 %v5009_v23, %v5008_v18  ;;  %v4858_v56 = vadd.f32 %v10852_v48, %v14013_v50  ;;  %v4734_v11 = vpop.f32.mrb[205].mxu0  ;;  %v14178_v43 = vld [vmem:[#allocation2 + $0xb0] sm:$0xff] }
 0x7bc   :  { %5065 = vst.msk [vmem:[#allocation2 + $0xc0] sm:$0xff] %vm203_vm2, %v5039_v19  ;;  %v4856_v17 = vadd.f32 %v14013_v50, %v4734_v11  ;;  %v10853_v35 = vpop.f32.mrb[206].mxu0  ;;  %v14172_v16 = vld [vmem:[#allocation2 + $0xa8] sm:$0xff] }
 0x7bd   :  { %5064 = vst.msk [vmem:[#allocation2 + $0xb8] sm:$0xff] %vm203_vm2, %v5038_v49  ;;  %v4962_v21 = vmul.f32 0.01, %v4858_v56  ;;  %v4859_v0 = vadd.f32 %v10853_v35, %v14013_v50  ;;  %v4737_v37 = vpop.f32.mrb[207].mxu0  ;;  %10902 = vmatprep.mubr.msk.bf16.mxu1 %vm203_vm2, %v14172_v16  ;;  %vm4910_vm12 = vcmp.ge.f32.partialorder %v4858_v56, 0.0 }
 0x7be   :  { %v4960_v39 = vmul.f32 0.01, %v4856_v17  ;;  %v4857_v51 = vadd.f32 %v14013_v50, %v4737_v37  ;;  %10903 = vmatmul.mubr.msk.bf16.gmra.mrb[144].mxu1 %vm203_vm2, %v14178_v43  ;;  %vm4908_vm13 = vcmp.ge.f32.partialorder %v4856_v17, 0.0 }
 0x7bf   :  { %vm4911_vm14 = vcmp.ge.f32.partialorder %v4859_v0, 0.0  ;;  %v4963_v9 = vmul.f32 0.01, %v4859_v0  ;;  %v5014_v59 = vsel %vm4910_vm12, %v4858_v56, %v4962_v21 }
 0x7c0   :  { %vm4909_vm15 = vcmp.ge.f32.partialorder %v4857_v51, 0.0  ;;  %v4961_v13 = vmul.f32 0.01, %v4857_v51  ;;  %v5012_v62 = vsel %vm4908_vm13, %v4856_v17, %v4960_v39 }
 0x7c1   :  { %v5015_v24 = vsel %vm4911_vm14, %v4859_v0, %v4963_v9 }
 0x7c2   :  { %v5041_v44 = vpack.c.bf16 %v5015_v24, %v5014_v59  ;;  %v5013_v28 = vsel %vm4909_vm15, %v4857_v51, %v4961_v13 }
 0x7c3   :  { %v5040_v47 = vpack.c.bf16 %v5013_v28, %v5012_v62  ;;  %v14189_v50 = vld [vmem:[#allocation2 + $0xc0] sm:$0xff] }
 0x7c4   :  { %5067 = vst.msk [vmem:[#allocation2 + $0xd0] sm:$0xff] %vm203_vm2, %v5041_v44  ;;  %v14184_v55 = vld [vmem:[#allocation2 + $0xb8] sm:$0xff] }
 0x7c5   :  { %5066 = vst.msk [vmem:[#allocation2 + $0xc8] sm:$0xff] %vm203_vm2, %v5040_v47  ;;  %10906 = vmatprep.mubr.msk.bf16.mxu1 %vm203_vm2, %v14184_v55 }
 0x7c6   :  { %10907 = vmatmul.mubr.msk.bf16.gmra.mrb[148].mxu1 %vm203_vm2, %v14189_v50 }
 0x7cb   :  { %v14197_v5 = vld [vmem:[#allocation2 + $0xd0] sm:$0xff] }
 0x7cc   :  { %v14193_v40 = vld [vmem:[#allocation2 + $0xc8] sm:$0xff] }
 0x7cd   :  { %10910 = vmatprep.mubr.msk.bf16.mxu1 %vm203_vm2, %v14193_v40 }
 0x7ce   :  { %10911 = vmatmul.mubr.msk.bf16.gmra.mrb[152].mxu1 %vm203_vm2, %v14197_v5 }
 0x7cf   :  { %10922 = vmatprep.mubr.msk.bf16.mxu1 %vm203_vm2, %v13886_v10  ;;  %v12055_v10 = vld [vmem:[%s14927_s13] sm:$0xff]  }
 0x7d0   :  { %11034 = vmatprep.subr.bf16.mxu0 %v12055_v10 }
 0x7d1   :  { %11035 = vmatpush3.bf16.msra.mxu0 %v12055_v10 }
 0x7d6   :  { %10923 = vmatmul.mubr.msk.bf16.vlgmr.msra.gmra.mrb[104].mxu1 %vm203_vm2, %v14028_v63  ;;  %v12056_v63 = vld [vmem:[%s14927_s13 + $0x8] sm:$0xff]  }
 0x7d7   :  { %10926 = vmatprep.mubr.msk.bf16.mxu1 %vm203_vm2, %v14034_v3  ;;  %10975 = vmatpush3.bf16.msra.mxu1 %v14054_v42  ;;  %v12057_v42 = vld [vmem:[%s14927_s13 + $0x10] sm:$0xff]  }
 0x7d8   :  { %10976 = vmatprep.subr.bf16.mxu1 %v12052_v34  ;;  %11036 = vmatprep.subr.bf16.mxu0 %v12056_v63 }
 0x7d9   :  { %11037 = vmatpush3.bf16.msra.mxu0 %v12056_v63 }
 0x7da   :  { %11038 = vmatprep.subr.bf16.mxu0 %v12057_v42 }
 0x7db   :  { %10977 = vmatpush3.bf16.msra.mxu1 %v12052_v34 }
 0x7dc   :  { %10978 = vmatprep.subr.bf16.mxu1 %v12053_v20 }
 0x7dd   :  { %11039 = vmatpush3.bf16.msra.mxu0 %v12057_v42 }
 0x7de   :  { %10927 = vmatmul.mubr.msk.bf16.gmra.mrb[108].mxu1 %vm203_vm2, %v14043_v60  ;;  %11040 = vmatprep.subr.bf16.mxu0 %v12058_v7 }
 0x7df   :  { %10930 = vmatprep.mubr.msk.bf16.mxu1 %vm203_vm2, %v14049_v58  ;;  %10979 = vmatpush3.bf16.msra.mxu1 %v12053_v20 }
 0x7e0   :  { %10980 = vmatprep.subr.bf16.mxu1 %v12054_v15 }
 0x7e1   :  { %11041 = vmatpush3.bf16.msra.mxu0 %v12058_v7 }
 0x7e3   :  { %10981 = vmatpush3.bf16.msra.mxu1 %v12054_v15 }
 0x7e6   :  { %10931 = vmatmul.mubr.msk.bf16.gmra.mrb[112].mxu1 %vm203_vm2, %v14059_v32 }
 0x7e7   :  { %10934 = vmatprep.mubr.msk.bf16.mxu1 %vm203_vm2, %v14066_v22 }
 0x7ee   :  { %10935 = vmatmul.mubr.msk.bf16.gmra.mrb[116].mxu1 %vm203_vm2, %v14074_v29 }
 0x7ef   :  { %10938 = vmatprep.mubr.msk.bf16.mxu1 %vm203_vm2, %v14080_v14 }
 0x7f6   :  { %10939 = vmatmul.mubr.msk.bf16.gmra.mrb[120].mxu1 %vm203_vm2, %v14088_v57 }
 0x7f7   :  { %10942 = vmatprep.mubr.msk.bf16.mxu1 %vm203_vm2, %v14094_v6 }
 0x7fe   :  { %10943 = vmatmul.mubr.msk.bf16.gmra.mrb[124].mxu1 %vm203_vm2, %v14102_v25 }
 0x7ff   :  { %10946 = vmatprep.mubr.msk.bf16.mxu1 %vm203_vm2, %v14108_v27 }
 0x806   :  { %10947 = vmatmul.mubr.msk.bf16.gmra.mrb[128].mxu1 %vm203_vm2, %v14116_v33 }
 0x807   :  { %10950 = vmatprep.mubr.msk.bf16.mxu1 %vm203_vm2, %v14122_v53 }
 0x80e   :  { %10951 = vmatmul.mubr.msk.bf16.gmra.mrb[132].mxu1 %vm203_vm2, %v14130_v52 }
 0x80f   :  { %10954 = vmatprep.mubr.msk.bf16.mxu1 %vm203_vm2, %v14136_v31 }
 0x816   :  { %10955 = vmatmul.mubr.msk.bf16.gmra.mrb[136].mxu1 %vm203_vm2, %v14144_v41 }
 0x817   :  { %10958 = vmatprep.mubr.msk.bf16.mxu1 %vm203_vm2, %v14150_v1 }
 0x81e   :  { %10959 = vmatmul.mubr.msk.bf16.gmra.mrb[140].mxu1 %vm203_vm2, %v14158_v12 }
 0x81f   :  { %10962 = vmatprep.mubr.msk.bf16.mxu1 %vm203_vm2, %v14164_v46 }
 0x826   :  { %10963 = vmatmul.mubr.msk.bf16.gmra.mrb[144].mxu1 %vm203_vm2, %v14172_v16 }
 0x827   :  { %10966 = vmatprep.mubr.msk.bf16.mxu1 %vm203_vm2, %v14178_v43 }
 0x82e   :  { %10967 = vmatmul.mubr.msk.bf16.gmra.mrb[148].mxu1 %vm203_vm2, %v14184_v55 }
 0x82f   :  { %10970 = vmatprep.mubr.msk.bf16.mxu1 %vm203_vm2, %v14189_v50 }
 0x836   :  { %10971 = vmatmul.mubr.msk.bf16.gmra.mrb[152].mxu1 %vm203_vm2, %v14193_v40 }
 0x837   :  { %10982 = vmatprep.mubr.msk.bf16.mxu1 %vm203_vm2, %v14034_v3  ;;  %v12059_v3 = vld [vmem:[#allocation19] sm:$0xff]  }
 0x83e   :  { %10983 = vmatmul.mubr.msk.bf16.vlgmr.msra.gmra.mrb[104].mxu1 %vm203_vm2, %v14043_v60  ;;  %v12463_v60 = vmov 0.0  }
 0x83f   :  { %10986 = vmatprep.mubr.msk.bf16.mxu1 %vm203_vm2, %v14049_v58  ;;  %11094 = vmatprep.subr.bf16.mxu1 %v12463_v60  ;;  %v12060_v58 = vld [vmem:[#allocation19 + $0x8] sm:$0xff]  }
 0x840   :  { %11406 = vmatprep.subr.bf16.mxu0 %v12463_v60  ;;  %11095 = vmatpush3.bf16.msra.mxu1 %v12059_v3 }
 0x841   :  { %11096 = vmatprep.subr.bf16.mxu1 %v12463_v60 }
 0x844   :  { %11097 = vmatpush3.bf16.msra.mxu1 %v12060_v58 }
 0x845   :  { %11098 = vmatprep.subr.bf16.mxu1 %v12463_v60 }
 0x846   :  { %10987 = vmatmul.mubr.msk.bf16.gmra.mrb[108].mxu1 %vm203_vm2, %v14059_v32  ;;  %v12061_v32 = vld [vmem:[#allocation19 + $0x10] sm:$0xff]  }
 0x847   :  { %10990 = vmatprep.mubr.msk.bf16.mxu1 %vm203_vm2, %v14066_v22  ;;  %v12062_v22 = vld [vmem:[#allocation19 + $0x18] sm:$0xff]  }
 0x848   :  { %11099 = vmatpush3.bf16.msra.mxu1 %v12061_v32 }
 0x849   :  { %11100 = vmatprep.subr.bf16.mxu1 %v12463_v60 }
 0x84c   :  { %11101 = vmatpush3.bf16.msra.mxu1 %v12062_v22 }
 0x84d   :  { %11106 = vmatprep.subr.bf16.mxu1 %v12463_v60 }
 0x84e   :  { %10991 = vmatmul.mubr.msk.bf16.gmra.mrb[112].mxu1 %vm203_vm2, %v14074_v29  ;;  %v14324_v29 = vld [vmem:[#allocation16] ss:$0 sm:$0xff] }
 0x84f   :  { %10994 = vmatprep.mubr.msk.bf16.mxu1 %vm203_vm2, %v14080_v14 }
 0x856   :  { %10995 = vmatmul.mubr.msk.bf16.gmra.mrb[116].mxu1 %vm203_vm2, %v14088_v57 }
 0x857   :  { %10998 = vmatprep.mubr.msk.bf16.mxu1 %vm203_vm2, %v14094_v6 }
 0x85e   :  { %10999 = vmatmul.mubr.msk.bf16.gmra.mrb[120].mxu1 %vm203_vm2, %v14102_v25 }
 0x85f   :  { %11002 = vmatprep.mubr.msk.bf16.mxu1 %vm203_vm2, %v14108_v27 }
 0x866   :  { %11003 = vmatmul.mubr.msk.bf16.gmra.mrb[124].mxu1 %vm203_vm2, %v14116_v33 }
 0x867   :  { %11006 = vmatprep.mubr.msk.bf16.mxu1 %vm203_vm2, %v14122_v53 }
 0x86e   :  { %11007 = vmatmul.mubr.msk.bf16.gmra.mrb[128].mxu1 %vm203_vm2, %v14130_v52 }
 0x86f   :  { %11010 = vmatprep.mubr.msk.bf16.mxu1 %vm203_vm2, %v14136_v31 }
 0x876   :  { %11011 = vmatmul.mubr.msk.bf16.gmra.mrb[132].mxu1 %vm203_vm2, %v14144_v41 }
 0x877   :  { %11014 = vmatprep.mubr.msk.bf16.mxu1 %vm203_vm2, %v14150_v1 }
 0x87e   :  { %11015 = vmatmul.mubr.msk.bf16.gmra.mrb[136].mxu1 %vm203_vm2, %v14158_v12 }
 0x87f   :  { %11018 = vmatprep.mubr.msk.bf16.mxu1 %vm203_vm2, %v14164_v46 }
 0x886   :  { %11019 = vmatmul.mubr.msk.bf16.gmra.mrb[140].mxu1 %vm203_vm2, %v14172_v16 }
 0x887   :  { %11022 = vmatprep.mubr.msk.bf16.mxu1 %vm203_vm2, %v14178_v43 }
 0x88e   :  { %11023 = vmatmul.mubr.msk.bf16.gmra.mrb[144].mxu1 %vm203_vm2, %v14184_v55 }
 0x88f   :  { %11026 = vmatprep.mubr.msk.bf16.mxu1 %vm203_vm2, %v14189_v50 }
 0x896   :  { %11027 = vmatmul.mubr.msk.bf16.gmra.mrb[148].mxu1 %vm203_vm2, %v14193_v40 }
 0x897   :  { %11030 = vmatprep.mubr.msk.bf16.mxu1 %vm203_vm2, %v14197_v5 }
 0x89e   :  { %11031 = vmatmul.mubr.msk.bf16.gmra.mrb[152].mxu1 %vm203_vm2, %v14006_v45 }
 0x89f   :  { %11102 = vmatprep.mubr.msk.bf16.mxu1 %vm12464_vm0, %v12463_v60 }
 0x911   :  { %v10984_v45 = vpop.f32.mrb[104].mxu1 }
 0x912   :  { %v5794_v14 = vpop.f32.mrb[105].mxu1  ;;  %v6062_v6 = vadd.f32 %v10984_v45, %v14324_v29 }
 0x913   :  { %v10985_v57 = vpop.f32.mrb[106].mxu1  ;;  %v6060_v33 = vadd.f32 %v14324_v29, %v5794_v14 }
 0x914   :  { %v6063_v25 = vadd.f32 %v10985_v57, %v14324_v29  ;;  %v5797_v27 = vpop.f32.mrb[107].mxu1 }
 0x915   :  { %v6061_v53 = vadd.f32 %v14324_v29, %v5797_v27 }
 0x916   :  { %v6113_v52 = vpack.c.bf16 %v6063_v25, %v6062_v6 }
 0x917   :  { %v6112_v31 = vpack.c.bf16 %v6061_v53, %v6060_v33 }
 0x919   :  { %v10988_v41 = vpop.f32.mrb[108].mxu1  ;;  %11042 = vmatprep.mubr.msk.bf16.mxu0 %vm203_vm2, %v6112_v31 }
 0x91a   :  { %v5810_v1 = vpop.f32.mrb[109].mxu1  ;;  %11043 = vmatmul.mubr.msk.bf16.vlgmr.msra.gmra.mrb[208].mxu0 %vm203_vm2, %v6113_v52  ;;  %v6066_v4 = vadd.f32 %v10988_v41, %v14324_v29 }
 0x91b   :  { %v10989_v12 = vpop.f32.mrb[110].mxu1  ;;  %v6064_v46 = vadd.f32 %v14324_v29, %v5810_v1 }
 0x91c   :  { %v6067_v30 = vadd.f32 %v10989_v12, %v14324_v29  ;;  %v5813_v36 = vpop.f32.mrb[111].mxu1 }
 0x91d   :  { %v6065_v26 = vadd.f32 %v14324_v29, %v5813_v36 }
 0x91e   :  { %v6115_v8 = vpack.c.bf16 %v6067_v30, %v6066_v4 }
 0x91f   :  { %v6114_v54 = vpack.c.bf16 %v6065_v26, %v6064_v46 }
 0x921   :  { %v10992_v61 = vpop.f32.mrb[112].mxu1  ;;  %11046 = vmatprep.mubr.msk.bf16.mxu0 %vm203_vm2, %v6114_v54 }
 0x922   :  { %v5826_v2 = vpop.f32.mrb[113].mxu1  ;;  %11047 = vmatmul.mubr.msk.bf16.gmra.mrb[212].mxu0 %vm203_vm2, %v6115_v8  ;;  %v6070_v18 = vadd.f32 %v10992_v61, %v14324_v29 }
 0x923   :  { %v10993_v38 = vpop.f32.mrb[114].mxu1  ;;  %v6068_v48 = vadd.f32 %v14324_v29, %v5826_v2 }
 0x924   :  { %v6071_v19 = vadd.f32 %v10993_v38, %v14324_v29  ;;  %v5829_v23 = vpop.f32.mrb[115].mxu1 }
 0x925   :  { %v6069_v49 = vadd.f32 %v14324_v29, %v5829_v23 }
 0x926   :  { %v6117_v56 = vpack.c.bf16 %v6071_v19, %v6070_v18 }
 0x927   :  { %v6116_v11 = vpack.c.bf16 %v6069_v49, %v6068_v48 }
 0x929   :  { %v10996_v17 = vpop.f32.mrb[116].mxu1  ;;  %11050 = vmatprep.mubr.msk.bf16.mxu0 %vm203_vm2, %v6116_v11 }
 0x92a   :  { %v5842_v35 = vpop.f32.mrb[117].mxu1  ;;  %11051 = vmatmul.mubr.msk.bf16.gmra.mrb[216].mxu0 %vm203_vm2, %v6117_v56  ;;  %v6074_v21 = vadd.f32 %v10996_v17, %v14324_v29 }
 0x92b   :  { %v10997_v16 = vpop.f32.mrb[118].mxu1  ;;  %v6072_v43 = vadd.f32 %v14324_v29, %v5842_v35 }
 0x92c   :  { %v6075_v0 = vadd.f32 %v10997_v16, %v14324_v29  ;;  %v5845_v37 = vpop.f32.mrb[119].mxu1 }
 0x92d   :  { %v6073_v39 = vadd.f32 %v14324_v29, %v5845_v37 }
 0x92e   :  { %v6119_v51 = vpack.c.bf16 %v6075_v0, %v6074_v21 }
 0x92f   :  { %v6118_v9 = vpack.c.bf16 %v6073_v39, %v6072_v43 }
 0x931   :  { %v11000_v13 = vpop.f32.mrb[120].mxu1  ;;  %11054 = vmatprep.mubr.msk.bf16.mxu0 %vm203_vm2, %v6118_v9 }
 0x932   :  { %v5858_v59 = vpop.f32.mrb[121].mxu1  ;;  %11055 = vmatmul.mubr.msk.bf16.gmra.mrb[220].mxu0 %vm203_vm2, %v6119_v51  ;;  %v6078_v62 = vadd.f32 %v11000_v13, %v14324_v29 }
 0x933   :  { %v11001_v24 = vpop.f32.mrb[122].mxu1  ;;  %v6076_v47 = vadd.f32 %v14324_v29, %v5858_v59 }
 0x934   :  { %v6079_v44 = vadd.f32 %v11001_v24, %v14324_v29  ;;  %v5861_v28 = vpop.f32.mrb[123].mxu1 }
 0x935   :  { %v6077_v55 = vadd.f32 %v14324_v29, %v5861_v28 }
 0x936   :  { %v6121_v50 = vpack.c.bf16 %v6079_v44, %v6078_v62 }
 0x937   :  { %v6120_v40 = vpack.c.bf16 %v6077_v55, %v6076_v47 }
 0x939   :  { %v11004_v5 = vpop.f32.mrb[124].mxu1  ;;  %11058 = vmatprep.mubr.msk.bf16.mxu0 %vm203_vm2, %v6120_v40 }
 0x93a   :  { %v5874_v34 = vpop.f32.mrb[125].mxu1  ;;  %11059 = vmatmul.mubr.msk.bf16.gmra.mrb[224].mxu0 %vm203_vm2, %v6121_v50  ;;  %v6082_v15 = vadd.f32 %v11004_v5, %v14324_v29 }
 0x93b   :  { %v11005_v20 = vpop.f32.mrb[126].mxu1  ;;  %v6080_v42 = vadd.f32 %v14324_v29, %v5874_v34 }
 0x93c   :  { %v6083_v10 = vadd.f32 %v11005_v20, %v14324_v29  ;;  %v5877_v63 = vpop.f32.mrb[127].mxu1 }
 0x93d   :  { %v6081_v7 = vadd.f32 %v14324_v29, %v5877_v63 }
 0x93e   :  { %v6123_v3 = vpack.c.bf16 %v6083_v10, %v6082_v15 }
 0x93f   :  { %v6122_v58 = vpack.c.bf16 %v6081_v7, %v6080_v42 }
 0x941   :  { %v11008_v32 = vpop.f32.mrb[128].mxu1  ;;  %11062 = vmatprep.mubr.msk.bf16.mxu0 %vm203_vm2, %v6122_v58 }
 0x942   :  { %v5890_v22 = vpop.f32.mrb[129].mxu1  ;;  %11063 = vmatmul.mubr.msk.bf16.gmra.mrb[228].mxu0 %vm203_vm2, %v6123_v3  ;;  %v6086_v14 = vadd.f32 %v11008_v32, %v14324_v29 }
 0x943   :  { %v11009_v45 = vpop.f32.mrb[130].mxu1  ;;  %v6084_v25 = vadd.f32 %v14324_v29, %v5890_v22 }
 0x944   :  { %v6087_v57 = vadd.f32 %v11009_v45, %v14324_v29  ;;  %v5893_v6 = vpop.f32.mrb[131].mxu1 }
 0x945   :  { %v6085_v27 = vadd.f32 %v14324_v29, %v5893_v6 }
 0x946   :  { %v6125_v33 = vpack.c.bf16 %v6087_v57, %v6086_v14 }
 0x947   :  { %v6124_v53 = vpack.c.bf16 %v6085_v27, %v6084_v25 }
 0x949   :  { %v11012_v52 = vpop.f32.mrb[132].mxu1  ;;  %11066 = vmatprep.mubr.msk.bf16.mxu0 %vm203_vm2, %v6124_v53 }
 0x94a   :  { %v5906_v31 = vpop.f32.mrb[133].mxu1  ;;  %11067 = vmatmul.mubr.msk.bf16.gmra.mrb[232].mxu0 %vm203_vm2, %v6125_v33  ;;  %v6090_v1 = vadd.f32 %v11012_v52, %v14324_v29  ;;  %v14408_v33 = vld [vmem:[#allocation18] ss:$0 sm:$0xff] }
 0x94b   :  { %v11013_v41 = vpop.f32.mrb[134].mxu1  ;;  %v6088_v30 = vadd.f32 %v14324_v29, %v5906_v31 }
 0x94c   :  { %v6091_v12 = vadd.f32 %v11013_v41, %v14324_v29  ;;  %v5909_v4 = vpop.f32.mrb[135].mxu1 }
 0x94d   :  { %v6089_v36 = vadd.f32 %v14324_v29, %v5909_v4 }
 0x94e   :  { %v6127_v46 = vpack.c.bf16 %v6091_v12, %v6090_v1 }
 0x94f   :  { %v6126_v26 = vpack.c.bf16 %v6089_v36, %v6088_v30 }
 0x951   :  { %v11016_v8 = vpop.f32.mrb[136].mxu1  ;;  %11070 = vmatprep.mubr.msk.bf16.mxu0 %vm203_vm2, %v6126_v26 }
 0x952   :  { %v5922_v54 = vpop.f32.mrb[137].mxu1  ;;  %11071 = vmatmul.mubr.msk.bf16.gmra.mrb[236].mxu0 %vm203_vm2, %v6127_v46  ;;  %v6094_v2 = vadd.f32 %v11016_v8, %v14324_v29 }
 0x953   :  { %v11017_v61 = vpop.f32.mrb[138].mxu1  ;;  %v6092_v19 = vadd.f32 %v14324_v29, %v5922_v54 }
 0x954   :  { %v6095_v38 = vadd.f32 %v11017_v61, %v14324_v29  ;;  %v5925_v18 = vpop.f32.mrb[139].mxu1 }
 0x955   :  { %v6093_v23 = vadd.f32 %v14324_v29, %v5925_v18 }
 0x956   :  { %v6129_v48 = vpack.c.bf16 %v6095_v38, %v6094_v2 }
 0x957   :  { %v6128_v49 = vpack.c.bf16 %v6093_v23, %v6092_v19  ;;  %v12063_v19 = vld [vmem:[#allocation19 + $0x20] sm:$0xff]  }
 0x959   :  { %v11020_v56 = vpop.f32.mrb[140].mxu1  ;;  %11074 = vmatprep.mubr.msk.bf16.mxu0 %vm203_vm2, %v6128_v49 }
 0x95a   :  { %v5938_v11 = vpop.f32.mrb[141].mxu1  ;;  %11075 = vmatmul.mubr.msk.bf16.gmra.mrb[240].mxu0 %vm203_vm2, %v6129_v48  ;;  %v6098_v35 = vadd.f32 %v11020_v56, %v14324_v29 }
 0x95b   :  { %v11021_v17 = vpop.f32.mrb[142].mxu1  ;;  %v6096_v0 = vadd.f32 %v14324_v29, %v5938_v11 }
 0x95c   :  { %v6099_v16 = vadd.f32 %v11021_v17, %v14324_v29  ;;  %v5941_v21 = vpop.f32.mrb[143].mxu1 }
 0x95d   :  { %v6097_v37 = vadd.f32 %v14324_v29, %v5941_v21 }
 0x95e   :  { %v6131_v43 = vpack.c.bf16 %v6099_v16, %v6098_v35 }
 0x95f   :  { %v6130_v39 = vpack.c.bf16 %v6097_v37, %v6096_v0  ;;  %v12064_v37 = vld [vmem:[#allocation19 + $0x28] sm:$0xff]  }
 0x961   :  { %v11024_v51 = vpop.f32.mrb[144].mxu1  ;;  %11078 = vmatprep.mubr.msk.bf16.mxu0 %vm203_vm2, %v6130_v39 }
 0x962   :  { %v5954_v9 = vpop.f32.mrb[145].mxu1  ;;  %11079 = vmatmul.mubr.msk.bf16.gmra.mrb[244].mxu0 %vm203_vm2, %v6131_v43  ;;  %v6102_v59 = vadd.f32 %v11024_v51, %v14324_v29 }
 0x963   :  { %v11025_v13 = vpop.f32.mrb[146].mxu1  ;;  %v6100_v44 = vadd.f32 %v14324_v29, %v5954_v9 }
 0x964   :  { %v6103_v24 = vadd.f32 %v11025_v13, %v14324_v29  ;;  %v5957_v62 = vpop.f32.mrb[147].mxu1 }
 0x965   :  { %v6101_v28 = vadd.f32 %v14324_v29, %v5957_v62 }
 0x966   :  { %v6133_v47 = vpack.c.bf16 %v6103_v24, %v6102_v59 }
 0x967   :  { %v6132_v55 = vpack.c.bf16 %v6101_v28, %v6100_v44  ;;  %v12065_v44 = vld [vmem:[#allocation19 + $0x30] sm:$0xff]  }
 0x969   :  { %v11028_v50 = vpop.f32.mrb[148].mxu1  ;;  %11082 = vmatprep.mubr.msk.bf16.mxu0 %vm203_vm2, %v6132_v55 }
 0x96a   :  { %v5970_v40 = vpop.f32.mrb[149].mxu1  ;;  %11083 = vmatmul.mubr.msk.bf16.gmra.mrb[248].mxu0 %vm203_vm2, %v6133_v47  ;;  %v6106_v34 = vadd.f32 %v11028_v50, %v14324_v29 }
 0x96b   :  { %v11029_v5 = vpop.f32.mrb[150].mxu1  ;;  %v6104_v10 = vadd.f32 %v14324_v29, %v5970_v40 }
 0x96c   :  { %v6107_v20 = vadd.f32 %v11029_v5, %v14324_v29  ;;  %v5973_v15 = vpop.f32.mrb[151].mxu1 }
 0x96d   :  { %v6105_v63 = vadd.f32 %v14324_v29, %v5973_v15 }
 0x96e   :  { %v6135_v42 = vpack.c.bf16 %v6107_v20, %v6106_v34 }
 0x96f   :  { %v6134_v7 = vpack.c.bf16 %v6105_v63, %v6104_v10  ;;  %v12066_v63 = vld [vmem:[#allocation19 + $0x38] sm:$0xff]  }
 0x971   :  { %v11032_v3 = vpop.f32.mrb[152].mxu1  ;;  %11086 = vmatprep.mubr.msk.bf16.mxu0 %vm203_vm2, %v6134_v7 }
 0x972   :  { %v5986_v58 = vpop.f32.mrb[153].mxu1  ;;  %11087 = vmatmul.mubr.msk.bf16.gmra.mrb[252].mxu0 %vm203_vm2, %v6135_v42  ;;  %v6110_v22 = vadd.f32 %v11032_v3, %v14324_v29 }
 0x973   :  { %v11033_v32 = vpop.f32.mrb[154].mxu1  ;;  %v6108_v57 = vadd.f32 %v14324_v29, %v5986_v58 }
 0x974   :  { %v6111_v45 = vadd.f32 %v11033_v32, %v14324_v29  ;;  %v5989_v14 = vpop.f32.mrb[155].mxu1 }
 0x975   :  { %v6109_v6 = vadd.f32 %v14324_v29, %v5989_v14 }
 0x976   :  { %v6137_v25 = vpack.c.bf16 %v6111_v45, %v6110_v22 }
 0x977   :  { %v6136_v27 = vpack.c.bf16 %v6109_v6, %v6108_v57  ;;  %v12067_v57 = vld [vmem:[#allocation19 + $0x40] sm:$0xff]  }
 0x979   :  { %11090 = vmatprep.mubr.msk.bf16.mxu0 %vm203_vm2, %v6136_v27 }
 0x97a   :  { %11091 = vmatmul.mubr.msk.bf16.gmra.mrb[0].mxu0 %vm203_vm2, %v6137_v25 }
 0x97b   :  { %11422 = vmatprep.mubr.msk.bf16.mxu0 %vm12464_vm0, %v12463_v60 }
 0x9ed   :  { %v11044_v53 = vpop.f32.mrb[208].mxu0 }
 0x9ee   :  { %v6298_v52 = vadd.f32 %v11044_v53, %v14408_v33  ;;  %v6289_v31 = vpop.f32.mrb[209].mxu0 }
 0x9ef   :  { %v6290_v29 = vadd.f32 %v14408_v33, %v6289_v31  ;;  %v11045_v41 = vpop.f32.mrb[210].mxu0 }
 0x9f0   :  { %v6550_v1 = vmul.f32 0.01, %v6298_v52  ;;  %v6301_v12 = vadd.f32 %v11045_v41, %v14408_v33  ;;  %v6292_v4 = vpop.f32.mrb[211].mxu0  ;;  %vm6498_vm1 = vcmp.ge.f32.partialorder %v6298_v52, 0.0 }
 0x9f1   :  { %v6548_v30 = vmul.f32 0.01, %v6290_v29  ;;  %v6293_v36 = vadd.f32 %v14408_v33, %v6292_v4  ;;  %vm6496_vm3 = vcmp.ge.f32.partialorder %v6290_v29, 0.0  ;;  %v12068_v4 = vld [vmem:[#allocation19 + $0x48] sm:$0xff]  }
 0x9f2   :  { %vm6499_vm4 = vcmp.ge.f32.partialorder %v6301_v12, 0.0  ;;  %v6551_v46 = vmul.f32 0.01, %v6301_v12  ;;  %v14414_v8 = vsel %vm6498_vm1, %v6298_v52, %v6550_v1 }
 0x9f3   :  { %vm6497_vm5 = vcmp.ge.f32.partialorder %v6293_v36, 0.0  ;;  %v6549_v26 = vmul.f32 0.01, %v6293_v36  ;;  %v6600_v61 = vsel %vm6496_vm3, %v6290_v29, %v6548_v30 }
 0x9f4   :  { %v14416_v54 = vsel %vm6499_vm4, %v6301_v12, %v6551_v46 }
 0x9f5   :  { %v6653_v2 = vpack.c.bf16 %v14416_v54, %v14414_v8  ;;  %v6601_v38 = vsel %vm6497_vm5, %v6293_v36, %v6549_v26  ;;  %v11048_v18 = vpop.f32.mrb[212].mxu0 }
 0x9f6   :  { %v6652_v23 = vpack.c.bf16 %v6601_v38, %v6600_v61  ;;  %v6314_v48 = vadd.f32 %v11048_v18, %v14408_v33  ;;  %v6305_v49 = vpop.f32.mrb[213].mxu0  ;;  %v12069_v38 = vld [vmem:[#allocation19 + $0x50] sm:$0xff]  }
 0x9f7   :  { %v6306_v56 = vadd.f32 %v14408_v33, %v6305_v49  ;;  %v11049_v11 = vpop.f32.mrb[214].mxu0 }
 0x9f8   :  { %v6554_v17 = vmul.f32 0.01, %v6314_v48  ;;  %v6317_v35 = vadd.f32 %v11049_v11, %v14408_v33  ;;  %v6308_v16 = vpop.f32.mrb[215].mxu0  ;;  %11103 = vmatmul.mubr.msk.bf16.vlgmr.msra.gmra.mrb[156].mxu1 %vm203_vm2, %v6652_v23  ;;  %vm6502_vm6 = vcmp.ge.f32.partialorder %v6314_v48, 0.0 }
 0x9f9   :  { %v6552_v21 = vmul.f32 0.01, %v6306_v56  ;;  %v6309_v0 = vadd.f32 %v14408_v33, %v6308_v16  ;;  %11107 = vmatpush3.bf16.msra.mxu1 %v12063_v19  ;;  %11114 = vmatprep.mubr.msk.bf16.mxu1 %vm12464_vm0, %v12463_v60  ;;  %vm6500_vm7 = vcmp.ge.f32.partialorder %v6306_v56, 0.0 }
 0x9fa   :  { %vm6503_vm8 = vcmp.ge.f32.partialorder %v6317_v35, 0.0  ;;  %v6555_v43 = vmul.f32 0.01, %v6317_v35  ;;  %11108 = vmatprep.subr.bf16.mxu1 %v12463_v60  ;;  %v14428_v51 = vsel %vm6502_vm6, %v6314_v48, %v6554_v17 }
 0x9fb   :  { %vm6501_vm9 = vcmp.ge.f32.partialorder %v6309_v0, 0.0  ;;  %v6553_v39 = vmul.f32 0.01, %v6309_v0  ;;  %v14432_v13 = vsel %vm6500_vm7, %v6306_v56, %v6552_v21  ;;  %v12070_v21 = vld [vmem:[#allocation19 + $0x58] sm:$0xff]  }
 0x9fc   :  { %v14430_v9 = vsel %vm6503_vm8, %v6317_v35, %v6555_v43 }
 0x9fd   :  { %v6655_v59 = vpack.c.bf16 %v14430_v9, %v14428_v51  ;;  %v14436_v24 = vsel %vm6501_vm9, %v6309_v0, %v6553_v39  ;;  %11109 = vmatpush3.bf16.msra.mxu1 %v12064_v37  ;;  %v11052_v62 = vpop.f32.mrb[216].mxu0 }
 0x9fe   :  { %v6654_v28 = vpack.c.bf16 %v14436_v24, %v14432_v13  ;;  %v6330_v47 = vadd.f32 %v11052_v62, %v14408_v33  ;;  %v6321_v55 = vpop.f32.mrb[217].mxu0  ;;  %11110 = vmatprep.subr.bf16.mxu1 %v12463_v60 }
 0x9ff   :  { %v6322_v50 = vadd.f32 %v14408_v33, %v6321_v55  ;;  %v11053_v40 = vpop.f32.mrb[218].mxu0 }
 0xa00   :  { %v6558_v5 = vmul.f32 0.01, %v6330_v47  ;;  %v6333_v34 = vadd.f32 %v11053_v40, %v14408_v33  ;;  %v6324_v20 = vpop.f32.mrb[219].mxu0  ;;  %vm6506_vm10 = vcmp.ge.f32.partialorder %v6330_v47, 0.0 }
 0xa01   :  { %v6556_v15 = vmul.f32 0.01, %v6322_v50  ;;  %v6325_v10 = vadd.f32 %v14408_v33, %v6324_v20  ;;  %11111 = vmatpush3.bf16.msra.mxu1 %v12065_v44  ;;  %vm6504_vm11 = vcmp.ge.f32.partialorder %v6322_v50, 0.0 }
 0xa02   :  { %vm6507_vm12 = vcmp.ge.f32.partialorder %v6333_v34, 0.0  ;;  %v6559_v42 = vmul.f32 0.01, %v6333_v34  ;;  %11112 = vmatprep.subr.bf16.mxu1 %v12463_v60  ;;  %v14446_v3 = vsel %vm6506_vm10, %v6330_v47, %v6558_v5 }
 0xa03   :  { %vm6505_vm13 = vcmp.ge.f32.partialorder %v6325_v10, 0.0  ;;  %v6557_v7 = vmul.f32 0.01, %v6325_v10  ;;  %v14450_v32 = vsel %vm6504_vm11, %v6322_v50, %v6556_v15  ;;  %v12071_v50 = vld [vmem:[#allocation19 + $0x60] sm:$0xff]  }
 0xa04   :  { %v14448_v58 = vsel %vm6507_vm12, %v6333_v34, %v6559_v42 }
 0xa05   :  { %v6657_v22 = vpack.c.bf16 %v14448_v58, %v14446_v3  ;;  %v14454_v45 = vsel %vm6505_vm13, %v6325_v10, %v6557_v7  ;;  %11113 = vmatpush3.bf16.msra.mxu1 %v12066_v63  ;;  %v11056_v14 = vpop.f32.mrb[220].mxu0 }
 0xa06   :  { %v6656_v6 = vpack.c.bf16 %v14454_v45, %v14450_v32  ;;  %v6346_v25 = vadd.f32 %v11056_v14, %v14408_v33  ;;  %v6337_v27 = vpop.f32.mrb[221].mxu0  ;;  %11118 = vmatprep.subr.bf16.mxu1 %v12463_v60 }
 0xa07   :  { %v6338_v53 = vadd.f32 %v14408_v33, %v6337_v27  ;;  %v11057_v52 = vpop.f32.mrb[222].mxu0 }
 0xa08   :  { %v6562_v31 = vmul.f32 0.01, %v6346_v25  ;;  %v6349_v29 = vadd.f32 %v11057_v52, %v14408_v33  ;;  %11115 = vmatmul.mubr.msk.bf16.vlgmr.msra.gmra.mrb[156].mxu1 %vm203_vm2, %v6653_v2  ;;  %v6340_v41 = vpop.f32.mrb[223].mxu0  ;;  %vm6510_vm14 = vcmp.ge.f32.partialorder %v6346_v25, 0.0 }
 0xa09   :  { %v6560_v1 = vmul.f32 0.01, %v6338_v53  ;;  %v6341_v12 = vadd.f32 %v14408_v33, %v6340_v41  ;;  %11119 = vmatpush3.bf16.msra.mxu1 %v12067_v57  ;;  %11126 = vmatprep.mubr.msk.bf16.mxu1 %vm12464_vm0, %v12463_v60  ;;  %vm6508_vm15 = vcmp.ge.f32.partialorder %v6338_v53, 0.0  ;;  %v12072_v57 = vld [vmem:[#allocation19 + $0x68] sm:$0xff]  }
 0xa0a   :  { %vm6511_vm1 = vcmp.ge.f32.partialorder %v6349_v29, 0.0  ;;  %v6563_v30 = vmul.f32 0.01, %v6349_v29  ;;  %11120 = vmatprep.subr.bf16.mxu1 %v12463_v60  ;;  %v14470_v46 = vsel %vm6510_vm14, %v6346_v25, %v6562_v31 }
 0xa0b   :  { %vm6509_vm3 = vcmp.ge.f32.partialorder %v6341_v12, 0.0  ;;  %v6561_v36 = vmul.f32 0.01, %v6341_v12  ;;  %v14474_v8 = vsel %vm6508_vm15, %v6338_v53, %v6560_v1 }
 0xa0c   :  { %v14472_v26 = vsel %vm6511_vm1, %v6349_v29, %v6563_v30  ;;  %v12073_v29 = vld [vmem:[#allocation19 + $0x70] sm:$0xff]  }
 0xa0d   :  { %v6659_v54 = vpack.c.bf16 %v14472_v26, %v14470_v46  ;;  %v14478_v61 = vsel %vm6509_vm3, %v6341_v12, %v6561_v36  ;;  %11121 = vmatpush3.bf16.msra.mxu1 %v12068_v4  ;;  %v11060_v2 = vpop.f32.mrb[224].mxu0  ;;  %v12096_v46 = vld [vmem:[#allocation19 + $0x128] sm:$0xff]   ;;  %v12097_v26 = vld [vmem:[#allocation19 + $0x130] sm:$0xff]  }
 0xa0e   :  { %v6658_v18 = vpack.c.bf16 %v14478_v61, %v14474_v8  ;;  %v6362_v19 = vadd.f32 %v11060_v2, %v14408_v33  ;;  %v6353_v23 = vpop.f32.mrb[225].mxu0  ;;  %11122 = vmatprep.subr.bf16.mxu1 %v12463_v60  ;;  %v12092_v8 = vld [vmem:[#allocation19 + $0x108] sm:$0xff]   ;;  %v12093_v61 = vld [vmem:[#allocation19 + $0x110] sm:$0xff]  }
 0xa0f   :  { %v6354_v48 = vadd.f32 %v14408_v33, %v6353_v23  ;;  %v11061_v49 = vpop.f32.mrb[226].mxu0 }
 0xa10   :  { %v6566_v56 = vmul.f32 0.01, %v6362_v19  ;;  %v6365_v11 = vadd.f32 %v11061_v49, %v14408_v33  ;;  %v6356_v17 = vpop.f32.mrb[227].mxu0  ;;  %vm6514_vm4 = vcmp.ge.f32.partialorder %v6362_v19, 0.0 }
 0xa11   :  { %v6564_v35 = vmul.f32 0.01, %v6354_v48  ;;  %v6357_v16 = vadd.f32 %v14408_v33, %v6356_v17  ;;  %11123 = vmatpush3.bf16.msra.mxu1 %v12069_v38  ;;  %vm6512_vm5 = vcmp.ge.f32.partialorder %v6354_v48, 0.0 }
 0xa12   :  { %vm6515_vm6 = vcmp.ge.f32.partialorder %v6365_v11, 0.0  ;;  %v6567_v0 = vmul.f32 0.01, %v6365_v11  ;;  %11124 = vmatprep.subr.bf16.mxu1 %v12463_v60  ;;  %v14488_v43 = vsel %vm6514_vm4, %v6362_v19, %v6566_v56 }
 0xa13   :  { %vm6513_vm7 = vcmp.ge.f32.partialorder %v6357_v16, 0.0  ;;  %v6565_v37 = vmul.f32 0.01, %v6357_v16  ;;  %v14492_v62 = vsel %vm6512_vm5, %v6354_v48, %v6564_v35  ;;  %v12074_v48 = vld [vmem:[#allocation19 + $0x78] sm:$0xff]  }
 0xa14   :  { %v14490_v39 = vsel %vm6515_vm6, %v6365_v11, %v6567_v0 }
 0xa15   :  { %v6661_v44 = vpack.c.bf16 %v14490_v39, %v14488_v43  ;;  %v14496_v47 = vsel %vm6513_vm7, %v6357_v16, %v6565_v37  ;;  %11125 = vmatpush3.bf16.msra.mxu1 %v12070_v21  ;;  %v11064_v55 = vpop.f32.mrb[228].mxu0  ;;  %v12075_v37 = vld [vmem:[#allocation19 + $0x80] sm:$0xff]   ;;  %v12104_v43 = vld [vmem:[#allocation19 + $0x168] sm:$0xff]   ;;  %v12105_v39 = vld [vmem:[#allocation19 + $0x170] sm:$0xff]  }
 0xa16   :  { %v6660_v40 = vpack.c.bf16 %v14496_v47, %v14492_v62  ;;  %v6378_v5 = vadd.f32 %v11064_v55, %v14408_v33  ;;  %v6369_v34 = vpop.f32.mrb[229].mxu0  ;;  %11130 = vmatprep.subr.bf16.mxu1 %v12463_v60  ;;  %v12100_v62 = vld [vmem:[#allocation19 + $0x148] sm:$0xff]   ;;  %v12101_v47 = vld [vmem:[#allocation19 + $0x150] sm:$0xff]  }
 0xa17   :  { %v6370_v20 = vadd.f32 %v14408_v33, %v6369_v34  ;;  %v11065_v15 = vpop.f32.mrb[230].mxu0 }
 0xa18   :  { %v6570_v10 = vmul.f32 0.01, %v6378_v5  ;;  %v6381_v63 = vadd.f32 %v11065_v15, %v14408_v33  ;;  %11127 = vmatmul.mubr.msk.bf16.vlgmr.msra.gmra.mrb[156].mxu1 %vm203_vm2, %v6654_v28  ;;  %v6372_v42 = vpop.f32.mrb[231].mxu0  ;;  %vm6518_vm8 = vcmp.ge.f32.partialorder %v6378_v5, 0.0 }
 0xa19   :  { %v6568_v7 = vmul.f32 0.01, %v6370_v20  ;;  %v6373_v14 = vadd.f32 %v14408_v33, %v6372_v42  ;;  %11131 = vmatpush3.bf16.msra.mxu1 %v12071_v50  ;;  %11138 = vmatprep.mubr.msk.bf16.mxu1 %vm12464_vm0, %v12463_v60  ;;  %vm6516_vm9 = vcmp.ge.f32.partialorder %v6370_v20, 0.0 }
 0xa1a   :  { %vm6519_vm10 = vcmp.ge.f32.partialorder %v6381_v63, 0.0  ;;  %v6571_v25 = vmul.f32 0.01, %v6381_v63  ;;  %11132 = vmatprep.subr.bf16.mxu1 %v12463_v60  ;;  %v14512_v13 = vsel %vm6518_vm8, %v6378_v5, %v6570_v10 }
 0xa1b   :  { %vm6517_vm11 = vcmp.ge.f32.partialorder %v6373_v14, 0.0  ;;  %v6569_v27 = vmul.f32 0.01, %v6373_v14  ;;  %v14516_v28 = vsel %vm6516_vm9, %v6370_v20, %v6568_v7 }
 0xa1c   :  { %v14514_v24 = vsel %vm6519_vm10, %v6381_v63, %v6571_v25 }
 0xa1d   :  { %v6663_v53 = vpack.c.bf16 %v14514_v24, %v14512_v13  ;;  %v14520_v52 = vsel %vm6517_vm11, %v6373_v14, %v6569_v27  ;;  %11133 = vmatpush3.bf16.msra.mxu1 %v12072_v57  ;;  %v11068_v31 = vpop.f32.mrb[232].mxu0  ;;  %v12076_v14 = vld [vmem:[#allocation19 + $0x88] sm:$0xff]   ;;  %v12113_v24 = vld [vmem:[#allocation19 + $0x1b0] sm:$0xff]  }
 0xa1e   :  { %v6662_v41 = vpack.c.bf16 %v14520_v52, %v14516_v28  ;;  %v6394_v1 = vadd.f32 %v11068_v31, %v14408_v33  ;;  %v6385_v12 = vpop.f32.mrb[233].mxu0  ;;  %11134 = vmatprep.subr.bf16.mxu1 %v12463_v60  ;;  %v12108_v28 = vld [vmem:[#allocation19 + $0x188] sm:$0xff]   ;;  %v12109_v52 = vld [vmem:[#allocation19 + $0x190] sm:$0xff]  }
 0xa1f   :  { %v6386_v4 = vadd.f32 %v14408_v33, %v6385_v12  ;;  %v11069_v30 = vpop.f32.mrb[234].mxu0  ;;  %v12112_v13 = vld [vmem:[#allocation19 + $0x1a8] sm:$0xff]  }
 0xa20   :  { %v6574_v36 = vmul.f32 0.01, %v6394_v1  ;;  %v6397_v2 = vadd.f32 %v11069_v30, %v14408_v33  ;;  %v6388_v38 = vpop.f32.mrb[235].mxu0  ;;  %vm6522_vm12 = vcmp.ge.f32.partialorder %v6394_v1, 0.0 }
 0xa21   :  { %v6572_v19 = vmul.f32 0.01, %v6386_v4  ;;  %v6389_v23 = vadd.f32 %v14408_v33, %v6388_v38  ;;  %11135 = vmatpush3.bf16.msra.mxu1 %v12073_v29  ;;  %vm6520_vm13 = vcmp.ge.f32.partialorder %v6386_v4, 0.0 }
 0xa22   :  { %vm6523_vm14 = vcmp.ge.f32.partialorder %v6397_v2, 0.0  ;;  %v6575_v49 = vmul.f32 0.01, %v6397_v2  ;;  %11136 = vmatprep.subr.bf16.mxu1 %v12463_v60  ;;  %v14530_v11 = vsel %vm6522_vm12, %v6394_v1, %v6574_v36  ;;  %v12077_v1 = vld [vmem:[#allocation19 + $0x90] sm:$0xff]  }
 0xa23   :  { %vm6521_vm15 = vcmp.ge.f32.partialorder %v6389_v23, 0.0  ;;  %v6573_v56 = vmul.f32 0.01, %v6389_v23  ;;  %v14534_v35 = vsel %vm6520_vm13, %v6386_v4, %v6572_v19 }
 0xa24   :  { %v14532_v17 = vsel %vm6523_vm14, %v6397_v2, %v6575_v49 }
 0xa25   :  { %v6665_v16 = vpack.c.bf16 %v14532_v17, %v14530_v11  ;;  %v14538_v21 = vsel %vm6521_vm15, %v6389_v23, %v6573_v56  ;;  %11137 = vmatpush3.bf16.msra.mxu1 %v12074_v48  ;;  %v11072_v0 = vpop.f32.mrb[236].mxu0  ;;  %v12078_v56 = vld [vmem:[#allocation19 + $0x98] sm:$0xff]   ;;  %v12120_v11 = vld [vmem:[#allocation19 + $0x1e8] sm:$0xff]   ;;  %v12121_v17 = vld [vmem:[#allocation19 + $0x1f0] sm:$0xff]  }
 0xa26   :  { %v6664_v55 = vpack.c.bf16 %v14538_v21, %v14534_v35  ;;  %v6410_v50 = vadd.f32 %v11072_v0, %v14408_v33  ;;  %v6401_v5 = vpop.f32.mrb[237].mxu0  ;;  %11142 = vmatprep.subr.bf16.mxu1 %v12463_v60  ;;  %v12116_v35 = vld [vmem:[#allocation19 + $0x1c8] sm:$0xff]   ;;  %v12117_v21 = vld [vmem:[#allocation19 + $0x1d0] sm:$0xff]  }
 0xa27   :  { %v6402_v34 = vadd.f32 %v14408_v33, %v6401_v5  ;;  %v11073_v20 = vpop.f32.mrb[238].mxu0 }
 0xa28   :  { %v6578_v15 = vmul.f32 0.01, %v6410_v50  ;;  %v6413_v10 = vadd.f32 %v11073_v20, %v14408_v33  ;;  %11139 = vmatmul.mubr.msk.bf16.vlgmr.msra.gmra.mrb[156].mxu1 %vm203_vm2, %v6655_v59  ;;  %v6404_v63 = vpop.f32.mrb[239].mxu0  ;;  %vm6526_vm1 = vcmp.ge.f32.partialorder %v6410_v50, 0.0 }
 0xa29   :  { %v6576_v42 = vmul.f32 0.01, %v6402_v34  ;;  %v6405_v7 = vadd.f32 %v14408_v33, %v6404_v63  ;;  %11143 = vmatpush3.bf16.msra.mxu1 %v12075_v37  ;;  %11150 = vmatprep.mubr.msk.bf16.mxu1 %vm12464_vm0, %v12463_v60  ;;  %vm6524_vm3 = vcmp.ge.f32.partialorder %v6402_v34, 0.0  ;;  %v12079_v63 = vld [vmem:[#allocation19 + $0xa0] sm:$0xff]  }
 0xa2a   :  { %vm6527_vm4 = vcmp.ge.f32.partialorder %v6413_v10, 0.0  ;;  %v6579_v57 = vmul.f32 0.01, %v6413_v10  ;;  %11144 = vmatprep.subr.bf16.mxu1 %v12463_v60  ;;  %v14554_v51 = vsel %vm6526_vm1, %v6410_v50, %v6578_v15 }
 0xa2b   :  { %vm6525_vm5 = vcmp.ge.f32.partialorder %v6405_v7, 0.0  ;;  %v6577_v25 = vmul.f32 0.01, %v6405_v7  ;;  %v14558_v59 = vsel %vm6524_vm3, %v6402_v34, %v6576_v42 }
 0xa2c   :  { %v14556_v9 = vsel %vm6527_vm4, %v6413_v10, %v6579_v57 }
 0xa2d   :  { %v6667_v27 = vpack.c.bf16 %v14556_v9, %v14554_v51  ;;  %v14562_v31 = vsel %vm6525_vm5, %v6405_v7, %v6577_v25  ;;  %11145 = vmatpush3.bf16.msra.mxu1 %v12076_v14  ;;  %v11076_v29 = vpop.f32.mrb[240].mxu0  ;;  %v12128_v9 = vld [vmem:[#allocation19 + $0x228] sm:$0xff]  }
 0xa2e   :  { %v6666_v12 = vpack.c.bf16 %v14562_v31, %v14558_v59  ;;  %v6426_v4 = vadd.f32 %v11076_v29, %v14408_v33  ;;  %v6417_v30 = vpop.f32.mrb[241].mxu0  ;;  %11146 = vmatprep.subr.bf16.mxu1 %v12463_v60  ;;  %v12124_v59 = vld [vmem:[#allocation19 + $0x208] sm:$0xff]   ;;  %v12125_v31 = vld [vmem:[#allocation19 + $0x210] sm:$0xff]  }
 0xa2f   :  { %v6418_v36 = vadd.f32 %v14408_v33, %v6417_v30  ;;  %v11077_v2 = vpop.f32.mrb[242].mxu0 }
 0xa30   :  { %v6582_v38 = vmul.f32 0.01, %v6426_v4  ;;  %v6429_v19 = vadd.f32 %v11077_v2, %v14408_v33  ;;  %v6420_v23 = vpop.f32.mrb[243].mxu0  ;;  %vm6530_vm6 = vcmp.ge.f32.partialorder %v6426_v4, 0.0  ;;  %v12080_v2 = vld [vmem:[#allocation19 + $0xa8] sm:$0xff]  }
 0xa31   :  { %v6580_v48 = vmul.f32 0.01, %v6418_v36  ;;  %v6421_v49 = vadd.f32 %v14408_v33, %v6420_v23  ;;  %11147 = vmatpush3.bf16.msra.mxu1 %v12077_v1  ;;  %vm6528_vm7 = vcmp.ge.f32.partialorder %v6418_v36, 0.0 }
 0xa32   :  { %vm6531_vm8 = vcmp.ge.f32.partialorder %v6429_v19, 0.0  ;;  %v6583_v0 = vmul.f32 0.01, %v6429_v19  ;;  %11148 = vmatprep.subr.bf16.mxu1 %v12463_v60  ;;  %v14572_v50 = vsel %vm6530_vm6, %v6426_v4, %v6582_v38 }
 0xa33   :  { %vm6529_vm9 = vcmp.ge.f32.partialorder %v6421_v49, 0.0  ;;  %v6581_v37 = vmul.f32 0.01, %v6421_v49  ;;  %v14576_v34 = vsel %vm6528_vm7, %v6418_v36, %v6580_v48 }
 0xa34   :  { %v14574_v5 = vsel %vm6531_vm8, %v6429_v19, %v6583_v0 }
 0xa35   :  { %v14580_v15 = vsel %vm6529_vm9, %v6421_v49, %v6581_v37  ;;  %11149 = vmatpush3.bf16.msra.mxu1 %v12078_v56  ;;  %v11080_v10 = vpop.f32.mrb[244].mxu0  ;;  %v12081_v56 = vld [vmem:[#allocation19 + $0xb0] sm:$0xff]  }
 0xa36   :  { %v6442_v7 = vadd.f32 %v11080_v10, %v14408_v33  ;;  %v6433_v14 = vpop.f32.mrb[245].mxu0  ;;  %11154 = vmatprep.subr.bf16.mxu1 %v12463_v60  ;;  %v14958_v51 = vpack.c.bf16 %v14580_v15, %v14576_v34  ;;  %v14959_v34 = vpack.c.bf16 %v14574_v5, %v14572_v50  ;;  %v12163_v15 = vld [vmem:[%s14931_s17] sm:$0xff]   ;;  %v12165_v5 = vld [vmem:[%s14931_s17 + $0x10] sm:$0xff]  }
 0xa37   :  { %v6434_v57 = vadd.f32 %v14408_v33, %v6433_v14  ;;  %v11081_v25 = vpop.f32.mrb[246].mxu0  ;;  %11407 = vmatpush3.bf16.msra.mxu0 %v12163_v15  ;;  %v12133_v50 = vld [vmem:[#allocation19 + $0x250] sm:$0xff]  }
 0xa38   :  { %v6586_v29 = vmul.f32 0.01, %v6442_v7  ;;  %v6445_v1 = vadd.f32 %v11081_v25, %v14408_v33  ;;  %11151 = vmatmul.mubr.msk.bf16.vlgmr.msra.gmra.mrb[156].mxu1 %vm203_vm2, %v6656_v6  ;;  %v6436_v4 = vpop.f32.mrb[247].mxu0  ;;  %vm6534_vm10 = vcmp.ge.f32.partialorder %v6442_v7, 0.0  ;;  %11408 = vmatprep.subr.bf16.mxu0 %v12463_v60 }
 0xa39   :  { %v6584_v30 = vmul.f32 0.01, %v6434_v57  ;;  %v6437_v36 = vadd.f32 %v14408_v33, %v6436_v4  ;;  %11155 = vmatpush3.bf16.msra.mxu1 %v12079_v63  ;;  %11162 = vmatprep.mubr.msk.bf16.mxu1 %vm12464_vm0, %v12463_v60  ;;  %vm6532_vm11 = vcmp.ge.f32.partialorder %v6434_v57, 0.0  ;;  %v12082_v4 = vld [vmem:[#allocation19 + $0xb8] sm:$0xff]  }
 0xa3a   :  { %vm6535_vm12 = vcmp.ge.f32.partialorder %v6445_v1, 0.0  ;;  %v6587_v38 = vmul.f32 0.01, %v6445_v1  ;;  %11156 = vmatprep.subr.bf16.mxu1 %v12463_v60  ;;  %v14596_v32 = vsel %vm6534_vm10, %v6442_v7, %v6586_v29 }
 0xa3b   :  { %vm6533_vm13 = vcmp.ge.f32.partialorder %v6437_v36, 0.0  ;;  %v6585_v19 = vmul.f32 0.01, %v6437_v36  ;;  %v14600_v6 = vsel %vm6532_vm11, %v6434_v57, %v6584_v30 }
 0xa3c   :  { %v14598_v45 = vsel %vm6535_vm12, %v6445_v1, %v6587_v38 }
 0xa3d   :  { %v14604_v48 = vsel %vm6533_vm13, %v6437_v36, %v6585_v19  ;;  %11157 = vmatpush3.bf16.msra.mxu1 %v12080_v2  ;;  %v11084_v49 = vpop.f32.mrb[248].mxu0 }
 0xa3e   :  { %v6458_v37 = vadd.f32 %v11084_v49, %v14408_v33  ;;  %v6449_v10 = vpop.f32.mrb[249].mxu0  ;;  %11158 = vmatprep.subr.bf16.mxu1 %v12463_v60 }
 0xa3f   :  { %v6450_v63 = vadd.f32 %v14408_v33, %v6449_v10  ;;  %v11085_v7 = vpop.f32.mrb[250].mxu0 }
 0xa40   :  { %v6590_v14 = vmul.f32 0.01, %v6458_v37  ;;  %v6461_v57 = vadd.f32 %v11085_v7, %v14408_v33  ;;  %v6452_v25 = vpop.f32.mrb[251].mxu0  ;;  %vm6538_vm14 = vcmp.ge.f32.partialorder %v6458_v37, 0.0  ;;  %v12083_v7 = vld [vmem:[#allocation19 + $0xc0] sm:$0xff]  }
 0xa41   :  { %v6588_v29 = vmul.f32 0.01, %v6450_v63  ;;  %v6453_v1 = vadd.f32 %v14408_v33, %v6452_v25  ;;  %11159 = vmatpush3.bf16.msra.mxu1 %v12081_v56  ;;  %vm6536_vm15 = vcmp.ge.f32.partialorder %v6450_v63, 0.0 }
 0xa42   :  { %vm6539_vm1 = vcmp.ge.f32.partialorder %v6461_v57, 0.0  ;;  %v6591_v30 = vmul.f32 0.01, %v6461_v57  ;;  %11160 = vmatprep.subr.bf16.mxu1 %v12463_v60  ;;  %v14614_v2 = vsel %vm6538_vm14, %v6458_v37, %v6590_v14 }
 0xa43   :  { %vm6537_vm3 = vcmp.ge.f32.partialorder %v6453_v1, 0.0  ;;  %v6589_v36 = vmul.f32 0.01, %v6453_v1  ;;  %v14618_v19 = vsel %vm6536_vm15, %v6450_v63, %v6588_v29  ;;  %vm8875_vm15 = vcmask 261120  }
 0xa44   :  { %v14616_v38 = vsel %vm6539_vm1, %v6461_v57, %v6591_v30  ;;  %v12084_v30 = vld [vmem:[#allocation19 + $0xc8] sm:$0xff]  }
 0xa45   :  { %v14622_v10 = vsel %vm6537_vm3, %v6453_v1, %v6589_v36  ;;  %11161 = vmatpush3.bf16.msra.mxu1 %v12082_v4  ;;  %v11088_v56 = vpop.f32.mrb[252].mxu0 }
 0xa46   :  { %v6474_v23 = vadd.f32 %v11088_v56, %v14408_v33  ;;  %v6465_v0 = vpop.f32.mrb[253].mxu0  ;;  %11166 = vmatprep.subr.bf16.mxu1 %v12463_v60 }
 0xa47   :  { %v6466_v37 = vadd.f32 %v14408_v33, %v6465_v0  ;;  %v11089_v63 = vpop.f32.mrb[254].mxu0 }
 0xa48   :  { %v6594_v14 = vmul.f32 0.01, %v6474_v23  ;;  %v6477_v57 = vadd.f32 %v11089_v63, %v14408_v33  ;;  %11163 = vmatmul.mubr.msk.bf16.vlgmr.msra.gmra.mrb[156].mxu1 %vm203_vm2, %v6657_v22  ;;  %v6468_v29 = vpop.f32.mrb[255].mxu0  ;;  %vm6542_vm4 = vcmp.ge.f32.partialorder %v6474_v23, 0.0 }
 0xa49   :  { %v6592_v1 = vmul.f32 0.01, %v6466_v37  ;;  %v6469_v4 = vadd.f32 %v14408_v33, %v6468_v29  ;;  %11167 = vmatpush3.bf16.msra.mxu1 %v12083_v7  ;;  %11174 = vmatprep.mubr.msk.bf16.mxu1 %vm12464_vm0, %v12463_v60  ;;  %vm6540_vm5 = vcmp.ge.f32.partialorder %v6466_v37, 0.0  ;;  %v12085_v29 = vld [vmem:[#allocation19 + $0xd0] sm:$0xff]  }
 0xa4a   :  { %vm6543_vm6 = vcmp.ge.f32.partialorder %v6477_v57, 0.0  ;;  %v6595_v0 = vmul.f32 0.01, %v6477_v57  ;;  %11168 = vmatprep.subr.bf16.mxu1 %v12463_v60  ;;  %v14638_v3 = vsel %vm6542_vm4, %v6474_v23, %v6594_v14 }
 0xa4b   :  { %vm6541_vm7 = vcmp.ge.f32.partialorder %v6469_v4, 0.0  ;;  %v6593_v36 = vmul.f32 0.01, %v6469_v4  ;;  %v14642_v22 = vsel %vm6540_vm5, %v6466_v37, %v6592_v1 }
 0xa4c   :  { %v14640_v58 = vsel %vm6543_vm6, %v6477_v57, %v6595_v0  ;;  %v12086_v0 = vld [vmem:[#allocation19 + $0xd8] sm:$0xff]  }
 0xa4d   :  { %v14646_v7 = vsel %vm6541_vm7, %v6469_v4, %v6593_v36  ;;  %11169 = vmatpush3.bf16.msra.mxu1 %v12084_v30  ;;  %v11092_v63 = vpop.f32.mrb[0].mxu0 }
 0xa4e   :  { %v6490_v25 = vadd.f32 %v11092_v63, %v14408_v33  ;;  %v6481_v20 = vpop.f32.mrb[1].mxu0  ;;  %11170 = vmatprep.subr.bf16.mxu1 %v12463_v60 }
 0xa4f   :  { %v6482_v23 = vadd.f32 %v14408_v33, %v6481_v20  ;;  %v11093_v37 = vpop.f32.mrb[2].mxu0 }
 0xa50   :  { %v6598_v14 = vmul.f32 0.01, %v6490_v25  ;;  %v6493_v57 = vadd.f32 %v11093_v37, %v14408_v33  ;;  %v6484_v1 = vpop.f32.mrb[3].mxu0  ;;  %vm6546_vm8 = vcmp.ge.f32.partialorder %v6490_v25, 0.0 }
 0xa51   :  { %v6596_v4 = vmul.f32 0.01, %v6482_v23  ;;  %v6485_v30 = vadd.f32 %v14408_v33, %v6484_v1  ;;  %11171 = vmatpush3.bf16.msra.mxu1 %v12085_v29  ;;  %vm6544_vm9 = vcmp.ge.f32.partialorder %v6482_v23, 0.0  ;;  %v12087_v33 = vld [vmem:[#allocation19 + $0xe0] sm:$0xff]  }
 0xa52   :  { %vm6547_vm10 = vcmp.ge.f32.partialorder %v6493_v57, 0.0  ;;  %v6599_v36 = vmul.f32 0.01, %v6493_v57  ;;  %11172 = vmatprep.subr.bf16.mxu1 %v12463_v60  ;;  %v14656_v56 = vsel %vm6546_vm8, %v6490_v25, %v6598_v14  ;;  %v12088_v25 = vld [vmem:[#allocation19 + $0xe8] sm:$0xff]   ;;  %v12090_v14 = vld [vmem:[#allocation19 + $0xf8] sm:$0xff]   ;;  %v12095_v1 = vld [vmem:[#allocation19 + $0x120] sm:$0xff]  }
 0xa53   :  { %vm6545_vm11 = vcmp.ge.f32.partialorder %v6485_v30, 0.0  ;;  %v6597_v63 = vmul.f32 0.01, %v6485_v30  ;;  %v14660_v49 = vsel %vm6544_vm9, %v6482_v23, %v6596_v4  ;;  %v12089_v23 = vld [vmem:[#allocation19 + $0xf0] sm:$0xff]   ;;  %v12099_v4 = vld [vmem:[#allocation19 + $0x140] sm:$0xff]  }
 0xa54   :  { %v14658_v20 = vsel %vm6547_vm10, %v6493_v57, %v6599_v36  ;;  %v12091_v57 = vld [vmem:[#allocation19 + $0x100] sm:$0xff]  }
 0xa55   :  { %v6677_v37 = vpack.c.bf16 %v14658_v20, %v14656_v56  ;;  %v14664_v42 = vsel %vm6545_vm11, %v6485_v30, %v6597_v63  ;;  %11173 = vmatpush3.bf16.msra.mxu1 %v12086_v0  ;;  %v12103_v30 = vld [vmem:[#allocation19 + $0x160] sm:$0xff]   ;;  %v8865_v56 = vld [vmem:[#allocation3] sm:$0x1] }
 0xa56   :  { %v6676_v29 = vpack.c.bf16 %v14664_v42, %v14660_v49  ;;  %11178 = vmatprep.subr.bf16.mxu1 %v12463_v60  ;;  %v12107_v0 = vld [vmem:[#allocation19 + $0x180] sm:$0xff]   ;;  %8868 = vperm.xlu0 %11976, %v8865_v56   ;;  %v9602_v20 = vld [vmem:[%s14932_s18] ss:$0 sm:$0xff]  ;;  %s12465_s18 = smov [#allocation22]  }
 0xa57   :  { %v12111_v36 = vld [vmem:[#allocation19 + $0x1a0] sm:$0xff]   ;;  %s8930_s9 = sshll.u32 %s12465_s18, 4  ;;  %s8931_s9 = int_to_ptr.vmem [resolvable:$true] %s8930_s9 }
 0xa58   :  { %11175 = vmatmul.mubr.msk.bf16.vlgmr.msra.gmra.mrb[156].mxu1 %vm203_vm2, %v6658_v18  ;;  %v12094_v18 = vld [vmem:[#allocation19 + $0x118] sm:$0xff]   ;;  %v12115_v63 = vld [vmem:[#allocation19 + $0x1c0] sm:$0xff]   ;;  %s12413_s29 = scalar_lea.vmem %s8931_s9, 16  ;;  %s12417_s7 = scalar_lea.vmem %s8931_s9, 32 }
 0xa59   :  { %11179 = vmatpush3.bf16.msra.mxu1 %v12087_v33  ;;  %11186 = vmatprep.mubr.msk.bf16.mxu1 %vm12464_vm0, %v12463_v60  ;;  %v12119_v33 = vld [vmem:[#allocation19 + $0x1e0] sm:$0xff]   ;;  %p12414_p4 = scmp.ne.s32.totalorder %s8931_s9, %s12413_s29  ;;  %p12418_p5 = scmp.lt.s32.totalorder %s8931_s9, %s8931_s9 }
 0xa5a   :  { %11180 = vmatprep.subr.bf16.mxu1 %v12463_v60  ;;  %v9476_v42 = vld [vmem:[#allocation21] ss:$0 sm:$0xff]  ;;  %p12419_p6 = scmp.lt.s32.totalorder %s12417_s7, %s12413_s29 }
 0xa5c   :  { %p12420_p7 = por %p12419_p6, %p12418_p5 }
 0xa5d   :  { %11181 = vmatpush3.bf16.msra.mxu1 %v12088_v25  ;;  %v12123_v25 = vld [vmem:[#allocation19 + $0x200] sm:$0xff]  }
 0xa5e   :  { %11182 = vmatprep.subr.bf16.mxu1 %v12463_v60  ;;  %p12421_p8 = pnand %p12420_p7, %p12414_p4 }
 0xa61   :  { %11183 = vmatpush3.bf16.msra.mxu1 %v12089_v23  ;;  %v12127_v23 = vld [vmem:[#allocation19 + $0x220] sm:$0xff]  }
 0xa62   :  { %11184 = vmatprep.subr.bf16.mxu1 %v12463_v60 }
 0xa65   :  { %11185 = vmatpush3.bf16.msra.mxu1 %v12090_v14  ;;  %v12130_v14 = vld [vmem:[#allocation19 + $0x238] sm:$0xff]  }
 0xa66   :  { %11190 = vmatprep.subr.bf16.mxu1 %v12463_v60 }
 0xa68   :  { %11187 = vmatmul.mubr.msk.bf16.vlgmr.msra.gmra.mrb[156].mxu1 %vm203_vm2, %v6659_v54  ;;  %v12098_v54 = vld [vmem:[#allocation19 + $0x138] sm:$0xff]  }
 0xa69   :  { %11191 = vmatpush3.bf16.msra.mxu1 %v12091_v57  ;;  %11198 = vmatprep.mubr.msk.bf16.mxu1 %vm12464_vm0, %v12463_v60  ;;  %v12131_v57 = vld [vmem:[#allocation19 + $0x240] sm:$0xff]  }
 0xa6a   :  { %11192 = vmatprep.subr.bf16.mxu1 %v12463_v60 }
 0xa6d   :  { %11193 = vmatpush3.bf16.msra.mxu1 %v12092_v8  ;;  %v12132_v8 = vld [vmem:[#allocation19 + $0x248] sm:$0xff]  }
 0xa6e   :  { %11194 = vmatprep.subr.bf16.mxu1 %v12463_v60 }
 0xa71   :  { %11195 = vmatpush3.bf16.msra.mxu1 %v12093_v61  ;;  %v12164_v61 = vld [vmem:[%s14931_s17 + $0x8] sm:$0xff]  }
 0xa72   :  { %11196 = vmatprep.subr.bf16.mxu1 %v12463_v60  ;;  %11409 = vmatpush3.bf16.msra.mxu0 %v12164_v61 }
 0xa73   :  { %11410 = vmatprep.subr.bf16.mxu0 %v12463_v60 }
 0xa75   :  { %11197 = vmatpush3.bf16.msra.mxu1 %v12094_v18  ;;  %v12134_v18 = vld [vmem:[#allocation19 + $0x258] sm:$0xff]  }
 0xa76   :  { %11202 = vmatprep.subr.bf16.mxu1 %v12463_v60  ;;  %11411 = vmatpush3.bf16.msra.mxu0 %v12165_v5 }
 0xa77   :  { %11412 = vmatprep.subr.bf16.mxu0 %v12463_v60 }
 0xa78   :  { %11199 = vmatmul.mubr.msk.bf16.vlgmr.msra.gmra.mrb[156].mxu1 %vm203_vm2, %v6660_v40  ;;  %v12102_v40 = vld [vmem:[#allocation19 + $0x158] sm:$0xff]  }
 0xa79   :  { %11203 = vmatpush3.bf16.msra.mxu1 %v12095_v1  ;;  %11210 = vmatprep.mubr.msk.bf16.mxu1 %vm12464_vm0, %v12463_v60  ;;  %v12166_v1 = vld [vmem:[%s14931_s17 + $0x18] sm:$0xff]  }
 0xa7a   :  { %11204 = vmatprep.subr.bf16.mxu1 %v12463_v60  ;;  %11413 = vmatpush3.bf16.msra.mxu0 %v12166_v1 }
 0xa7b   :  { %11414 = vmatprep.subr.bf16.mxu0 %v12463_v60 }
 0xa7d   :  { %11205 = vmatpush3.bf16.msra.mxu1 %v12096_v46  ;;  %v12135_v46 = vld [vmem:[#allocation19 + $0x260] sm:$0xff]  }
 0xa7e   :  { %11206 = vmatprep.subr.bf16.mxu1 %v12463_v60 }
 0xa81   :  { %11207 = vmatpush3.bf16.msra.mxu1 %v12097_v26  ;;  %v12167_v26 = vld [vmem:[%s14931_s17 + $0x20] sm:$0xff]  }
 0xa82   :  { %11208 = vmatprep.subr.bf16.mxu1 %v12463_v60  ;;  %11415 = vmatpush3.bf16.msra.mxu0 %v12167_v26  ;;  %v8871_v26 = vlaneseq }
 0xa83   :  { %11416 = vmatprep.subr.bf16.mxu0 %v12463_v60 }
 0xa85   :  { %11209 = vmatpush3.bf16.msra.mxu1 %v12098_v54  ;;  %v14960_v54 = vpack.c.bf16 %v14604_v48, %v14600_v6  ;;  %v12169_v6 = vld [vmem:[%s14931_s17 + $0x30] sm:$0xff]  }
 0xa86   :  { %11214 = vmatprep.subr.bf16.mxu1 %v12463_v60  ;;  %v12138_v48 = vld [vmem:[#allocation19 + $0x278] sm:$0xff]  }
 0xa88   :  { %11211 = vmatmul.mubr.msk.bf16.vlgmr.msra.gmra.mrb[156].mxu1 %vm203_vm2, %v6661_v44  ;;  %v12106_v44 = vld [vmem:[#allocation19 + $0x178] sm:$0xff]  }
 0xa89   :  { %11215 = vmatpush3.bf16.msra.mxu1 %v12099_v4  ;;  %11222 = vmatprep.mubr.msk.bf16.mxu1 %vm12464_vm0, %v12463_v60  ;;  %v12136_v4 = vld [vmem:[#allocation19 + $0x268] sm:$0xff]  }
 0xa8a   :  { %11216 = vmatprep.subr.bf16.mxu1 %v12463_v60 }
 0xa8d   :  { %11217 = vmatpush3.bf16.msra.mxu1 %v12100_v62  ;;  %v12168_v62 = vld [vmem:[%s14931_s17 + $0x28] sm:$0xff]  }
 0xa8e   :  { %11218 = vmatprep.subr.bf16.mxu1 %v12463_v60  ;;  %11417 = vmatpush3.bf16.msra.mxu0 %v12168_v62 }
 0xa8f   :  { %11418 = vmatprep.subr.bf16.mxu0 %v12463_v60 }
 0xa91   :  { %11219 = vmatpush3.bf16.msra.mxu1 %v12101_v47  ;;  %v12137_v47 = vld [vmem:[#allocation19 + $0x270] sm:$0xff]  }
 0xa92   :  { %11220 = vmatprep.subr.bf16.mxu1 %v12463_v60  ;;  %11419 = vmatpush3.bf16.msra.mxu0 %v12169_v6 }
 0xa93   :  { %11420 = vmatprep.subr.bf16.mxu0 %v12463_v60 }
 0xa95   :  { %11221 = vmatpush3.bf16.msra.mxu1 %v12102_v40  ;;  %v12170_v40 = vld [vmem:[%s14931_s17 + $0x38] sm:$0xff]  }
 0xa96   :  { %11226 = vmatprep.subr.bf16.mxu1 %v12463_v60  ;;  %11421 = vmatpush3.bf16.msra.mxu0 %v12170_v40 }
 0xa97   :  { %11426 = vmatprep.subr.bf16.mxu0 %v12463_v60 }
 0xa98   :  { %11223 = vmatmul.mubr.msk.bf16.vlgmr.msra.gmra.mrb[156].mxu1 %vm203_vm2, %v6662_v41  ;;  %v12110_v41 = vld [vmem:[#allocation19 + $0x198] sm:$0xff]  }
 0xa99   :  { %11227 = vmatpush3.bf16.msra.mxu1 %v12103_v30  ;;  %11234 = vmatprep.mubr.msk.bf16.mxu1 %vm12464_vm0, %v12463_v60  ;;  %v12139_v30 = vld [vmem:[#allocation19 + $0x280] sm:$0xff]  }
 0xa9a   :  { %11228 = vmatprep.subr.bf16.mxu1 %v12463_v60 }
 0xa9d   :  { %11229 = vmatpush3.bf16.msra.mxu1 %v12104_v43  ;;  %v14961_v43 = vpack.c.bf16 %v14598_v45, %v14596_v32  ;;  %v14962_v32 = vpack.c.bf16 %v14622_v10, %v14618_v19  ;;  %v12144_v45 = vld [vmem:[#allocation19 + $0x2a8] sm:$0xff]   ;;  %v14963_v19 = vpack.c.bf16 %v14616_v38, %v14614_v2  ;;  %v14964_v2 = vpack.c.bf16 %v14646_v7, %v14642_v22 }
 0xa9e   :  { %11230 = vmatprep.subr.bf16.mxu1 %v12463_v60  ;;  %v12148_v10 = vld [vmem:[#allocation19 + $0x2c8] sm:$0xff]   ;;  %v14965_v22 = vpack.c.bf16 %v14640_v58, %v14638_v3  ;;  %v12161_v58 = vld [vmem:[#allocation19 + $0x330] sm:$0xff]  }
 0xa9f   :  { %v12152_v38 = vld [vmem:[#allocation19 + $0x2e8] sm:$0xff]  }
 0xaa0   :  { %v12156_v7 = vld [vmem:[#allocation19 + $0x308] sm:$0xff]  }
 0xaa1   :  { %11231 = vmatpush3.bf16.msra.mxu1 %v12105_v39  ;;  %v12140_v39 = vld [vmem:[#allocation19 + $0x288] sm:$0xff]  }
 0xaa2   :  { %11232 = vmatprep.subr.bf16.mxu1 %v12463_v60  ;;  %v12160_v3 = vld [vmem:[#allocation19 + $0x328] sm:$0xff]  }
 0xaa5   :  { %11233 = vmatpush3.bf16.msra.mxu1 %v12106_v44  ;;  %v12141_v44 = vld [vmem:[#allocation19 + $0x290] sm:$0xff]  }
 0xaa6   :  { %11238 = vmatprep.subr.bf16.mxu1 %v12463_v60 }
 0xaa8   :  { %11235 = vmatmul.mubr.msk.bf16.vlgmr.msra.gmra.mrb[156].mxu1 %vm203_vm2, %v6663_v53  ;;  %v12114_v53 = vld [vmem:[#allocation19 + $0x1b8] sm:$0xff]  }
 0xaa9   :  { %11239 = vmatpush3.bf16.msra.mxu1 %v12107_v0  ;;  %11246 = vmatprep.mubr.msk.bf16.mxu1 %vm12464_vm0, %v12463_v60  ;;  %v12142_v0 = vld [vmem:[#allocation19 + $0x298] sm:$0xff]  }
 0xaaa   :  { %11240 = vmatprep.subr.bf16.mxu1 %v12463_v60 }
 0xaad   :  { %11241 = vmatpush3.bf16.msra.mxu1 %v12108_v28  ;;  %v12143_v28 = vld [vmem:[#allocation19 + $0x2a0] sm:$0xff]  }
 0xaae   :  { %11242 = vmatprep.subr.bf16.mxu1 %v12463_v60 }
 0xab1   :  { %11243 = vmatpush3.bf16.msra.mxu1 %v12109_v52  ;;  %v12145_v52 = vld [vmem:[#allocation19 + $0x2b0] sm:$0xff]  }
 0xab2   :  { %11244 = vmatprep.subr.bf16.mxu1 %v12463_v60 }
 0xab5   :  { %11245 = vmatpush3.bf16.msra.mxu1 %v12110_v41  ;;  %v12146_v41 = vld [vmem:[#allocation19 + $0x2b8] sm:$0xff]  }
 0xab6   :  { %11250 = vmatprep.subr.bf16.mxu1 %v12463_v60 }
 0xab8   :  { %11247 = vmatmul.mubr.msk.bf16.vlgmr.msra.gmra.mrb[156].mxu1 %vm203_vm2, %v6664_v55  ;;  %v12118_v55 = vld [vmem:[#allocation19 + $0x1d8] sm:$0xff]  }
 0xab9   :  { %11251 = vmatpush3.bf16.msra.mxu1 %v12111_v36  ;;  %11258 = vmatprep.mubr.msk.bf16.mxu1 %vm12464_vm0, %v12463_v60  ;;  %v12147_v36 = vld [vmem:[#allocation19 + $0x2c0] sm:$0xff]  }
 0xaba   :  { %11252 = vmatprep.subr.bf16.mxu1 %v12463_v60 }
 0xabd   :  { %11253 = vmatpush3.bf16.msra.mxu1 %v12112_v13  ;;  %v12149_v13 = vld [vmem:[#allocation19 + $0x2d0] sm:$0xff]  }
 0xabe   :  { %11254 = vmatprep.subr.bf16.mxu1 %v12463_v60 }
 0xac1   :  { %11255 = vmatpush3.bf16.msra.mxu1 %v12113_v24  ;;  %v12150_v24 = vld [vmem:[#allocation19 + $0x2d8] sm:$0xff]  }
 0xac2   :  { %11256 = vmatprep.subr.bf16.mxu1 %v12463_v60 }
 0xac5   :  { %11257 = vmatpush3.bf16.msra.mxu1 %v12114_v53  ;;  %v12151_v53 = vld [vmem:[#allocation19 + $0x2e0] sm:$0xff]  }
 0xac6   :  { %11262 = vmatprep.subr.bf16.mxu1 %v12463_v60 }
 0xac8   :  { %11259 = vmatmul.mubr.msk.bf16.vlgmr.msra.gmra.mrb[156].mxu1 %vm203_vm2, %v6665_v16  ;;  %v12122_v16 = vld [vmem:[#allocation19 + $0x1f8] sm:$0xff]  }
 0xac9   :  { %11263 = vmatpush3.bf16.msra.mxu1 %v12115_v63  ;;  %11270 = vmatprep.mubr.msk.bf16.mxu1 %vm12464_vm0, %v12463_v60  ;;  %v12153_v63 = vld [vmem:[#allocation19 + $0x2f0] sm:$0xff]  }
 0xaca   :  { %11264 = vmatprep.subr.bf16.mxu1 %v12463_v60 }
 0xacd   :  { %11265 = vmatpush3.bf16.msra.mxu1 %v12116_v35  ;;  %v12154_v35 = vld [vmem:[#allocation19 + $0x2f8] sm:$0xff]  }
 0xace   :  { %11266 = vmatprep.subr.bf16.mxu1 %v12463_v60 }
 0xad1   :  { %11267 = vmatpush3.bf16.msra.mxu1 %v12117_v21  ;;  %v12155_v21 = vld [vmem:[#allocation19 + $0x300] sm:$0xff]  }
 0xad2   :  { %11268 = vmatprep.subr.bf16.mxu1 %v12463_v60 }
 0xad5   :  { %11269 = vmatpush3.bf16.msra.mxu1 %v12118_v55  ;;  %v12157_v55 = vld [vmem:[#allocation19 + $0x310] sm:$0xff]   ;;  %v8869_v62 = vpop.permute.xlu0 %8868 }
 0xad6   :  { %11274 = vmatprep.subr.bf16.mxu1 %v12463_v60 }
 0xad8   :  { %11271 = vmatmul.mubr.msk.bf16.vlgmr.msra.gmra.mrb[156].mxu1 %vm203_vm2, %v6666_v12  ;;  %v12126_v12 = vld [vmem:[#allocation19 + $0x218] sm:$0xff]  }
 0xad9   :  { %11275 = vmatpush3.bf16.msra.mxu1 %v12119_v33  ;;  %11282 = vmatprep.mubr.msk.bf16.mxu1 %vm12464_vm0, %v12463_v60  ;;  %v12158_v33 = vld [vmem:[#allocation19 + $0x318] sm:$0xff]  }
 0xada   :  { %11276 = vmatprep.subr.bf16.mxu1 %v12463_v60 }
 0xadd   :  { %11277 = vmatpush3.bf16.msra.mxu1 %v12120_v11  ;;  %v12159_v11 = vld [vmem:[#allocation19 + $0x320] sm:$0xff]  }
 0xade   :  { %11278 = vmatprep.subr.bf16.mxu1 %v12463_v60 }
 0xae1   :  { %11279 = vmatpush3.bf16.msra.mxu1 %v12121_v17  ;;  %v12162_v17 = vld [vmem:[#allocation19 + $0x338] sm:$0xff]  }
 0xae2   :  { %11280 = vmatprep.subr.bf16.mxu1 %v12463_v60 }
 0xae5   :  { %11281 = vmatpush3.bf16.msra.mxu1 %v12122_v16 }
 0xae6   :  { %11286 = vmatprep.subr.bf16.mxu1 %v12463_v60 }
 0xae8   :  { %11283 = vmatmul.mubr.msk.bf16.vlgmr.msra.gmra.mrb[156].mxu1 %vm203_vm2, %v6667_v27  ;;  %v12129_v27 = vld [vmem:[#allocation19 + $0x230] sm:$0xff]  }
 0xae9   :  { %11287 = vmatpush3.bf16.msra.mxu1 %v12123_v25  ;;  %11294 = vmatprep.mubr.msk.bf16.mxu1 %vm12464_vm0, %v12463_v60 }
 0xaea   :  { %11288 = vmatprep.subr.bf16.mxu1 %v12463_v60 }
 0xaed   :  { %11289 = vmatpush3.bf16.msra.mxu1 %v12124_v59 }
 0xaee   :  { %11290 = vmatprep.subr.bf16.mxu1 %v12463_v60 }
 0xaf1   :  { %11291 = vmatpush3.bf16.msra.mxu1 %v12125_v31 }
 0xaf2   :  { %11292 = vmatprep.subr.bf16.mxu1 %v12463_v60 }
 0xaf5   :  { %11293 = vmatpush3.bf16.msra.mxu1 %v12126_v12 }
 0xaf6   :  { %11298 = vmatprep.subr.bf16.mxu1 %v12463_v60 }
 0xaf8   :  { %11295 = vmatmul.mubr.msk.bf16.vlgmr.msra.gmra.mrb[156].mxu1 %vm203_vm2, %v14958_v51 }
 0xaf9   :  { %11299 = vmatpush3.bf16.msra.mxu1 %v12127_v23  ;;  %11306 = vmatprep.mubr.msk.bf16.mxu1 %vm12464_vm0, %v12463_v60 }
 0xafa   :  { %11300 = vmatprep.subr.bf16.mxu1 %v12463_v60 }
 0xafd   :  { %11301 = vmatpush3.bf16.msra.mxu1 %v12128_v9 }
 0xafe   :  { %11302 = vmatprep.subr.bf16.mxu1 %v12463_v60 }
 0xb01   :  { %11303 = vmatpush3.bf16.msra.mxu1 %v12129_v27 }
 0xb02   :  { %11304 = vmatprep.subr.bf16.mxu1 %v12463_v60 }
 0xb05   :  { %11305 = vmatpush3.bf16.msra.mxu1 %v12130_v14 }
 0xb06   :  { %11310 = vmatprep.subr.bf16.mxu1 %v12463_v60 }
 0xb08   :  { %11307 = vmatmul.mubr.msk.bf16.vlgmr.msra.gmra.mrb[156].mxu1 %vm203_vm2, %v14959_v34 }
 0xb09   :  { %11311 = vmatpush3.bf16.msra.mxu1 %v12131_v57  ;;  %11318 = vmatprep.mubr.msk.bf16.mxu1 %vm12464_vm0, %v12463_v60 }
 0xb0a   :  { %11312 = vmatprep.subr.bf16.mxu1 %v12463_v60 }
 0xb0d   :  { %11313 = vmatpush3.bf16.msra.mxu1 %v12132_v8 }
 0xb0e   :  { %11314 = vmatprep.subr.bf16.mxu1 %v12463_v60 }
 0xb11   :  { %11315 = vmatpush3.bf16.msra.mxu1 %v12133_v50 }
 0xb12   :  { %11316 = vmatprep.subr.bf16.mxu1 %v12463_v60 }
 0xb15   :  { %11317 = vmatpush3.bf16.msra.mxu1 %v12134_v18 }
 0xb16   :  { %11322 = vmatprep.subr.bf16.mxu1 %v12463_v60 }
 0xb18   :  { %11319 = vmatmul.mubr.msk.bf16.vlgmr.msra.gmra.mrb[156].mxu1 %vm203_vm2, %v14960_v54  ;;  %v8872_v54 = vshrl.u32 %v8871_v26, 7 }
 0xb19   :  { %11323 = vmatpush3.bf16.msra.mxu1 %v12135_v46  ;;  %11330 = vmatprep.mubr.msk.bf16.mxu1 %vm12464_vm0, %v12463_v60  ;;  %v8863_v46 = vld [vmem:[%s14933_s19] sm:$0x1] }
 0xb1a   :  { %11324 = vmatprep.subr.bf16.mxu1 %v12463_v60 }
 0xb1d   :  { %11325 = vmatpush3.bf16.msra.mxu1 %v12136_v4  ;;  %v8873_v4 = vsub.s32 0, %v8872_v54 }
 0xb1e   :  { %11326 = vmatprep.subr.bf16.mxu1 %v12463_v60 }
 0xb21   :  { %11327 = vmatpush3.bf16.msra.mxu1 %v12137_v47  ;;  %v8874_v47 = vrot.slane %v8869_v62, %v8873_v4 }
 0xb22   :  { %11328 = vmatprep.subr.bf16.mxu1 %v12463_v60 }
 0xb25   :  { %11329 = vmatpush3.bf16.msra.mxu1 %v12138_v48 }
 0xb26   :  { %11334 = vmatprep.subr.bf16.mxu1 %v12463_v60 }
 0xb28   :  { %11331 = vmatmul.mubr.msk.bf16.vlgmr.msra.gmra.mrb[156].mxu1 %vm203_vm2, %v14961_v43 }
 0xb29   :  { %11335 = vmatpush3.bf16.msra.mxu1 %v12139_v30  ;;  %11342 = vmatprep.mubr.msk.bf16.mxu1 %vm12464_vm0, %v12463_v60 }
 0xb2a   :  { %11336 = vmatprep.subr.bf16.mxu1 %v12463_v60 }
 0xb2d   :  { %11337 = vmatpush3.bf16.msra.mxu1 %v12140_v39 }
 0xb2e   :  { %11338 = vmatprep.subr.bf16.mxu1 %v12463_v60 }
 0xb31   :  { %11339 = vmatpush3.bf16.msra.mxu1 %v12141_v44 }
 0xb32   :  { %11340 = vmatprep.subr.bf16.mxu1 %v12463_v60 }
 0xb35   :  { %11341 = vmatpush3.bf16.msra.mxu1 %v12142_v0 }
 0xb36   :  { %11346 = vmatprep.subr.bf16.mxu1 %v12463_v60 }
 0xb38   :  { %11343 = vmatmul.mubr.msk.bf16.vlgmr.msra.gmra.mrb[156].mxu1 %vm203_vm2, %v14962_v32 }
 0xb39   :  { %11347 = vmatpush3.bf16.msra.mxu1 %v12143_v28  ;;  %11354 = vmatprep.mubr.msk.bf16.mxu1 %vm12464_vm0, %v12463_v60 }
 0xb3a   :  { %11348 = vmatprep.subr.bf16.mxu1 %v12463_v60 }
 0xb3d   :  { %11349 = vmatpush3.bf16.msra.mxu1 %v12144_v45 }
 0xb3e   :  { %11350 = vmatprep.subr.bf16.mxu1 %v12463_v60 }
 0xb41   :  { %11351 = vmatpush3.bf16.msra.mxu1 %v12145_v52 }
 0xb42   :  { %11352 = vmatprep.subr.bf16.mxu1 %v12463_v60 }
 0xb45   :  { %11353 = vmatpush3.bf16.msra.mxu1 %v12146_v41 }
 0xb46   :  { %11358 = vmatprep.subr.bf16.mxu1 %v12463_v60 }
 0xb48   :  { %11355 = vmatmul.mubr.msk.bf16.vlgmr.msra.gmra.mrb[156].mxu1 %vm203_vm2, %v14963_v19 }
 0xb49   :  { %11359 = vmatpush3.bf16.msra.mxu1 %v12147_v36  ;;  %11366 = vmatprep.mubr.msk.bf16.mxu1 %vm12464_vm0, %v12463_v60 }
 0xb4a   :  { %11360 = vmatprep.subr.bf16.mxu1 %v12463_v60 }
 0xb4d   :  { %11361 = vmatpush3.bf16.msra.mxu1 %v12148_v10 }
 0xb4e   :  { %11362 = vmatprep.subr.bf16.mxu1 %v12463_v60 }
 0xb51   :  { %11363 = vmatpush3.bf16.msra.mxu1 %v12149_v13 }
 0xb52   :  { %11364 = vmatprep.subr.bf16.mxu1 %v12463_v60 }
 0xb55   :  { %11365 = vmatpush3.bf16.msra.mxu1 %v12150_v24 }
 0xb56   :  { %11370 = vmatprep.subr.bf16.mxu1 %v12463_v60 }
 0xb58   :  { %11367 = vmatmul.mubr.msk.bf16.vlgmr.msra.gmra.mrb[156].mxu1 %vm203_vm2, %v14964_v2 }
 0xb59   :  { %11371 = vmatpush3.bf16.msra.mxu1 %v12151_v53  ;;  %11378 = vmatprep.mubr.msk.bf16.mxu1 %vm12464_vm0, %v12463_v60 }
 0xb5a   :  { %11372 = vmatprep.subr.bf16.mxu1 %v12463_v60 }
 0xb5d   :  { %11373 = vmatpush3.bf16.msra.mxu1 %v12152_v38 }
 0xb5e   :  { %11374 = vmatprep.subr.bf16.mxu1 %v12463_v60 }
 0xb61   :  { %11375 = vmatpush3.bf16.msra.mxu1 %v12153_v63 }
 0xb62   :  { %11376 = vmatprep.subr.bf16.mxu1 %v12463_v60 }
 0xb65   :  { %11377 = vmatpush3.bf16.msra.mxu1 %v12154_v35 }
 0xb66   :  { %11382 = vmatprep.subr.bf16.mxu1 %v12463_v60 }
 0xb68   :  { %11379 = vmatmul.mubr.msk.bf16.vlgmr.msra.gmra.mrb[156].mxu1 %vm203_vm2, %v14965_v22 }
 0xb69   :  { %11383 = vmatpush3.bf16.msra.mxu1 %v12155_v21  ;;  %11390 = vmatprep.mubr.msk.bf16.mxu1 %vm12464_vm0, %v12463_v60 }
 0xb6a   :  { %11384 = vmatprep.subr.bf16.mxu1 %v12463_v60 }
 0xb6d   :  { %11385 = vmatpush3.bf16.msra.mxu1 %v12156_v7 }
 0xb6e   :  { %11386 = vmatprep.subr.bf16.mxu1 %v12463_v60 }
 0xb71   :  { %11387 = vmatpush3.bf16.msra.mxu1 %v12157_v55 }
 0xb72   :  { %11388 = vmatprep.subr.bf16.mxu1 %v12463_v60 }
 0xb75   :  { %11389 = vmatpush3.bf16.msra.mxu1 %v12158_v33 }
 0xb76   :  { %11394 = vmatprep.subr.bf16.mxu1 %v12463_v60 }
 0xb78   :  { %11391 = vmatmul.mubr.msk.bf16.vlgmr.msra.gmra.mrb[156].mxu1 %vm203_vm2, %v6676_v29 }
 0xb79   :  { %11395 = vmatpush3.bf16.msra.mxu1 %v12159_v11  ;;  %11402 = vmatprep.mubr.msk.bf16.mxu1 %vm12464_vm0, %v12463_v60 }
 0xb7a   :  { %11396 = vmatprep.subr.bf16.mxu1 %v12463_v60 }
 0xb7d   :  { %11397 = vmatpush3.bf16.msra.mxu1 %v12160_v3 }
 0xb7e   :  { %11398 = vmatprep.subr.bf16.mxu1 %v12463_v60 }
 0xb81   :  { %11399 = vmatpush3.bf16.msra.mxu1 %v12161_v58 }
 0xb82   :  { %11400 = vmatprep.subr.bf16.mxu1 %v12463_v60 }
 0xb85   :  { %11401 = vmatpush3.bf16.msra.mxu1 %v12162_v17 }
 0xb88   :  { %11403 = vmatmul.mubr.msk.bf16.vlgmr.msra.gmra.mrb[156].mxu1 %vm203_vm2, %v6677_v37 }
 0xc5b   :  { %v8729_v49 = vpop.f32.mrb[156].mxu1 }
 0xc5c   :  { %v11492_v29 = vadd.f32 %v9476_v42, %v8729_v49  ;;  %v11404_v16 = vpop.f32.mrb[157].mxu1 }
 0xc5d   :  { %v8732_v25 = vpop.f32.mrb[158].mxu1 }
 0xc5e   :  { %v8740_v59 = vmul.f32 0.01, %v11492_v29  ;;  %v11493_v31 = vadd.f32 %v9476_v42, %v8732_v25  ;;  %v11405_v12 = vpop.f32.mrb[159].mxu1  ;;  %vm8738_vm12 = vcmp.ge.f32.partialorder %v11492_v29, 0.0 }
 0xc60   :  { %vm8739_vm13 = vcmp.ge.f32.partialorder %v11493_v31, 0.0  ;;  %v8741_v23 = vmul.f32 0.01, %v11493_v31  ;;  %v8742_v51 = vsel %vm8738_vm12, %v11492_v29, %v8740_v59 }
 0xc62   :  { %v8743_v9 = vsel %vm8739_vm13, %v11493_v31, %v8741_v23 }
 0xc63   :  { %v8744_v27 = vpack.c.bf16 %v8743_v9, %v8742_v51 }
 0xc65   :  { %11423 = vmatmul.mubr.bf16.vlgmr.msra.gmra.mrb[4].mxu0 %v8744_v27 }
 0xc66   :  { %11428 = vmatprep.mubr.msk.bf16.mxu0 %vm12464_vm0, %v12463_v60  ;;  %vm8922_vm0 = vcmask 122880  }
 0xd38   :  { %v8850_v37 = vpop.f32.mrb[4].mxu0 }
 0xd39   :  { %v8851_v14 = vadd.f32 %v9602_v20, %v8850_v37  ;;  %v11424_v57 = vpop.f32.mrb[5].mxu0 }
 0xd3a   :  { %v8853_v34 = vpop.f32.mrb[6].mxu0 }
 0xd3b   :  { %v8859_v15 = vmul.f32 0.01, %v8851_v14  ;;  %v8854_v8 = vadd.f32 %v9602_v20, %v8853_v34  ;;  %v11425_v61 = vpop.f32.mrb[7].mxu0  ;;  %vm8857_vm2 = vcmp.ge.f32.partialorder %v8851_v14, 0.0 }
 0xd3d   :  { %vm8858_vm14 = vcmp.ge.f32.partialorder %v8854_v8, 0.0  ;;  %v8860_v50 = vmul.f32 0.01, %v8854_v8  ;;  %v8861_v5 = vsel %vm8857_vm2, %v8851_v14, %v8859_v15 }
 0xd3f   :  { %v8862_v18 = vsel %vm8858_vm14, %v8854_v8, %v8860_v50 }
 0xd40   :  { %v8864_v60 = vpack.c.bf16 %v8862_v18, %v8861_v5 }
 0xd42   :  { %v8880_v1 = vsel %vm8875_vm15, %v8864_v60, 0 }
 0xd43   :  { %11427 = vmatpush3.bf16.xpose.msra.mxu0 %v8880_v1 }
 0xd4a   :  { %11429 = vmatmul.mubr.msk.bf16.vlgmr.msra.gmra.mrb[8].mxu0 %vm8875_vm15, %v8863_v46 }
 0xe1d   :  { %v8916_v6 = vpop.f32.mrb[8].mxu0 }
 0xe1e   :  { %v8917_v48 = vadd.f32 %v8916_v6, %v8874_v47  ;;  %v11430_v40 = vpop.f32.mrb[9].mxu0 }
 0xe1f   :  { %v8919_v30 = vpop.f32.mrb[10].mxu0 }
 0xe20   :  { %v11431_v43 = vpop.f32.mrb[11].mxu0  ;;  %8923 = vst.msk [vmem:[#allocation22] sm:$0x1] %vm8922_vm0, %v8917_v48 }
 0xe21   :  { %12424 = shalt.err (!%p12421_p8)
}
 0xe22   :  { %s12425_s12 = scalar_lea.hbm %s14935_s21, 16 }
 0xe23   :  { %p12426_p9 = scmp.ne.s32.totalorder %s14935_s21, %s12425_s12  ;;  %p12429_p10 = scmp.lt.u32.totalorder %s12425_s12, %s14935_s21 }
 0xe25   :  { %p12431_p11 = pnand %p12429_p10, %p12426_p9 }
 0xe27   :  { %12434 = shalt.err (!%p12431_p11)
}
 0xe28   :  { %8933 = dma.vmem_to_hbm [thread:$0]  %s8931_s9, 16, %s14935_s21, [#allocation6]  }
 0xe29   :  { %12447 = dma.done.wait [#allocation6], 16  }
 0xe2a   :  { %12448 = vsyncadd [#allocation6], 4294967280 }
 0xe2b   :  { %8937 = vsyncpa [#allocation5], 1 }
 0xe2c   :  { %8938 = vsyncpa [#allocation8], 1 }
 0xe2d   :  { %8939 = vsyncpa [#allocation11], 1 }
 0xe2e   :  { %8940 = vsyncpa [#allocation14], 1 }
 0xe2f   :  { %8941 = vsyncpa [#allocation17], 1 }
 0xe30   :  { %8942 = vsyncpa [#allocation20], 1 }
 0xe31   :  { %8943 = vsyncpa [#allocation6], 1 }

</bundles_post_ra>
